<compile_context>
chip_gen: v7x
topology: tpu7x:2x2x1
jax: 0.10.0
libtpu: 0.0.40
codegen_flags: <defaults>
</compile_context>

<pallas_src>
import functools
import math

import jax
import jax.numpy as jnp
from jax.experimental import pallas as pl
from jax.experimental.pallas import tpu as pltpu

LATENT = 2        # latent_size in the PyTorch module
LU_EPS = 1e-3     # nflows LULinear: diag(U) = softplus(raw) + eps
MAF_EPS = 1e-3    # MaskedAffineAutoregressive: scale = sigmoid(u + 2) + eps


def _round_up(x, m):
    return (x + m - 1) // m * m


# --------------------------------------------------------------------------
# Pallas kernel: one (context b, sample-tile t) block -> partial sum of log q.
# --------------------------------------------------------------------------
def nfm_kernel(x_ref, ctx_init_ref, gate_ref, w_init_ref,
               w_blk_ref, b_blk_ref, w_out_ref, b_out_ref,
               flow_sc_ref, const_ref, out_ref,
               *, num_flows, num_blocks, block_rows, samples_per_ctx):
    x = x_ref[...]                                   # (TS, 2) f32
    z0 = x[:, 0:1]                                   # (TS, 1)
    z1 = x[:, 1:2]
    log_q = jnp.zeros((block_rows, 1), jnp.float32)

    # Flows are applied in the inverse (density) direction: last flow first.
    for k in range(num_flows - 1, -1, -1):
        # ---- LULinearPermute.inverse: permutation + L@U folded to 4 scalar FMAs (VPU) ----
        w00 = flow_sc_ref[k, 0]
        w10 = flow_sc_ref[k, 1]
        w01 = flow_sc_ref[k, 2]
        w11 = flow_sc_ref[k, 3]
        nz0 = z0 * w00 + z1 * w10 + flow_sc_ref[k, 4]
        nz1 = z0 * w01 + z1 * w11 + flow_sc_ref[k, 5]
        z0, z1 = nz0, nz1
        # (its log|det| is a per-sample constant, pre-summed into const_ref)

        # ---- MaskedAffineAutoregressive.inverse == one MADE pass + affine ----
        # Autoregressive mask zeroes row 1 of the initial layer -> broadcast multiply;
        # context projection + biases come pre-folded per unique context (VMEM table).
        h = z0 * w_init_ref[k] + ctx_init_ref[k]      # (TS, H) f32
        for j in range(num_blocks):
            a = jnp.maximum(h, 0.0).astype(jnp.bfloat16)
            t = (jnp.dot(a, w_blk_ref[k, j, 0], preferred_element_type=jnp.float32)
                 + b_blk_ref[k, j, 0])
            a = jnp.maximum(t, 0.0).astype(jnp.bfloat16)
            # TODO(synk): dropout_probability defaults to 0.0 -> identity here.
            t = (jnp.dot(a, w_blk_ref[k, j, 1], preferred_element_type=jnp.float32)
                 + b_blk_ref[k, j, 1])
            h = h + t * gate_ref[k, j]                # GLU gate precomputed per context

        # Final masked layer: feature-0 scale/shift are per-flow constants (folded);
        # feature-1 scale & shift share one (TS,H)@(H,2) bf16 matmul.
        o2 = (jnp.dot(h.astype(jnp.bfloat16), w_out_ref[k],
                      preferred_element_type=jnp.float32) + b_out_ref[k])   # (TS, 2)
        scale1 = jax.nn.sigmoid(o2[:, 0:1] + 2.0) + MAF_EPS
        log_q = log_q + jnp.log(scale1)
        z1 = scale1 * z1 + o2[:, 1:2]
        z0 = flow_sc_ref[k, 6] * z0 + flow_sc_ref[k, 7]

    # Standard-normal base log-prob; constants (Gaussian normalizer, LU logdets,
    # feature-0 log-scales) are pre-summed in const_ref (SMEM scalar).
    log_q = log_q - 0.5 * (z0 * z0 + z1 * z1) + const_ref[0, 0]

    # Mask padded sample rows of this context, reduce to one partial sum per tile.
    row = (pl.program_id(1) * block_rows
           + jax.lax.broadcasted_iota(jnp.int32, (block_rows, 1), 0))
    log_q = jnp.where(row < samples_per_ctx, log_q, 0.0)
    out_ref[...] = jnp.broadcast_to(jnp.sum(log_q), out_ref.shape)


# --------------------------------------------------------------------------
# Wrapper: constant folding, context hoisting, layout glue + pallas_call.
# --------------------------------------------------------------------------
def nfm_forward(samples, context, params, *, block_rows=512):
    """NFM.forward: samples (B, S, 2), context (B, C) -> scalar forward-KLD."""
    B, S, D = samples.shape
    assert D == LATENT
    maf = params['maf']
    K = len(maf)
    nb = len(maf[0]['blocks'])
    H = maf[0]['w_ctx'].shape[-1]

    # ---- tiling: grid = (context, sample-tile); tile bounded by samples/context ----
    ts = min(block_rows, _round_up(S, 8))
    if B * (_round_up(S, ts) // ts) < 2 and S > 8:
        ts = _round_up(-(-S // 2), 8)      # guarantee >=2 grid steps (v7x has 2 TCs)
    s_pad = _round_up(S, ts)
    T = s_pad // ts

    x = samples.astype(jnp.float32)
    if s_pad != S:
        x = jnp.pad(x, ((0, 0), (0, s_pad - S), (0, 0)))
    ctx_f = context.astype(jnp.float32)

    # ---- hoist all context-only work (MADE context projection + GLU gates) --------
    w_ctx0 = jnp.stack([m['w_ctx'] for m in maf])                 # (K, C, H)
    b_ctx0 = jnp.stack([m['b_ctx'] for m in maf])[:, 0, :]        # (K, H)
    b_init = jnp.stack([m['b_init'] for m in maf])[:, 0, :]       # (K, H)
    ctx_init = (jnp.einsum('bc,kch->bkh', ctx_f, w_ctx0)
                + (b_ctx0 + b_init)[None])                        # (B, K, H)
    ctx_init = ctx_init[:, :, None, :]                            # (B, K, 1, H)

    w_bctx = jnp.stack([jnp.stack([blk['wc'] for blk in m['blocks']]) for m in maf])
    b_bctx = jnp.stack([jnp.stack([blk['bc'] for blk in m['blocks']])
                        for m in maf])[:, :, 0, :]
    gates = jax.nn.sigmoid(jnp.einsum('bc,kjch->bkjh', ctx_f, w_bctx)
                           + b_bctx[None])                        # (B, K, nb, H)
    gates = gates[:, :, :, None, :]                               # (B, K, nb, 1, H)

    # ---- MADE weights (autoregressive masks baked in); MXU operands as bf16 -------
    # Initial layer: mask zeroes row 1 -> keep row 0 only (VPU broadcast multiply).
    w_init_row0 = jnp.stack([m['w_init'][0:1, :] for m in maf])              # (K,1,H) f32
    w_blk = jnp.stack([jnp.stack([jnp.stack([blk['w0'], blk['w1']])
                                  for blk in m['blocks']]) for m in maf]
                      ).astype(jnp.bfloat16)                                 # (K,nb,2,H,H)
    b_blk = jnp.stack([jnp.stack([jnp.stack([blk['b0'], blk['b1']])
                                  for blk in m['blocks']]) for m in maf])    # (K,nb,2,1,H)
    # Final layer: feature-0 column is masked out; pack feature-1 scale & shift
    # columns into one (H, 2) matrix per flow.
    w_out = jnp.stack([jnp.concatenate([m['w_scale'][:, 1:2], m['w_shift'][:, 1:2]], 1)
                       for m in maf]).astype(jnp.bfloat16)                   # (K, H, 2)
    b_out = jnp.stack([jnp.concatenate([m['b_scale'][:, 1:2], m['b_shift'][:, 1:2]], 1)
                       for m in maf])                                        # (K, 1, 2)

    # ---- fold LULinearPermute (perm + L@U) to 4 scalars/flow, feature-0 affine
    #      constants, and pre-sum every per-sample constant into one SMEM scalar ----
    rows = []
    const = jnp.float32(-0.5 * LATENT * math.log(2.0 * math.pi))
    for k in range(K):
        p = params['lu'][k]
        diag = jax.nn.softplus(p['u_unconstrained_diag']) + LU_EPS
        lower = jnp.eye(2, dtype=jnp.float32).at[1, 0].set(p['l_off'])
        upper = (jnp.zeros((2, 2), jnp.float32)
                 .at[0, 0].set(diag[0]).at[1, 1].set(diag[1]).at[0, 1].set(p['u_off']))
        w_t = (lower @ upper).T                      # z_perm @ W^T == z_perm @ w_t
        W = w_t[jnp.argsort(p['perm'])]              # fold the permutation in
        s0 = jax.nn.sigmoid(maf[k]['b_scale'][0, 0] + 2.0) + MAF_EPS
        t0 = maf[k]['b_shift'][0, 0]
        rows.append(jnp.stack([W[0, 0], W[1, 0], W[0, 1], W[1, 1],
                               p['bias'][0], p['bias'][1], s0, t0]))
        const = const + jnp.sum(jnp.log(diag)) + jnp.log(s0)
    flow_sc = jnp.stack(rows).astype(jnp.float32)    # (K, 8) SMEM scalars
    const = jnp.reshape(const, (1, 1)).astype(jnp.float32)

    kernel = functools.partial(nfm_kernel, num_flows=K, num_blocks=nb,
                               block_rows=ts, samples_per_ctx=S)
    args = (x, ctx_init, gates, w_init_row0, w_blk, b_blk, w_out, b_out,
            flow_sc, const)

    def build(use_single_buffer):
        def rep_spec(a):
            zeros = (0,) * a.ndim
            idx = lambda b, t, _z=zeros: _z
            if use_single_buffer:
                # Constant index_map -> double-buffering buys nothing; save VMEM/DMAs.
                return pl.BlockSpec(a.shape, idx, pipeline_mode=pl.Buffered(1))
            return pl.BlockSpec(a.shape, idx)

        in_specs = [
            pl.BlockSpec((None, ts, LATENT), lambda b, t: (b, t, 0)),
            pl.BlockSpec((None, K, 1, H), lambda b, t: (b, 0, 0, 0)),
            pl.BlockSpec((None, K, nb, 1, H), lambda b, t: (b, 0, 0, 0, 0)),
            rep_spec(w_init_row0),
            rep_spec(w_blk),
            rep_spec(b_blk),
            rep_spec(w_out),
            rep_spec(b_out),
            pl.BlockSpec(memory_space=pltpu.MemorySpace.SMEM),
            pl.BlockSpec(memory_space=pltpu.MemorySpace.SMEM),
        ]
        return pl.pallas_call(
            kernel,
            out_shape=jax.ShapeDtypeStruct((B, T, 8, 128), jnp.float32),
            grid=(B, T),
            in_specs=in_specs,
            out_specs=pl.BlockSpec((1, 1, 8, 128), lambda b, t: (b, t, 0, 0)),
            compiler_params=pltpu.CompilerParams(
                dimension_semantics=("parallel", "parallel")),
        )

    try:
        partial_sums = build(True)(*args)
    except Exception:  # pragma: no cover - fallback if pl.Buffered(1) is unsupported
        partial_sums = build(False)(*args)

    # Final -mean() across tiles (trivial wrapper glue).
    return -(jnp.sum(partial_sums[:, :, 0, 0]) / (B * S))


# --------------------------------------------------------------------------
# Synthetic parameters (shapes match the normflows modules; masks pre-applied).
# --------------------------------------------------------------------------
def init_params(key, context_size, K=3, hidden_units=128, num_blocks=2):
    H, C = hidden_units, context_size
    keys = iter(jax.random.split(key, 256))

    def u(shape, scale=0.1):
        return jax.random.uniform(next(keys), shape, jnp.float32, -scale, scale)

    # Autoregressive masks for features=2: hidden degrees are all 1, so
    #  - the initial masked layer only sees input feature 0,
    #  - the final layer's feature-0 scale/shift depend only on their biases.
    mask_init = jnp.array([[1.0], [0.0]], jnp.float32)   # zero row 1 of (2, H)
    mask_out = jnp.array([0.0, 1.0], jnp.float32)        # zero column 0 of (H, 2)

    maf, lu = [], []
    for _ in range(K):
        blocks = []
        for _ in range(num_blocks):
            blocks.append(dict(
                w0=u((H, H), 0.05), b0=u((1, H)),
                w1=u((H, H), 0.05), b1=u((1, H)),
                wc=u((C, H), 0.1), bc=u((1, H)),
            ))
        maf.append(dict(
            w_init=u((2, H), 0.3) * mask_init, b_init=u((1, H)),
            w_ctx=u((C, H), 0.1), b_ctx=u((1, H)),
            blocks=blocks,
            w_scale=u((H, 2), 0.05) * mask_out, b_scale=u((1, 2)),
            w_shift=u((H, 2), 0.05) * mask_out, b_shift=u((1, 2)),
        ))
        lu.append(dict(
            perm=jax.random.permutation(next(keys), 2),
            l_off=u((), 0.3), u_off=u((), 0.3),
            u_unconstrained_diag=u((2,), 0.3),
            bias=u((2,), 0.1),
        ))
    return dict(maf=maf, lu=lu)


# --------------------------------------------------------------------------
# Pure-JAX f32 reference (unfused permutation / LU / masks) for correctness.
# --------------------------------------------------------------------------
def ref_forward(samples, context, params):
    B, S, D = samples.shape
    z = samples.reshape(B * S, D).astype(jnp.float32)
    ctx = jnp.repeat(context.astype(jnp.float32), S, axis=0)
    log_q = jnp.zeros((B * S,), jnp.float32)
    K = len(params['maf'])

    def made(m, z, ctx):
        h = z @ m['w_init'] + m['b_init'] + ctx @ m['w_ctx'] + m['b_ctx']
        for blk in m['blocks']:
            t = jnp.maximum(h, 0.0)
            t = t @ blk['w0'] + blk['b0']
            t = jnp.maximum(t, 0.0)
            t = t @ blk['w1'] + blk['b1']
            h = h + t * jax.nn.sigmoid(ctx @ blk['wc'] + blk['bc'])
        return h @ m['w_scale'] + m['b_scale'], h @ m['w_shift'] + m['b_shift']

    for k in range(K - 1, -1, -1):
        p = params['lu'][k]
        diag = jax.nn.softplus(p['u_unconstrained_diag']) + LU_EPS
        lower = jnp.eye(2, dtype=jnp.float32).at[1, 0].set(p['l_off'])
        upper = (jnp.zeros((2, 2), jnp.float32)
                 .at[0, 0].set(diag[0]).at[1, 1].set(diag[1]).at[0, 1].set(p['u_off']))
        z = z[:, p['perm']]                      # permutation.forward
        z = z @ upper.T
        z = z @ lower.T + p['bias'][None, :]
        log_q = log_q + jnp.sum(jnp.log(diag))
        u_scale, shift = made(params['maf'][k], z, ctx)
        scale = jax.nn.sigmoid(u_scale + 2.0) + MAF_EPS
        log_q = log_q + jnp.sum(jnp.log(scale), axis=-1)
        z = scale * z + shift

    log_q = (log_q - 0.5 * jnp.sum(z * z, axis=-1)
             - 0.5 * D * math.log(2.0 * math.pi))
    return -jnp.mean(log_q)


if __name__ == "__main__":
    key = jax.random.PRNGKey(0)
    k_s, k_c, k_p = jax.random.split(key, 3)

    context_size = 8
    B, S = 4, 60                                 # 4 contexts x 60 samples = 240 rows
    samples = jax.random.normal(k_s, (B, S, LATENT), jnp.float32)
    context = jax.random.normal(k_c, (B, context_size), jnp.float32)
    params = init_params(k_p, context_size, K=3, hidden_units=128, num_blocks=2)

    loss = jax.block_until_ready(nfm_forward(samples, context, params))
    ref = jax.block_until_ready(ref_forward(samples, context, params))

    assert loss.shape == ()
    assert bool(jnp.isfinite(loss))
    # bf16 MXU operands (f32 accumulation) -> slightly looser tolerance than pure f32.
    assert jnp.allclose(loss, ref, atol=2e-2, rtol=2e-2), (
        f"mismatch: kernel {loss} vs reference {ref}")
    print("KERNEL_OK")
</pallas_src>

<mosaic_0001>
module attributes {stable_mosaic.version = 11 : i64} {
  func.func @nfm_kernel(%arg0: i32, %arg1: i32, %arg2: memref<1x64x2xf32, #tpu.memory_space<vmem>>, %arg3: memref<1x3x1x128xf32, #tpu.memory_space<vmem>>, %arg4: memref<1x3x2x1x128xf32, #tpu.memory_space<vmem>>, %arg5: memref<3x1x128xf32, #tpu.memory_space<vmem>>, %arg6: memref<3x2x2x128x128xbf16, #tpu.memory_space<vmem>>, %arg7: memref<3x2x2x1x128xf32, #tpu.memory_space<vmem>>, %arg8: memref<3x128x2xbf16, #tpu.memory_space<vmem>>, %arg9: memref<3x1x2xf32, #tpu.memory_space<vmem>>, %arg10: memref<3x8xf32, #tpu.memory_space<smem>>, %arg11: memref<1x1xf32, #tpu.memory_space<smem>>, %arg12: memref<1x1x8x128xf32, #tpu.memory_space<vmem>>) attributes {dimension_semantics = [#tpu.dimension_semantics<parallel>, #tpu.dimension_semantics<parallel>], iteration_bounds = array<i64: 4, 1>, scalar_prefetch = 0 : i64, scratch_operands = 0 : i64, tpu.core_type = #tpu.core_type<tc>, window_params = [{transform_indices = @transform_0, window_bounds = array<i64: 1, 64, 2>}, {transform_indices = @transform_1, window_bounds = array<i64: 1, 3, 1, 128>}, {transform_indices = @transform_2, window_bounds = array<i64: 1, 3, 2, 1, 128>}, {pipeline_mode = #tpu.pipeline_mode<synchronous>, transform_indices = @transform_3, window_bounds = array<i64: 3, 1, 128>}, {pipeline_mode = #tpu.pipeline_mode<synchronous>, transform_indices = @transform_4, window_bounds = array<i64: 3, 2, 2, 128, 128>}, {pipeline_mode = #tpu.pipeline_mode<synchronous>, transform_indices = @transform_5, window_bounds = array<i64: 3, 2, 2, 1, 128>}, {pipeline_mode = #tpu.pipeline_mode<synchronous>, transform_indices = @transform_6, window_bounds = array<i64: 3, 128, 2>}, {pipeline_mode = #tpu.pipeline_mode<synchronous>, transform_indices = @transform_7, window_bounds = array<i64: 3, 1, 2>}, {transform_indices = @transform_8, window_bounds = array<i64: 3, 8>}, {transform_indices = @transform_9, window_bounds = array<i64: 1, 1>}, {transform_indices = @transform_10, window_bounds = array<i64: 1, 1, 8, 128>}]} {
    %c0 = arith.constant 0 : index
    %c0_0 = arith.constant 0 : index
    %c0_1 = arith.constant 0 : index
    %0 = vector.load %arg2[%c0, %c0_0, %c0_1] : memref<1x64x2xf32, #tpu.memory_space<vmem>>, vector<1x64x2xf32>
    %1 = vector.shape_cast %0 : vector<1x64x2xf32> to vector<64x2xf32>
    %2 = vector.extract_strided_slice %1 {offsets = [0, 0], sizes = [64, 1], strides = [1, 1]} : vector<64x2xf32> to vector<64x1xf32>
    %3 = vector.extract_strided_slice %1 {offsets = [0, 1], sizes = [64, 1], strides = [1, 1]} : vector<64x2xf32> to vector<64x1xf32>
    %cst = arith.constant 0.000000e+00 : f32
    %4 = vector.broadcast %cst : f32 to vector<64x1xf32>
    %c2 = arith.constant 2 : index
    %c0_2 = arith.constant 0 : index
    %5 = memref.load %arg10[%c2, %c0_2] : memref<3x8xf32, #tpu.memory_space<smem>>
    %c2_3 = arith.constant 2 : index
    %c1 = arith.constant 1 : index
    %6 = memref.load %arg10[%c2_3, %c1] : memref<3x8xf32, #tpu.memory_space<smem>>
    %c2_4 = arith.constant 2 : index
    %c2_5 = arith.constant 2 : index
    %7 = memref.load %arg10[%c2_4, %c2_5] : memref<3x8xf32, #tpu.memory_space<smem>>
    %c2_6 = arith.constant 2 : index
    %c3 = arith.constant 3 : index
    %8 = memref.load %arg10[%c2_6, %c3] : memref<3x8xf32, #tpu.memory_space<smem>>
    %9 = vector.broadcast %5 : f32 to vector<64x1xf32>
    %10 = arith.mulf %2, %9 : vector<64x1xf32>
    %11 = vector.broadcast %6 : f32 to vector<64x1xf32>
    %12 = arith.mulf %3, %11 : vector<64x1xf32>
    %13 = arith.addf %10, %12 : vector<64x1xf32>
    %c2_7 = arith.constant 2 : index
    %c4 = arith.constant 4 : index
    %14 = memref.load %arg10[%c2_7, %c4] : memref<3x8xf32, #tpu.memory_space<smem>>
    %15 = vector.broadcast %14 : f32 to vector<64x1xf32>
    %16 = arith.addf %13, %15 : vector<64x1xf32>
    %17 = vector.broadcast %7 : f32 to vector<64x1xf32>
    %18 = arith.mulf %2, %17 : vector<64x1xf32>
    %19 = vector.broadcast %8 : f32 to vector<64x1xf32>
    %20 = arith.mulf %3, %19 : vector<64x1xf32>
    %21 = arith.addf %18, %20 : vector<64x1xf32>
    %c2_8 = arith.constant 2 : index
    %c5 = arith.constant 5 : index
    %22 = memref.load %arg10[%c2_8, %c5] : memref<3x8xf32, #tpu.memory_space<smem>>
    %23 = vector.broadcast %22 : f32 to vector<64x1xf32>
    %24 = arith.addf %21, %23 : vector<64x1xf32>
    %c2_9 = arith.constant 2 : index
    %c0_10 = arith.constant 0 : index
    %c0_11 = arith.constant 0 : index
    %25 = vector.load %arg5[%c2_9, %c0_10, %c0_11] : memref<3x1x128xf32, #tpu.memory_space<vmem>>, vector<1x1x128xf32>
    %26 = vector.shape_cast %25 : vector<1x1x128xf32> to vector<1x128xf32>
    %27 = vector.broadcast %16 : vector<64x1xf32> to vector<64x128xf32>
    %28 = vector.broadcast %26 : vector<1x128xf32> to vector<64x128xf32>
    %29 = arith.mulf %27, %28 : vector<64x128xf32>
    %c0_12 = arith.constant 0 : index
    %c2_13 = arith.constant 2 : index
    %c0_14 = arith.constant 0 : index
    %c0_15 = arith.constant 0 : index
    %30 = vector.load %arg3[%c0_12, %c2_13, %c0_14, %c0_15] : memref<1x3x1x128xf32, #tpu.memory_space<vmem>>, vector<1x1x1x128xf32>
    %31 = vector.shape_cast %30 : vector<1x1x1x128xf32> to vector<1x128xf32>
    %32 = vector.broadcast %31 : vector<1x128xf32> to vector<64x128xf32>
    %33 = arith.addf %29, %32 : vector<64x128xf32>
    %cst_16 = arith.constant 0.000000e+00 : f32
    %34 = vector.broadcast %cst_16 : f32 to vector<64x128xf32>
    %35 = arith.maximumf %33, %34 : vector<64x128xf32>
    %36 = arith.truncf %35 : vector<64x128xf32> to vector<64x128xbf16>
    %c2_17 = arith.constant 2 : index
    %c0_18 = arith.constant 0 : index
    %c0_19 = arith.constant 0 : index
    %c0_20 = arith.constant 0 : index
    %c0_21 = arith.constant 0 : index
    %37 = vector.load %arg6[%c2_17, %c0_18, %c0_19, %c0_20, %c0_21] : memref<3x2x2x128x128xbf16, #tpu.memory_space<vmem>>, vector<1x1x1x128x128xbf16>
    %38 = vector.shape_cast %37 : vector<1x1x1x128x128xbf16> to vector<128x128xbf16>
    %cst_22 = arith.constant dense<0.000000e+00> : vector<64x128xf32>
    %39 = tpu.matmul %36, %38, %cst_22 {dimension_numbers = #tpu.dot_dimension_numbers<[1], [0], [0], [1], [0, 0, 1, 1], [], []>} : vector<64x128xbf16>, vector<128x128xbf16>, vector<64x128xf32> -> vector<64x128xf32>
    %c2_23 = arith.constant 2 : index
    %c0_24 = arith.constant 0 : index
    %c0_25 = arith.constant 0 : index
    %c0_26 = arith.constant 0 : index
    %c0_27 = arith.constant 0 : index
    %40 = vector.load %arg7[%c2_23, %c0_24, %c0_25, %c0_26, %c0_27] : memref<3x2x2x1x128xf32, #tpu.memory_space<vmem>>, vector<1x1x1x1x128xf32>
    %41 = vector.shape_cast %40 : vector<1x1x1x1x128xf32> to vector<1x128xf32>
    %42 = vector.broadcast %41 : vector<1x128xf32> to vector<64x128xf32>
    %43 = arith.addf %39, %42 : vector<64x128xf32>
    %cst_28 = arith.constant 0.000000e+00 : f32
    %44 = vector.broadcast %cst_28 : f32 to vector<64x128xf32>
    %45 = arith.maximumf %43, %44 : vector<64x128xf32>
    %46 = arith.truncf %45 : vector<64x128xf32> to vector<64x128xbf16>
    %c2_29 = arith.constant 2 : index
    %c0_30 = arith.constant 0 : index
    %c1_31 = arith.constant 1 : index
    %c0_32 = arith.constant 0 : index
    %c0_33 = arith.constant 0 : index
    %47 = vector.load %arg6[%c2_29, %c0_30, %c1_31, %c0_32, %c0_33] : memref<3x2x2x128x128xbf16, #tpu.memory_space<vmem>>, vector<1x1x1x128x128xbf16>
    %48 = vector.shape_cast %47 : vector<1x1x1x128x128xbf16> to vector<128x128xbf16>
    %cst_34 = arith.constant dense<0.000000e+00> : vector<64x128xf32>
    %49 = tpu.matmul %46, %48, %cst_34 {dimension_numbers = #tpu.dot_dimension_numbers<[1], [0], [0], [1], [0, 0, 1, 1], [], []>} : vector<64x128xbf16>, vector<128x128xbf16>, vector<64x128xf32> -> vector<64x128xf32>
    %c2_35 = arith.constant 2 : index
    %c0_36 = arith.constant 0 : index
    %c1_37 = arith.constant 1 : index
    %c0_38 = arith.constant 0 : index
    %c0_39 = arith.constant 0 : index
    %50 = vector.load %arg7[%c2_35, %c0_36, %c1_37, %c0_38, %c0_39] : memref<3x2x2x1x128xf32, #tpu.memory_space<vmem>>, vector<1x1x1x1x128xf32>
    %51 = vector.shape_cast %50 : vector<1x1x1x1x128xf32> to vector<1x128xf32>
    %52 = vector.broadcast %51 : vector<1x128xf32> to vector<64x128xf32>
    %53 = arith.addf %49, %52 : vector<64x128xf32>
    %c0_40 = arith.constant 0 : index
    %c2_41 = arith.constant 2 : index
    %c0_42 = arith.constant 0 : index
    %c0_43 = arith.constant 0 : index
    %c0_44 = arith.constant 0 : index
    %54 = vector.load %arg4[%c0_40, %c2_41, %c0_42, %c0_43, %c0_44] : memref<1x3x2x1x128xf32, #tpu.memory_space<vmem>>, vector<1x1x1x1x128xf32>
    %55 = vector.shape_cast %54 : vector<1x1x1x1x128xf32> to vector<1x128xf32>
    %56 = vector.broadcast %55 : vector<1x128xf32> to vector<64x128xf32>
    %57 = arith.mulf %53, %56 : vector<64x128xf32>
    %58 = arith.addf %33, %57 : vector<64x128xf32>
    %cst_45 = arith.constant 0.000000e+00 : f32
    %59 = vector.broadcast %cst_45 : f32 to vector<64x128xf32>
    %60 = arith.maximumf %58, %59 : vector<64x128xf32>
    %61 = arith.truncf %60 : vector<64x128xf32> to vector<64x128xbf16>
    %c2_46 = arith.constant 2 : index
    %c1_47 = arith.constant 1 : index
    %c0_48 = arith.constant 0 : index
    %c0_49 = arith.constant 0 : index
    %c0_50 = arith.constant 0 : index
    %62 = vector.load %arg6[%c2_46, %c1_47, %c0_48, %c0_49, %c0_50] : memref<3x2x2x128x128xbf16, #tpu.memory_space<vmem>>, vector<1x1x1x128x128xbf16>
    %63 = vector.shape_cast %62 : vector<1x1x1x128x128xbf16> to vector<128x128xbf16>
    %cst_51 = arith.constant dense<0.000000e+00> : vector<64x128xf32>
    %64 = tpu.matmul %61, %63, %cst_51 {dimension_numbers = #tpu.dot_dimension_numbers<[1], [0], [0], [1], [0, 0, 1, 1], [], []>} : vector<64x128xbf16>, vector<128x128xbf16>, vector<64x128xf32> -> vector<64x128xf32>
    %c2_52 = arith.constant 2 : index
    %c1_53 = arith.constant 1 : index
    %c0_54 = arith.constant 0 : index
    %c0_55 = arith.constant 0 : index
    %c0_56 = arith.constant 0 : index
    %65 = vector.load %arg7[%c2_52, %c1_53, %c0_54, %c0_55, %c0_56] : memref<3x2x2x1x128xf32, #tpu.memory_space<vmem>>, vector<1x1x1x1x128xf32>
    %66 = vector.shape_cast %65 : vector<1x1x1x1x128xf32> to vector<1x128xf32>
    %67 = vector.broadcast %66 : vector<1x128xf32> to vector<64x128xf32>
    %68 = arith.addf %64, %67 : vector<64x128xf32>
    %cst_57 = arith.constant 0.000000e+00 : f32
    %69 = vector.broadcast %cst_57 : f32 to vector<64x128xf32>
    %70 = arith.maximumf %68, %69 : vector<64x128xf32>
    %71 = arith.truncf %70 : vector<64x128xf32> to vector<64x128xbf16>
    %c2_58 = arith.constant 2 : index
    %c1_59 = arith.constant 1 : index
    %c1_60 = arith.constant 1 : index
    %c0_61 = arith.constant 0 : index
    %c0_62 = arith.constant 0 : index
    %72 = vector.load %arg6[%c2_58, %c1_59, %c1_60, %c0_61, %c0_62] : memref<3x2x2x128x128xbf16, #tpu.memory_space<vmem>>, vector<1x1x1x128x128xbf16>
    %73 = vector.shape_cast %72 : vector<1x1x1x128x128xbf16> to vector<128x128xbf16>
    %cst_63 = arith.constant dense<0.000000e+00> : vector<64x128xf32>
    %74 = tpu.matmul %71, %73, %cst_63 {dimension_numbers = #tpu.dot_dimension_numbers<[1], [0], [0], [1], [0, 0, 1, 1], [], []>} : vector<64x128xbf16>, vector<128x128xbf16>, vector<64x128xf32> -> vector<64x128xf32>
    %c2_64 = arith.constant 2 : index
    %c1_65 = arith.constant 1 : index
    %c1_66 = arith.constant 1 : index
    %c0_67 = arith.constant 0 : index
    %c0_68 = arith.constant 0 : index
    %75 = vector.load %arg7[%c2_64, %c1_65, %c1_66, %c0_67, %c0_68] : memref<3x2x2x1x128xf32, #tpu.memory_space<vmem>>, vector<1x1x1x1x128xf32>
    %76 = vector.shape_cast %75 : vector<1x1x1x1x128xf32> to vector<1x128xf32>
    %77 = vector.broadcast %76 : vector<1x128xf32> to vector<64x128xf32>
    %78 = arith.addf %74, %77 : vector<64x128xf32>
    %c0_69 = arith.constant 0 : index
    %c2_70 = arith.constant 2 : index
    %c1_71 = arith.constant 1 : index
    %c0_72 = arith.constant 0 : index
    %c0_73 = arith.constant 0 : index
    %79 = vector.load %arg4[%c0_69, %c2_70, %c1_71, %c0_72, %c0_73] : memref<1x3x2x1x128xf32, #tpu.memory_space<vmem>>, vector<1x1x1x1x128xf32>
    %80 = vector.shape_cast %79 : vector<1x1x1x1x128xf32> to vector<1x128xf32>
    %81 = vector.broadcast %80 : vector<1x128xf32> to vector<64x128xf32>
    %82 = arith.mulf %78, %81 : vector<64x128xf32>
    %83 = arith.addf %58, %82 : vector<64x128xf32>
    %84 = arith.truncf %83 : vector<64x128xf32> to vector<64x128xbf16>
    %c2_74 = arith.constant 2 : index
    %c0_75 = arith.constant 0 : index
    %c0_76 = arith.constant 0 : index
    %85 = vector.load %arg8[%c2_74, %c0_75, %c0_76] : memref<3x128x2xbf16, #tpu.memory_space<vmem>>, vector<1x128x2xbf16>
    %86 = vector.shape_cast %85 : vector<1x128x2xbf16> to vector<128x2xbf16>
    %cst_77 = arith.constant dense<0.000000e+00> : vector<64x2xf32>
    %87 = tpu.matmul %84, %86, %cst_77 {dimension_numbers = #tpu.dot_dimension_numbers<[1], [0], [0], [1], [0, 0, 1, 1], [], []>} : vector<64x128xbf16>, vector<128x2xbf16>, vector<64x2xf32> -> vector<64x2xf32>
    %c2_78 = arith.constant 2 : index
    %c0_79 = arith.constant 0 : index
    %c0_80 = arith.constant 0 : index
    %88 = vector.load %arg9[%c2_78, %c0_79, %c0_80] : memref<3x1x2xf32, #tpu.memory_space<vmem>>, vector<1x1x2xf32>
    %89 = vector.shape_cast %88 : vector<1x1x2xf32> to vector<1x2xf32>
    %90 = vector.broadcast %89 : vector<1x2xf32> to vector<64x2xf32>
    %91 = arith.addf %87, %90 : vector<64x2xf32>
    %92 = vector.extract_strided_slice %91 {offsets = [0, 0], sizes = [64, 1], strides = [1, 1]} : vector<64x2xf32> to vector<64x1xf32>
    %cst_81 = arith.constant 2.000000e+00 : f32
    %93 = vector.broadcast %cst_81 : f32 to vector<64x1xf32>
    %94 = arith.addf %92, %93 : vector<64x1xf32>
    %95 = arith.negf %94 : vector<64x1xf32>
    %96 = math.exp %95 : vector<64x1xf32>
    %cst_82 = arith.constant 1.000000e+00 : f32
    %97 = vector.broadcast %cst_82 : f32 to vector<64x1xf32>
    %98 = arith.addf %97, %96 : vector<64x1xf32>
    %99 = arith.divf %97, %98 : vector<64x1xf32>
    %cst_83 = arith.constant 1.000000e-03 : f32
    %100 = vector.broadcast %cst_83 : f32 to vector<64x1xf32>
    %101 = arith.addf %99, %100 : vector<64x1xf32>
    %102 = math.log %101 : vector<64x1xf32>
    %103 = arith.addf %4, %102 : vector<64x1xf32>
    %104 = arith.mulf %101, %24 : vector<64x1xf32>
    %105 = vector.extract_strided_slice %91 {offsets = [0, 1], sizes = [64, 1], strides = [1, 1]} : vector<64x2xf32> to vector<64x1xf32>
    %106 = arith.addf %104, %105 : vector<64x1xf32>
    %c2_84 = arith.constant 2 : index
    %c6 = arith.constant 6 : index
    %107 = memref.load %arg10[%c2_84, %c6] : memref<3x8xf32, #tpu.memory_space<smem>>
    %108 = vector.broadcast %107 : f32 to vector<64x1xf32>
    %109 = arith.mulf %108, %16 : vector<64x1xf32>
    %c2_85 = arith.constant 2 : index
    %c7 = arith.constant 7 : index
    %110 = memref.load %arg10[%c2_85, %c7] : memref<3x8xf32, #tpu.memory_space<smem>>
    %111 = vector.broadcast %110 : f32 to vector<64x1xf32>
    %112 = arith.addf %109, %111 : vector<64x1xf32>
    %c1_86 = arith.constant 1 : index
    %c0_87 = arith.constant 0 : index
    %113 = memref.load %arg10[%c1_86, %c0_87] : memref<3x8xf32, #tpu.memory_space<smem>>
    %c1_88 = arith.constant 1 : index
    %c1_89 = arith.constant 1 : index
    %114 = memref.load %arg10[%c1_88, %c1_89] : memref<3x8xf32, #tpu.memory_space<smem>>
    %c1_90 = arith.constant 1 : index
    %c2_91 = arith.constant 2 : index
    %115 = memref.load %arg10[%c1_90, %c2_91] : memref<3x8xf32, #tpu.memory_space<smem>>
    %c1_92 = arith.constant 1 : index
    %c3_93 = arith.constant 3 : index
    %116 = memref.load %arg10[%c1_92, %c3_93] : memref<3x8xf32, #tpu.memory_space<smem>>
    %117 = vector.broadcast %113 : f32 to vector<64x1xf32>
    %118 = arith.mulf %112, %117 : vector<64x1xf32>
    %119 = vector.broadcast %114 : f32 to vector<64x1xf32>
    %120 = arith.mulf %106, %119 : vector<64x1xf32>
    %121 = arith.addf %118, %120 : vector<64x1xf32>
    %c1_94 = arith.constant 1 : index
    %c4_95 = arith.constant 4 : index
    %122 = memref.load %arg10[%c1_94, %c4_95] : memref<3x8xf32, #tpu.memory_space<smem>>
    %123 = vector.broadcast %122 : f32 to vector<64x1xf32>
    %124 = arith.addf %121, %123 : vector<64x1xf32>
    %125 = vector.broadcast %115 : f32 to vector<64x1xf32>
    %126 = arith.mulf %112, %125 : vector<64x1xf32>
    %127 = vector.broadcast %116 : f32 to vector<64x1xf32>
    %128 = arith.mulf %106, %127 : vector<64x1xf32>
    %129 = arith.addf %126, %128 : vector<64x1xf32>
    %c1_96 = arith.constant 1 : index
    %c5_97 = arith.constant 5 : index
    %130 = memref.load %arg10[%c1_96, %c5_97] : memref<3x8xf32, #tpu.memory_space<smem>>
    %131 = vector.broadcast %130 : f32 to vector<64x1xf32>
    %132 = arith.addf %129, %131 : vector<64x1xf32>
    %c1_98 = arith.constant 1 : index
    %c0_99 = arith.constant 0 : index
    %c0_100 = arith.constant 0 : index
    %133 = vector.load %arg5[%c1_98, %c0_99, %c0_100] : memref<3x1x128xf32, #tpu.memory_space<vmem>>, vector<1x1x128xf32>
    %134 = vector.shape_cast %133 : vector<1x1x128xf32> to vector<1x128xf32>
    %135 = vector.broadcast %124 : vector<64x1xf32> to vector<64x128xf32>
    %136 = vector.broadcast %134 : vector<1x128xf32> to vector<64x128xf32>
    %137 = arith.mulf %135, %136 : vector<64x128xf32>
    %c0_101 = arith.constant 0 : index
    %c1_102 = arith.constant 1 : index
    %c0_103 = arith.constant 0 : index
    %c0_104 = arith.constant 0 : index
    %138 = vector.load %arg3[%c0_101, %c1_102, %c0_103, %c0_104] : memref<1x3x1x128xf32, #tpu.memory_space<vmem>>, vector<1x1x1x128xf32>
    %139 = vector.shape_cast %138 : vector<1x1x1x128xf32> to vector<1x128xf32>
    %140 = vector.broadcast %139 : vector<1x128xf32> to vector<64x128xf32>
    %141 = arith.addf %137, %140 : vector<64x128xf32>
    %cst_105 = arith.constant 0.000000e+00 : f32
    %142 = vector.broadcast %cst_105 : f32 to vector<64x128xf32>
    %143 = arith.maximumf %141, %142 : vector<64x128xf32>
    %144 = arith.truncf %143 : vector<64x128xf32> to vector<64x128xbf16>
    %c1_106 = arith.constant 1 : index
    %c0_107 = arith.constant 0 : index
    %c0_108 = arith.constant 0 : index
    %c0_109 = arith.constant 0 : index
    %c0_110 = arith.constant 0 : index
    %145 = vector.load %arg6[%c1_106, %c0_107, %c0_108, %c0_109, %c0_110] : memref<3x2x2x128x128xbf16, #tpu.memory_space<vmem>>, vector<1x1x1x128x128xbf16>
    %146 = vector.shape_cast %145 : vector<1x1x1x128x128xbf16> to vector<128x128xbf16>
    %cst_111 = arith.constant dense<0.000000e+00> : vector<64x128xf32>
    %147 = tpu.matmul %144, %146, %cst_111 {dimension_numbers = #tpu.dot_dimension_numbers<[1], [0], [0], [1], [0, 0, 1, 1], [], []>} : vector<64x128xbf16>, vector<128x128xbf16>, vector<64x128xf32> -> vector<64x128xf32>
    %c1_112 = arith.constant 1 : index
    %c0_113 = arith.constant 0 : index
    %c0_114 = arith.constant 0 : index
    %c0_115 = arith.constant 0 : index
    %c0_116 = arith.constant 0 : index
    %148 = vector.load %arg7[%c1_112, %c0_113, %c0_114, %c0_115, %c0_116] : memref<3x2x2x1x128xf32, #tpu.memory_space<vmem>>, vector<1x1x1x1x128xf32>
    %149 = vector.shape_cast %148 : vector<1x1x1x1x128xf32> to vector<1x128xf32>
    %150 = vector.broadcast %149 : vector<1x128xf32> to vector<64x128xf32>
    %151 = arith.addf %147, %150 : vector<64x128xf32>
    %cst_117 = arith.constant 0.000000e+00 : f32
    %152 = vector.broadcast %cst_117 : f32 to vector<64x128xf32>
    %153 = arith.maximumf %151, %152 : vector<64x128xf32>
    %154 = arith.truncf %153 : vector<64x128xf32> to vector<64x128xbf16>
    %c1_118 = arith.constant 1 : index
    %c0_119 = arith.constant 0 : index
    %c1_120 = arith.constant 1 : index
    %c0_121 = arith.constant 0 : index
    %c0_122 = arith.constant 0 : index
    %155 = vector.load %arg6[%c1_118, %c0_119, %c1_120, %c0_121, %c0_122] : memref<3x2x2x128x128xbf16, #tpu.memory_space<vmem>>, vector<1x1x1x128x128xbf16>
    %156 = vector.shape_cast %155 : vector<1x1x1x128x128xbf16> to vector<128x128xbf16>
    %cst_123 = arith.constant dense<0.000000e+00> : vector<64x128xf32>
    %157 = tpu.matmul %154, %156, %cst_123 {dimension_numbers = #tpu.dot_dimension_numbers<[1], [0], [0], [1], [0, 0, 1, 1], [], []>} : vector<64x128xbf16>, vector<128x128xbf16>, vector<64x128xf32> -> vector<64x128xf32>
    %c1_124 = arith.constant 1 : index
    %c0_125 = arith.constant 0 : index
    %c1_126 = arith.constant 1 : index
    %c0_127 = arith.constant 0 : index
    %c0_128 = arith.constant 0 : index
    %158 = vector.load %arg7[%c1_124, %c0_125, %c1_126, %c0_127, %c0_128] : memref<3x2x2x1x128xf32, #tpu.memory_space<vmem>>, vector<1x1x1x1x128xf32>
    %159 = vector.shape_cast %158 : vector<1x1x1x1x128xf32> to vector<1x128xf32>
    %160 = vector.broadcast %159 : vector<1x128xf32> to vector<64x128xf32>
    %161 = arith.addf %157, %160 : vector<64x128xf32>
    %c0_129 = arith.constant 0 : index
    %c1_130 = arith.constant 1 : index
    %c0_131 = arith.constant 0 : index
    %c0_132 = arith.constant 0 : index
    %c0_133 = arith.constant 0 : index
    %162 = vector.load %arg4[%c0_129, %c1_130, %c0_131, %c0_132, %c0_133] : memref<1x3x2x1x128xf32, #tpu.memory_space<vmem>>, vector<1x1x1x1x128xf32>
    %163 = vector.shape_cast %162 : vector<1x1x1x1x128xf32> to vector<1x128xf32>
    %164 = vector.broadcast %163 : vector<1x128xf32> to vector<64x128xf32>
    %165 = arith.mulf %161, %164 : vector<64x128xf32>
    %166 = arith.addf %141, %165 : vector<64x128xf32>
    %cst_134 = arith.constant 0.000000e+00 : f32
    %167 = vector.broadcast %cst_134 : f32 to vector<64x128xf32>
    %168 = arith.maximumf %166, %167 : vector<64x128xf32>
    %169 = arith.truncf %168 : vector<64x128xf32> to vector<64x128xbf16>
    %c1_135 = arith.constant 1 : index
    %c1_136 = arith.constant 1 : index
    %c0_137 = arith.constant 0 : index
    %c0_138 = arith.constant 0 : index
    %c0_139 = arith.constant 0 : index
    %170 = vector.load %arg6[%c1_135, %c1_136, %c0_137, %c0_138, %c0_139] : memref<3x2x2x128x128xbf16, #tpu.memory_space<vmem>>, vector<1x1x1x128x128xbf16>
    %171 = vector.shape_cast %170 : vector<1x1x1x128x128xbf16> to vector<128x128xbf16>
    %cst_140 = arith.constant dense<0.000000e+00> : vector<64x128xf32>
    %172 = tpu.matmul %169, %171, %cst_140 {dimension_numbers = #tpu.dot_dimension_numbers<[1], [0], [0], [1], [0, 0, 1, 1], [], []>} : vector<64x128xbf16>, vector<128x128xbf16>, vector<64x128xf32> -> vector<64x128xf32>
    %c1_141 = arith.constant 1 : index
    %c1_142 = arith.constant 1 : index
    %c0_143 = arith.constant 0 : index
    %c0_144 = arith.constant 0 : index
    %c0_145 = arith.constant 0 : index
    %173 = vector.load %arg7[%c1_141, %c1_142, %c0_143, %c0_144, %c0_145] : memref<3x2x2x1x128xf32, #tpu.memory_space<vmem>>, vector<1x1x1x1x128xf32>
    %174 = vector.shape_cast %173 : vector<1x1x1x1x128xf32> to vector<1x128xf32>
    %175 = vector.broadcast %174 : vector<1x128xf32> to vector<64x128xf32>
    %176 = arith.addf %172, %175 : vector<64x128xf32>
    %cst_146 = arith.constant 0.000000e+00 : f32
    %177 = vector.broadcast %cst_146 : f32 to vector<64x128xf32>
    %178 = arith.maximumf %176, %177 : vector<64x128xf32>
    %179 = arith.truncf %178 : vector<64x128xf32> to vector<64x128xbf16>
    %c1_147 = arith.constant 1 : index
    %c1_148 = arith.constant 1 : index
    %c1_149 = arith.constant 1 : index
    %c0_150 = arith.constant 0 : index
    %c0_151 = arith.constant 0 : index
    %180 = vector.load %arg6[%c1_147, %c1_148, %c1_149, %c0_150, %c0_151] : memref<3x2x2x128x128xbf16, #tpu.memory_space<vmem>>, vector<1x1x1x128x128xbf16>
    %181 = vector.shape_cast %180 : vector<1x1x1x128x128xbf16> to vector<128x128xbf16>
    %cst_152 = arith.constant dense<0.000000e+00> : vector<64x128xf32>
    %182 = tpu.matmul %179, %181, %cst_152 {dimension_numbers = #tpu.dot_dimension_numbers<[1], [0], [0], [1], [0, 0, 1, 1], [], []>} : vector<64x128xbf16>, vector<128x128xbf16>, vector<64x128xf32> -> vector<64x128xf32>
    %c1_153 = arith.constant 1 : index
    %c1_154 = arith.constant 1 : index
    %c1_155 = arith.constant 1 : index
    %c0_156 = arith.constant 0 : index
    %c0_157 = arith.constant 0 : index
    %183 = vector.load %arg7[%c1_153, %c1_154, %c1_155, %c0_156, %c0_157] : memref<3x2x2x1x128xf32, #tpu.memory_space<vmem>>, vector<1x1x1x1x128xf32>
    %184 = vector.shape_cast %183 : vector<1x1x1x1x128xf32> to vector<1x128xf32>
    %185 = vector.broadcast %184 : vector<1x128xf32> to vector<64x128xf32>
    %186 = arith.addf %182, %185 : vector<64x128xf32>
    %c0_158 = arith.constant 0 : index
    %c1_159 = arith.constant 1 : index
    %c1_160 = arith.constant 1 : index
    %c0_161 = arith.constant 0 : index
    %c0_162 = arith.constant 0 : index
    %187 = vector.load %arg4[%c0_158, %c1_159, %c1_160, %c0_161, %c0_162] : memref<1x3x2x1x128xf32, #tpu.memory_space<vmem>>, vector<1x1x1x1x128xf32>
    %188 = vector.shape_cast %187 : vector<1x1x1x1x128xf32> to vector<1x128xf32>
    %189 = vector.broadcast %188 : vector<1x128xf32> to vector<64x128xf32>
    %190 = arith.mulf %186, %189 : vector<64x128xf32>
    %191 = arith.addf %166, %190 : vector<64x128xf32>
    %192 = arith.truncf %191 : vector<64x128xf32> to vector<64x128xbf16>
    %c1_163 = arith.constant 1 : index
    %c0_164 = arith.constant 0 : index
    %c0_165 = arith.constant 0 : index
    %193 = vector.load %arg8[%c1_163, %c0_164, %c0_165] : memref<3x128x2xbf16, #tpu.memory_space<vmem>>, vector<1x128x2xbf16>
    %194 = vector.shape_cast %193 : vector<1x128x2xbf16> to vector<128x2xbf16>
    %cst_166 = arith.constant dense<0.000000e+00> : vector<64x2xf32>
    %195 = tpu.matmul %192, %194, %cst_166 {dimension_numbers = #tpu.dot_dimension_numbers<[1], [0], [0], [1], [0, 0, 1, 1], [], []>} : vector<64x128xbf16>, vector<128x2xbf16>, vector<64x2xf32> -> vector<64x2xf32>
    %c1_167 = arith.constant 1 : index
    %c0_168 = arith.constant 0 : index
    %c0_169 = arith.constant 0 : index
    %196 = vector.load %arg9[%c1_167, %c0_168, %c0_169] : memref<3x1x2xf32, #tpu.memory_space<vmem>>, vector<1x1x2xf32>
    %197 = vector.shape_cast %196 : vector<1x1x2xf32> to vector<1x2xf32>
    %198 = vector.broadcast %197 : vector<1x2xf32> to vector<64x2xf32>
    %199 = arith.addf %195, %198 : vector<64x2xf32>
    %200 = vector.extract_strided_slice %199 {offsets = [0, 0], sizes = [64, 1], strides = [1, 1]} : vector<64x2xf32> to vector<64x1xf32>
    %cst_170 = arith.constant 2.000000e+00 : f32
    %201 = vector.broadcast %cst_170 : f32 to vector<64x1xf32>
    %202 = arith.addf %200, %201 : vector<64x1xf32>
    %203 = arith.negf %202 : vector<64x1xf32>
    %204 = math.exp %203 : vector<64x1xf32>
    %cst_171 = arith.constant 1.000000e+00 : f32
    %205 = vector.broadcast %cst_171 : f32 to vector<64x1xf32>
    %206 = arith.addf %205, %204 : vector<64x1xf32>
    %207 = arith.divf %205, %206 : vector<64x1xf32>
    %cst_172 = arith.constant 1.000000e-03 : f32
    %208 = vector.broadcast %cst_172 : f32 to vector<64x1xf32>
    %209 = arith.addf %207, %208 : vector<64x1xf32>
    %210 = math.log %209 : vector<64x1xf32>
    %211 = arith.addf %103, %210 : vector<64x1xf32>
    %212 = arith.mulf %209, %132 : vector<64x1xf32>
    %213 = vector.extract_strided_slice %199 {offsets = [0, 1], sizes = [64, 1], strides = [1, 1]} : vector<64x2xf32> to vector<64x1xf32>
    %214 = arith.addf %212, %213 : vector<64x1xf32>
    %c1_173 = arith.constant 1 : index
    %c6_174 = arith.constant 6 : index
    %215 = memref.load %arg10[%c1_173, %c6_174] : memref<3x8xf32, #tpu.memory_space<smem>>
    %216 = vector.broadcast %215 : f32 to vector<64x1xf32>
    %217 = arith.mulf %216, %124 : vector<64x1xf32>
    %c1_175 = arith.constant 1 : index
    %c7_176 = arith.constant 7 : index
    %218 = memref.load %arg10[%c1_175, %c7_176] : memref<3x8xf32, #tpu.memory_space<smem>>
    %219 = vector.broadcast %218 : f32 to vector<64x1xf32>
    %220 = arith.addf %217, %219 : vector<64x1xf32>
    %c0_177 = arith.constant 0 : index
    %c0_178 = arith.constant 0 : index
    %221 = memref.load %arg10[%c0_177, %c0_178] : memref<3x8xf32, #tpu.memory_space<smem>>
    %c0_179 = arith.constant 0 : index
    %c1_180 = arith.constant 1 : index
    %222 = memref.load %arg10[%c0_179, %c1_180] : memref<3x8xf32, #tpu.memory_space<smem>>
    %c0_181 = arith.constant 0 : index
    %c2_182 = arith.constant 2 : index
    %223 = memref.load %arg10[%c0_181, %c2_182] : memref<3x8xf32, #tpu.memory_space<smem>>
    %c0_183 = arith.constant 0 : index
    %c3_184 = arith.constant 3 : index
    %224 = memref.load %arg10[%c0_183, %c3_184] : memref<3x8xf32, #tpu.memory_space<smem>>
    %225 = vector.broadcast %221 : f32 to vector<64x1xf32>
    %226 = arith.mulf %220, %225 : vector<64x1xf32>
    %227 = vector.broadcast %222 : f32 to vector<64x1xf32>
    %228 = arith.mulf %214, %227 : vector<64x1xf32>
    %229 = arith.addf %226, %228 : vector<64x1xf32>
    %c0_185 = arith.constant 0 : index
    %c4_186 = arith.constant 4 : index
    %230 = memref.load %arg10[%c0_185, %c4_186] : memref<3x8xf32, #tpu.memory_space<smem>>
    %231 = vector.broadcast %230 : f32 to vector<64x1xf32>
    %232 = arith.addf %229, %231 : vector<64x1xf32>
    %233 = vector.broadcast %223 : f32 to vector<64x1xf32>
    %234 = arith.mulf %220, %233 : vector<64x1xf32>
    %235 = vector.broadcast %224 : f32 to vector<64x1xf32>
    %236 = arith.mulf %214, %235 : vector<64x1xf32>
    %237 = arith.addf %234, %236 : vector<64x1xf32>
    %c0_187 = arith.constant 0 : index
    %c5_188 = arith.constant 5 : index
    %238 = memref.load %arg10[%c0_187, %c5_188] : memref<3x8xf32, #tpu.memory_space<smem>>
    %239 = vector.broadcast %238 : f32 to vector<64x1xf32>
    %240 = arith.addf %237, %239 : vector<64x1xf32>
    %c0_189 = arith.constant 0 : index
    %c0_190 = arith.constant 0 : index
    %c0_191 = arith.constant 0 : index
    %241 = vector.load %arg5[%c0_189, %c0_190, %c0_191] : memref<3x1x128xf32, #tpu.memory_space<vmem>>, vector<1x1x128xf32>
    %242 = vector.shape_cast %241 : vector<1x1x128xf32> to vector<1x128xf32>
    %243 = vector.broadcast %232 : vector<64x1xf32> to vector<64x128xf32>
    %244 = vector.broadcast %242 : vector<1x128xf32> to vector<64x128xf32>
    %245 = arith.mulf %243, %244 : vector<64x128xf32>
    %c0_192 = arith.constant 0 : index
    %c0_193 = arith.constant 0 : index
    %c0_194 = arith.constant 0 : index
    %c0_195 = arith.constant 0 : index
    %246 = vector.load %arg3[%c0_192, %c0_193, %c0_194, %c0_195] : memref<1x3x1x128xf32, #tpu.memory_space<vmem>>, vector<1x1x1x128xf32>
    %247 = vector.shape_cast %246 : vector<1x1x1x128xf32> to vector<1x128xf32>
    %248 = vector.broadcast %247 : vector<1x128xf32> to vector<64x128xf32>
    %249 = arith.addf %245, %248 : vector<64x128xf32>
    %cst_196 = arith.constant 0.000000e+00 : f32
    %250 = vector.broadcast %cst_196 : f32 to vector<64x128xf32>
    %251 = arith.maximumf %249, %250 : vector<64x128xf32>
    %252 = arith.truncf %251 : vector<64x128xf32> to vector<64x128xbf16>
    %c0_197 = arith.constant 0 : index
    %c0_198 = arith.constant 0 : index
    %c0_199 = arith.constant 0 : index
    %c0_200 = arith.constant 0 : index
    %c0_201 = arith.constant 0 : index
    %253 = vector.load %arg6[%c0_197, %c0_198, %c0_199, %c0_200, %c0_201] : memref<3x2x2x128x128xbf16, #tpu.memory_space<vmem>>, vector<1x1x1x128x128xbf16>
    %254 = vector.shape_cast %253 : vector<1x1x1x128x128xbf16> to vector<128x128xbf16>
    %cst_202 = arith.constant dense<0.000000e+00> : vector<64x128xf32>
    %255 = tpu.matmul %252, %254, %cst_202 {dimension_numbers = #tpu.dot_dimension_numbers<[1], [0], [0], [1], [0, 0, 1, 1], [], []>} : vector<64x128xbf16>, vector<128x128xbf16>, vector<64x128xf32> -> vector<64x128xf32>
    %c0_203 = arith.constant 0 : index
    %c0_204 = arith.constant 0 : index
    %c0_205 = arith.constant 0 : index
    %c0_206 = arith.constant 0 : index
    %c0_207 = arith.constant 0 : index
    %256 = vector.load %arg7[%c0_203, %c0_204, %c0_205, %c0_206, %c0_207] : memref<3x2x2x1x128xf32, #tpu.memory_space<vmem>>, vector<1x1x1x1x128xf32>
    %257 = vector.shape_cast %256 : vector<1x1x1x1x128xf32> to vector<1x128xf32>
    %258 = vector.broadcast %257 : vector<1x128xf32> to vector<64x128xf32>
    %259 = arith.addf %255, %258 : vector<64x128xf32>
    %cst_208 = arith.constant 0.000000e+00 : f32
    %260 = vector.broadcast %cst_208 : f32 to vector<64x128xf32>
    %261 = arith.maximumf %259, %260 : vector<64x128xf32>
    %262 = arith.truncf %261 : vector<64x128xf32> to vector<64x128xbf16>
    %c0_209 = arith.constant 0 : index
    %c0_210 = arith.constant 0 : index
    %c1_211 = arith.constant 1 : index
    %c0_212 = arith.constant 0 : index
    %c0_213 = arith.constant 0 : index
    %263 = vector.load %arg6[%c0_209, %c0_210, %c1_211, %c0_212, %c0_213] : memref<3x2x2x128x128xbf16, #tpu.memory_space<vmem>>, vector<1x1x1x128x128xbf16>
    %264 = vector.shape_cast %263 : vector<1x1x1x128x128xbf16> to vector<128x128xbf16>
    %cst_214 = arith.constant dense<0.000000e+00> : vector<64x128xf32>
    %265 = tpu.matmul %262, %264, %cst_214 {dimension_numbers = #tpu.dot_dimension_numbers<[1], [0], [0], [1], [0, 0, 1, 1], [], []>} : vector<64x128xbf16>, vector<128x128xbf16>, vector<64x128xf32> -> vector<64x128xf32>
    %c0_215 = arith.constant 0 : index
    %c0_216 = arith.constant 0 : index
    %c1_217 = arith.constant 1 : index
    %c0_218 = arith.constant 0 : index
    %c0_219 = arith.constant 0 : index
    %266 = vector.load %arg7[%c0_215, %c0_216, %c1_217, %c0_218, %c0_219] : memref<3x2x2x1x128xf32, #tpu.memory_space<vmem>>, vector<1x1x1x1x128xf32>
    %267 = vector.shape_cast %266 : vector<1x1x1x1x128xf32> to vector<1x128xf32>
    %268 = vector.broadcast %267 : vector<1x128xf32> to vector<64x128xf32>
    %269 = arith.addf %265, %268 : vector<64x128xf32>
    %c0_220 = arith.constant 0 : index
    %c0_221 = arith.constant 0 : index
    %c0_222 = arith.constant 0 : index
    %c0_223 = arith.constant 0 : index
    %c0_224 = arith.constant 0 : index
    %270 = vector.load %arg4[%c0_220, %c0_221, %c0_222, %c0_223, %c0_224] : memref<1x3x2x1x128xf32, #tpu.memory_space<vmem>>, vector<1x1x1x1x128xf32>
    %271 = vector.shape_cast %270 : vector<1x1x1x1x128xf32> to vector<1x128xf32>
    %272 = vector.broadcast %271 : vector<1x128xf32> to vector<64x128xf32>
    %273 = arith.mulf %269, %272 : vector<64x128xf32>
    %274 = arith.addf %249, %273 : vector<64x128xf32>
    %cst_225 = arith.constant 0.000000e+00 : f32
    %275 = vector.broadcast %cst_225 : f32 to vector<64x128xf32>
    %276 = arith.maximumf %274, %275 : vector<64x128xf32>
    %277 = arith.truncf %276 : vector<64x128xf32> to vector<64x128xbf16>
    %c0_226 = arith.constant 0 : index
    %c1_227 = arith.constant 1 : index
    %c0_228 = arith.constant 0 : index
    %c0_229 = arith.constant 0 : index
    %c0_230 = arith.constant 0 : index
    %278 = vector.load %arg6[%c0_226, %c1_227, %c0_228, %c0_229, %c0_230] : memref<3x2x2x128x128xbf16, #tpu.memory_space<vmem>>, vector<1x1x1x128x128xbf16>
    %279 = vector.shape_cast %278 : vector<1x1x1x128x128xbf16> to vector<128x128xbf16>
    %cst_231 = arith.constant dense<0.000000e+00> : vector<64x128xf32>
    %280 = tpu.matmul %277, %279, %cst_231 {dimension_numbers = #tpu.dot_dimension_numbers<[1], [0], [0], [1], [0, 0, 1, 1], [], []>} : vector<64x128xbf16>, vector<128x128xbf16>, vector<64x128xf32> -> vector<64x128xf32>
    %c0_232 = arith.constant 0 : index
    %c1_233 = arith.constant 1 : index
    %c0_234 = arith.constant 0 : index
    %c0_235 = arith.constant 0 : index
    %c0_236 = arith.constant 0 : index
    %281 = vector.load %arg7[%c0_232, %c1_233, %c0_234, %c0_235, %c0_236] : memref<3x2x2x1x128xf32, #tpu.memory_space<vmem>>, vector<1x1x1x1x128xf32>
    %282 = vector.shape_cast %281 : vector<1x1x1x1x128xf32> to vector<1x128xf32>
    %283 = vector.broadcast %282 : vector<1x128xf32> to vector<64x128xf32>
    %284 = arith.addf %280, %283 : vector<64x128xf32>
    %cst_237 = arith.constant 0.000000e+00 : f32
    %285 = vector.broadcast %cst_237 : f32 to vector<64x128xf32>
    %286 = arith.maximumf %284, %285 : vector<64x128xf32>
    %287 = arith.truncf %286 : vector<64x128xf32> to vector<64x128xbf16>
    %c0_238 = arith.constant 0 : index
    %c1_239 = arith.constant 1 : index
    %c1_240 = arith.constant 1 : index
    %c0_241 = arith.constant 0 : index
    %c0_242 = arith.constant 0 : index
    %288 = vector.load %arg6[%c0_238, %c1_239, %c1_240, %c0_241, %c0_242] : memref<3x2x2x128x128xbf16, #tpu.memory_space<vmem>>, vector<1x1x1x128x128xbf16>
    %289 = vector.shape_cast %288 : vector<1x1x1x128x128xbf16> to vector<128x128xbf16>
    %cst_243 = arith.constant dense<0.000000e+00> : vector<64x128xf32>
    %290 = tpu.matmul %287, %289, %cst_243 {dimension_numbers = #tpu.dot_dimension_numbers<[1], [0], [0], [1], [0, 0, 1, 1], [], []>} : vector<64x128xbf16>, vector<128x128xbf16>, vector<64x128xf32> -> vector<64x128xf32>
    %c0_244 = arith.constant 0 : index
    %c1_245 = arith.constant 1 : index
    %c1_246 = arith.constant 1 : index
    %c0_247 = arith.constant 0 : index
    %c0_248 = arith.constant 0 : index
    %291 = vector.load %arg7[%c0_244, %c1_245, %c1_246, %c0_247, %c0_248] : memref<3x2x2x1x128xf32, #tpu.memory_space<vmem>>, vector<1x1x1x1x128xf32>
    %292 = vector.shape_cast %291 : vector<1x1x1x1x128xf32> to vector<1x128xf32>
    %293 = vector.broadcast %292 : vector<1x128xf32> to vector<64x128xf32>
    %294 = arith.addf %290, %293 : vector<64x128xf32>
    %c0_249 = arith.constant 0 : index
    %c0_250 = arith.constant 0 : index
    %c1_251 = arith.constant 1 : index
    %c0_252 = arith.constant 0 : index
    %c0_253 = arith.constant 0 : index
    %295 = vector.load %arg4[%c0_249, %c0_250, %c1_251, %c0_252, %c0_253] : memref<1x3x2x1x128xf32, #tpu.memory_space<vmem>>, vector<1x1x1x1x128xf32>
    %296 = vector.shape_cast %295 : vector<1x1x1x1x128xf32> to vector<1x128xf32>
    %297 = vector.broadcast %296 : vector<1x128xf32> to vector<64x128xf32>
    %298 = arith.mulf %294, %297 : vector<64x128xf32>
    %299 = arith.addf %274, %298 : vector<64x128xf32>
    %300 = arith.truncf %299 : vector<64x128xf32> to vector<64x128xbf16>
    %c0_254 = arith.constant 0 : index
    %c0_255 = arith.constant 0 : index
    %c0_256 = arith.constant 0 : index
    %301 = vector.load %arg8[%c0_254, %c0_255, %c0_256] : memref<3x128x2xbf16, #tpu.memory_space<vmem>>, vector<1x128x2xbf16>
    %302 = vector.shape_cast %301 : vector<1x128x2xbf16> to vector<128x2xbf16>
    %cst_257 = arith.constant dense<0.000000e+00> : vector<64x2xf32>
    %303 = tpu.matmul %300, %302, %cst_257 {dimension_numbers = #tpu.dot_dimension_numbers<[1], [0], [0], [1], [0, 0, 1, 1], [], []>} : vector<64x128xbf16>, vector<128x2xbf16>, vector<64x2xf32> -> vector<64x2xf32>
    %c0_258 = arith.constant 0 : index
    %c0_259 = arith.constant 0 : index
    %c0_260 = arith.constant 0 : index
    %304 = vector.load %arg9[%c0_258, %c0_259, %c0_260] : memref<3x1x2xf32, #tpu.memory_space<vmem>>, vector<1x1x2xf32>
    %305 = vector.shape_cast %304 : vector<1x1x2xf32> to vector<1x2xf32>
    %306 = vector.broadcast %305 : vector<1x2xf32> to vector<64x2xf32>
    %307 = arith.addf %303, %306 : vector<64x2xf32>
    %308 = vector.extract_strided_slice %307 {offsets = [0, 0], sizes = [64, 1], strides = [1, 1]} : vector<64x2xf32> to vector<64x1xf32>
    %cst_261 = arith.constant 2.000000e+00 : f32
    %309 = vector.broadcast %cst_261 : f32 to vector<64x1xf32>
    %310 = arith.addf %308, %309 : vector<64x1xf32>
    %311 = arith.negf %310 : vector<64x1xf32>
    %312 = math.exp %311 : vector<64x1xf32>
    %cst_262 = arith.constant 1.000000e+00 : f32
    %313 = vector.broadcast %cst_262 : f32 to vector<64x1xf32>
    %314 = arith.addf %313, %312 : vector<64x1xf32>
    %315 = arith.divf %313, %314 : vector<64x1xf32>
    %cst_263 = arith.constant 1.000000e-03 : f32
    %316 = vector.broadcast %cst_263 : f32 to vector<64x1xf32>
    %317 = arith.addf %315, %316 : vector<64x1xf32>
    %318 = math.log %317 : vector<64x1xf32>
    %319 = arith.addf %211, %318 : vector<64x1xf32>
    %320 = arith.mulf %317, %240 : vector<64x1xf32>
    %321 = vector.extract_strided_slice %307 {offsets = [0, 1], sizes = [64, 1], strides = [1, 1]} : vector<64x2xf32> to vector<64x1xf32>
    %322 = arith.addf %320, %321 : vector<64x1xf32>
    %c0_264 = arith.constant 0 : index
    %c6_265 = arith.constant 6 : index
    %323 = memref.load %arg10[%c0_264, %c6_265] : memref<3x8xf32, #tpu.memory_space<smem>>
    %324 = vector.broadcast %323 : f32 to vector<64x1xf32>
    %325 = arith.mulf %324, %232 : vector<64x1xf32>
    %c0_266 = arith.constant 0 : index
    %c7_267 = arith.constant 7 : index
    %326 = memref.load %arg10[%c0_266, %c7_267] : memref<3x8xf32, #tpu.memory_space<smem>>
    %327 = vector.broadcast %326 : f32 to vector<64x1xf32>
    %328 = arith.addf %325, %327 : vector<64x1xf32>
    %329 = arith.mulf %328, %328 : vector<64x1xf32>
    %330 = arith.mulf %322, %322 : vector<64x1xf32>
    %331 = arith.addf %329, %330 : vector<64x1xf32>
    %cst_268 = arith.constant 5.000000e-01 : f32
    %332 = vector.broadcast %cst_268 : f32 to vector<64x1xf32>
    %333 = arith.mulf %332, %331 : vector<64x1xf32>
    %334 = arith.subf %319, %333 : vector<64x1xf32>
    %c0_269 = arith.constant 0 : index
    %c0_270 = arith.constant 0 : index
    %335 = memref.load %arg11[%c0_269, %c0_270] : memref<1x1xf32, #tpu.memory_space<smem>>
    %336 = vector.broadcast %335 : f32 to vector<64x1xf32>
    %337 = arith.addf %334, %336 : vector<64x1xf32>
    %c64_i32 = arith.constant 64 : i32
    %338 = arith.muli %arg1, %c64_i32 : i32
    %339 = tpu.iota {dimensions = array<i32: 0>} : vector<64x1xi32>
    %340 = vector.broadcast %338 : i32 to vector<64x1xi32>
    %341 = arith.addi %340, %339 : vector<64x1xi32>
    %c60_i32 = arith.constant 60 : i32
    %342 = vector.broadcast %c60_i32 : i32 to vector<64x1xi32>
    %343 = arith.cmpi slt, %341, %342 : vector<64x1xi32>
    %cst_271 = arith.constant 0.000000e+00 : f32
    %344 = vector.broadcast %cst_271 : f32 to vector<64x1xf32>
    %345 = arith.select %343, %337, %344 : vector<64x1xi1>, vector<64x1xf32>
    %346 = vector.shape_cast %345 : vector<64x1xf32> to vector<1x64x1xf32>
    %cst_272 = arith.constant dense<0.000000e+00> : vector<1xf32>
    %347 = vector.multi_reduction <add>, %346, %cst_272 [1, 2] : vector<1x64x1xf32> to vector<1xf32>
    %348 = vector.shape_cast %347 : vector<1xf32> to vector<1x1x1xf32>
    %349 = vector.extract %348[0, 0, 0] : f32 from vector<1x1x1xf32>
    %350 = vector.broadcast %349 : f32 to vector<1x1x8x128xf32>
    %c0_273 = arith.constant 0 : index
    %c0_274 = arith.constant 0 : index
    %c0_275 = arith.constant 0 : index
    %c0_276 = arith.constant 0 : index
    %351 = vector.load %arg12[%c0_273, %c0_274, %c0_275, %c0_276] : memref<1x1x8x128xf32, #tpu.memory_space<vmem>>, vector<1x1x8x128xf32>
    tpu.vector_store %arg12[%c0_273, %c0_274, %c0_275, %c0_276], %350 {strides = array<i32>} : memref<1x1x8x128xf32, #tpu.memory_space<vmem>>, vector<1x1x8x128xf32>,
    return
  }
  func.func @transform_0(%arg0: i32, %arg1: i32) -> (i32, i32, i32) {
    %c0_i32 = arith.constant 0 : i32
    %c0_i32_0 = arith.constant 0 : i32
    return %arg0, %arg1, %c0_i32 : i32, i32, i32
  }
  func.func @transform_1(%arg0: i32, %arg1: i32) -> (i32, i32, i32, i32) {
    %c0_i32 = arith.constant 0 : i32
    %c0_i32_0 = arith.constant 0 : i32
    %c0_i32_1 = arith.constant 0 : i32
    %c0_i32_2 = arith.constant 0 : i32
    return %arg0, %c0_i32, %c0_i32_0, %c0_i32_1 : i32, i32, i32, i32
  }
  func.func @transform_2(%arg0: i32, %arg1: i32) -> (i32, i32, i32, i32, i32) {
    %c0_i32 = arith.constant 0 : i32
    %c0_i32_0 = arith.constant 0 : i32
    %c0_i32_1 = arith.constant 0 : i32
    %c0_i32_2 = arith.constant 0 : i32
    %c0_i32_3 = arith.constant 0 : i32
    return %arg0, %c0_i32, %c0_i32_0, %c0_i32_1, %c0_i32_2 : i32, i32, i32, i32, i32
  }
  func.func @transform_3(%arg0: i32, %arg1: i32) -> (i32, i32, i32) {
    %c0_i32 = arith.constant 0 : i32
    %c0_i32_0 = arith.constant 0 : i32
    %c0_i32_1 = arith.constant 0 : i32
    %c0_i32_2 = arith.constant 0 : i32
    return %c0_i32, %c0_i32_0, %c0_i32_1 : i32, i32, i32
  }
  func.func @transform_4(%arg0: i32, %arg1: i32) -> (i32, i32, i32, i32, i32) {
    %c0_i32 = arith.constant 0 : i32
    %c0_i32_0 = arith.constant 0 : i32
    %c0_i32_1 = arith.constant 0 : i32
    %c0_i32_2 = arith.constant 0 : i32
    %c0_i32_3 = arith.constant 0 : i32
    %c0_i32_4 = arith.constant 0 : i32
    return %c0_i32, %c0_i32_0, %c0_i32_1, %c0_i32_2, %c0_i32_3 : i32, i32, i32, i32, i32
  }
  func.func @transform_5(%arg0: i32, %arg1: i32) -> (i32, i32, i32, i32, i32) {
    %c0_i32 = arith.constant 0 : i32
    %c0_i32_0 = arith.constant 0 : i32
    %c0_i32_1 = arith.constant 0 : i32
    %c0_i32_2 = arith.constant 0 : i32
    %c0_i32_3 = arith.constant 0 : i32
    %c0_i32_4 = arith.constant 0 : i32
    return %c0_i32, %c0_i32_0, %c0_i32_1, %c0_i32_2, %c0_i32_3 : i32, i32, i32, i32, i32
  }
  func.func @transform_6(%arg0: i32, %arg1: i32) -> (i32, i32, i32) {
    %c0_i32 = arith.constant 0 : i32
    %c0_i32_0 = arith.constant 0 : i32
    %c0_i32_1 = arith.constant 0 : i32
    %c0_i32_2 = arith.constant 0 : i32
    return %c0_i32, %c0_i32_0, %c0_i32_1 : i32, i32, i32
  }
  func.func @transform_7(%arg0: i32, %arg1: i32) -> (i32, i32, i32) {
    %c0_i32 = arith.constant 0 : i32
    %c0_i32_0 = arith.constant 0 : i32
    %c0_i32_1 = arith.constant 0 : i32
    %c0_i32_2 = arith.constant 0 : i32
    return %c0_i32, %c0_i32_0, %c0_i32_1 : i32, i32, i32
  }
  func.func @transform_8(%arg0: i32, %arg1: i32) -> (i32, i32) {
    %c0_i32 = arith.constant 0 : i32
    %c0_i32_0 = arith.constant 0 : i32
    %c0_i32_1 = arith.constant 0 : i32
    return %c0_i32, %c0_i32_0 : i32, i32
  }
  func.func @transform_9(%arg0: i32, %arg1: i32) -> (i32, i32) {
    %c0_i32 = arith.constant 0 : i32
    %c0_i32_0 = arith.constant 0 : i32
    %c0_i32_1 = arith.constant 0 : i32
    return %c0_i32, %c0_i32_0 : i32, i32
  }
  func.func @transform_10(%arg0: i32, %arg1: i32) -> (i32, i32, i32, i32) {
    %c0_i32 = arith.constant 0 : i32
    %c0_i32_0 = arith.constant 0 : i32
    %c0_i32_1 = arith.constant 0 : i32
    return %arg0, %arg1, %c0_i32, %c0_i32_0 : i32, i32, i32, i32
  }
}

module attributes {stable_mosaic.version = 11 : i64} {
  func.func @nfm_kernel(%arg0: i32, %arg1: i32, %arg2: memref<1x64x2xf32, #tpu.memory_space<vmem>>, %arg3: memref<1x3x1x128xf32, #tpu.memory_space<vmem>>, %arg4: memref<1x3x2x1x128xf32, #tpu.memory_space<vmem>>, %arg5: memref<3x1x128xf32, #tpu.memory_space<vmem>>, %arg6: memref<3x2x2x128x128xbf16, #tpu.memory_space<vmem>>, %arg7: memref<3x2x2x1x128xf32, #tpu.memory_space<vmem>>, %arg8: memref<3x128x2xbf16, #tpu.memory_space<vmem>>, %arg9: memref<3x1x2xf32, #tpu.memory_space<vmem>>, %arg10: memref<3x8xf32, #tpu.memory_space<smem>>, %arg11: memref<1x1xf32, #tpu.memory_space<smem>>, %arg12: memref<1x1x8x128xf32, #tpu.memory_space<vmem>>) attributes {dimension_semantics = [#tpu.dimension_semantics<parallel>, #tpu.dimension_semantics<parallel>], iteration_bounds = array<i64: 4, 1>, scalar_prefetch = 0 : i64, scratch_operands = 0 : i64, tpu.core_type = #tpu.core_type<tc>, window_params = [{transform_indices = @transform_0, window_bounds = array<i64: 1, 64, 2>}, {transform_indices = @transform_1, window_bounds = array<i64: 1, 3, 1, 128>}, {transform_indices = @transform_2, window_bounds = array<i64: 1, 3, 2, 1, 128>}, {pipeline_mode = #tpu.pipeline_mode<synchronous>, transform_indices = @transform_3, window_bounds = array<i64: 3, 1, 128>}, {pipeline_mode = #tpu.pipeline_mode<synchronous>, transform_indices = @transform_4, window_bounds = array<i64: 3, 2, 2, 128, 128>}, {pipeline_mode = #tpu.pipeline_mode<synchronous>, transform_indices = @transform_5, window_bounds = array<i64: 3, 2, 2, 1, 128>}, {pipeline_mode = #tpu.pipeline_mode<synchronous>, transform_indices = @transform_6, window_bounds = array<i64: 3, 128, 2>}, {pipeline_mode = #tpu.pipeline_mode<synchronous>, transform_indices = @transform_7, window_bounds = array<i64: 3, 1, 2>}, {transform_indices = @transform_8, window_bounds = array<i64: 3, 8>}, {transform_indices = @transform_9, window_bounds = array<i64: 1, 1>}, {transform_indices = @transform_10, window_bounds = array<i64: 1, 1, 8, 128>}]} {
    %c0 = arith.constant 0 : index
    %c0_0 = arith.constant 0 : index
    %c0_1 = arith.constant 0 : index
    %0 = vector.load %arg2[%c0, %c0_0, %c0_1] : memref<1x64x2xf32, #tpu.memory_space<vmem>>, vector<1x64x2xf32>
    %1 = vector.shape_cast %0 : vector<1x64x2xf32> to vector<64x2xf32>
    %2 = vector.extract_strided_slice %1 {offsets = [0, 0], sizes = [64, 1], strides = [1, 1]} : vector<64x2xf32> to vector<64x1xf32>
    %3 = vector.extract_strided_slice %1 {offsets = [0, 1], sizes = [64, 1], strides = [1, 1]} : vector<64x2xf32> to vector<64x1xf32>
    %cst = arith.constant 0.000000e+00 : f32
    %4 = vector.broadcast %cst : f32 to vector<64x1xf32>
    %c2 = arith.constant 2 : index
    %c0_2 = arith.constant 0 : index
    %5 = memref.load %arg10[%c2, %c0_2] : memref<3x8xf32, #tpu.memory_space<smem>>
    %c2_3 = arith.constant 2 : index
    %c1 = arith.constant 1 : index
    %6 = memref.load %arg10[%c2_3, %c1] : memref<3x8xf32, #tpu.memory_space<smem>>
    %c2_4 = arith.constant 2 : index
    %c2_5 = arith.constant 2 : index
    %7 = memref.load %arg10[%c2_4, %c2_5] : memref<3x8xf32, #tpu.memory_space<smem>>
    %c2_6 = arith.constant 2 : index
    %c3 = arith.constant 3 : index
    %8 = memref.load %arg10[%c2_6, %c3] : memref<3x8xf32, #tpu.memory_space<smem>>
    %9 = vector.broadcast %5 : f32 to vector<64x1xf32>
    %10 = arith.mulf %2, %9 : vector<64x1xf32>
    %11 = vector.broadcast %6 : f32 to vector<64x1xf32>
    %12 = arith.mulf %3, %11 : vector<64x1xf32>
    %13 = arith.addf %10, %12 : vector<64x1xf32>
    %c2_7 = arith.constant 2 : index
    %c4 = arith.constant 4 : index
    %14 = memref.load %arg10[%c2_7, %c4] : memref<3x8xf32, #tpu.memory_space<smem>>
    %15 = vector.broadcast %14 : f32 to vector<64x1xf32>
    %16 = arith.addf %13, %15 : vector<64x1xf32>
    %17 = vector.broadcast %7 : f32 to vector<64x1xf32>
    %18 = arith.mulf %2, %17 : vector<64x1xf32>
    %19 = vector.broadcast %8 : f32 to vector<64x1xf32>
    %20 = arith.mulf %3, %19 : vector<64x1xf32>
    %21 = arith.addf %18, %20 : vector<64x1xf32>
    %c2_8 = arith.constant 2 : index
    %c5 = arith.constant 5 : index
    %22 = memref.load %arg10[%c2_8, %c5] : memref<3x8xf32, #tpu.memory_space<smem>>
    %23 = vector.broadcast %22 : f32 to vector<64x1xf32>
    %24 = arith.addf %21, %23 : vector<64x1xf32>
    %c2_9 = arith.constant 2 : index
    %c0_10 = arith.constant 0 : index
    %c0_11 = arith.constant 0 : index
    %25 = vector.load %arg5[%c2_9, %c0_10, %c0_11] : memref<3x1x128xf32, #tpu.memory_space<vmem>>, vector<1x1x128xf32>
    %26 = vector.shape_cast %25 : vector<1x1x128xf32> to vector<1x128xf32>
    %27 = vector.broadcast %16 : vector<64x1xf32> to vector<64x128xf32>
    %28 = vector.broadcast %26 : vector<1x128xf32> to vector<64x128xf32>
    %29 = arith.mulf %27, %28 : vector<64x128xf32>
    %c0_12 = arith.constant 0 : index
    %c2_13 = arith.constant 2 : index
    %c0_14 = arith.constant 0 : index
    %c0_15 = arith.constant 0 : index
    %30 = vector.load %arg3[%c0_12, %c2_13, %c0_14, %c0_15] : memref<1x3x1x128xf32, #tpu.memory_space<vmem>>, vector<1x1x1x128xf32>
    %31 = vector.shape_cast %30 : vector<1x1x1x128xf32> to vector<1x128xf32>
    %32 = vector.broadcast %31 : vector<1x128xf32> to vector<64x128xf32>
    %33 = arith.addf %29, %32 : vector<64x128xf32>
    %cst_16 = arith.constant 0.000000e+00 : f32
    %34 = vector.broadcast %cst_16 : f32 to vector<64x128xf32>
    %35 = arith.maximumf %33, %34 : vector<64x128xf32>
    %36 = arith.truncf %35 : vector<64x128xf32> to vector<64x128xbf16>
    %c2_17 = arith.constant 2 : index
    %c0_18 = arith.constant 0 : index
    %c0_19 = arith.constant 0 : index
    %c0_20 = arith.constant 0 : index
    %c0_21 = arith.constant 0 : index
    %37 = vector.load %arg6[%c2_17, %c0_18, %c0_19, %c0_20, %c0_21] : memref<3x2x2x128x128xbf16, #tpu.memory_space<vmem>>, vector<1x1x1x128x128xbf16>
    %38 = vector.shape_cast %37 : vector<1x1x1x128x128xbf16> to vector<128x128xbf16>
    %cst_22 = arith.constant dense<0.000000e+00> : vector<64x128xf32>
    %39 = tpu.matmul %36, %38, %cst_22 {dimension_numbers = #tpu.dot_dimension_numbers<[1], [0], [0], [1], [0, 0, 1, 1], [], []>} : vector<64x128xbf16>, vector<128x128xbf16>, vector<64x128xf32> -> vector<64x128xf32>
    %c2_23 = arith.constant 2 : index
    %c0_24 = arith.constant 0 : index
    %c0_25 = arith.constant 0 : index
    %c0_26 = arith.constant 0 : index
    %c0_27 = arith.constant 0 : index
    %40 = vector.load %arg7[%c2_23, %c0_24, %c0_25, %c0_26, %c0_27] : memref<3x2x2x1x128xf32, #tpu.memory_space<vmem>>, vector<1x1x1x1x128xf32>
    %41 = vector.shape_cast %40 : vector<1x1x1x1x128xf32> to vector<1x128xf32>
    %42 = vector.broadcast %41 : vector<1x128xf32> to vector<64x128xf32>
    %43 = arith.addf %39, %42 : vector<64x128xf32>
    %cst_28 = arith.constant 0.000000e+00 : f32
    %44 = vector.broadcast %cst_28 : f32 to vector<64x128xf32>
    %45 = arith.maximumf %43, %44 : vector<64x128xf32>
    %46 = arith.truncf %45 : vector<64x128xf32> to vector<64x128xbf16>
    %c2_29 = arith.constant 2 : index
    %c0_30 = arith.constant 0 : index
    %c1_31 = arith.constant 1 : index
    %c0_32 = arith.constant 0 : index
    %c0_33 = arith.constant 0 : index
    %47 = vector.load %arg6[%c2_29, %c0_30, %c1_31, %c0_32, %c0_33] : memref<3x2x2x128x128xbf16, #tpu.memory_space<vmem>>, vector<1x1x1x128x128xbf16>
    %48 = vector.shape_cast %47 : vector<1x1x1x128x128xbf16> to vector<128x128xbf16>
    %cst_34 = arith.constant dense<0.000000e+00> : vector<64x128xf32>
    %49 = tpu.matmul %46, %48, %cst_34 {dimension_numbers = #tpu.dot_dimension_numbers<[1], [0], [0], [1], [0, 0, 1, 1], [], []>} : vector<64x128xbf16>, vector<128x128xbf16>, vector<64x128xf32> -> vector<64x128xf32>
    %c2_35 = arith.constant 2 : index
    %c0_36 = arith.constant 0 : index
    %c1_37 = arith.constant 1 : index
    %c0_38 = arith.constant 0 : index
    %c0_39 = arith.constant 0 : index
    %50 = vector.load %arg7[%c2_35, %c0_36, %c1_37, %c0_38, %c0_39] : memref<3x2x2x1x128xf32, #tpu.memory_space<vmem>>, vector<1x1x1x1x128xf32>
    %51 = vector.shape_cast %50 : vector<1x1x1x1x128xf32> to vector<1x128xf32>
    %52 = vector.broadcast %51 : vector<1x128xf32> to vector<64x128xf32>
    %53 = arith.addf %49, %52 : vector<64x128xf32>
    %c0_40 = arith.constant 0 : index
    %c2_41 = arith.constant 2 : index
    %c0_42 = arith.constant 0 : index
    %c0_43 = arith.constant 0 : index
    %c0_44 = arith.constant 0 : index
    %54 = vector.load %arg4[%c0_40, %c2_41, %c0_42, %c0_43, %c0_44] : memref<1x3x2x1x128xf32, #tpu.memory_space<vmem>>, vector<1x1x1x1x128xf32>
    %55 = vector.shape_cast %54 : vector<1x1x1x1x128xf32> to vector<1x128xf32>
    %56 = vector.broadcast %55 : vector<1x128xf32> to vector<64x128xf32>
    %57 = arith.mulf %53, %56 : vector<64x128xf32>
    %58 = arith.addf %33, %57 : vector<64x128xf32>
    %cst_45 = arith.constant 0.000000e+00 : f32
    %59 = vector.broadcast %cst_45 : f32 to vector<64x128xf32>
    %60 = arith.maximumf %58, %59 : vector<64x128xf32>
    %61 = arith.truncf %60 : vector<64x128xf32> to vector<64x128xbf16>
    %c2_46 = arith.constant 2 : index
    %c1_47 = arith.constant 1 : index
    %c0_48 = arith.constant 0 : index
    %c0_49 = arith.constant 0 : index
    %c0_50 = arith.constant 0 : index
    %62 = vector.load %arg6[%c2_46, %c1_47, %c0_48, %c0_49, %c0_50] : memref<3x2x2x128x128xbf16, #tpu.memory_space<vmem>>, vector<1x1x1x128x128xbf16>
    %63 = vector.shape_cast %62 : vector<1x1x1x128x128xbf16> to vector<128x128xbf16>
    %cst_51 = arith.constant dense<0.000000e+00> : vector<64x128xf32>
    %64 = tpu.matmul %61, %63, %cst_51 {dimension_numbers = #tpu.dot_dimension_numbers<[1], [0], [0], [1], [0, 0, 1, 1], [], []>} : vector<64x128xbf16>, vector<128x128xbf16>, vector<64x128xf32> -> vector<64x128xf32>
    %c2_52 = arith.constant 2 : index
    %c1_53 = arith.constant 1 : index
    %c0_54 = arith.constant 0 : index
    %c0_55 = arith.constant 0 : index
    %c0_56 = arith.constant 0 : index
    %65 = vector.load %arg7[%c2_52, %c1_53, %c0_54, %c0_55, %c0_56] : memref<3x2x2x1x128xf32, #tpu.memory_space<vmem>>, vector<1x1x1x1x128xf32>
    %66 = vector.shape_cast %65 : vector<1x1x1x1x128xf32> to vector<1x128xf32>
    %67 = vector.broadcast %66 : vector<1x128xf32> to vector<64x128xf32>
    %68 = arith.addf %64, %67 : vector<64x128xf32>
    %cst_57 = arith.constant 0.000000e+00 : f32
    %69 = vector.broadcast %cst_57 : f32 to vector<64x128xf32>
    %70 = arith.maximumf %68, %69 : vector<64x128xf32>
    %71 = arith.truncf %70 : vector<64x128xf32> to vector<64x128xbf16>
    %c2_58 = arith.constant 2 : index
    %c1_59 = arith.constant 1 : index
    %c1_60 = arith.constant 1 : index
    %c0_61 = arith.constant 0 : index
    %c0_62 = arith.constant 0 : index
    %72 = vector.load %arg6[%c2_58, %c1_59, %c1_60, %c0_61, %c0_62] : memref<3x2x2x128x128xbf16, #tpu.memory_space<vmem>>, vector<1x1x1x128x128xbf16>
    %73 = vector.shape_cast %72 : vector<1x1x1x128x128xbf16> to vector<128x128xbf16>
    %cst_63 = arith.constant dense<0.000000e+00> : vector<64x128xf32>
    %74 = tpu.matmul %71, %73, %cst_63 {dimension_numbers = #tpu.dot_dimension_numbers<[1], [0], [0], [1], [0, 0, 1, 1], [], []>} : vector<64x128xbf16>, vector<128x128xbf16>, vector<64x128xf32> -> vector<64x128xf32>
    %c2_64 = arith.constant 2 : index
    %c1_65 = arith.constant 1 : index
    %c1_66 = arith.constant 1 : index
    %c0_67 = arith.constant 0 : index
    %c0_68 = arith.constant 0 : index
    %75 = vector.load %arg7[%c2_64, %c1_65, %c1_66, %c0_67, %c0_68] : memref<3x2x2x1x128xf32, #tpu.memory_space<vmem>>, vector<1x1x1x1x128xf32>
    %76 = vector.shape_cast %75 : vector<1x1x1x1x128xf32> to vector<1x128xf32>
    %77 = vector.broadcast %76 : vector<1x128xf32> to vector<64x128xf32>
    %78 = arith.addf %74, %77 : vector<64x128xf32>
    %c0_69 = arith.constant 0 : index
    %c2_70 = arith.constant 2 : index
    %c1_71 = arith.constant 1 : index
    %c0_72 = arith.constant 0 : index
    %c0_73 = arith.constant 0 : index
    %79 = vector.load %arg4[%c0_69, %c2_70, %c1_71, %c0_72, %c0_73] : memref<1x3x2x1x128xf32, #tpu.memory_space<vmem>>, vector<1x1x1x1x128xf32>
    %80 = vector.shape_cast %79 : vector<1x1x1x1x128xf32> to vector<1x128xf32>
    %81 = vector.broadcast %80 : vector<1x128xf32> to vector<64x128xf32>
    %82 = arith.mulf %78, %81 : vector<64x128xf32>
    %83 = arith.addf %58, %82 : vector<64x128xf32>
    %84 = arith.truncf %83 : vector<64x128xf32> to vector<64x128xbf16>
    %c2_74 = arith.constant 2 : index
    %c0_75 = arith.constant 0 : index
    %c0_76 = arith.constant 0 : index
    %85 = vector.load %arg8[%c2_74, %c0_75, %c0_76] : memref<3x128x2xbf16, #tpu.memory_space<vmem>>, vector<1x128x2xbf16>
    %86 = vector.shape_cast %85 : vector<1x128x2xbf16> to vector<128x2xbf16>
    %cst_77 = arith.constant dense<0.000000e+00> : vector<64x2xf32>
    %87 = tpu.matmul %84, %86, %cst_77 {dimension_numbers = #tpu.dot_dimension_numbers<[1], [0], [0], [1], [0, 0, 1, 1], [], []>} : vector<64x128xbf16>, vector<128x2xbf16>, vector<64x2xf32> -> vector<64x2xf32>
    %c2_78 = arith.constant 2 : index
    %c0_79 = arith.constant 0 : index
    %c0_80 = arith.constant 0 : index
    %88 = vector.load %arg9[%c2_78, %c0_79, %c0_80] : memref<3x1x2xf32, #tpu.memory_space<vmem>>, vector<1x1x2xf32>
    %89 = vector.shape_cast %88 : vector<1x1x2xf32> to vector<1x2xf32>
    %90 = vector.broadcast %89 : vector<1x2xf32> to vector<64x2xf32>
    %91 = arith.addf %87, %90 : vector<64x2xf32>
    %92 = vector.extract_strided_slice %91 {offsets = [0, 0], sizes = [64, 1], strides = [1, 1]} : vector<64x2xf32> to vector<64x1xf32>
    %cst_81 = arith.constant 2.000000e+00 : f32
    %93 = vector.broadcast %cst_81 : f32 to vector<64x1xf32>
    %94 = arith.addf %92, %93 : vector<64x1xf32>
    %95 = arith.negf %94 : vector<64x1xf32>
    %96 = math.exp %95 : vector<64x1xf32>
    %cst_82 = arith.constant 1.000000e+00 : f32
    %97 = vector.broadcast %cst_82 : f32 to vector<64x1xf32>
    %98 = arith.addf %97, %96 : vector<64x1xf32>
    %99 = arith.divf %97, %98 : vector<64x1xf32>
    %cst_83 = arith.constant 1.000000e-03 : f32
    %100 = vector.broadcast %cst_83 : f32 to vector<64x1xf32>
    %101 = arith.addf %99, %100 : vector<64x1xf32>
    %102 = math.log %101 : vector<64x1xf32>
    %103 = arith.addf %4, %102 : vector<64x1xf32>
    %104 = arith.mulf %101, %24 : vector<64x1xf32>
    %105 = vector.extract_strided_slice %91 {offsets = [0, 1], sizes = [64, 1], strides = [1, 1]} : vector<64x2xf32> to vector<64x1xf32>
    %106 = arith.addf %104, %105 : vector<64x1xf32>
    %c2_84 = arith.constant 2 : index
    %c6 = arith.constant 6 : index
    %107 = memref.load %arg10[%c2_84, %c6] : memref<3x8xf32, #tpu.memory_space<smem>>
    %108 = vector.broadcast %107 : f32 to vector<64x1xf32>
    %109 = arith.mulf %108, %16 : vector<64x1xf32>
    %c2_85 = arith.constant 2 : index
    %c7 = arith.constant 7 : index
    %110 = memref.load %arg10[%c2_85, %c7] : memref<3x8xf32, #tpu.memory_space<smem>>
    %111 = vector.broadcast %110 : f32 to vector<64x1xf32>
    %112 = arith.addf %109, %111 : vector<64x1xf32>
    %c1_86 = arith.constant 1 : index
    %c0_87 = arith.constant 0 : index
    %113 = memref.load %arg10[%c1_86, %c0_87] : memref<3x8xf32, #tpu.memory_space<smem>>
    %c1_88 = arith.constant 1 : index
    %c1_89 = arith.constant 1 : index
    %114 = memref.load %arg10[%c1_88, %c1_89] : memref<3x8xf32, #tpu.memory_space<smem>>
    %c1_90 = arith.constant 1 : index
    %c2_91 = arith.constant 2 : index
    %115 = memref.load %arg10[%c1_90, %c2_91] : memref<3x8xf32, #tpu.memory_space<smem>>
    %c1_92 = arith.constant 1 : index
    %c3_93 = arith.constant 3 : index
    %116 = memref.load %arg10[%c1_92, %c3_93] : memref<3x8xf32, #tpu.memory_space<smem>>
    %117 = vector.broadcast %113 : f32 to vector<64x1xf32>
    %118 = arith.mulf %112, %117 : vector<64x1xf32>
    %119 = vector.broadcast %114 : f32 to vector<64x1xf32>
    %120 = arith.mulf %106, %119 : vector<64x1xf32>
    %121 = arith.addf %118, %120 : vector<64x1xf32>
    %c1_94 = arith.constant 1 : index
    %c4_95 = arith.constant 4 : index
    %122 = memref.load %arg10[%c1_94, %c4_95] : memref<3x8xf32, #tpu.memory_space<smem>>
    %123 = vector.broadcast %122 : f32 to vector<64x1xf32>
    %124 = arith.addf %121, %123 : vector<64x1xf32>
    %125 = vector.broadcast %115 : f32 to vector<64x1xf32>
    %126 = arith.mulf %112, %125 : vector<64x1xf32>
    %127 = vector.broadcast %116 : f32 to vector<64x1xf32>
    %128 = arith.mulf %106, %127 : vector<64x1xf32>
    %129 = arith.addf %126, %128 : vector<64x1xf32>
    %c1_96 = arith.constant 1 : index
    %c5_97 = arith.constant 5 : index
    %130 = memref.load %arg10[%c1_96, %c5_97] : memref<3x8xf32, #tpu.memory_space<smem>>
    %131 = vector.broadcast %130 : f32 to vector<64x1xf32>
    %132 = arith.addf %129, %131 : vector<64x1xf32>
    %c1_98 = arith.constant 1 : index
    %c0_99 = arith.constant 0 : index
    %c0_100 = arith.constant 0 : index
    %133 = vector.load %arg5[%c1_98, %c0_99, %c0_100] : memref<3x1x128xf32, #tpu.memory_space<vmem>>, vector<1x1x128xf32>
    %134 = vector.shape_cast %133 : vector<1x1x128xf32> to vector<1x128xf32>
    %135 = vector.broadcast %124 : vector<64x1xf32> to vector<64x128xf32>
    %136 = vector.broadcast %134 : vector<1x128xf32> to vector<64x128xf32>
    %137 = arith.mulf %135, %136 : vector<64x128xf32>
    %c0_101 = arith.constant 0 : index
    %c1_102 = arith.constant 1 : index
    %c0_103 = arith.constant 0 : index
    %c0_104 = arith.constant 0 : index
    %138 = vector.load %arg3[%c0_101, %c1_102, %c0_103, %c0_104] : memref<1x3x1x128xf32, #tpu.memory_space<vmem>>, vector<1x1x1x128xf32>
    %139 = vector.shape_cast %138 : vector<1x1x1x128xf32> to vector<1x128xf32>
    %140 = vector.broadcast %139 : vector<1x128xf32> to vector<64x128xf32>
    %141 = arith.addf %137, %140 : vector<64x128xf32>
    %cst_105 = arith.constant 0.000000e+00 : f32
    %142 = vector.broadcast %cst_105 : f32 to vector<64x128xf32>
    %143 = arith.maximumf %141, %142 : vector<64x128xf32>
    %144 = arith.truncf %143 : vector<64x128xf32> to vector<64x128xbf16>
    %c1_106 = arith.constant 1 : index
    %c0_107 = arith.constant 0 : index
    %c0_108 = arith.constant 0 : index
    %c0_109 = arith.constant 0 : index
    %c0_110 = arith.constant 0 : index
    %145 = vector.load %arg6[%c1_106, %c0_107, %c0_108, %c0_109, %c0_110] : memref<3x2x2x128x128xbf16, #tpu.memory_space<vmem>>, vector<1x1x1x128x128xbf16>
    %146 = vector.shape_cast %145 : vector<1x1x1x128x128xbf16> to vector<128x128xbf16>
    %cst_111 = arith.constant dense<0.000000e+00> : vector<64x128xf32>
    %147 = tpu.matmul %144, %146, %cst_111 {dimension_numbers = #tpu.dot_dimension_numbers<[1], [0], [0], [1], [0, 0, 1, 1], [], []>} : vector<64x128xbf16>, vector<128x128xbf16>, vector<64x128xf32> -> vector<64x128xf32>
    %c1_112 = arith.constant 1 : index
    %c0_113 = arith.constant 0 : index
    %c0_114 = arith.constant 0 : index
    %c0_115 = arith.constant 0 : index
    %c0_116 = arith.constant 0 : index
    %148 = vector.load %arg7[%c1_112, %c0_113, %c0_114, %c0_115, %c0_116] : memref<3x2x2x1x128xf32, #tpu.memory_space<vmem>>, vector<1x1x1x1x128xf32>
    %149 = vector.shape_cast %148 : vector<1x1x1x1x128xf32> to vector<1x128xf32>
    %150 = vector.broadcast %149 : vector<1x128xf32> to vector<64x128xf32>
    %151 = arith.addf %147, %150 : vector<64x128xf32>
    %cst_117 = arith.constant 0.000000e+00 : f32
    %152 = vector.broadcast %cst_117 : f32 to vector<64x128xf32>
    %153 = arith.maximumf %151, %152 : vector<64x128xf32>
    %154 = arith.truncf %153 : vector<64x128xf32> to vector<64x128xbf16>
    %c1_118 = arith.constant 1 : index
    %c0_119 = arith.constant 0 : index
    %c1_120 = arith.constant 1 : index
    %c0_121 = arith.constant 0 : index
    %c0_122 = arith.constant 0 : index
    %155 = vector.load %arg6[%c1_118, %c0_119, %c1_120, %c0_121, %c0_122] : memref<3x2x2x128x128xbf16, #tpu.memory_space<vmem>>, vector<1x1x1x128x128xbf16>
    %156 = vector.shape_cast %155 : vector<1x1x1x128x128xbf16> to vector<128x128xbf16>
    %cst_123 = arith.constant dense<0.000000e+00> : vector<64x128xf32>
    %157 = tpu.matmul %154, %156, %cst_123 {dimension_numbers = #tpu.dot_dimension_numbers<[1], [0], [0], [1], [0, 0, 1, 1], [], []>} : vector<64x128xbf16>, vector<128x128xbf16>, vector<64x128xf32> -> vector<64x128xf32>
    %c1_124 = arith.constant 1 : index
    %c0_125 = arith.constant 0 : index
    %c1_126 = arith.constant 1 : index
    %c0_127 = arith.constant 0 : index
    %c0_128 = arith.constant 0 : index
    %158 = vector.load %arg7[%c1_124, %c0_125, %c1_126, %c0_127, %c0_128] : memref<3x2x2x1x128xf32, #tpu.memory_space<vmem>>, vector<1x1x1x1x128xf32>
    %159 = vector.shape_cast %158 : vector<1x1x1x1x128xf32> to vector<1x128xf32>
    %160 = vector.broadcast %159 : vector<1x128xf32> to vector<64x128xf32>
    %161 = arith.addf %157, %160 : vector<64x128xf32>
    %c0_129 = arith.constant 0 : index
    %c1_130 = arith.constant 1 : index
    %c0_131 = arith.constant 0 : index
    %c0_132 = arith.constant 0 : index
    %c0_133 = arith.constant 0 : index
    %162 = vector.load %arg4[%c0_129, %c1_130, %c0_131, %c0_132, %c0_133] : memref<1x3x2x1x128xf32, #tpu.memory_space<vmem>>, vector<1x1x1x1x128xf32>
    %163 = vector.shape_cast %162 : vector<1x1x1x1x128xf32> to vector<1x128xf32>
    %164 = vector.broadcast %163 : vector<1x128xf32> to vector<64x128xf32>
    %165 = arith.mulf %161, %164 : vector<64x128xf32>
    %166 = arith.addf %141, %165 : vector<64x128xf32>
    %cst_134 = arith.constant 0.000000e+00 : f32
    %167 = vector.broadcast %cst_134 : f32 to vector<64x128xf32>
    %168 = arith.maximumf %166, %167 : vector<64x128xf32>
    %169 = arith.truncf %168 : vector<64x128xf32> to vector<64x128xbf16>
    %c1_135 = arith.constant 1 : index
    %c1_136 = arith.constant 1 : index
    %c0_137 = arith.constant 0 : index
    %c0_138 = arith.constant 0 : index
    %c0_139 = arith.constant 0 : index
    %170 = vector.load %arg6[%c1_135, %c1_136, %c0_137, %c0_138, %c0_139] : memref<3x2x2x128x128xbf16, #tpu.memory_space<vmem>>, vector<1x1x1x128x128xbf16>
    %171 = vector.shape_cast %170 : vector<1x1x1x128x128xbf16> to vector<128x128xbf16>
    %cst_140 = arith.constant dense<0.000000e+00> : vector<64x128xf32>
    %172 = tpu.matmul %169, %171, %cst_140 {dimension_numbers = #tpu.dot_dimension_numbers<[1], [0], [0], [1], [0, 0, 1, 1], [], []>} : vector<64x128xbf16>, vector<128x128xbf16>, vector<64x128xf32> -> vector<64x128xf32>
    %c1_141 = arith.constant 1 : index
    %c1_142 = arith.constant 1 : index
    %c0_143 = arith.constant 0 : index
    %c0_144 = arith.constant 0 : index
    %c0_145 = arith.constant 0 : index
    %173 = vector.load %arg7[%c1_141, %c1_142, %c0_143, %c0_144, %c0_145] : memref<3x2x2x1x128xf32, #tpu.memory_space<vmem>>, vector<1x1x1x1x128xf32>
    %174 = vector.shape_cast %173 : vector<1x1x1x1x128xf32> to vector<1x128xf32>
    %175 = vector.broadcast %174 : vector<1x128xf32> to vector<64x128xf32>
    %176 = arith.addf %172, %175 : vector<64x128xf32>
    %cst_146 = arith.constant 0.000000e+00 : f32
    %177 = vector.broadcast %cst_146 : f32 to vector<64x128xf32>
    %178 = arith.maximumf %176, %177 : vector<64x128xf32>
    %179 = arith.truncf %178 : vector<64x128xf32> to vector<64x128xbf16>
    %c1_147 = arith.constant 1 : index
    %c1_148 = arith.constant 1 : index
    %c1_149 = arith.constant 1 : index
    %c0_150 = arith.constant 0 : index
    %c0_151 = arith.constant 0 : index
    %180 = vector.load %arg6[%c1_147, %c1_148, %c1_149, %c0_150, %c0_151] : memref<3x2x2x128x128xbf16, #tpu.memory_space<vmem>>, vector<1x1x1x128x128xbf16>
    %181 = vector.shape_cast %180 : vector<1x1x1x128x128xbf16> to vector<128x128xbf16>
    %cst_152 = arith.constant dense<0.000000e+00> : vector<64x128xf32>
    %182 = tpu.matmul %179, %181, %cst_152 {dimension_numbers = #tpu.dot_dimension_numbers<[1], [0], [0], [1], [0, 0, 1, 1], [], []>} : vector<64x128xbf16>, vector<128x128xbf16>, vector<64x128xf32> -> vector<64x128xf32>
    %c1_153 = arith.constant 1 : index
    %c1_154 = arith.constant 1 : index
    %c1_155 = arith.constant 1 : index
    %c0_156 = arith.constant 0 : index
    %c0_157 = arith.constant 0 : index
    %183 = vector.load %arg7[%c1_153, %c1_154, %c1_155, %c0_156, %c0_157] : memref<3x2x2x1x128xf32, #tpu.memory_space<vmem>>, vector<1x1x1x1x128xf32>
    %184 = vector.shape_cast %183 : vector<1x1x1x1x128xf32> to vector<1x128xf32>
    %185 = vector.broadcast %184 : vector<1x128xf32> to vector<64x128xf32>
    %186 = arith.addf %182, %185 : vector<64x128xf32>
    %c0_158 = arith.constant 0 : index
    %c1_159 = arith.constant 1 : index
    %c1_160 = arith.constant 1 : index
    %c0_161 = arith.constant 0 : index
    %c0_162 = arith.constant 0 : index
    %187 = vector.load %arg4[%c0_158, %c1_159, %c1_160, %c0_161, %c0_162] : memref<1x3x2x1x128xf32, #tpu.memory_space<vmem>>, vector<1x1x1x1x128xf32>
    %188 = vector.shape_cast %187 : vector<1x1x1x1x128xf32> to vector<1x128xf32>
    %189 = vector.broadcast %188 : vector<1x128xf32> to vector<64x128xf32>
    %190 = arith.mulf %186, %189 : vector<64x128xf32>
    %191 = arith.addf %166, %190 : vector<64x128xf32>
    %192 = arith.truncf %191 : vector<64x128xf32> to vector<64x128xbf16>
    %c1_163 = arith.constant 1 : index
    %c0_164 = arith.constant 0 : index
    %c0_165 = arith.constant 0 : index
    %193 = vector.load %arg8[%c1_163, %c0_164, %c0_165] : memref<3x128x2xbf16, #tpu.memory_space<vmem>>, vector<1x128x2xbf16>
    %194 = vector.shape_cast %193 : vector<1x128x2xbf16> to vector<128x2xbf16>
    %cst_166 = arith.constant dense<0.000000e+00> : vector<64x2xf32>
    %195 = tpu.matmul %192, %194, %cst_166 {dimension_numbers = #tpu.dot_dimension_numbers<[1], [0], [0], [1], [0, 0, 1, 1], [], []>} : vector<64x128xbf16>, vector<128x2xbf16>, vector<64x2xf32> -> vector<64x2xf32>
    %c1_167 = arith.constant 1 : index
    %c0_168 = arith.constant 0 : index
    %c0_169 = arith.constant 0 : index
    %196 = vector.load %arg9[%c1_167, %c0_168, %c0_169] : memref<3x1x2xf32, #tpu.memory_space<vmem>>, vector<1x1x2xf32>
    %197 = vector.shape_cast %196 : vector<1x1x2xf32> to vector<1x2xf32>
    %198 = vector.broadcast %197 : vector<1x2xf32> to vector<64x2xf32>
    %199 = arith.addf %195, %198 : vector<64x2xf32>
    %200 = vector.extract_strided_slice %199 {offsets = [0, 0], sizes = [64, 1], strides = [1, 1]} : vector<64x2xf32> to vector<64x1xf32>
    %cst_170 = arith.constant 2.000000e+00 : f32
    %201 = vector.broadcast %cst_170 : f32 to vector<64x1xf32>
    %202 = arith.addf %200, %201 : vector<64x1xf32>
    %203 = arith.negf %202 : vector<64x1xf32>
    %204 = math.exp %203 : vector<64x1xf32>
    %cst_171 = arith.constant 1.000000e+00 : f32
    %205 = vector.broadcast %cst_171 : f32 to vector<64x1xf32>
    %206 = arith.addf %205, %204 : vector<64x1xf32>
    %207 = arith.divf %205, %206 : vector<64x1xf32>
    %cst_172 = arith.constant 1.000000e-03 : f32
    %208 = vector.broadcast %cst_172 : f32 to vector<64x1xf32>
    %209 = arith.addf %207, %208 : vector<64x1xf32>
    %210 = math.log %209 : vector<64x1xf32>
    %211 = arith.addf %103, %210 : vector<64x1xf32>
    %212 = arith.mulf %209, %132 : vector<64x1xf32>
    %213 = vector.extract_strided_slice %199 {offsets = [0, 1], sizes = [64, 1], strides = [1, 1]} : vector<64x2xf32> to vector<64x1xf32>
    %214 = arith.addf %212, %213 : vector<64x1xf32>
    %c1_173 = arith.constant 1 : index
    %c6_174 = arith.constant 6 : index
    %215 = memref.load %arg10[%c1_173, %c6_174] : memref<3x8xf32, #tpu.memory_space<smem>>
    %216 = vector.broadcast %215 : f32 to vector<64x1xf32>
    %217 = arith.mulf %216, %124 : vector<64x1xf32>
    %c1_175 = arith.constant 1 : index
    %c7_176 = arith.constant 7 : index
    %218 = memref.load %arg10[%c1_175, %c7_176] : memref<3x8xf32, #tpu.memory_space<smem>>
    %219 = vector.broadcast %218 : f32 to vector<64x1xf32>
    %220 = arith.addf %217, %219 : vector<64x1xf32>
    %c0_177 = arith.constant 0 : index
    %c0_178 = arith.constant 0 : index
    %221 = memref.load %arg10[%c0_177, %c0_178] : memref<3x8xf32, #tpu.memory_space<smem>>
    %c0_179 = arith.constant 0 : index
    %c1_180 = arith.constant 1 : index
    %222 = memref.load %arg10[%c0_179, %c1_180] : memref<3x8xf32, #tpu.memory_space<smem>>
    %c0_181 = arith.constant 0 : index
    %c2_182 = arith.constant 2 : index
    %223 = memref.load %arg10[%c0_181, %c2_182] : memref<3x8xf32, #tpu.memory_space<smem>>
    %c0_183 = arith.constant 0 : index
    %c3_184 = arith.constant 3 : index
    %224 = memref.load %arg10[%c0_183, %c3_184] : memref<3x8xf32, #tpu.memory_space<smem>>
    %225 = vector.broadcast %221 : f32 to vector<64x1xf32>
    %226 = arith.mulf %220, %225 : vector<64x1xf32>
    %227 = vector.broadcast %222 : f32 to vector<64x1xf32>
    %228 = arith.mulf %214, %227 : vector<64x1xf32>
    %229 = arith.addf %226, %228 : vector<64x1xf32>
    %c0_185 = arith.constant 0 : index
    %c4_186 = arith.constant 4 : index
    %230 = memref.load %arg10[%c0_185, %c4_186] : memref<3x8xf32, #tpu.memory_space<smem>>
    %231 = vector.broadcast %230 : f32 to vector<64x1xf32>
    %232 = arith.addf %229, %231 : vector<64x1xf32>
    %233 = vector.broadcast %223 : f32 to vector<64x1xf32>
    %234 = arith.mulf %220, %233 : vector<64x1xf32>
    %235 = vector.broadcast %224 : f32 to vector<64x1xf32>
    %236 = arith.mulf %214, %235 : vector<64x1xf32>
    %237 = arith.addf %234, %236 : vector<64x1xf32>
    %c0_187 = arith.constant 0 : index
    %c5_188 = arith.constant 5 : index
    %238 = memref.load %arg10[%c0_187, %c5_188] : memref<3x8xf32, #tpu.memory_space<smem>>
    %239 = vector.broadcast %238 : f32 to vector<64x1xf32>
    %240 = arith.addf %237, %239 : vector<64x1xf32>
    %c0_189 = arith.constant 0 : index
    %c0_190 = arith.constant 0 : index
    %c0_191 = arith.constant 0 : index
    %241 = vector.load %arg5[%c0_189, %c0_190, %c0_191] : memref<3x1x128xf32, #tpu.memory_space<vmem>>, vector<1x1x128xf32>
    %242 = vector.shape_cast %241 : vector<1x1x128xf32> to vector<1x128xf32>
    %243 = vector.broadcast %232 : vector<64x1xf32> to vector<64x128xf32>
    %244 = vector.broadcast %242 : vector<1x128xf32> to vector<64x128xf32>
    %245 = arith.mulf %243, %244 : vector<64x128xf32>
    %c0_192 = arith.constant 0 : index
    %c0_193 = arith.constant 0 : index
    %c0_194 = arith.constant 0 : index
    %c0_195 = arith.constant 0 : index
    %246 = vector.load %arg3[%c0_192, %c0_193, %c0_194, %c0_195] : memref<1x3x1x128xf32, #tpu.memory_space<vmem>>, vector<1x1x1x128xf32>
    %247 = vector.shape_cast %246 : vector<1x1x1x128xf32> to vector<1x128xf32>
    %248 = vector.broadcast %247 : vector<1x128xf32> to vector<64x128xf32>
    %249 = arith.addf %245, %248 : vector<64x128xf32>
    %cst_196 = arith.constant 0.000000e+00 : f32
    %250 = vector.broadcast %cst_196 : f32 to vector<64x128xf32>
    %251 = arith.maximumf %249, %250 : vector<64x128xf32>
    %252 = arith.truncf %251 : vector<64x128xf32> to vector<64x128xbf16>
    %c0_197 = arith.constant 0 : index
    %c0_198 = arith.constant 0 : index
    %c0_199 = arith.constant 0 : index
    %c0_200 = arith.constant 0 : index
    %c0_201 = arith.constant 0 : index
    %253 = vector.load %arg6[%c0_197, %c0_198, %c0_199, %c0_200, %c0_201] : memref<3x2x2x128x128xbf16, #tpu.memory_space<vmem>>, vector<1x1x1x128x128xbf16>
    %254 = vector.shape_cast %253 : vector<1x1x1x128x128xbf16> to vector<128x128xbf16>
    %cst_202 = arith.constant dense<0.000000e+00> : vector<64x128xf32>
    %255 = tpu.matmul %252, %254, %cst_202 {dimension_numbers = #tpu.dot_dimension_numbers<[1], [0], [0], [1], [0, 0, 1, 1], [], []>} : vector<64x128xbf16>, vector<128x128xbf16>, vector<64x128xf32> -> vector<64x128xf32>
    %c0_203 = arith.constant 0 : index
    %c0_204 = arith.constant 0 : index
    %c0_205 = arith.constant 0 : index
    %c0_206 = arith.constant 0 : index
    %c0_207 = arith.constant 0 : index
    %256 = vector.load %arg7[%c0_203, %c0_204, %c0_205, %c0_206, %c0_207] : memref<3x2x2x1x128xf32, #tpu.memory_space<vmem>>, vector<1x1x1x1x128xf32>
    %257 = vector.shape_cast %256 : vector<1x1x1x1x128xf32> to vector<1x128xf32>
    %258 = vector.broadcast %257 : vector<1x128xf32> to vector<64x128xf32>
    %259 = arith.addf %255, %258 : vector<64x128xf32>
    %cst_208 = arith.constant 0.000000e+00 : f32
    %260 = vector.broadcast %cst_208 : f32 to vector<64x128xf32>
    %261 = arith.maximumf %259, %260 : vector<64x128xf32>
    %262 = arith.truncf %261 : vector<64x128xf32> to vector<64x128xbf16>
    %c0_209 = arith.constant 0 : index
    %c0_210 = arith.constant 0 : index
    %c1_211 = arith.constant 1 : index
    %c0_212 = arith.constant 0 : index
    %c0_213 = arith.constant 0 : index
    %263 = vector.load %arg6[%c0_209, %c0_210, %c1_211, %c0_212, %c0_213] : memref<3x2x2x128x128xbf16, #tpu.memory_space<vmem>>, vector<1x1x1x128x128xbf16>
    %264 = vector.shape_cast %263 : vector<1x1x1x128x128xbf16> to vector<128x128xbf16>
    %cst_214 = arith.constant dense<0.000000e+00> : vector<64x128xf32>
    %265 = tpu.matmul %262, %264, %cst_214 {dimension_numbers = #tpu.dot_dimension_numbers<[1], [0], [0], [1], [0, 0, 1, 1], [], []>} : vector<64x128xbf16>, vector<128x128xbf16>, vector<64x128xf32> -> vector<64x128xf32>
    %c0_215 = arith.constant 0 : index
    %c0_216 = arith.constant 0 : index
    %c1_217 = arith.constant 1 : index
    %c0_218 = arith.constant 0 : index
    %c0_219 = arith.constant 0 : index
    %266 = vector.load %arg7[%c0_215, %c0_216, %c1_217, %c0_218, %c0_219] : memref<3x2x2x1x128xf32, #tpu.memory_space<vmem>>, vector<1x1x1x1x128xf32>
    %267 = vector.shape_cast %266 : vector<1x1x1x1x128xf32> to vector<1x128xf32>
    %268 = vector.broadcast %267 : vector<1x128xf32> to vector<64x128xf32>
    %269 = arith.addf %265, %268 : vector<64x128xf32>
    %c0_220 = arith.constant 0 : index
    %c0_221 = arith.constant 0 : index
    %c0_222 = arith.constant 0 : index
    %c0_223 = arith.constant 0 : index
    %c0_224 = arith.constant 0 : index
    %270 = vector.load %arg4[%c0_220, %c0_221, %c0_222, %c0_223, %c0_224] : memref<1x3x2x1x128xf32, #tpu.memory_space<vmem>>, vector<1x1x1x1x128xf32>
    %271 = vector.shape_cast %270 : vector<1x1x1x1x128xf32> to vector<1x128xf32>
    %272 = vector.broadcast %271 : vector<1x128xf32> to vector<64x128xf32>
    %273 = arith.mulf %269, %272 : vector<64x128xf32>
    %274 = arith.addf %249, %273 : vector<64x128xf32>
    %cst_225 = arith.constant 0.000000e+00 : f32
    %275 = vector.broadcast %cst_225 : f32 to vector<64x128xf32>
    %276 = arith.maximumf %274, %275 : vector<64x128xf32>
    %277 = arith.truncf %276 : vector<64x128xf32> to vector<64x128xbf16>
    %c0_226 = arith.constant 0 : index
    %c1_227 = arith.constant 1 : index
    %c0_228 = arith.constant 0 : index
    %c0_229 = arith.constant 0 : index
    %c0_230 = arith.constant 0 : index
    %278 = vector.load %arg6[%c0_226, %c1_227, %c0_228, %c0_229, %c0_230] : memref<3x2x2x128x128xbf16, #tpu.memory_space<vmem>>, vector<1x1x1x128x128xbf16>
    %279 = vector.shape_cast %278 : vector<1x1x1x128x128xbf16> to vector<128x128xbf16>
    %cst_231 = arith.constant dense<0.000000e+00> : vector<64x128xf32>
    %280 = tpu.matmul %277, %279, %cst_231 {dimension_numbers = #tpu.dot_dimension_numbers<[1], [0], [0], [1], [0, 0, 1, 1], [], []>} : vector<64x128xbf16>, vector<128x128xbf16>, vector<64x128xf32> -> vector<64x128xf32>
    %c0_232 = arith.constant 0 : index
    %c1_233 = arith.constant 1 : index
    %c0_234 = arith.constant 0 : index
    %c0_235 = arith.constant 0 : index
    %c0_236 = arith.constant 0 : index
    %281 = vector.load %arg7[%c0_232, %c1_233, %c0_234, %c0_235, %c0_236] : memref<3x2x2x1x128xf32, #tpu.memory_space<vmem>>, vector<1x1x1x1x128xf32>
    %282 = vector.shape_cast %281 : vector<1x1x1x1x128xf32> to vector<1x128xf32>
    %283 = vector.broadcast %282 : vector<1x128xf32> to vector<64x128xf32>
    %284 = arith.addf %280, %283 : vector<64x128xf32>
    %cst_237 = arith.constant 0.000000e+00 : f32
    %285 = vector.broadcast %cst_237 : f32 to vector<64x128xf32>
    %286 = arith.maximumf %284, %285 : vector<64x128xf32>
    %287 = arith.truncf %286 : vector<64x128xf32> to vector<64x128xbf16>
    %c0_238 = arith.constant 0 : index
    %c1_239 = arith.constant 1 : index
    %c1_240 = arith.constant 1 : index
    %c0_241 = arith.constant 0 : index
    %c0_242 = arith.constant 0 : index
    %288 = vector.load %arg6[%c0_238, %c1_239, %c1_240, %c0_241, %c0_242] : memref<3x2x2x128x128xbf16, #tpu.memory_space<vmem>>, vector<1x1x1x128x128xbf16>
    %289 = vector.shape_cast %288 : vector<1x1x1x128x128xbf16> to vector<128x128xbf16>
    %cst_243 = arith.constant dense<0.000000e+00> : vector<64x128xf32>
    %290 = tpu.matmul %287, %289, %cst_243 {dimension_numbers = #tpu.dot_dimension_numbers<[1], [0], [0], [1], [0, 0, 1, 1], [], []>} : vector<64x128xbf16>, vector<128x128xbf16>, vector<64x128xf32> -> vector<64x128xf32>
    %c0_244 = arith.constant 0 : index
    %c1_245 = arith.constant 1 : index
    %c1_246 = arith.constant 1 : index
    %c0_247 = arith.constant 0 : index
    %c0_248 = arith.constant 0 : index
    %291 = vector.load %arg7[%c0_244, %c1_245, %c1_246, %c0_247, %c0_248] : memref<3x2x2x1x128xf32, #tpu.memory_space<vmem>>, vector<1x1x1x1x128xf32>
    %292 = vector.shape_cast %291 : vector<1x1x1x1x128xf32> to vector<1x128xf32>
    %293 = vector.broadcast %292 : vector<1x128xf32> to vector<64x128xf32>
    %294 = arith.addf %290, %293 : vector<64x128xf32>
    %c0_249 = arith.constant 0 : index
    %c0_250 = arith.constant 0 : index
    %c1_251 = arith.constant 1 : index
    %c0_252 = arith.constant 0 : index
    %c0_253 = arith.constant 0 : index
    %295 = vector.load %arg4[%c0_249, %c0_250, %c1_251, %c0_252, %c0_253] : memref<1x3x2x1x128xf32, #tpu.memory_space<vmem>>, vector<1x1x1x1x128xf32>
    %296 = vector.shape_cast %295 : vector<1x1x1x1x128xf32> to vector<1x128xf32>
    %297 = vector.broadcast %296 : vector<1x128xf32> to vector<64x128xf32>
    %298 = arith.mulf %294, %297 : vector<64x128xf32>
    %299 = arith.addf %274, %298 : vector<64x128xf32>
    %300 = arith.truncf %299 : vector<64x128xf32> to vector<64x128xbf16>
    %c0_254 = arith.constant 0 : index
    %c0_255 = arith.constant 0 : index
    %c0_256 = arith.constant 0 : index
    %301 = vector.load %arg8[%c0_254, %c0_255, %c0_256] : memref<3x128x2xbf16, #tpu.memory_space<vmem>>, vector<1x128x2xbf16>
    %302 = vector.shape_cast %301 : vector<1x128x2xbf16> to vector<128x2xbf16>
    %cst_257 = arith.constant dense<0.000000e+00> : vector<64x2xf32>
    %303 = tpu.matmul %300, %302, %cst_257 {dimension_numbers = #tpu.dot_dimension_numbers<[1], [0], [0], [1], [0, 0, 1, 1], [], []>} : vector<64x128xbf16>, vector<128x2xbf16>, vector<64x2xf32> -> vector<64x2xf32>
    %c0_258 = arith.constant 0 : index
    %c0_259 = arith.constant 0 : index
    %c0_260 = arith.constant 0 : index
    %304 = vector.load %arg9[%c0_258, %c0_259, %c0_260] : memref<3x1x2xf32, #tpu.memory_space<vmem>>, vector<1x1x2xf32>
    %305 = vector.shape_cast %304 : vector<1x1x2xf32> to vector<1x2xf32>
    %306 = vector.broadcast %305 : vector<1x2xf32> to vector<64x2xf32>
    %307 = arith.addf %303, %306 : vector<64x2xf32>
    %308 = vector.extract_strided_slice %307 {offsets = [0, 0], sizes = [64, 1], strides = [1, 1]} : vector<64x2xf32> to vector<64x1xf32>
    %cst_261 = arith.constant 2.000000e+00 : f32
    %309 = vector.broadcast %cst_261 : f32 to vector<64x1xf32>
    %310 = arith.addf %308, %309 : vector<64x1xf32>
    %311 = arith.negf %310 : vector<64x1xf32>
    %312 = math.exp %311 : vector<64x1xf32>
    %cst_262 = arith.constant 1.000000e+00 : f32
    %313 = vector.broadcast %cst_262 : f32 to vector<64x1xf32>
    %314 = arith.addf %313, %312 : vector<64x1xf32>
    %315 = arith.divf %313, %314 : vector<64x1xf32>
    %cst_263 = arith.constant 1.000000e-03 : f32
    %316 = vector.broadcast %cst_263 : f32 to vector<64x1xf32>
    %317 = arith.addf %315, %316 : vector<64x1xf32>
    %318 = math.log %317 : vector<64x1xf32>
    %319 = arith.addf %211, %318 : vector<64x1xf32>
    %320 = arith.mulf %317, %240 : vector<64x1xf32>
    %321 = vector.extract_strided_slice %307 {offsets = [0, 1], sizes = [64, 1], strides = [1, 1]} : vector<64x2xf32> to vector<64x1xf32>
    %322 = arith.addf %320, %321 : vector<64x1xf32>
    %c0_264 = arith.constant 0 : index
    %c6_265 = arith.constant 6 : index
    %323 = memref.load %arg10[%c0_264, %c6_265] : memref<3x8xf32, #tpu.memory_space<smem>>
    %324 = vector.broadcast %323 : f32 to vector<64x1xf32>
    %325 = arith.mulf %324, %232 : vector<64x1xf32>
    %c0_266 = arith.constant 0 : index
    %c7_267 = arith.constant 7 : index
    %326 = memref.load %arg10[%c0_266, %c7_267] : memref<3x8xf32, #tpu.memory_space<smem>>
    %327 = vector.broadcast %326 : f32 to vector<64x1xf32>
    %328 = arith.addf %325, %327 : vector<64x1xf32>
    %329 = arith.mulf %328, %328 : vector<64x1xf32>
    %330 = arith.mulf %322, %322 : vector<64x1xf32>
    %331 = arith.addf %329, %330 : vector<64x1xf32>
    %cst_268 = arith.constant 5.000000e-01 : f32
    %332 = vector.broadcast %cst_268 : f32 to vector<64x1xf32>
    %333 = arith.mulf %332, %331 : vector<64x1xf32>
    %334 = arith.subf %319, %333 : vector<64x1xf32>
    %c0_269 = arith.constant 0 : index
    %c0_270 = arith.constant 0 : index
    %335 = memref.load %arg11[%c0_269, %c0_270] : memref<1x1xf32, #tpu.memory_space<smem>>
    %336 = vector.broadcast %335 : f32 to vector<64x1xf32>
    %337 = arith.addf %334, %336 : vector<64x1xf32>
    %c64_i32 = arith.constant 64 : i32
    %338 = arith.muli %arg1, %c64_i32 : i32
    %339 = tpu.iota {dimensions = array<i32: 0>} : vector<64x1xi32>
    %340 = vector.broadcast %338 : i32 to vector<64x1xi32>
    %341 = arith.addi %340, %339 : vector<64x1xi32>
    %c60_i32 = arith.constant 60 : i32
    %342 = vector.broadcast %c60_i32 : i32 to vector<64x1xi32>
    %343 = arith.cmpi slt, %341, %342 : vector<64x1xi32>
    %cst_271 = arith.constant 0.000000e+00 : f32
    %344 = vector.broadcast %cst_271 : f32 to vector<64x1xf32>
    %345 = arith.select %343, %337, %344 : vector<64x1xi1>, vector<64x1xf32>
    %346 = vector.shape_cast %345 : vector<64x1xf32> to vector<1x64x1xf32>
    %cst_272 = arith.constant dense<0.000000e+00> : vector<1xf32>
    %347 = vector.multi_reduction <add>, %346, %cst_272 [1, 2] : vector<1x64x1xf32> to vector<1xf32>
    %348 = vector.shape_cast %347 : vector<1xf32> to vector<1x1x1xf32>
    %349 = vector.extract %348[0, 0, 0] : f32 from vector<1x1x1xf32>
    %350 = vector.broadcast %349 : f32 to vector<1x1x8x128xf32>
    %c0_273 = arith.constant 0 : index
    %c0_274 = arith.constant 0 : index
    %c0_275 = arith.constant 0 : index
    %c0_276 = arith.constant 0 : index
    %351 = vector.load %arg12[%c0_273, %c0_274, %c0_275, %c0_276] : memref<1x1x8x128xf32, #tpu.memory_space<vmem>>, vector<1x1x8x128xf32>
    tpu.vector_store %arg12[%c0_273, %c0_274, %c0_275, %c0_276], %350 {strides = array<i32>} : memref<1x1x8x128xf32, #tpu.memory_space<vmem>>, vector<1x1x8x128xf32>,
    return
  }
  func.func @transform_0(%arg0: i32, %arg1: i32) -> (i32, i32, i32) {
    %c0_i32 = arith.constant 0 : i32
    %c0_i32_0 = arith.constant 0 : i32
    return %arg0, %arg1, %c0_i32 : i32, i32, i32
  }
  func.func @transform_1(%arg0: i32, %arg1: i32) -> (i32, i32, i32, i32) {
    %c0_i32 = arith.constant 0 : i32
    %c0_i32_0 = arith.constant 0 : i32
    %c0_i32_1 = arith.constant 0 : i32
    %c0_i32_2 = arith.constant 0 : i32
    return %arg0, %c0_i32, %c0_i32_0, %c0_i32_1 : i32, i32, i32, i32
  }
  func.func @transform_2(%arg0: i32, %arg1: i32) -> (i32, i32, i32, i32, i32) {
    %c0_i32 = arith.constant 0 : i32
    %c0_i32_0 = arith.constant 0 : i32
    %c0_i32_1 = arith.constant 0 : i32
    %c0_i32_2 = arith.constant 0 : i32
    %c0_i32_3 = arith.constant 0 : i32
    return %arg0, %c0_i32, %c0_i32_0, %c0_i32_1, %c0_i32_2 : i32, i32, i32, i32, i32
  }
  func.func @transform_3(%arg0: i32, %arg1: i32) -> (i32, i32, i32) {
    %c0_i32 = arith.constant 0 : i32
    %c0_i32_0 = arith.constant 0 : i32
    %c0_i32_1 = arith.constant 0 : i32
    %c0_i32_2 = arith.constant 0 : i32
    return %c0_i32, %c0_i32_0, %c0_i32_1 : i32, i32, i32
  }
  func.func @transform_4(%arg0: i32, %arg1: i32) -> (i32, i32, i32, i32, i32) {
    %c0_i32 = arith.constant 0 : i32
    %c0_i32_0 = arith.constant 0 : i32
    %c0_i32_1 = arith.constant 0 : i32
    %c0_i32_2 = arith.constant 0 : i32
    %c0_i32_3 = arith.constant 0 : i32
    %c0_i32_4 = arith.constant 0 : i32
    return %c0_i32, %c0_i32_0, %c0_i32_1, %c0_i32_2, %c0_i32_3 : i32, i32, i32, i32, i32
  }
  func.func @transform_5(%arg0: i32, %arg1: i32) -> (i32, i32, i32, i32, i32) {
    %c0_i32 = arith.constant 0 : i32
    %c0_i32_0 = arith.constant 0 : i32
    %c0_i32_1 = arith.constant 0 : i32
    %c0_i32_2 = arith.constant 0 : i32
    %c0_i32_3 = arith.constant 0 : i32
    %c0_i32_4 = arith.constant 0 : i32
    return %c0_i32, %c0_i32_0, %c0_i32_1, %c0_i32_2, %c0_i32_3 : i32, i32, i32, i32, i32
  }
  func.func @transform_6(%arg0: i32, %arg1: i32) -> (i32, i32, i32) {
    %c0_i32 = arith.constant 0 : i32
    %c0_i32_0 = arith.constant 0 : i32
    %c0_i32_1 = arith.constant 0 : i32
    %c0_i32_2 = arith.constant 0 : i32
    return %c0_i32, %c0_i32_0, %c0_i32_1 : i32, i32, i32
  }
  func.func @transform_7(%arg0: i32, %arg1: i32) -> (i32, i32, i32) {
    %c0_i32 = arith.constant 0 : i32
    %c0_i32_0 = arith.constant 0 : i32
    %c0_i32_1 = arith.constant 0 : i32
    %c0_i32_2 = arith.constant 0 : i32
    return %c0_i32, %c0_i32_0, %c0_i32_1 : i32, i32, i32
  }
  func.func @transform_8(%arg0: i32, %arg1: i32) -> (i32, i32) {
    %c0_i32 = arith.constant 0 : i32
    %c0_i32_0 = arith.constant 0 : i32
    %c0_i32_1 = arith.constant 0 : i32
    return %c0_i32, %c0_i32_0 : i32, i32
  }
  func.func @transform_9(%arg0: i32, %arg1: i32) -> (i32, i32) {
    %c0_i32 = arith.constant 0 : i32
    %c0_i32_0 = arith.constant 0 : i32
    %c0_i32_1 = arith.constant 0 : i32
    return %c0_i32, %c0_i32_0 : i32, i32
  }
  func.func @transform_10(%arg0: i32, %arg1: i32) -> (i32, i32, i32, i32) {
    %c0_i32 = arith.constant 0 : i32
    %c0_i32_0 = arith.constant 0 : i32
    %c0_i32_1 = arith.constant 0 : i32
    return %arg0, %arg1, %c0_i32, %c0_i32_0 : i32, i32, i32, i32
  }
}

</mosaic_0001>

<bundles_post_ra>
// kernel: tpu_custom_call.1
= control target key start
LH: loop header
LB: loop body
LE: loop exit
PB: predicated region body
PF: predicated region fallthrough
CT: control target
= control target key end

     0   :  { %s6488_s0 = inlined_call_operand.vmem [shape: f32[4,64,2], index: 0, kind: input, shape index: {}]   ;;  %s6489_s1 = inlined_call_operand.vmem [shape: f32[4,3,1,128], index: 1, kind: input, shape index: {}]   ;;  %s6490_s2 = inlined_call_operand.vmem [shape: f32[4,3,2,1,128], index: 2, kind: input, shape index: {}]   ;;  %s6491_s3 = inlined_call_operand.vmem [shape: f32[3,1,128], index: 3, kind: input, shape index: {}]   ;;  %s6492_s4 = inlined_call_operand.hbm [shape: bf16[3,2,2,128,128], index: 4, kind: input, shape index: {}]   ;;  %s6493_s5 = inlined_call_operand.vmem [shape: f32[3,2,2,1,128], index: 5, kind: input, shape index: {}]   ;;  %s6494_s6 = inlined_call_operand.vmem [shape: bf16[3,128,2], index: 6, kind: input, shape index: {}]   ;;  %s6495_s7 = inlined_call_operand.vmem [shape: f32[3,1,2], index: 7, kind: input, shape index: {}]   ;;  %s6496_s8 = inlined_call_operand.vmem [shape: f32[3,8], index: 8, kind: input, shape index: {}]   ;;  %s6497_s9 = inlined_call_operand.<no memory space> [shape: f32[1,1], index: 9, kind: input, shape index: {}]   ;;  %s6498_s10 = inlined_call_operand.hbm [shape: f32[4,1,8,128], index: 10, kind: output, shape index: {}]  }
   0x1   :  { %6504 = sst [smem:[#allocation13_spill]] %s6496_s8 }
   0x2   :  { %15 = sst [smem:[#allocation2]] %s6497_s9 }
   0x3   :  { %16 = vsyncpa [#allocation4], 0 }
   0x4   :  { %17 = vsyncpa [#allocation6], 0 }
   0x5   :  { %18 = vsyncpa [#allocation5], 0 }
   0x6   :  { %20 = vsyncpa [#allocation5 + $0x1], 0  ;;  %s5424_s15 = smov 0   ;;  %s5426_s16 = smov 0  }
   0x7   :  { %s5428_s17 = smov 0   ;;  %s5430_s18 = smov 0  }
   0x8   :  { %s5432_s19 = smov 0   ;;  %s5434_s20 = smov 0  }
   0x9 LB: > { %s4049_s9 = sadd.s32 4294967295, %s5357_s20   ;;  %s4050_s21 = sadd.s32 4294967294, %s5357_s20   ;;  %s5357_s20 = sphi %s5434_s20, %s26_s20   ;;  %s5353_s19 = sphi %s5432_s19, %s6521_s19   ;;  %s5349_s18 = sphi %s5430_s18, %s6520_s18   ;;  %s5345_s17 = sphi %s5428_s17, %s6519_s17   ;;  %s5341_s16 = sphi %s5426_s16, %s6518_s16   ;;  %s5337_s15 = sphi %s5424_s15, %s6517_s15  }
   0xa   : > { %s38_s22 = sadd.s32 1, %s5353_s19  ;;  %s274_s23 = sadd.s32 1, %s5345_s17 }
   0xb   : > { %p40_p0 = scmp.ge.s32.totalorder %s38_s22, 4  ;;  %p284_p1 = scmp.ne.s32.totalorder %s5345_s17, %s5341_s16 }
   0xc   : > { %p285_p2 = scmp.eq.s32.totalorder %s4049_s9, 3  ;;  %p290_p3 = scmp.ne.s32.totalorder %s5341_s16, %s5337_s15 }
   0xd   : > { %s6523_s22 = smov (%p40_p0, %s38_s22), 0  ;;  %p291_p5 = scmp.eq.s32.totalorder %s4050_s21, 3 }
   0xe   : > { %6505 = sst [smem:[#allocation12_spill]] %s6523_s22  ;;  %p5464_p4 = por %p285_p2, %p284_p1 }
   0xf   : > { %s269_s25 = ssub.s32 %s5353_s19, %s6523_s22  ;;  %p4051_p6 = scmp.ge.s32.totalorder %s5357_s20, 1 }
  0x10   : > { %s6506_s24 = scalar_select %p5464_p4, 1, 0 }
  0x11   : > { %p272_p7 = scmp.eq.s32.totalorder %s269_s25, 0  ;;  %p5471_p8 = por %p291_p5, %p290_p3 }
  0x12   : > { %p298_p9 = scmp.lt.s32.totalorder %s5357_s20, 5  ;;  %p5483_p11 = scmp.eq.s32.totalorder %s4049_s9, 0 }
  0x13   : > { %s6507_s26 = scalar_select %p5471_p8, 1, 0 }
  0x14   : > { %s5477_s27 = scalar_select %p272_p7, %s5345_s17, %s274_s23  }
  0x15   : > { %p5479_p10 = pnand %p4051_p6, %p298_p9  ;;  %s5359_s30 = smov [#allocation3]  }
  0x16   : > { %s6509_s29 = scalar_select %p5483_p11, 1, 0 }
  0x17   : > { %s6508_s28 = scalar_select %p5479_p10, 1, 0 }
  0x18   : > { %p4884_p12 = pneg %p5479_p10  ;;  %s313_s11 = sshll.u32 %s5359_s30, 4  ;;  %s314_s11 = int_to_ptr.vmem [resolvable:$true] %s313_s11 }
  0x19   : > { %s6511_s8 = sld [smem:[#allocation13_spill]]  ;;  %s5228_s25 = scalar_lea.hbm %s6492_s4, 12288 }
  0x1a   : > { %p5491_p13 = pnand %p5483_p11, %p4884_p12  ;;  %p5229_p0 = scmp.ne.s32.totalorder %s6492_s4, %s5228_s25 }
  0x1b   : > { %p5235_p5 = scmp.lt.u32.totalorder %s5228_s25, %s6492_s4 }
  0x1c   : > { %p5230_p1 = pneg %p5491_p13 }
  0x1e   : > { %p5231_p2 = pnand %p5230_p1, %p5229_p0 }
  0x1f   : > { %s336_s9 = sshll.u32 %s6511_s8, 4  ;;  %s5498_s9 = int_to_ptr.vmem [resolvable:$true] %s336_s9 }
  0x20   : > { %p5232_p3 = pneg %p5231_p2 }
  0x22   : > { %p5237_p6 = pnand %p5235_p5, %p5232_p3 }
  0x24   : > { %5240 = shalt.err (!%p5237_p6)
}
  0x25   : > { %s5241_s8 = scalar_lea.vmem %s314_s11, 12288  ;;  %p5249_p8 = scmp.lt.s32.totalorder %s314_s11, %s314_s11 }
  0x26   : > { %p5242_p7 = scmp.ne.s32.totalorder %s314_s11, %s5241_s8  ;;  %p5250_p4 = scmp.lt.s32.totalorder %s5241_s8, %s5241_s8 }
  0x28   : > { %p5244_p9 = pnand %p5242_p7, %p5230_p1  ;;  %p5251_p11 = por %p5250_p4, %p5249_p8 }
  0x2a   : > { %p5245_p12 = pneg %p5244_p9 }
  0x2c   : > { %p5252_p10 = pnand %p5251_p11, %p5245_p12 }
  0x2e   : > { %5255 = shalt.err (!%p5252_p10)
}
  0x2f   : > { %s5360_s22 = smov 64   ;;  %s5361_s21 = smov 4  }
  0x30   : > { %4887 = dma.hbm_to_vmem [thread:$0]  (!%p5491_p13), %s6492_s4, 12288, %s314_s11, [#allocation4], %s5360_s22, %s5360_s22, %s5361_s21  }
  0x31   : > { %s5256_s30 = scalar_lea.vmem %s5498_s9, 64  ;;  %p5264_p8 = scmp.lt.s32.totalorder %s5498_s9, %s5498_s9 }
  0x32   : > { %p5257_p0 = scmp.ne.s32.totalorder %s5498_s9, %s5256_s30  ;;  %p5265_p10 = scmp.lt.s32.totalorder %s5256_s30, %s5256_s30 }
  0x34   : > { %p5259_p2 = pnand %p5257_p0, %p5230_p1  ;;  %p5266_p11 = por %p5265_p10, %p5264_p8 }
  0x36   : > { %p5260_p4 = pneg %p5259_p2 }
  0x38   : > { %p5267_p3 = pnand %p5266_p11, %p5260_p4 }
  0x3a   : > { %5270 = shalt.err (!%p5267_p3)
}
  0x3b   : > { %s5362_s8 = smov [#allocation7]   ;;  %p6512_p5 = scmp.ne.s32.totalorder %s6508_s28, 0 }
  0x3c   : > { %4890 = dma.vmem_to_smem (!%p5491_p13), %s5498_s9, 64, %s5362_s8, [#allocation6]  }
  0x3d   : > { %379 = sbr.rel (%p6512_p5) target bundleno = 4570 (0x11da), region = 60  ;;  %p6513_p6 = scmp.ne.s32.totalorder (!%p6512_p5), %s6509_s29, 0 }
  0x44   : > { %5324 = dma.done.wait (%p6513_p6), [#allocation4], 12288  }
  0x45   : > { %5326 = vsyncadd (%p6513_p6), [#allocation4], 4294955008 }
  0x46   : > { %5328 = dma.done.wait (%p6513_p6), [#allocation6], 64  }
  0x47   : > { %5330 = vsyncadd (%p6513_p6), [#allocation6], 4294967232 }
  0x48   : > { %389 = sfence }
  0x49   : > { %p435_p1 = scmp.lt.s32.totalorder %s5349_s18, 3  ;;  %s4062_s11 = sld [smem:[#allocation7 + $0x101]]  ;;  %v5363_v0 = vmov 0   ;;  %v4956_v16 = vld [vmem:[#allocation3 + $0x200] sm:$0xff]   ;;  %v4957_v17 = vld [vmem:[#allocation3 + $0x208] sm:$0xff]   ;;  %v4958_v20 = vld [vmem:[#allocation3 + $0x210] sm:$0xff]  }
  0x4a   : > { %4954 = vset.pattern.permute.xlu0 %v5363_v0  ;;  %4955 = vset.pattern.permute.xlu1 %v5363_v0  ;;  %s5364_s29 = smov 127   ;;  %v4959_v21 = vld [vmem:[#allocation3 + $0x218] sm:$0xff]   ;;  %s4061_s22 = sld [smem:[#allocation7 + $0x100]]  ;;  %v4960_v32 = vld [vmem:[#allocation3 + $0x220] sm:$0xff]   ;;  %v4961_v42 = vld [vmem:[#allocation3 + $0x228] sm:$0xff]   ;;  %vm3885_vm0 = vcmask 7168  }
  0x4b   : > { %s5544_s28 = scalar_select %p435_p1, %s5349_s18, 3  ;;  %4494 = vmatprep.subr.bf16.mxu0 %v4956_v16  ;;  %v4962_v51 = vld [vmem:[#allocation3 + $0x230] sm:$0xff]   ;;  %v4963_v58 = vld [vmem:[#allocation3 + $0x238] sm:$0xff]   ;;  %v4964_v60 = vld [vmem:[#allocation3 + $0x240] sm:$0xff]  }
  0x4c   : > { %4495 = vmatpush3.bf16.msra.mxu0 %v4956_v16  ;;  %s4065_s21 = sld [smem:[#allocation7 + $0x104]]  ;;  %v4965_v61 = vld [vmem:[#allocation3 + $0x248] sm:$0xff]   ;;  %4518 = vmatprep.subr.bf16.mxu1 %v4964_v60  ;;  %v4966_v62 = vld [vmem:[#allocation3 + $0x250] sm:$0xff]   ;;  %v4967_v63 = vld [vmem:[#allocation3 + $0x258] sm:$0xff]   ;;  %s4151_s30 = sld [smem:[#allocation7 + $0x80]] }
  0x4d   : > { %s4313_s12 = sshll.u32 %s5544_s28, 6  ;;  %4496 = vmatprep.subr.bf16.mxu0 %v4957_v17  ;;  %4519 = vmatpush3.bf16.msra.mxu1 %v4964_v60  ;;  %v4968_v0 = vld [vmem:[#allocation3 + $0x260] sm:$0xff]   ;;  %s4870_s23 = smul.u32 3, %s5544_s28 }
  0x4e   : > { %s5550_s14 = scalar_lea.vmem %s6488_s0, %s4313_s12  ;;  %4520 = vmatprep.subr.bf16.mxu1 %v4965_v61  ;;  %s4066_s8 = sld [smem:[#allocation7 + $0x105]] }
  0x4f   : > { %v455_v1 = vld [vmem:[%s5550_s14 + $0x10] sm:$0xff]  ;;  %v474_v2 = vstv %s4062_s11  ;;  %v453_v3 = vld [vmem:[%s5550_s14] sm:$0xff]  ;;  %v456_v4 = vld [vmem:[%s5550_s14 + $0x18] sm:$0xff]  ;;  %s5599_s12 = scalar_lea.vmem %s6489_s1, %s4870_s23  ;;  %s4150_s23 = sld [smem:[#allocation7 + $0x107]] }
  0x50   : > { %v477_v5 = vmul.f32 %v474_v2, %v455_v1  ;;  %v475_v6 = vmul.f32 %v474_v2, %v453_v3  ;;  %v454_v7 = vld [vmem:[%s5550_s14 + $0x8] sm:$0xff]  ;;  %v457_v9 = vld [vmem:[%s5550_s14 + $0x20] sm:$0xff]  ;;  %v478_v10 = vmul.f32 %v474_v2, %v456_v4  ;;  %v460_v12 = vld [vmem:[%s5550_s14 + $0x38] sm:$0xff]  ;;  %4497 = vmatpush3.bf16.msra.mxu0 %v4957_v17  ;;  %v465_v22 = vstv %s4061_s22  ;;  %s4871_s22 = smul.u32 6, %s5544_s28  ;;  %s4064_s28 = sld [smem:[#allocation7 + $0x103]] }
  0x51   : > { %v458_v8 = vld [vmem:[%s5550_s14 + $0x28] sm:$0xff]  ;;  %v476_v11 = vmul.f32 %v474_v2, %v454_v7  ;;  %v459_v13 = vld [vmem:[%s5550_s14 + $0x30] sm:$0xff]  ;;  %v479_v15 = vmul.f32 %v474_v2, %v457_v9  ;;  %v482_v18 = vmul.f32 %v474_v2, %v460_v12  ;;  %4498 = vmatprep.subr.bf16.mxu0 %v4958_v20  ;;  %v466_v23 = vmul.f32 %v465_v22, %v453_v3  ;;  %s5793_s11 = sld [smem:[#allocation7 + $0x81]]  ;;  %s5801_s9 = sld [smem:[#allocation7 + $0x83]] }
  0x52   : > { %495 = vrot.lane.b32.xlu1 %v477_v5, %s5364_s29  ;;  %491 = vrot.lane.b32.xlu0 %v475_v6, %s5364_s29  ;;  %v480_v14 = vmul.f32 %v474_v2, %v458_v8  ;;  %v481_v19 = vmul.f32 %v474_v2, %v459_v13  ;;  %v524_v24 = vstv %s4065_s21  ;;  %v469_v28 = vmul.f32 %v465_v22, %v456_v4  ;;  %v4068_v2 = vld [vmem:[%s6491_s3 + $0x2] ss:$0 sm:$0xff]  ;;  %s5633_s25 = scalar_lea.vmem %s6490_s2, %s4871_s22  ;;  %s4063_s21 = sld [smem:[#allocation7 + $0x102]] }
  0x53   : > { %v467_v29 = vmul.f32 %v465_v22, %v454_v7  ;;  %v468_v30 = vmul.f32 %v465_v22, %v455_v1  ;;  %v471_v37 = vmul.f32 %v465_v22, %v458_v8  ;;  %v470_v38 = vmul.f32 %v465_v22, %v457_v9  ;;  %4521 = vmatpush3.bf16.msra.mxu1 %v4965_v61  ;;  %v4969_v1 = vld [vmem:[#allocation3 + $0x268] sm:$0xff]   ;;  %v4070_v5 = vld [vmem:[%s5599_s12 + $0x2] ss:$0 sm:$0xff]  ;;  %s5848_s13 = sld [smem:[#allocation7 + $0x84]]  ;;  %s4240_s22 = sld [smem:[#allocation7 + $0x87]] }
  0x54   : > { %4499 = vmatpush3.bf16.msra.mxu0 %v4958_v20  ;;  %v473_v46 = vmul.f32 %v465_v22, %v460_v12  ;;  %v472_v47 = vmul.f32 %v465_v22, %v459_v13  ;;  %4522 = vmatprep.subr.bf16.mxu1 %v4966_v62  ;;  %p6514_p7 = scmp.ne.s32.totalorder %s6506_s24, 0 }
  0x55   : > { %4500 = vmatprep.subr.bf16.mxu0 %v4959_v21 }
  0x56   : > { %497 = vrot.lane.b32.xlu1 %v478_v10, %s5364_s29  ;;  %493 = vrot.lane.b32.xlu0 %v476_v11, %s5364_s29 }
  0x57   : > { %4523 = vmatpush3.bf16.msra.mxu1 %v4966_v62 }
  0x58   : > { %4501 = vmatpush3.bf16.msra.mxu0 %v4959_v21  ;;  %4524 = vmatprep.subr.bf16.mxu1 %v4967_v63 }
  0x59   : > { %4502 = vmatprep.subr.bf16.mxu0 %v4960_v32 }
  0x5a   : > { %501 = vrot.lane.b32.xlu1 %v480_v14, %s5364_s29  ;;  %499 = vrot.lane.b32.xlu0 %v479_v15, %s5364_s29 }
  0x5b   : > { %4525 = vmatpush3.bf16.msra.mxu1 %v4967_v63 }
  0x5c   : > { %4503 = vmatpush3.bf16.msra.mxu0 %v4960_v32  ;;  %4526 = vmatprep.subr.bf16.mxu1 %v4968_v0 }
  0x5d   : > { %4504 = vmatprep.subr.bf16.mxu0 %v4961_v42 }
  0x5e   : > { %505 = vrot.lane.b32.xlu1 %v482_v18, %s5364_s29  ;;  %503 = vrot.lane.b32.xlu0 %v481_v19, %s5364_s29 }
  0x5f   : > { %4527 = vmatpush3.bf16.msra.mxu1 %v4968_v0 }
  0x60   : > { %4505 = vmatpush3.bf16.msra.mxu0 %v4961_v42  ;;  %4528 = vmatprep.subr.bf16.mxu1 %v4969_v1 }
  0x61   : > { %4506 = vmatprep.subr.bf16.mxu0 %v4962_v51 }
  0x63   : > { %4529 = vmatpush3.bf16.msra.mxu1 %v4969_v1 }
  0x64   : > { %4507 = vmatpush3.bf16.msra.mxu0 %v4962_v51  ;;  %v4976_v51 = vld [vmem:[#allocation3 + $0x2a0] sm:$0xff]  }
  0x65   : > { %4508 = vmatprep.subr.bf16.mxu0 %v4963_v58 }
  0x68   : > { %4509 = vmatpush3.bf16.msra.mxu0 %v4963_v58 }
  0xc4   : > { %v496_v25 = vpop.permute.xlu1 %495  ;;  %v492_v26 = vpop.permute.xlu0 %491 }
  0xc5   : > { %v515_v27 = vadd.f32 %v492_v26, %v466_v23  ;;  %v517_v39 = vadd.f32 %v496_v25, %v468_v30 }
  0xc7   : > { %v5568_v31 = vadd.f32 %v524_v24, %v515_v27  ;;  %v5577_v49 = vadd.f32 %v524_v24, %v517_v39 }
  0xc8   : > { %v498_v33 = vpop.permute.xlu1 %497  ;;  %v494_v34 = vpop.permute.xlu0 %493 }
  0xc9   : > { %v518_v35 = vadd.f32 %v498_v33, %v469_v28  ;;  %v516_v36 = vadd.f32 %v494_v34, %v467_v29  ;;  %605 = vperm.xlu0 %4954, %v5568_v31  }
  0xcb   : > { %v5571_v40 = vadd.f32 %v524_v24, %v518_v35  ;;  %v5573_v41 = vadd.f32 %v524_v24, %v516_v36 }
  0xcc   : > { %v502_v43 = vpop.permute.xlu1 %501  ;;  %v500_v44 = vpop.permute.xlu0 %499 }
  0xcd   : > { %v520_v45 = vadd.f32 %v502_v43, %v471_v37  ;;  %610 = vperm.xlu1 %4955, %v5573_v41   ;;  %620 = vperm.xlu0 %4954, %v5571_v40   ;;  %v519_v48 = vadd.f32 %v500_v44, %v470_v38  ;;  %v4970_v43 = vld [vmem:[#allocation3 + $0x270] sm:$0xff]   ;;  %v4971_v44 = vld [vmem:[#allocation3 + $0x278] sm:$0xff]  }
  0xce   : > { %4530 = vmatprep.subr.bf16.mxu1 %v4970_v43 }
  0xcf   : > { %v5579_v50 = vadd.f32 %v524_v24, %v520_v45  ;;  %v5581_v55 = vadd.f32 %v524_v24, %v519_v48  ;;  %4531 = vmatpush3.bf16.msra.mxu1 %v4970_v43  ;;  %v4972_v45 = vld [vmem:[#allocation3 + $0x280] sm:$0xff]   ;;  %v4975_v48 = vld [vmem:[#allocation3 + $0x298] sm:$0xff]  }
  0xd0   : > { %v506_v52 = vpop.permute.xlu1 %505  ;;  %v504_v53 = vpop.permute.xlu0 %503  ;;  %4532 = vmatprep.subr.bf16.mxu1 %v4971_v44  ;;  %4542 = vmatprep.subr.bf16.mxu0 %v4972_v45 }
  0xd1   : > { %v522_v54 = vadd.f32 %v506_v52, %v473_v46  ;;  %615 = vperm.xlu1 %4955, %v5577_v49   ;;  %630 = vperm.xlu0 %4954, %v5579_v50   ;;  %v521_v56 = vadd.f32 %v504_v53, %v472_v47  ;;  %v4973_v46 = vld [vmem:[#allocation3 + $0x288] sm:$0xff]   ;;  %v4974_v47 = vld [vmem:[#allocation3 + $0x290] sm:$0xff]  }
  0xd2   : > { %v4072_v52 = vld [vmem:[%s6493_s5 + $0x8] ss:$0 sm:$0xff] }
  0xd3   : > { %v5585_v57 = vadd.f32 %v524_v24, %v522_v54  ;;  %v5587_v59 = vadd.f32 %v524_v24, %v521_v56  ;;  %4533 = vmatpush3.bf16.msra.mxu1 %v4971_v44 }
  0xd5   : > { %625 = vperm.xlu1 %4955, %v5581_v55   ;;  %640 = vperm.xlu0 %4954, %v5585_v57  }
  0xd9   : > { %635 = vperm.xlu1 %4955, %v5587_v59  }
 0x148   : > { %v606_v3 = vpop.permute.xlu0 %605 }
 0x149   : > { %v649_v4 = vmul.f32 %v4068_v2, %v606_v3 }
 0x14b   : > { %v5602_v8 = vadd.f32 %v4070_v5, %v649_v4 }
 0x14c   : > { %v611_v6 = vpop.permute.xlu1 %610  ;;  %v621_v7 = vpop.permute.xlu0 %620 }
 0x14d   : > { %v650_v9 = vmul.f32 %v4068_v2, %v611_v6  ;;  %v652_v10 = vmul.f32 %v4068_v2, %v621_v7  ;;  %v673_v17 = vmax.f32 %v5602_v8, 0.0 }
 0x14f   : > { %v5604_v11 = vadd.f32 %v4070_v5, %v650_v9  ;;  %v5606_v12 = vadd.f32 %v4070_v5, %v652_v10 }
 0x150   : > { %v616_v13 = vpop.permute.xlu1 %615  ;;  %v631_v14 = vpop.permute.xlu0 %630 }
 0x151   : > { %v651_v15 = vmul.f32 %v4068_v2, %v616_v13  ;;  %v654_v16 = vmul.f32 %v4068_v2, %v631_v14  ;;  %v674_v18 = vmax.f32 %v5604_v11, 0.0  ;;  %v676_v21 = vmax.f32 %v5606_v12, 0.0 }
 0x153   : > { %v5610_v19 = vadd.f32 %v4070_v5, %v651_v15  ;;  %v681_v20 = vpack.c.bf16 %v674_v18, %v673_v17  ;;  %v5614_v25 = vadd.f32 %v4070_v5, %v654_v16 }
 0x154   : > { %v626_v22 = vpop.permute.xlu1 %625  ;;  %v641_v23 = vpop.permute.xlu0 %640 }
 0x155   : > { %v675_v24 = vmax.f32 %v5610_v19, 0.0  ;;  %v653_v26 = vmul.f32 %v4068_v2, %v626_v22  ;;  %v656_v27 = vmul.f32 %v4068_v2, %v641_v23  ;;  %4510 = vmatprep.mubr.bf16.mxu0 %v681_v20  ;;  %v678_v32 = vmax.f32 %v5614_v25, 0.0 }
 0x157   : > { %v5616_v28 = vadd.f32 %v4070_v5, %v653_v26  ;;  %v682_v29 = vpack.c.bf16 %v676_v21, %v675_v24  ;;  %v5620_v34 = vadd.f32 %v4070_v5, %v656_v27  ;;  %v4977_v24 = vld [vmem:[#allocation3 + $0x2a8] sm:$0xff]   ;;  %v4978_v26 = vld [vmem:[#allocation3 + $0x2b0] sm:$0xff]   ;;  %v4979_v27 = vld [vmem:[#allocation3 + $0x2b8] sm:$0xff]  }
 0x158   : > { %v636_v30 = vpop.permute.xlu1 %635 }
 0x159   : > { %v677_v33 = vmax.f32 %v5616_v28, 0.0  ;;  %v655_v35 = vmul.f32 %v4068_v2, %v636_v30  ;;  %4511 = vmatmul.mubr.bf16.vlgmr.msra.gmra.mrb[0].mxu0 %v682_v29  ;;  %v680_v38 = vmax.f32 %v5620_v34, 0.0  ;;  %v4980_v29 = vld [vmem:[#allocation3 + $0x2c0] sm:$0xff]   ;;  %v4981_v30 = vld [vmem:[#allocation3 + $0x2c8] sm:$0xff]  }
 0x15a   : > { %4543 = vmatpush3.bf16.msra.mxu0 %v4972_v45  ;;  %4566 = vmatprep.subr.bf16.mxu1 %v4980_v29 }
 0x15b   : > { %v5622_v36 = vadd.f32 %v4070_v5, %v655_v35  ;;  %v683_v37 = vpack.c.bf16 %v678_v32, %v677_v33  ;;  %4544 = vmatprep.subr.bf16.mxu0 %v4973_v46  ;;  %v4982_v32 = vld [vmem:[#allocation3 + $0x2d0] sm:$0xff]   ;;  %v4983_v33 = vld [vmem:[#allocation3 + $0x2d8] sm:$0xff]   ;;  %v4984_v35 = vld [vmem:[#allocation3 + $0x2e0] sm:$0xff]  }
 0x15d   : > { %v679_v39 = vmax.f32 %v5622_v36, 0.0  ;;  %4514 = vmatprep.mubr.bf16.mxu0 %v683_v37  ;;  %v4985_v37 = vld [vmem:[#allocation3 + $0x2e8] sm:$0xff]  }
 0x15e   : > { %4545 = vmatpush3.bf16.msra.mxu0 %v4973_v46 }
 0x15f   : > { %v684_v42 = vpack.c.bf16 %v680_v38, %v679_v39  ;;  %4546 = vmatprep.subr.bf16.mxu0 %v4974_v47  ;;  %v4082_v38 = vld [vmem:[%s6493_s5 + $0x9] ss:$0 sm:$0xff] }
 0x161   : > { %4515 = vmatmul.mubr.bf16.gmra.mrb[4].mxu0 %v684_v42  ;;  %v4092_v42 = vld [vmem:[%s5633_s25 + $0x4] ss:$0 sm:$0xff] }
 0x162   : > { %4547 = vmatpush3.bf16.msra.mxu0 %v4974_v47 }
 0x163   : > { %4548 = vmatprep.subr.bf16.mxu0 %v4975_v48 }
 0x166   : > { %4549 = vmatpush3.bf16.msra.mxu0 %v4975_v48 }
 0x167   : > { %4550 = vmatprep.subr.bf16.mxu0 %v4976_v51 }
 0x16a   : > { %4551 = vmatpush3.bf16.msra.mxu0 %v4976_v51 }
 0x16b   : > { %4552 = vmatprep.subr.bf16.mxu0 %v4977_v24 }
 0x16e   : > { %4553 = vmatpush3.bf16.msra.mxu0 %v4977_v24 }
 0x16f   : > { %4554 = vmatprep.subr.bf16.mxu0 %v4978_v26 }
 0x172   : > { %4555 = vmatpush3.bf16.msra.mxu0 %v4978_v26 }
 0x173   : > { %4556 = vmatprep.subr.bf16.mxu0 %v4979_v27 }
 0x176   : > { %4557 = vmatpush3.bf16.msra.mxu0 %v4979_v27  ;;  %v4989_v27 = vld [vmem:[%s6494_s6 + $0x88] sm:$0xff]  }
 0x22c   : > { %v4512_v53 = vpop.f32.mrb[0].mxu0 }
 0x22d   : > { %v801_v54 = vadd.f32 %v4512_v53, %v4072_v52  ;;  %v792_v56 = vpop.f32.mrb[1].mxu0 }
 0x22e   : > { %v793_v58 = vadd.f32 %v4072_v52, %v792_v56  ;;  %v4513_v60 = vpop.f32.mrb[2].mxu0 }
 0x22f   : > { %v804_v61 = vadd.f32 %v4513_v60, %v4072_v52  ;;  %v795_v62 = vpop.f32.mrb[3].mxu0  ;;  %v825_v0 = vmax.f32 %v801_v54, 0.0 }
 0x230   : > { %v796_v63 = vadd.f32 %v4072_v52, %v795_v62  ;;  %v823_v2 = vmax.f32 %v793_v58, 0.0 }
 0x231   : > { %v826_v1 = vmax.f32 %v804_v61, 0.0 }
 0x232   : > { %v824_v3 = vmax.f32 %v796_v63, 0.0 }
 0x233   : > { %v832_v4 = vpack.c.bf16 %v826_v1, %v825_v0 }
 0x234   : > { %v4516_v5 = vpop.f32.mrb[4].mxu0  ;;  %v831_v6 = vpack.c.bf16 %v824_v3, %v823_v2 }
 0x235   : > { %v817_v7 = vadd.f32 %v4516_v5, %v4072_v52  ;;  %v808_v9 = vpop.f32.mrb[5].mxu0 }
 0x236   : > { %v809_v10 = vadd.f32 %v4072_v52, %v808_v9  ;;  %v4517_v13 = vpop.f32.mrb[6].mxu0  ;;  %4534 = vmatprep.mubr.bf16.mxu1 %v831_v6 }
 0x237   : > { %v820_v14 = vadd.f32 %v4517_v13, %v4072_v52  ;;  %v811_v15 = vpop.f32.mrb[7].mxu0  ;;  %4535 = vmatmul.mubr.bf16.vlgmr.msra.gmra.mrb[0].mxu1 %v832_v4  ;;  %v829_v17 = vmax.f32 %v817_v7, 0.0 }
 0x238   : > { %v812_v16 = vadd.f32 %v4072_v52, %v811_v15  ;;  %v827_v20 = vmax.f32 %v809_v10, 0.0  ;;  %4567 = vmatpush3.bf16.msra.mxu1 %v4980_v29  ;;  %v4990_v29 = vld [vmem:[%s6494_s6 + $0x90] sm:$0xff]  }
 0x239   : > { %v830_v18 = vmax.f32 %v820_v14, 0.0  ;;  %4568 = vmatprep.subr.bf16.mxu1 %v4981_v30 }
 0x23a   : > { %v828_v21 = vmax.f32 %v812_v16, 0.0 }
 0x23b   : > { %v834_v22 = vpack.c.bf16 %v830_v18, %v829_v17 }
 0x23c   : > { %v833_v23 = vpack.c.bf16 %v828_v21, %v827_v20  ;;  %4569 = vmatpush3.bf16.msra.mxu1 %v4981_v30  ;;  %v4991_v30 = vld [vmem:[%s6494_s6 + $0x98] sm:$0xff]  }
 0x23d   : > { %4570 = vmatprep.subr.bf16.mxu1 %v4982_v32 }
 0x23e   : > { %4538 = vmatprep.mubr.bf16.mxu1 %v833_v23 }
 0x23f   : > { %4539 = vmatmul.mubr.bf16.gmra.mrb[4].mxu1 %v834_v22 }
 0x240   : > { %4571 = vmatpush3.bf16.msra.mxu1 %v4982_v32  ;;  %v4992_v32 = vld [vmem:[%s6494_s6 + $0xa0] sm:$0xff]  }
 0x241   : > { %4572 = vmatprep.subr.bf16.mxu1 %v4983_v33 }
 0x244   : > { %4573 = vmatpush3.bf16.msra.mxu1 %v4983_v33  ;;  %v4094_v33 = vld [vmem:[%s6493_s5 + $0xa] ss:$0 sm:$0xff] }
 0x245   : > { %4574 = vmatprep.subr.bf16.mxu1 %v4984_v35 }
 0x248   : > { %4575 = vmatpush3.bf16.msra.mxu1 %v4984_v35 }
 0x249   : > { %4576 = vmatprep.subr.bf16.mxu1 %v4985_v37 }
 0x24c   : > { %4577 = vmatpush3.bf16.msra.mxu1 %v4985_v37 }
 0x30a   : > { %v4536_v39 = vpop.f32.mrb[0].mxu1 }
 0x30b   : > { %v951_v43 = vadd.f32 %v4536_v39, %v4082_v38  ;;  %v942_v44 = vpop.f32.mrb[1].mxu1 }
 0x30c   : > { %v943_v45 = vadd.f32 %v4082_v38, %v942_v44  ;;  %v4537_v46 = vpop.f32.mrb[2].mxu1 }
 0x30d   : > { %v983_v47 = vmul.f32 %v4092_v42, %v951_v43  ;;  %v954_v48 = vadd.f32 %v4537_v46, %v4082_v38  ;;  %v945_v51 = vpop.f32.mrb[3].mxu1 }
 0x30e   : > { %v981_v52 = vmul.f32 %v4092_v42, %v943_v45  ;;  %v946_v53 = vadd.f32 %v4082_v38, %v945_v51 }
 0x30f   : > { %v984_v54 = vmul.f32 %v4092_v42, %v954_v48  ;;  %v5643_v60 = vadd.f32 %v983_v47, %v5610_v19 }
 0x310   : > { %v5640_v56 = vadd.f32 %v981_v52, %v5602_v8  ;;  %v982_v58 = vmul.f32 %v4092_v42, %v946_v53 }
 0x311   : > { %v5646_v61 = vadd.f32 %v984_v54, %v5606_v12  ;;  %v999_v19 = vmax.f32 %v5643_v60, 0.0 }
 0x312   : > { %v5649_v62 = vadd.f32 %v982_v58, %v5604_v11  ;;  %v4540_v63 = vpop.f32.mrb[4].mxu1  ;;  %v997_v8 = vmax.f32 %v5640_v56, 0.0 }
 0x313   : > { %v1000_v0 = vmax.f32 %v5646_v61, 0.0  ;;  %v967_v1 = vadd.f32 %v4540_v63, %v4082_v38  ;;  %v958_v2 = vpop.f32.mrb[5].mxu1 }
 0x314   : > { %v959_v3 = vadd.f32 %v4082_v38, %v958_v2  ;;  %v4541_v4 = vpop.f32.mrb[6].mxu1  ;;  %v998_v5 = vmax.f32 %v5649_v62, 0.0 }
 0x315   : > { %v987_v6 = vmul.f32 %v4092_v42, %v967_v1  ;;  %v970_v7 = vadd.f32 %v4541_v4, %v4082_v38  ;;  %v961_v12 = vpop.f32.mrb[7].mxu1  ;;  %v1006_v13 = vpack.c.bf16 %v1000_v0, %v999_v19 }
 0x316   : > { %v985_v9 = vmul.f32 %v4092_v42, %v959_v3  ;;  %v962_v10 = vadd.f32 %v4082_v38, %v961_v12  ;;  %v1005_v11 = vpack.c.bf16 %v998_v5, %v997_v8 }
 0x317   : > { %v988_v14 = vmul.f32 %v4092_v42, %v970_v7  ;;  %v5659_v17 = vadd.f32 %v987_v6, %v5622_v36  ;;  %v4986_v36 = vld [vmem:[#allocation3 + $0x2f0] sm:$0xff]  }
 0x318   : > { %v5656_v15 = vadd.f32 %v985_v9, %v5616_v28  ;;  %v986_v16 = vmul.f32 %v4092_v42, %v962_v10  ;;  %4558 = vmatprep.mubr.bf16.mxu0 %v1005_v11  ;;  %4578 = vmatprep.subr.bf16.mxu1 %v4986_v36  ;;  %v4993_v9 = vld [vmem:[%s6494_s6 + $0xa8] sm:$0xff]   ;;  %v4994_v10 = vld [vmem:[%s6494_s6 + $0xb0] sm:$0xff]   ;;  %v4995_v11 = vld [vmem:[%s6494_s6 + $0xb8] sm:$0xff]  }
 0x319   : > { %v5662_v18 = vadd.f32 %v988_v14, %v5620_v34  ;;  %4559 = vmatmul.mubr.bf16.vlgmr.msra.gmra.mrb[8].mxu0 %v1006_v13  ;;  %v1003_v28 = vmax.f32 %v5659_v17, 0.0  ;;  %4579 = vmatpush3.bf16.msra.mxu1 %v4986_v36  ;;  %v4987_v34 = vld [vmem:[#allocation3 + $0x2f8] sm:$0xff]   ;;  %v5698_v13 = vstv %s4064_s28  ;;  %v5701_v14 = vld [vmem:[%s5550_s14] sm:$0xff]  ;;  %s4153_s28 = sld [smem:[#allocation7 + $0x82]] }
 0x31a   : > { %v5665_v20 = vadd.f32 %v986_v16, %v5614_v25  ;;  %v1001_v22 = vmax.f32 %v5656_v15, 0.0  ;;  %4580 = vmatprep.subr.bf16.mxu1 %v4987_v34  ;;  %v4988_v25 = vld [vmem:[%s6494_s6 + $0x80] sm:$0xff]   ;;  %v543_v16 = vmul.f32 %v5701_v14, %v5698_v13 }
 0x31b   : > { %v1004_v21 = vmax.f32 %v5662_v18, 0.0  ;;  %4590 = vmatprep.subr.bf16.mxu0 %v4988_v25  ;;  %v5725_v36 = vld [vmem:[%s5550_s14 + $0x20] sm:$0xff] }
 0x31c   : > { %v1002_v23 = vmax.f32 %v5665_v20, 0.0  ;;  %4591 = vmatpush3.bf16.msra.mxu0 %v4988_v25  ;;  %559 = vrot.lane.b32.xlu1 %v543_v16, %s5364_s29  ;;  %v5730_v25 = vld [vmem:[%s5550_s14 + $0x28] sm:$0xff] }
 0x31d   : > { %v1008_v26 = vpack.c.bf16 %v1004_v21, %v1003_v28  ;;  %4581 = vmatpush3.bf16.msra.mxu1 %v4987_v34  ;;  %4592 = vmatprep.subr.bf16.mxu0 %v4989_v27  ;;  %v5706_v21 = vld [vmem:[%s5550_s14 + $0x8] sm:$0xff]  ;;  %v547_v34 = vmul.f32 %v5725_v36, %v5698_v13 }
 0x31e   : > { %v1007_v24 = vpack.c.bf16 %v1002_v23, %v1001_v22  ;;  %v544_v22 = vmul.f32 %v5706_v21, %v5698_v13  ;;  %v5713_v23 = vld [vmem:[%s5550_s14 + $0x10] sm:$0xff] }
 0x31f   : > { %v545_v28 = vmul.f32 %v5713_v23, %v5698_v13 }
 0x320   : > { %4562 = vmatprep.mubr.bf16.mxu0 %v1007_v24  ;;  %4593 = vmatpush3.bf16.msra.mxu0 %v4989_v27  ;;  %v5718_v24 = vld [vmem:[%s5550_s14 + $0x18] sm:$0xff]  ;;  %v548_v27 = vmul.f32 %v5730_v25, %v5698_v13 }
 0x321   : > { %4563 = vmatmul.mubr.bf16.gmra.mrb[12].mxu0 %v1008_v26  ;;  %4594 = vmatprep.subr.bf16.mxu0 %v4990_v29  ;;  %v546_v26 = vmul.f32 %v5718_v24, %v5698_v13 }
 0x322   : > { %561 = vrot.lane.b32.xlu0 %v544_v22, %s5364_s29  ;;  %563 = vrot.lane.b32.xlu1 %v545_v28, %s5364_s29 }
 0x324   : > { %4595 = vmatpush3.bf16.msra.mxu0 %v4990_v29  ;;  %v4104_v29 = vld [vmem:[%s6493_s5 + $0xb] ss:$0 sm:$0xff] }
 0x325   : > { %4596 = vmatprep.subr.bf16.mxu0 %v4991_v30 }
 0x326   : > { %565 = vrot.lane.b32.xlu0 %v546_v26, %s5364_s29  ;;  %567 = vrot.lane.b32.xlu1 %v547_v34, %s5364_s29  ;;  %v5755_v34 = vld [vmem:[%s5550_s14 + $0x30] sm:$0xff] }
 0x328   : > { %4597 = vmatpush3.bf16.msra.mxu0 %v4991_v30 }
 0x329   : > { %4598 = vmatprep.subr.bf16.mxu0 %v4992_v32 }
 0x32a   : > { %569 = vrot.lane.b32.xlu0 %v548_v27, %s5364_s29  ;;  %v549_v27 = vmul.f32 %v5755_v34, %v5698_v13 }
 0x32c   : > { %4599 = vmatpush3.bf16.msra.mxu0 %v4992_v32  ;;  %v4114_v32 = vld [vmem:[%s5633_s25 + $0x5] ss:$0 sm:$0xff] }
 0x32d   : > { %4600 = vmatprep.subr.bf16.mxu0 %v4993_v9 }
 0x330   : > { %4601 = vmatpush3.bf16.msra.mxu0 %v4993_v9 }
 0x331   : > { %4602 = vmatprep.subr.bf16.mxu0 %v4994_v10 }
 0x334   : > { %4603 = vmatpush3.bf16.msra.mxu0 %v4994_v10 }
 0x335   : > { %4604 = vmatprep.subr.bf16.mxu0 %v4995_v11 }
 0x338   : > { %4605 = vmatpush3.bf16.msra.mxu0 %v4995_v11  ;;  %v4132_v11 = vld [vmem:[%s6495_s7 + $0x2] ss:$0 sm:$0xff] }
 0x3ec   : > { %v4560_v35 = vpop.f32.mrb[8].mxu0 }
 0x3ed   : > { %v1125_v37 = vadd.f32 %v4560_v35, %v4094_v33  ;;  %v1116_v38 = vpop.f32.mrb[9].mxu0 }
 0x3ee   : > { %v1117_v39 = vadd.f32 %v4094_v33, %v1116_v38  ;;  %v4561_v42 = vpop.f32.mrb[10].mxu0 }
 0x3ef   : > { %v1128_v43 = vadd.f32 %v4561_v42, %v4094_v33  ;;  %v1119_v44 = vpop.f32.mrb[11].mxu0  ;;  %v1149_v46 = vmax.f32 %v1125_v37, 0.0 }
 0x3f0   : > { %v1120_v45 = vadd.f32 %v4094_v33, %v1119_v44  ;;  %v1147_v48 = vmax.f32 %v1117_v39, 0.0 }
 0x3f1   : > { %v1150_v47 = vmax.f32 %v1128_v43, 0.0 }
 0x3f2   : > { %v1148_v51 = vmax.f32 %v1120_v45, 0.0 }
 0x3f3   : > { %v1156_v52 = vpack.c.bf16 %v1150_v47, %v1149_v46 }
 0x3f4   : > { %v1155_v53 = vpack.c.bf16 %v1148_v51, %v1147_v48  ;;  %v4564_v54 = vpop.f32.mrb[12].mxu0 }
 0x3f5   : > { %v1141_v58 = vadd.f32 %v4564_v54, %v4094_v33  ;;  %v1132_v63 = vpop.f32.mrb[13].mxu0 }
 0x3f6   : > { %v1133_v0 = vadd.f32 %v4094_v33, %v1132_v63  ;;  %v4565_v1 = vpop.f32.mrb[14].mxu0  ;;  %4582 = vmatprep.mubr.bf16.mxu1 %v1155_v53 }
 0x3f7   : > { %v1144_v2 = vadd.f32 %v4565_v1, %v4094_v33  ;;  %v1135_v3 = vpop.f32.mrb[15].mxu0  ;;  %4583 = vmatmul.mubr.bf16.vlgmr.msra.gmra.mrb[8].mxu1 %v1156_v52  ;;  %v1153_v8 = vmax.f32 %v1141_v58, 0.0 }
 0x3f8   : > { %v1136_v4 = vadd.f32 %v4094_v33, %v1135_v3  ;;  %v1151_v19 = vmax.f32 %v1133_v0, 0.0 }
 0x3f9   : > { %v1154_v5 = vmax.f32 %v1144_v2, 0.0 }
 0x3fa   : > { %v1152_v6 = vmax.f32 %v1136_v4, 0.0 }
 0x3fb   : > { %v1158_v7 = vpack.c.bf16 %v1154_v5, %v1153_v8 }
 0x3fc   : > { %v1157_v12 = vpack.c.bf16 %v1152_v6, %v1151_v19 }
 0x3fe   : > { %4586 = vmatprep.mubr.bf16.mxu1 %v1157_v12 }
 0x3ff   : > { %4587 = vmatmul.mubr.bf16.gmra.mrb[12].mxu1 %v1158_v7 }
 0x4ca   : > { %v4584_v30 = vpop.f32.mrb[8].mxu1 }
 0x4cb   : > { %v1275_v33 = vadd.f32 %v4584_v30, %v4104_v29  ;;  %v1266_v35 = vpop.f32.mrb[9].mxu1 }
 0x4cc   : > { %v1267_v37 = vadd.f32 %v4104_v29, %v1266_v35  ;;  %v4585_v38 = vpop.f32.mrb[10].mxu1 }
 0x4cd   : > { %v1307_v39 = vmul.f32 %v4114_v32, %v1275_v33  ;;  %v1278_v42 = vadd.f32 %v4585_v38, %v4104_v29  ;;  %v1269_v43 = vpop.f32.mrb[11].mxu1 }
 0x4ce   : > { %v1305_v44 = vmul.f32 %v4114_v32, %v1267_v37  ;;  %v1270_v45 = vadd.f32 %v4104_v29, %v1269_v43  ;;  %v4996_v43 = vld [vmem:[#allocation3 + $0x100] sm:$0xff]  }
 0x4cf   : > { %v1308_v46 = vmul.f32 %v4114_v32, %v1278_v42  ;;  %v1315_v48 = vadd.f32 %v1307_v39, %v5643_v60  ;;  %4614 = vmatprep.subr.bf16.mxu1 %v4996_v43 }
 0x4d0   : > { %v1306_v47 = vmul.f32 %v4114_v32, %v1270_v45  ;;  %v1313_v52 = vadd.f32 %v1305_v44, %v5640_v56  ;;  %v4997_v44 = vld [vmem:[#allocation3 + $0x108] sm:$0xff]   ;;  %4615 = vmatpush3.bf16.msra.mxu1 %v4996_v43  ;;  %v5795_v43 = vstv %s4151_s30  ;;  %s4243_s30 = sld [smem:[#allocation7 + $0x3]] }
 0x4d1   : > { %v1316_v51 = vadd.f32 %v1308_v46, %v5646_v61  ;;  %4616 = vmatprep.subr.bf16.mxu1 %v4997_v44  ;;  %v4999_v46 = vld [vmem:[#allocation3 + $0x118] sm:$0xff]  }
 0x4d2   : > { %v1314_v53 = vadd.f32 %v1306_v47, %v5649_v62  ;;  %v4588_v54 = vpop.f32.mrb[12].mxu1  ;;  %v5000_v47 = vld [vmem:[#allocation3 + $0x120] sm:$0xff]  }
 0x4d3   : > { %v1322_v58 = vpack.c.bf16 %v1316_v51, %v1315_v48  ;;  %v1291_v63 = vadd.f32 %v4588_v54, %v4104_v29  ;;  %v1282_v0 = vpop.f32.mrb[13].mxu1 }
 0x4d4   : > { %v1283_v1 = vadd.f32 %v4104_v29, %v1282_v0  ;;  %v4589_v2 = vpop.f32.mrb[14].mxu1  ;;  %v1321_v3 = vpack.c.bf16 %v1314_v53, %v1313_v52  ;;  %4617 = vmatpush3.bf16.msra.mxu1 %v4997_v44 }
 0x4d5   : > { %v1311_v4 = vmul.f32 %v4114_v32, %v1291_v63  ;;  %v1294_v8 = vadd.f32 %v4589_v2, %v4104_v29  ;;  %v1285_v5 = vpop.f32.mrb[15].mxu1 }
 0x4d6   : > { %v1309_v19 = vmul.f32 %v4114_v32, %v1283_v1  ;;  %v1286_v6 = vadd.f32 %v4104_v29, %v1285_v5  ;;  %4606 = vmatprep.mubr.bf16.mxu0 %v1321_v3 }
 0x4d7   : > { %v1312_v60 = vmul.f32 %v4114_v32, %v1294_v8  ;;  %4607 = vmatmul.mubr.bf16.vlgmr.msra.gmra.mrb[16].mxu0 %v1322_v58  ;;  %v1319_v56 = vadd.f32 %v1311_v4, %v5659_v17 }
 0x4d8   : > { %v1310_v61 = vmul.f32 %v4114_v32, %v1286_v6  ;;  %v1317_v7 = vadd.f32 %v1309_v19, %v5656_v15  ;;  %v5761_v32 = vld [vmem:[%s5550_s14 + $0x38] sm:$0xff]  ;;  %s4149_s14 = sld [smem:[#allocation7 + $0x106]] }
 0x4d9   : > { %v1320_v62 = vadd.f32 %v1312_v60, %v5662_v18  ;;  %v550_v33 = vmul.f32 %v5761_v32, %v5698_v13  ;;  %v4998_v13 = vld [vmem:[#allocation3 + $0x110] sm:$0xff]  }
 0x4da   : > { %v1318_v12 = vadd.f32 %v1310_v61, %v5665_v20  ;;  %4618 = vmatprep.subr.bf16.mxu1 %v4998_v13 }
 0x4db   : > { %v1324_v9 = vpack.c.bf16 %v1320_v62, %v1319_v56  ;;  %4619 = vmatpush3.bf16.msra.mxu1 %v4998_v13 }
 0x4dc   : > { %v1323_v10 = vpack.c.bf16 %v1318_v12, %v1317_v7  ;;  %4620 = vmatprep.subr.bf16.mxu1 %v4999_v46 }
 0x4de   : > { %4610 = vmatprep.mubr.bf16.mxu0 %v1323_v10  ;;  %v560_v10 = vpop.permute.xlu1 %559 }
 0x4df   : > { %4611 = vmatmul.mubr.bf16.gmra.mrb[20].mxu0 %v1324_v9  ;;  %4621 = vmatpush3.bf16.msra.mxu1 %v4999_v46 }
 0x4e0   : > { %4622 = vmatprep.subr.bf16.mxu1 %v5000_v47 }
 0x4e3   : > { %4623 = vmatpush3.bf16.msra.mxu1 %v5000_v47  ;;  %v5804_v47 = vstv %s4153_s28 }
 0x5aa   : > { %v4608_v16 = vpop.f32.mrb[16].mxu0 }
 0x5ab   : > { %v1441_v22 = vadd.f32 %v4608_v16, %v4132_v11  ;;  %v1432_v28 = vpop.f32.mrb[17].mxu0 }
 0x5ac   : > { %v4609_v17 = vpop.f32.mrb[18].mxu0  ;;  %v1433_v18 = vadd.f32 %v4132_v11, %v1432_v28  ;;  %v562_v28 = vpop.permute.xlu0 %561 }
 0x5ad   : > { %v1444_v26 = vadd.f32 %v4609_v17, %v4132_v11  ;;  %1571 = vrot.lane.b32.xlu1 %v1441_v22, %s5364_s29  ;;  %v1435_v15 = vpop.f32.mrb[19].mxu0  ;;  %v1465_v48 = vadd.f32 2.0, %v1441_v22  ;;  %v5773_v22 = vstv %s4063_s21  ;;  %s4242_s21 = sld [smem:[#allocation7 + $0x2]] }
 0x5ae   : > { %v1436_v20 = vadd.f32 %v4132_v11, %v1435_v15  ;;  %v1463_v53 = vadd.f32 2.0, %v1433_v18 }
 0x5af   : > { %1573 = vrot.lane.b32.xlu0 %v1444_v26, %s5364_s29  ;;  %v1466_v51 = vadd.f32 2.0, %v1444_v26  ;;  %v4143_v52 = vmul.f32 -1.442695, %v1465_v48 }
 0x5b0   : > { %v1464_v54 = vadd.f32 2.0, %v1436_v20  ;;  %v4141_v63 = vmul.f32 -1.442695, %v1463_v53 }
 0x5b1   : > { %1567 = vrot.lane.b32.xlu1 %v1433_v18, %s5364_s29  ;;  %v4144_v58 = vmul.f32 -1.442695, %v1466_v51  ;;  %5076 = vpow2.f32 %v4143_v52  ;;  %v5779_v18 = vstv %s4150_s23  ;;  %s4241_s23 = sld [smem:[#allocation7 + $0x1]] }
 0x5b2   : > { %v4612_v29 = vpop.f32.mrb[20].mxu0  ;;  %v4142_v0 = vmul.f32 -1.442695, %v1464_v54 }
 0x5b3   : > { %1569 = vrot.lane.b32.xlu0 %v1436_v20, %s5364_s29  ;;  %v1448_v30 = vpop.f32.mrb[21].mxu0  ;;  %v1457_v42 = vadd.f32 %v4612_v29, %v4132_v11  ;;  %5078 = vpow2.f32 %v4144_v58  ;;  %v536_v20 = vmul.f32 %v5713_v23, %v5773_v22  ;;  %v535_v23 = vmul.f32 %v5706_v21, %v5773_v22 }
 0x5b4   : > { %v4613_v35 = vpop.f32.mrb[22].mxu0  ;;  %v1449_v38 = vadd.f32 %v4132_v11, %v1448_v30  ;;  %5080 = vpow2.f32 %v4141_v63 }
 0x5b5   : > { %571 = vrot.lane.b32.xlu1 %v549_v27, %s5364_s29  ;;  %v1451_v37 = vpop.f32.mrb[23].mxu0  ;;  %v1460_v45 = vadd.f32 %v4613_v35, %v4132_v11  ;;  %5082 = vpow2.f32 %v4142_v0  ;;  %v1469_v3 = vadd.f32 2.0, %v1457_v42  ;;  %v564_v27 = vpop.permute.xlu1 %563  ;;  %v584_v53 = vadd.f32 %v562_v28, %v535_v23 }
 0x5b6   : > { %v1452_v39 = vadd.f32 %v4132_v11, %v1451_v37  ;;  %v1467_v1 = vadd.f32 2.0, %v1449_v38  ;;  %v5771_v11 = vstv %s4149_s14  ;;  %v566_v37 = vpop.permute.xlu0 %565  ;;  %s2713_s14 = sld [smem:[#allocation7]] }
 0x5b7   : > { %573 = vrot.lane.b32.xlu0 %v550_v33, %s5364_s29  ;;  %v1470_v5 = vadd.f32 2.0, %v1460_v45  ;;  %v4147_v60 = vmul.f32 -1.442695, %v1469_v3  ;;  %v1603_v17 = vmul.f32 %v5771_v11, %v5577_v49  ;;  %v1601_v26 = vmul.f32 %v5771_v11, %v5568_v31 }
 0x5b8   : > { %v1468_v2 = vadd.f32 2.0, %v1452_v39  ;;  %v4145_v4 = vmul.f32 -1.442695, %v1467_v1  ;;  %v537_v33 = vmul.f32 %v5718_v24, %v5773_v22  ;;  %v1604_v31 = vmul.f32 %v5771_v11, %v5571_v40 }
 0x5b9   : > { %1575 = vrot.lane.b32.xlu1 %v1449_v38, %s5364_s29  ;;  %v4148_v62 = vmul.f32 -1.442695, %v1470_v5  ;;  %v1613_v30 = vadd.f32 %v5779_v18, %v1603_v17  ;;  %v1611_v49 = vadd.f32 %v5779_v18, %v1601_v26  ;;  %v1602_v44 = vmul.f32 %v5771_v11, %v5573_v41 }
 0x5ba   : > { %v4146_v19 = vmul.f32 -1.442695, %v1468_v2  ;;  %5084 = vpow2.f32 %v4145_v4  ;;  %v5799_v40 = vstv %s4066_s8  ;;  %v586_v46 = vadd.f32 %v566_v37, %v537_v33  ;;  %v568_v2 = vpop.permute.xlu1 %567  ;;  %s4244_s8 = sld [smem:[#allocation7 + $0x4]] }
 0x5bb   : > { %1577 = vrot.lane.b32.xlu0 %v1452_v39, %s5364_s29  ;;  %v5077_v8 = vpop.eup %5076  ;;  %v534_v39 = vmul.f32 %v5701_v14, %v5773_v22  ;;  %v1626_v14 = vmul.f32 %v5795_v43, %v1613_v30  ;;  %v1614_v48 = vadd.f32 %v5779_v18, %v1604_v31  ;;  %v1662_v51 = vmul.f32 %v5804_v47, %v1613_v30 }
 0x5bc   : > { %v1497_v61 = vadd.f32 1.0, %v5077_v8  ;;  %5086 = vpow2.f32 %v4146_v19  ;;  %v5809_v52 = vmul.f32 %v5795_v43, %v1611_v49  ;;  %v1612_v0 = vadd.f32 %v5779_v18, %v1602_v44 }
 0x5bd   : > { %1579 = vrot.lane.b32.xlu1 %v1457_v42, %s5364_s29  ;;  %v5079_v6 = vpop.eup %5078  ;;  %5088 = vpow2.f32 %v4147_v60  ;;  %v585_v42 = vadd.f32 %v564_v27, %v536_v20  ;;  %v583_v41 = vadd.f32 %v560_v10, %v534_v39  ;;  %v5816_v3 = vmul.f32 %v5804_v47, %v1611_v49 }
 0x5be   : > { %v5081_v56 = vpop.eup %5080  ;;  %v1498_v12 = vadd.f32 1.0, %v5079_v6  ;;  %5090 = vrcp.f32 %v1497_v61  ;;  %v1606_v8 = vmul.f32 %v5771_v11, %v5579_v50  ;;  %v596_v19 = vadd.f32 %v5799_v40, %v586_v46 }
 0x5bf   : > { %1581 = vrot.lane.b32.xlu0 %v1460_v45, %s5364_s29  ;;  %v5083_v7 = vpop.eup %5082  ;;  %v1495_v9 = vadd.f32 1.0, %v5081_v56  ;;  %5092 = vpow2.f32 %v4148_v62  ;;  %v595_v54 = vadd.f32 %v5799_v40, %v585_v42  ;;  %v1605_v60 = vmul.f32 %v5771_v11, %v5581_v55  ;;  %v570_v62 = vpop.permute.xlu0 %569 }
 0x5c0   : > { %v1496_v16 = vadd.f32 1.0, %v5083_v7  ;;  %5094 = vrcp.f32 %v1498_v12  ;;  %v538_v61 = vmul.f32 %v5725_v36, %v5773_v22  ;;  %v539_v56 = vmul.f32 %v5730_v25, %v5773_v22 }
 0x5c1   : > { %5096 = vrcp.f32 %v1495_v9  ;;  %v1627_v7 = vmul.f32 %v5795_v43, %v1614_v48  ;;  %v593_v12 = vadd.f32 %v5799_v40, %v583_v41  ;;  %v594_v50 = vadd.f32 %v5799_v40, %v584_v53 }
 0x5c2   : > { %5098 = vrcp.f32 %v1496_v16  ;;  %v5833_v9 = vstv %s5793_s11  ;;  %v5837_v16 = vstv %s5801_s9  ;;  %v1663_v26 = vmul.f32 %v5804_v47, %v1614_v48  ;;  %s4156_s9 = sld [smem:[#allocation7 + $0x85]]  ;;  %s4310_s11 = sshll.u32 %s5349_s18, 7 }
 0x5c3   : > { %v587_v20 = vadd.f32 %v568_v2, %v538_v61  ;;  %v1661_v30 = vmul.f32 %v5804_v47, %v1612_v0  ;;  %v1615_v33 = vadd.f32 %v5779_v18, %v1605_v60  ;;  %v1608_v48 = vmul.f32 %v5771_v11, %v5585_v57  ;;  %s5365_s18 = smov [#allocation8]  }
 0x5c4   : > { %v5085_v15 = vpop.eup %5084 }
 0x5c5   : > { %v1499_v35 = vadd.f32 1.0, %v5085_v15  ;;  %v1616_v15 = vadd.f32 %v5779_v18, %v1606_v8  ;;  %v597_v41 = vadd.f32 %v5799_v40, %v587_v20 }
 0x5c6   : > { %v5087_v29 = vpop.eup %5086 }
 0x5c7   : > { %v5089_v38 = vpop.eup %5088  ;;  %v1500_v45 = vadd.f32 1.0, %v5087_v29  ;;  %5100 = vrcp.f32 %v1499_v35  ;;  %v1625_v29 = vmul.f32 %v5795_v43, %v1612_v0 }
 0x5c8   : > { %v5091_v24 = vpop.eup %5090  ;;  %v1501_v1 = vadd.f32 1.0, %v5089_v38  ;;  %v588_v38 = vadd.f32 %v570_v62, %v539_v56  ;;  %v1629_v62 = vmul.f32 %v5795_v43, %v1616_v15 }
 0x5c9   : > { %v5093_v13 = vpop.eup %5092  ;;  %v5812_v58 = vadd.f32 0.001, %v5091_v24  ;;  %5102 = vrcp.f32 %v1500_v45  ;;  %v540_v24 = vmul.f32 %v5755_v34, %v5773_v22 }
 0x5ca   : > { %v5095_v21 = vpop.eup %5094  ;;  %v1502_v5 = vadd.f32 1.0, %v5093_v13  ;;  %5104 = vrcp.f32 %v1501_v1  ;;  %v1607_v1 = vmul.f32 %v5771_v11, %v5587_v59  ;;  %v598_v2 = vadd.f32 %v5799_v40, %v588_v38 }
 0x5cb   : > { %v5097_v63 = vpop.eup %5096  ;;  %v5821_v6 = vadd.f32 0.001, %v5095_v21  ;;  %v1553_v10 = vmul.f32 %v5812_v58, %v595_v54  ;;  %v5884_v11 = vstv %s5848_s13  ;;  %v1618_v38 = vadd.f32 %v5779_v18, %v1608_v48  ;;  %s4239_s13 = sld [smem:[#allocation7 + $0x86]] }
 0x5cc   : > { %v5099_v4 = vpop.eup %5098  ;;  %v5839_v28 = vadd.f32 0.001, %v5097_v63  ;;  %5106 = vrcp.f32 %v1502_v5  ;;  %v541_v63 = vmul.f32 %v5761_v32, %v5773_v22 }
 0x5cd   : > { %v5841_v36 = vadd.f32 0.001, %v5099_v4  ;;  %v1554_v17 = vmul.f32 %v5821_v6, %v596_v19 }
 0x5ce   : > { %v1551_v23 = vmul.f32 %v5839_v28, %v593_v12 }
 0x5cf   : > { %v1552_v42 = vmul.f32 %v5841_v36, %v594_v50 }
 0x5d1   : > { %v5101_v37 = vpop.eup %5100 }
 0x5d3   : > { %v5103_v21 = vpop.eup %5102 }
 0x5d4   : > { %v5877_v19 = vadd.f32 0.001, %v5103_v21  ;;  %v5105_v60 = vpop.eup %5104 }
 0x61f   : > { %v1572_v55 = vpop.permute.xlu1 %1571 }
 0x620   : > { %v1593_v25 = vadd.f32 %v1572_v55, %v1553_v10 }
 0x621   : > { %v1574_v27 = vpop.permute.xlu0 %1573 }
 0x622   : > { %v1635_v49 = vmul.f32 %v5833_v9, %v1593_v25  ;;  %v1671_v31 = vmul.f32 %v5837_v16, %v1593_v25  ;;  %v1594_v35 = vadd.f32 %v1574_v27, %v1554_v17  ;;  %v1628_v17 = vmul.f32 %v5795_v43, %v1615_v33 }
 0x623   : > { %v1568_v39 = vpop.permute.xlu1 %1567 }
 0x624   : > { %v1643_v44 = vadd.f32 %v1635_v49, %v1626_v14  ;;  %v5857_v45 = vadd.f32 %v1671_v31, %v1662_v51  ;;  %v1636_v13 = vmul.f32 %v5833_v9, %v1594_v35  ;;  %v1672_v46 = vmul.f32 %v5837_v16, %v1594_v35 }
 0x625   : > { %v1591_v53 = vadd.f32 %v1568_v39, %v1551_v23  ;;  %v1570_v54 = vpop.permute.xlu0 %1569  ;;  %v5868_v51 = vadd.f32 0.001, %v5101_v37  ;;  %v1617_v49 = vadd.f32 %v5779_v18, %v1607_v1  ;;  %v1665_v31 = vmul.f32 %v5804_v47, %v1616_v15 }
 0x626   : > { %v1644_v0 = vadd.f32 %v1636_v13, %v1627_v7  ;;  %v5866_v34 = vadd.f32 %v1672_v46, %v1663_v26  ;;  %v1592_v14 = vadd.f32 %v1570_v54, %v1552_v42  ;;  %v5107_v7 = vpop.eup %5106  ;;  %v5001_v42 = vld [vmem:[#allocation3 + $0x128] sm:$0xff]   ;;  %v5914_v15 = vadd.f32 %v5884_v11, %v1643_v44 }
 0x627   : > { %v1633_v57 = vmul.f32 %v5833_v9, %v1591_v53  ;;  %v1669_v4 = vmul.f32 %v5837_v16, %v1591_v53  ;;  %v572_v8 = vpop.permute.xlu1 %571  ;;  %v1555_v55 = vmul.f32 %v5868_v51, %v597_v41  ;;  %v5906_v37 = vadd.f32 0.001, %v5107_v7  ;;  %4624 = vmatprep.subr.bf16.mxu1 %v5001_v42 }
 0x628   : > { %v1634_v5 = vmul.f32 %v5833_v9, %v1592_v14  ;;  %v1670_v32 = vmul.f32 %v5837_v16, %v1592_v14  ;;  %v589_v22 = vadd.f32 %v572_v8, %v540_v24  ;;  %v5918_v21 = vadd.f32 %v5884_v11, %v1644_v0  ;;  %4625 = vmatpush3.bf16.msra.mxu1 %v5001_v42 }
 0x629   : > { %v1641_v61 = vadd.f32 %v1633_v57, %v5809_v52  ;;  %v5881_v56 = vadd.f32 %v1669_v4, %v5816_v3  ;;  %v574_v59 = vpop.permute.xlu0 %573  ;;  %v1664_v52 = vmul.f32 %v5804_v47, %v1615_v33  ;;  %v5904_v33 = vadd.f32 0.001, %v5105_v60  ;;  %v5002_v57 = vld [vmem:[#allocation3 + $0x130] sm:$0xff]  }
 0x62a   : > { %v1642_v12 = vadd.f32 %v1634_v5, %v1625_v29  ;;  %v5887_v50 = vadd.f32 %v1670_v32, %v1661_v30  ;;  %v590_v10 = vadd.f32 %v574_v59, %v541_v63  ;;  %v599_v25 = vadd.f32 %v5799_v40, %v589_v22  ;;  %4626 = vmatprep.subr.bf16.mxu1 %v5002_v57 }
 0x62b   : > { %v1576_v3 = vpop.permute.xlu1 %1575  ;;  %v5894_v26 = vadd.f32 %v5884_v11, %v1641_v61  ;;  %v1556_v29 = vmul.f32 %v5877_v19, %v598_v2  ;;  %v1630_v54 = vmul.f32 %v5795_v43, %v1617_v49  ;;  %v1666_v4 = vmul.f32 %v5804_v47, %v1617_v49 }
 0x62c   : > { %v600_v20 = vadd.f32 %v5799_v40, %v590_v10  ;;  %v1595_v27 = vadd.f32 %v1576_v3, %v1555_v55  ;;  %v5899_v30 = vadd.f32 %v5884_v11, %v1642_v12  ;;  %v1557_v24 = vmul.f32 %v5904_v33, %v599_v25  ;;  %4627 = vmatpush3.bf16.msra.mxu1 %v5002_v57  ;;  %v5005_v55 = vld [vmem:[#allocation3 + $0x148] sm:$0xff]   ;;  %v5006_v25 = vld [vmem:[#allocation3 + $0x150] sm:$0xff]   ;;  %v4158_v3 = vld [vmem:[%s6491_s3 + $0x1] ss:$0 sm:$0xff] }
 0x62d   : > { %1699 = vperm.xlu1 %4955, %v5894_v26   ;;  %v1578_v35 = vpop.permute.xlu0 %1577  ;;  %v1631_v32 = vmul.f32 %v5795_v43, %v1618_v38  ;;  %v1667_v22 = vmul.f32 %v5804_v47, %v1618_v38  ;;  %v5003_v43 = vld [vmem:[#allocation3 + $0x138] sm:$0xff]  }
 0x62e   : > { %v1637_v40 = vmul.f32 %v5833_v9, %v1595_v27  ;;  %v1673_v39 = vmul.f32 %v5837_v16, %v1595_v27  ;;  %v1596_v23 = vadd.f32 %v1578_v35, %v1556_v29  ;;  %1704 = vperm.xlu0 %4954, %v5899_v30   ;;  %v1558_v46 = vmul.f32 %v5906_v37, %v600_v20  ;;  %v4160_v20 = vld [vmem:[%s5599_s12 + $0x1] ss:$0 sm:$0xff] }
 0x62f   : > { %v1580_v13 = vpop.permute.xlu1 %1579  ;;  %4628 = vmatprep.subr.bf16.mxu1 %v5003_v43 }
 0x630   : > { %v1645_v18 = vadd.f32 %v1637_v40, %v1628_v17  ;;  %v5920_v48 = vadd.f32 %v1673_v39, %v1664_v52  ;;  %v1638_v41 = vmul.f32 %v5833_v9, %v1596_v23  ;;  %v1674_v53 = vmul.f32 %v5837_v16, %v1596_v23  ;;  %4629 = vmatpush3.bf16.msra.mxu1 %v5003_v43  ;;  %v5007_v17 = vld [vmem:[#allocation3 + $0x158] sm:$0xff]   ;;  %v5009_v52 = vld [vmem:[#allocation3 + $0x168] sm:$0xff]  }
 0x631   : > { %v1597_v63 = vadd.f32 %v1580_v13, %v1557_v24  ;;  %1709 = vperm.xlu1 %4955, %v5914_v15   ;;  %v1582_v44 = vpop.permute.xlu0 %1581 }
 0x632   : > { %v1646_v14 = vadd.f32 %v1638_v41, %v1629_v62  ;;  %v5926_v1 = vadd.f32 %v1674_v53, %v1665_v31  ;;  %v1598_v0 = vadd.f32 %v1582_v44, %v1558_v46  ;;  %1714 = vperm.xlu0 %4954, %v5918_v21   ;;  %v5930_v2 = vadd.f32 %v5884_v11, %v1645_v18 }
 0x633   : > { %v1639_v8 = vmul.f32 %v5833_v9, %v1597_v63  ;;  %v1675_v5 = vmul.f32 %v5837_v16, %v1597_v63 }
 0x634   : > { %v1640_v60 = vmul.f32 %v5833_v9, %v1598_v0  ;;  %v1676_v61 = vmul.f32 %v5837_v16, %v1598_v0  ;;  %v5940_v59 = vadd.f32 %v5884_v11, %v1646_v14  ;;  %v5004_v16 = vld [vmem:[#allocation3 + $0x140] sm:$0xff]  }
 0x635   : > { %v1647_v62 = vadd.f32 %v1639_v8, %v1630_v54  ;;  %v5942_v7 = vadd.f32 %v1675_v5, %v1666_v4  ;;  %1719 = vperm.xlu1 %4955, %v5930_v2   ;;  %4638 = vmatprep.subr.bf16.mxu0 %v5004_v16 }
 0x636   : > { %v1648_v12 = vadd.f32 %v1640_v60, %v1631_v32  ;;  %v5945_v10 = vadd.f32 %v1676_v61, %v1667_v22  ;;  %1724 = vperm.xlu0 %4954, %v5940_v59   ;;  %4639 = vmatpush3.bf16.msra.mxu0 %v5004_v16 }
 0x637   : > { %v5949_v47 = vadd.f32 %v5884_v11, %v1647_v62  ;;  %4640 = vmatprep.subr.bf16.mxu0 %v5005_v55 }
 0x638   : > { %v5952_v9 = vadd.f32 %v5884_v11, %v1648_v12  ;;  %v5008_v11 = vld [vmem:[#allocation3 + $0x160] sm:$0xff]  }
 0x639   : > { %1729 = vperm.xlu1 %4955, %v5949_v47  }
 0x63a   : > { %1734 = vperm.xlu0 %4954, %v5952_v9   ;;  %4641 = vmatpush3.bf16.msra.mxu0 %v5005_v55 }
 0x63b   : > { %4642 = vmatprep.subr.bf16.mxu0 %v5006_v25 }
 0x63e   : > { %4643 = vmatpush3.bf16.msra.mxu0 %v5006_v25 }
 0x63f   : > { %4644 = vmatprep.subr.bf16.mxu0 %v5007_v17 }
 0x642   : > { %4645 = vmatpush3.bf16.msra.mxu0 %v5007_v17 }
 0x643   : > { %4646 = vmatprep.subr.bf16.mxu0 %v5008_v11 }
 0x646   : > { %4647 = vmatpush3.bf16.msra.mxu0 %v5008_v11  ;;  %v5010_v11 = vld [vmem:[#allocation3 + $0x170] sm:$0xff]  }
 0x647   : > { %4648 = vmatprep.subr.bf16.mxu0 %v5009_v52 }
 0x64a   : > { %4649 = vmatpush3.bf16.msra.mxu0 %v5009_v52  ;;  %v5011_v52 = vld [vmem:[#allocation3 + $0x178] sm:$0xff]  }
 0x64b   : > { %4650 = vmatprep.subr.bf16.mxu0 %v5010_v11 }
 0x64e   : > { %4651 = vmatpush3.bf16.msra.mxu0 %v5010_v11 }
 0x64f   : > { %4652 = vmatprep.subr.bf16.mxu0 %v5011_v52 }
 0x652   : > { %4653 = vmatpush3.bf16.msra.mxu0 %v5011_v52 }
 0x6ac   : > { %v1700_v27 = vpop.permute.xlu1 %1699 }
 0x6ad   : > { %v1743_v29 = vmul.f32 %v4158_v3, %v1700_v27  ;;  %v1705_v49 = vpop.permute.xlu0 %1704  ;;  %v5013_v27 = vld [vmem:[#allocation3 + $0x188] sm:$0xff]  }
 0x6ae   : > { %v1744_v31 = vmul.f32 %v4158_v3, %v1705_v49  ;;  %v5016_v49 = vld [vmem:[#allocation3 + $0x1a0] sm:$0xff]  }
 0x6af   : > { %v5960_v35 = vadd.f32 %v4160_v20, %v1743_v29  ;;  %v5015_v29 = vld [vmem:[#allocation3 + $0x198] sm:$0xff]  }
 0x6b0   : > { %v5962_v38 = vadd.f32 %v4160_v20, %v1744_v31  ;;  %v1710_v40 = vpop.permute.xlu1 %1709  ;;  %v4162_v31 = vld [vmem:[%s6493_s5 + $0x4] ss:$0 sm:$0xff] }
 0x6b1   : > { %v1745_v39 = vmul.f32 %v4158_v3, %v1710_v40  ;;  %v1715_v23 = vpop.permute.xlu0 %1714  ;;  %v1767_v42 = vmax.f32 %v5960_v35, 0.0 }
 0x6b2   : > { %v1768_v24 = vmax.f32 %v5962_v38, 0.0  ;;  %v1746_v13 = vmul.f32 %v4158_v3, %v1715_v23 }
 0x6b3   : > { %v5966_v46 = vadd.f32 %v4160_v20, %v1745_v39 }
 0x6b4   : > { %v5968_v18 = vadd.f32 %v4160_v20, %v1746_v13  ;;  %v1720_v41 = vpop.permute.xlu1 %1719  ;;  %v1775_v53 = vpack.c.bf16 %v1768_v24, %v1767_v42 }
 0x6b5   : > { %v1747_v54 = vmul.f32 %v4158_v3, %v1720_v41  ;;  %v1725_v63 = vpop.permute.xlu0 %1724  ;;  %v1769_v44 = vmax.f32 %v5966_v46, 0.0 }
 0x6b6   : > { %v1770_v14 = vmax.f32 %v5968_v18, 0.0  ;;  %v1748_v0 = vmul.f32 %v4158_v3, %v1725_v63  ;;  %4630 = vmatprep.mubr.bf16.mxu1 %v1775_v53 }
 0x6b7   : > { %v5972_v57 = vadd.f32 %v4160_v20, %v1747_v54 }
 0x6b8   : > { %v1776_v4 = vpack.c.bf16 %v1770_v14, %v1769_v44  ;;  %v5974_v8 = vadd.f32 %v4160_v20, %v1748_v0  ;;  %v1730_v5 = vpop.permute.xlu1 %1729 }
 0x6b9   : > { %v1749_v32 = vmul.f32 %v4158_v3, %v1730_v5  ;;  %v1735_v22 = vpop.permute.xlu0 %1734  ;;  %v1771_v60 = vmax.f32 %v5972_v57, 0.0 }
 0x6ba   : > { %v1772_v61 = vmax.f32 %v5974_v8, 0.0  ;;  %v1750_v62 = vmul.f32 %v4158_v3, %v1735_v22  ;;  %4631 = vmatmul.mubr.bf16.vlgmr.msra.gmra.mrb[16].mxu1 %v1776_v4  ;;  %v5012_v3 = vld [vmem:[#allocation3 + $0x180] sm:$0xff]  }
 0x6bb   : > { %v5978_v12 = vadd.f32 %v4160_v20, %v1749_v32  ;;  %4662 = vmatprep.subr.bf16.mxu1 %v5012_v3 }
 0x6bc   : > { %v5980_v43 = vadd.f32 %v4160_v20, %v1750_v62  ;;  %v1777_v16 = vpack.c.bf16 %v1772_v61, %v1771_v60  ;;  %4663 = vmatpush3.bf16.msra.mxu1 %v5012_v3  ;;  %v5014_v20 = vld [vmem:[#allocation3 + $0x190] sm:$0xff]  }
 0x6bd   : > { %v1773_v55 = vmax.f32 %v5978_v12, 0.0  ;;  %4664 = vmatprep.subr.bf16.mxu1 %v5013_v27 }
 0x6be   : > { %v1774_v25 = vmax.f32 %v5980_v43, 0.0  ;;  %4634 = vmatprep.mubr.bf16.mxu1 %v1777_v16 }
 0x6c0   : > { %v1778_v17 = vpack.c.bf16 %v1774_v25, %v1773_v55  ;;  %4665 = vmatpush3.bf16.msra.mxu1 %v5013_v27 }
 0x6c1   : > { %4666 = vmatprep.subr.bf16.mxu1 %v5014_v20 }
 0x6c2   : > { %4635 = vmatmul.mubr.bf16.gmra.mrb[20].mxu1 %v1778_v17 }
 0x6c4   : > { %4667 = vmatpush3.bf16.msra.mxu1 %v5014_v20  ;;  %v5017_v20 = vld [vmem:[#allocation3 + $0x1a8] sm:$0xff]  }
 0x6c5   : > { %4668 = vmatprep.subr.bf16.mxu1 %v5015_v29 }
 0x6c8   : > { %4669 = vmatpush3.bf16.msra.mxu1 %v5015_v29  ;;  %v5018_v29 = vld [vmem:[#allocation3 + $0x1b0] sm:$0xff]  }
 0x6c9   : > { %4670 = vmatprep.subr.bf16.mxu1 %v5016_v49 }
 0x6cc   : > { %4671 = vmatpush3.bf16.msra.mxu1 %v5016_v49  ;;  %v5019_v49 = vld [vmem:[#allocation3 + $0x1b8] sm:$0xff]  }
 0x6cd   : > { %4672 = vmatprep.subr.bf16.mxu1 %v5017_v20 }
 0x6d0   : > { %4673 = vmatpush3.bf16.msra.mxu1 %v5017_v20 }
 0x6d1   : > { %4674 = vmatprep.subr.bf16.mxu1 %v5018_v29 }
 0x6d4   : > { %4675 = vmatpush3.bf16.msra.mxu1 %v5018_v29 }
 0x6d5   : > { %4676 = vmatprep.subr.bf16.mxu1 %v5019_v49 }
 0x6d8   : > { %4677 = vmatpush3.bf16.msra.mxu1 %v5019_v49 }
 0x78d   : > { %v4632_v40 = vpop.f32.mrb[16].mxu1 }
 0x78e   : > { %v1895_v39 = vadd.f32 %v4632_v40, %v4162_v31  ;;  %v1886_v23 = vpop.f32.mrb[17].mxu1  ;;  %v5020_v40 = vld [vmem:[#allocation3 + $0x1c0] sm:$0xff]  }
 0x78f   : > { %v1887_v42 = vadd.f32 %v4162_v31, %v1886_v23  ;;  %v4633_v24 = vpop.f32.mrb[18].mxu1  ;;  %4686 = vmatprep.subr.bf16.mxu0 %v5020_v40  ;;  %v5023_v23 = vld [vmem:[#allocation3 + $0x1d8] sm:$0xff]  }
 0x790   : > { %v1898_v13 = vadd.f32 %v4633_v24, %v4162_v31  ;;  %v1889_v41 = vpop.f32.mrb[19].mxu1  ;;  %v1919_v54 = vmax.f32 %v1895_v39, 0.0  ;;  %v5021_v39 = vld [vmem:[#allocation3 + $0x1c8] sm:$0xff]  }
 0x791   : > { %v1890_v53 = vadd.f32 %v4162_v31, %v1889_v41  ;;  %v1917_v44 = vmax.f32 %v1887_v42, 0.0  ;;  %v5024_v42 = vld [vmem:[#allocation3 + $0x1e0] sm:$0xff]   ;;  %v5025_v24 = vld [vmem:[#allocation3 + $0x1e8] sm:$0xff]  }
 0x792   : > { %v1920_v63 = vmax.f32 %v1898_v13, 0.0  ;;  %v4172_v13 = vld [vmem:[%s6493_s5 + $0x5] ss:$0 sm:$0xff] }
 0x793   : > { %v1918_v14 = vmax.f32 %v1890_v53, 0.0  ;;  %v4182_v53 = vld [vmem:[%s5633_s25 + $0x2] ss:$0 sm:$0xff] }
 0x794   : > { %v1926_v0 = vpack.c.bf16 %v1920_v63, %v1919_v54 }
 0x795   : > { %v1925_v4 = vpack.c.bf16 %v1918_v14, %v1917_v44  ;;  %v4636_v5 = vpop.f32.mrb[20].mxu1 }
 0x796   : > { %v1911_v32 = vadd.f32 %v4636_v5, %v4162_v31  ;;  %v1902_v22 = vpop.f32.mrb[21].mxu1 }
 0x797   : > { %v1903_v60 = vadd.f32 %v4162_v31, %v1902_v22  ;;  %v4637_v61 = vpop.f32.mrb[22].mxu1  ;;  %4654 = vmatprep.mubr.bf16.mxu0 %v1925_v4 }
 0x798   : > { %v1914_v62 = vadd.f32 %v4637_v61, %v4162_v31  ;;  %v1905_v16 = vpop.f32.mrb[23].mxu1  ;;  %4655 = vmatmul.mubr.bf16.vlgmr.msra.gmra.mrb[24].mxu0 %v1926_v0  ;;  %v1923_v25 = vmax.f32 %v1911_v32, 0.0 }
 0x799   : > { %v1906_v55 = vadd.f32 %v4162_v31, %v1905_v16  ;;  %v1921_v11 = vmax.f32 %v1903_v60, 0.0  ;;  %4687 = vmatpush3.bf16.msra.mxu0 %v5020_v40  ;;  %v5022_v31 = vld [vmem:[#allocation3 + $0x1d0] sm:$0xff]  }
 0x79a   : > { %v1924_v17 = vmax.f32 %v1914_v62, 0.0  ;;  %4688 = vmatprep.subr.bf16.mxu0 %v5021_v39 }
 0x79b   : > { %v1922_v52 = vmax.f32 %v1906_v55, 0.0 }
 0x79c   : > { %v1928_v3 = vpack.c.bf16 %v1924_v17, %v1923_v25 }
 0x79d   : > { %v1927_v27 = vpack.c.bf16 %v1922_v52, %v1921_v11  ;;  %4689 = vmatpush3.bf16.msra.mxu0 %v5021_v39 }
 0x79e   : > { %4690 = vmatprep.subr.bf16.mxu0 %v5022_v31 }
 0x79f   : > { %4658 = vmatprep.mubr.bf16.mxu0 %v1927_v27 }
 0x7a0   : > { %4659 = vmatmul.mubr.bf16.gmra.mrb[28].mxu0 %v1928_v3 }
 0x7a1   : > { %4691 = vmatpush3.bf16.msra.mxu0 %v5022_v31 }
 0x7a2   : > { %4692 = vmatprep.subr.bf16.mxu0 %v5023_v23 }
 0x7a5   : > { %4693 = vmatpush3.bf16.msra.mxu0 %v5023_v23 }
 0x7a6   : > { %4694 = vmatprep.subr.bf16.mxu0 %v5024_v42 }
 0x7a9   : > { %4695 = vmatpush3.bf16.msra.mxu0 %v5024_v42 }
 0x7aa   : > { %4696 = vmatprep.subr.bf16.mxu0 %v5025_v24 }
 0x7ad   : > { %4697 = vmatpush3.bf16.msra.mxu0 %v5025_v24 }
 0x86b   : > { %v4656_v41 = vpop.f32.mrb[24].mxu0 }
 0x86c   : > { %v2045_v54 = vadd.f32 %v4656_v41, %v4172_v13  ;;  %v2036_v63 = vpop.f32.mrb[25].mxu0 }
 0x86d   : > { %v2037_v44 = vadd.f32 %v4172_v13, %v2036_v63  ;;  %v4657_v14 = vpop.f32.mrb[26].mxu0 }
 0x86e   : > { %v2077_v0 = vmul.f32 %v4182_v53, %v2045_v54  ;;  %v2048_v4 = vadd.f32 %v4657_v14, %v4172_v13  ;;  %v2039_v5 = vpop.f32.mrb[27].mxu0 }
 0x86f   : > { %v2075_v32 = vmul.f32 %v4182_v53, %v2037_v44  ;;  %v2040_v22 = vadd.f32 %v4172_v13, %v2039_v5  ;;  %v5029_v5 = vld [vmem:[%s6494_s6 + $0x48] sm:$0xff]  }
 0x870   : > { %v2078_v60 = vmul.f32 %v4182_v53, %v2048_v4  ;;  %v5995_v16 = vadd.f32 %v2077_v0, %v5966_v46 }
 0x871   : > { %v5992_v61 = vadd.f32 %v2075_v32, %v5960_v35  ;;  %v2076_v62 = vmul.f32 %v4182_v53, %v2040_v22  ;;  %v5030_v32 = vld [vmem:[%s6494_s6 + $0x50] sm:$0xff]   ;;  %v5031_v22 = vld [vmem:[%s6494_s6 + $0x58] sm:$0xff]  }
 0x872   : > { %v5998_v55 = vadd.f32 %v2078_v60, %v5968_v18  ;;  %v2093_v46 = vmax.f32 %v5995_v16, 0.0  ;;  %v5032_v60 = vld [vmem:[%s6494_s6 + $0x60] sm:$0xff]  }
 0x873   : > { %v6001_v25 = vadd.f32 %v2076_v62, %v5962_v38  ;;  %v4660_v17 = vpop.f32.mrb[28].mxu0  ;;  %v2091_v35 = vmax.f32 %v5992_v61, 0.0  ;;  %v4184_v62 = vld [vmem:[%s6493_s5 + $0x6] ss:$0 sm:$0xff] }
 0x874   : > { %v2094_v11 = vmax.f32 %v5998_v55, 0.0  ;;  %v2061_v52 = vadd.f32 %v4660_v17, %v4172_v13  ;;  %v2052_v3 = vpop.f32.mrb[29].mxu0 }
 0x875   : > { %v2053_v27 = vadd.f32 %v4172_v13, %v2052_v3  ;;  %v4661_v20 = vpop.f32.mrb[30].mxu0  ;;  %v2092_v29 = vmax.f32 %v6001_v25, 0.0 }
 0x876   : > { %v2081_v49 = vmul.f32 %v4182_v53, %v2061_v52  ;;  %v2064_v40 = vadd.f32 %v4661_v20, %v4172_v13  ;;  %v2055_v18 = vpop.f32.mrb[31].mxu0  ;;  %v2100_v23 = vpack.c.bf16 %v2094_v11, %v2093_v46 }
 0x877   : > { %v2079_v39 = vmul.f32 %v4182_v53, %v2053_v27  ;;  %v2056_v31 = vadd.f32 %v4172_v13, %v2055_v18  ;;  %v2099_v38 = vpack.c.bf16 %v2092_v29, %v2091_v35 }
 0x878   : > { %v2082_v42 = vmul.f32 %v4182_v53, %v2064_v40  ;;  %v6011_v54 = vadd.f32 %v2081_v49, %v5978_v12  ;;  %v5026_v12 = vld [vmem:[#allocation3 + $0x1f0] sm:$0xff]  }
 0x879   : > { %v6008_v24 = vadd.f32 %v2079_v39, %v5972_v57  ;;  %v2080_v41 = vmul.f32 %v4182_v53, %v2056_v31  ;;  %4678 = vmatprep.mubr.bf16.mxu1 %v2099_v38  ;;  %4698 = vmatprep.subr.bf16.mxu0 %v5026_v12 }
 0x87a   : > { %v6014_v63 = vadd.f32 %v2082_v42, %v5980_v43  ;;  %4679 = vmatmul.mubr.bf16.vlgmr.msra.gmra.mrb[24].mxu1 %v2100_v23  ;;  %v2097_v57 = vmax.f32 %v6011_v54, 0.0  ;;  %4699 = vmatpush3.bf16.msra.mxu0 %v5026_v12  ;;  %v5027_v43 = vld [vmem:[#allocation3 + $0x1f8] sm:$0xff]  }
 0x87b   : > { %v6017_v44 = vadd.f32 %v2080_v41, %v5974_v8  ;;  %v2095_v14 = vmax.f32 %v6008_v24, 0.0  ;;  %4700 = vmatprep.subr.bf16.mxu0 %v5027_v43  ;;  %v5028_v8 = vld [vmem:[%s6494_s6 + $0x40] sm:$0xff]  }
 0x87c   : > { %v2098_v13 = vmax.f32 %v6014_v63, 0.0  ;;  %4710 = vmatprep.subr.bf16.mxu1 %v5028_v8 }
 0x87d   : > { %v2096_v0 = vmax.f32 %v6017_v44, 0.0  ;;  %4711 = vmatpush3.bf16.msra.mxu1 %v5028_v8 }
 0x87e   : > { %v2102_v4 = vpack.c.bf16 %v2098_v13, %v2097_v57  ;;  %4701 = vmatpush3.bf16.msra.mxu0 %v5027_v43  ;;  %4712 = vmatprep.subr.bf16.mxu1 %v5029_v5 }
 0x87f   : > { %v2101_v53 = vpack.c.bf16 %v2096_v0, %v2095_v14 }
 0x881   : > { %4682 = vmatprep.mubr.bf16.mxu1 %v2101_v53  ;;  %4713 = vmatpush3.bf16.msra.mxu1 %v5029_v5 }
 0x882   : > { %4683 = vmatmul.mubr.bf16.gmra.mrb[28].mxu1 %v2102_v4  ;;  %4714 = vmatprep.subr.bf16.mxu1 %v5030_v32 }
 0x885   : > { %4715 = vmatpush3.bf16.msra.mxu1 %v5030_v32  ;;  %v5033_v32 = vld [vmem:[%s6494_s6 + $0x68] sm:$0xff]  }
 0x886   : > { %4716 = vmatprep.subr.bf16.mxu1 %v5031_v22 }
 0x889   : > { %4717 = vmatpush3.bf16.msra.mxu1 %v5031_v22  ;;  %v5034_v22 = vld [vmem:[%s6494_s6 + $0x70] sm:$0xff]  }
 0x88a   : > { %4718 = vmatprep.subr.bf16.mxu1 %v5032_v60 }
 0x88d   : > { %4719 = vmatpush3.bf16.msra.mxu1 %v5032_v60  ;;  %v5035_v60 = vld [vmem:[%s6494_s6 + $0x78] sm:$0xff]  }
 0x88e   : > { %4720 = vmatprep.subr.bf16.mxu1 %v5033_v32 }
 0x891   : > { %4721 = vmatpush3.bf16.msra.mxu1 %v5033_v32 }
 0x892   : > { %4722 = vmatprep.subr.bf16.mxu1 %v5034_v22 }
 0x895   : > { %4723 = vmatpush3.bf16.msra.mxu1 %v5034_v22 }
 0x896   : > { %4724 = vmatprep.subr.bf16.mxu1 %v5035_v60 }
 0x899   : > { %4725 = vmatpush3.bf16.msra.mxu1 %v5035_v60 }
 0x94d   : > { %v4680_v17 = vpop.f32.mrb[24].mxu1 }
 0x94e   : > { %v2219_v11 = vadd.f32 %v4680_v17, %v4184_v62  ;;  %v2210_v52 = vpop.f32.mrb[25].mxu1 }
 0x94f   : > { %v2211_v3 = vadd.f32 %v4184_v62, %v2210_v52  ;;  %v4681_v27 = vpop.f32.mrb[26].mxu1 }
 0x950   : > { %v2222_v20 = vadd.f32 %v4681_v27, %v4184_v62  ;;  %v2213_v35 = vpop.f32.mrb[27].mxu1  ;;  %v2243_v46 = vmax.f32 %v2219_v11, 0.0  ;;  %v4204_v11 = vld [vmem:[%s5633_s25 + $0x3] ss:$0 sm:$0xff] }
 0x951   : > { %v2214_v29 = vadd.f32 %v4184_v62, %v2213_v35  ;;  %v2241_v40 = vmax.f32 %v2211_v3, 0.0 }
 0x952   : > { %v2244_v49 = vmax.f32 %v2222_v20, 0.0 }
 0x953   : > { %v2242_v18 = vmax.f32 %v2214_v29, 0.0 }
 0x954   : > { %v2250_v39 = vpack.c.bf16 %v2244_v49, %v2243_v46 }
 0x955   : > { %v2249_v31 = vpack.c.bf16 %v2242_v18, %v2241_v40  ;;  %v4684_v38 = vpop.f32.mrb[28].mxu1 }
 0x956   : > { %v2235_v23 = vadd.f32 %v4684_v38, %v4184_v62  ;;  %v2226_v42 = vpop.f32.mrb[29].mxu1 }
 0x957   : > { %v2227_v41 = vadd.f32 %v4184_v62, %v2226_v42  ;;  %v4685_v13 = vpop.f32.mrb[30].mxu1  ;;  %4702 = vmatprep.mubr.bf16.mxu0 %v2249_v31 }
 0x958   : > { %v2238_v14 = vadd.f32 %v4685_v13, %v4184_v62  ;;  %v2229_v0 = vpop.f32.mrb[31].mxu1  ;;  %4703 = vmatmul.mubr.bf16.vlgmr.msra.gmra.mrb[32].mxu0 %v2250_v39  ;;  %v2247_v53 = vmax.f32 %v2235_v23, 0.0 }
 0x959   : > { %v2230_v57 = vadd.f32 %v4184_v62, %v2229_v0  ;;  %v2245_v12 = vmax.f32 %v2227_v41, 0.0  ;;  %v4194_v62 = vld [vmem:[%s6493_s5 + $0x7] ss:$0 sm:$0xff] }
 0x95a   : > { %v2248_v4 = vmax.f32 %v2238_v14, 0.0 }
 0x95b   : > { %v2246_v43 = vmax.f32 %v2230_v57, 0.0 }
 0x95c   : > { %v2252_v8 = vpack.c.bf16 %v2248_v4, %v2247_v53 }
 0x95d   : > { %v2251_v5 = vpack.c.bf16 %v2246_v43, %v2245_v12 }
 0x95f   : > { %4706 = vmatprep.mubr.bf16.mxu0 %v2251_v5 }
 0x960   : > { %4707 = vmatmul.mubr.bf16.gmra.mrb[36].mxu0 %v2252_v8 }
 0xa2b   : > { %v4704_v17 = vpop.f32.mrb[32].mxu0 }
 0xa2c   : > { %v2369_v52 = vadd.f32 %v4704_v17, %v4194_v62  ;;  %v2360_v3 = vpop.f32.mrb[33].mxu0 }
 0xa2d   : > { %v2361_v27 = vadd.f32 %v4194_v62, %v2360_v3  ;;  %v4705_v20 = vpop.f32.mrb[34].mxu0 }
 0xa2e   : > { %v2401_v35 = vmul.f32 %v4204_v11, %v2369_v52  ;;  %v2372_v29 = vadd.f32 %v4705_v20, %v4194_v62  ;;  %v2363_v46 = vpop.f32.mrb[35].mxu0 }
 0xa2f   : > { %v2399_v49 = vmul.f32 %v4204_v11, %v2361_v27  ;;  %v2364_v40 = vadd.f32 %v4194_v62, %v2363_v46 }
 0xa30   : > { %v2402_v18 = vmul.f32 %v4204_v11, %v2372_v29  ;;  %v2409_v31 = vadd.f32 %v2401_v35, %v5995_v16 }
 0xa31   : > { %v2400_v39 = vmul.f32 %v4204_v11, %v2364_v40  ;;  %v2407_v23 = vadd.f32 %v2399_v49, %v5992_v61 }
 0xa32   : > { %v2410_v38 = vadd.f32 %v2402_v18, %v5998_v55 }
 0xa33   : > { %v2408_v42 = vadd.f32 %v2400_v39, %v6001_v25  ;;  %v4708_v41 = vpop.f32.mrb[36].mxu0 }
 0xa34   : > { %v2416_v13 = vpack.c.bf16 %v2410_v38, %v2409_v31  ;;  %v2385_v14 = vadd.f32 %v4708_v41, %v4194_v62  ;;  %v2376_v0 = vpop.f32.mrb[37].mxu0 }
 0xa35   : > { %v2377_v57 = vadd.f32 %v4194_v62, %v2376_v0  ;;  %v4709_v53 = vpop.f32.mrb[38].mxu0  ;;  %v2415_v4 = vpack.c.bf16 %v2408_v42, %v2407_v23 }
 0xa36   : > { %v2405_v12 = vmul.f32 %v4204_v11, %v2385_v14  ;;  %v2388_v43 = vadd.f32 %v4709_v53, %v4194_v62  ;;  %v2379_v8 = vpop.f32.mrb[39].mxu0 }
 0xa37   : > { %v2403_v5 = vmul.f32 %v4204_v11, %v2377_v57  ;;  %v2380_v32 = vadd.f32 %v4194_v62, %v2379_v8  ;;  %4726 = vmatprep.mubr.bf16.mxu1 %v2415_v4  ;;  %v4222_v62 = vld [vmem:[%s6495_s7 + $0x1] ss:$0 sm:$0xff] }
 0xa38   : > { %v2406_v16 = vmul.f32 %v4204_v11, %v2388_v43  ;;  %4727 = vmatmul.mubr.bf16.vlgmr.msra.gmra.mrb[32].mxu1 %v2416_v13  ;;  %v2413_v61 = vadd.f32 %v2405_v12, %v6011_v54 }
 0xa39   : > { %v2404_v55 = vmul.f32 %v4204_v11, %v2380_v32  ;;  %v2411_v22 = vadd.f32 %v2403_v5, %v6008_v24  ;;  %v5036_v32 = vld [vmem:[#allocation3] sm:$0xff]  }
 0xa3a   : > { %v2414_v25 = vadd.f32 %v2406_v16, %v6014_v63  ;;  %v5037_v16 = vld [vmem:[#allocation3 + $0x8] sm:$0xff]   ;;  %4734 = vmatprep.subr.bf16.mxu0 %v5036_v32 }
 0xa3b   : > { %v2412_v60 = vadd.f32 %v2404_v55, %v6017_v44  ;;  %4735 = vmatpush3.bf16.msra.mxu0 %v5036_v32 }
 0xa3c   : > { %v2418_v17 = vpack.c.bf16 %v2414_v25, %v2413_v61  ;;  %4736 = vmatprep.subr.bf16.mxu0 %v5037_v16 }
 0xa3d   : > { %v2417_v52 = vpack.c.bf16 %v2412_v60, %v2411_v22 }
 0xa3f   : > { %4730 = vmatprep.mubr.bf16.mxu1 %v2417_v52  ;;  %4737 = vmatpush3.bf16.msra.mxu0 %v5037_v16 }
 0xa40   : > { %4731 = vmatmul.mubr.bf16.gmra.mrb[36].mxu1 %v2418_v17  ;;  %v5038_v17 = vld [vmem:[#allocation3 + $0x10] sm:$0xff]  }
 0xa41   : > { %4738 = vmatprep.subr.bf16.mxu0 %v5038_v17 }
 0xa43   : > { %4739 = vmatpush3.bf16.msra.mxu0 %v5038_v17 }
 0xb0b   : > { %v4728_v3 = vpop.f32.mrb[32].mxu1 }
 0xb0c   : > { %v2535_v27 = vadd.f32 %v4728_v3, %v4222_v62  ;;  %v2526_v20 = vpop.f32.mrb[33].mxu1 }
 0xb0d   : > { %v2527_v11 = vadd.f32 %v4222_v62, %v2526_v20  ;;  %v4729_v35 = vpop.f32.mrb[34].mxu1 }
 0xb0e   : > { %v2559_v54 = vadd.f32 2.0, %v2535_v27  ;;  %v2538_v29 = vadd.f32 %v4729_v35, %v4222_v62  ;;  %v2529_v63 = vpop.f32.mrb[35].mxu1 }
 0xb0f   : > { %v2557_v46 = vadd.f32 2.0, %v2527_v11  ;;  %v2530_v24 = vadd.f32 %v4222_v62, %v2529_v63  ;;  %2661 = vrot.lane.b32.xlu1 %v2527_v11, %s5364_s29  ;;  %v5039_v11 = vld [vmem:[#allocation3 + $0x18] sm:$0xff]   ;;  %v5040_v63 = vld [vmem:[#allocation3 + $0x20] sm:$0xff]  }
 0xb10   : > { %v4233_v44 = vmul.f32 -1.442695, %v2559_v54  ;;  %v2560_v49 = vadd.f32 2.0, %v2538_v29  ;;  %4740 = vmatprep.subr.bf16.mxu0 %v5039_v11 }
 0xb11   : > { %v4231_v40 = vmul.f32 -1.442695, %v2557_v46  ;;  %v2558_v18 = vadd.f32 2.0, %v2530_v24  ;;  %2663 = vrot.lane.b32.xlu0 %v2530_v24, %s5364_s29  ;;  %4741 = vmatpush3.bf16.msra.mxu0 %v5039_v11 }
 0xb12   : > { %5108 = vpow2.f32 %v4233_v44  ;;  %v4234_v39 = vmul.f32 -1.442695, %v2560_v49  ;;  %4742 = vmatprep.subr.bf16.mxu0 %v5040_v63 }
 0xb13   : > { %5110 = vpow2.f32 %v4231_v40  ;;  %v4232_v31 = vmul.f32 -1.442695, %v2558_v18  ;;  %2665 = vrot.lane.b32.xlu1 %v2535_v27, %s5364_s29  ;;  %v4732_v38 = vpop.f32.mrb[36].mxu1  ;;  %v1686_v40 = vstv %s4156_s9 }
 0xb14   : > { %5112 = vpow2.f32 %v4234_v39  ;;  %v2551_v23 = vadd.f32 %v4732_v38, %v4222_v62  ;;  %v2542_v42 = vpop.f32.mrb[37].mxu1  ;;  %v1692_v17 = vadd.f32 %v1686_v40, %v5926_v1 }
 0xb15   : > { %5114 = vpow2.f32 %v4232_v31  ;;  %v2543_v41 = vadd.f32 %v4222_v62, %v2542_v42  ;;  %2667 = vrot.lane.b32.xlu0 %v2538_v29, %s5364_s29  ;;  %v4733_v13 = vpop.f32.mrb[38].mxu1  ;;  %4743 = vmatpush3.bf16.msra.mxu0 %v5040_v63 }
 0xb16   : > { %v2563_v14 = vadd.f32 2.0, %v2551_v23  ;;  %v2554_v0 = vadd.f32 %v4733_v13, %v4222_v62  ;;  %v2545_v57 = vpop.f32.mrb[39].mxu1  ;;  %v1690_v13 = vadd.f32 %v1686_v40, %v5866_v34  ;;  %v1693_v34 = vadd.f32 %v1686_v40, %v5942_v7 }
 0xb17   : > { %v2561_v53 = vadd.f32 2.0, %v2543_v41  ;;  %v2546_v4 = vadd.f32 %v4222_v62, %v2545_v57  ;;  %2669 = vrot.lane.b32.xlu1 %v2543_v41, %s5364_s29 }
 0xb18   : > { %v4237_v12 = vmul.f32 -1.442695, %v2563_v14  ;;  %v2564_v43 = vadd.f32 2.0, %v2554_v0 }
 0xb19   : > { %v4235_v8 = vmul.f32 -1.442695, %v2561_v53  ;;  %v2562_v5 = vadd.f32 2.0, %v2546_v4  ;;  %2671 = vrot.lane.b32.xlu0 %v2546_v4, %s5364_s29 }
 0xb1a   : > { %5116 = vpow2.f32 %v4237_v12  ;;  %v4238_v55 = vmul.f32 -1.442695, %v2564_v43 }
 0xb1b   : > { %5118 = vpow2.f32 %v4235_v8  ;;  %v4236_v61 = vmul.f32 -1.442695, %v2562_v5  ;;  %2673 = vrot.lane.b32.xlu1 %v2551_v23, %s5364_s29 }
 0xb1c   : > { %v5109_v25 = vpop.eup %5108  ;;  %5120 = vpow2.f32 %v4238_v55 }
 0xb1d   : > { %v5111_v22 = vpop.eup %5110  ;;  %v2591_v60 = vadd.f32 1.0, %v5109_v25  ;;  %5122 = vpow2.f32 %v4236_v61  ;;  %2675 = vrot.lane.b32.xlu0 %v2554_v0, %s5364_s29  ;;  %v1694_v25 = vadd.f32 %v1686_v40, %v5945_v10 }
 0xb1e   : > { %v5113_v52 = vpop.eup %5112  ;;  %v2589_v62 = vadd.f32 1.0, %v5111_v22 }
 0xb1f   : > { %v5115_v3 = vpop.eup %5114  ;;  %5124 = vrcp.f32 %v2591_v60  ;;  %v2592_v27 = vadd.f32 1.0, %v5113_v52 }
 0xb20   : > { %5126 = vrcp.f32 %v2589_v62  ;;  %v2590_v20 = vadd.f32 1.0, %v5115_v3 }
 0xb21   : > { %5128 = vrcp.f32 %v2592_v27 }
 0xb22   : > { %5130 = vrcp.f32 %v2590_v20 }
 0xb23   : > { %5132 = vlog2.f32 %v5812_v58 }
 0xb24   : > { %v5117_v35 = vpop.eup %5116  ;;  %5134 = vlog2.f32 %v5839_v28  ;;  %v1689_v28 = vadd.f32 %v1686_v40, %v5857_v45  ;;  %v1688_v45 = vadd.f32 %v1686_v40, %v5887_v50  ;;  %v1691_v50 = vadd.f32 %v1686_v40, %v5920_v48 }
 0xb25   : > { %v5119_v54 = vpop.eup %5118  ;;  %v2595_v29 = vadd.f32 1.0, %v5117_v35  ;;  %5136 = vlog2.f32 %v5821_v6  ;;  %v1687_v6 = vadd.f32 %v1686_v40, %v5881_v56 }
 0xb26   : > { %v5121_v46 = vpop.eup %5120  ;;  %v2593_v24 = vadd.f32 1.0, %v5119_v54 }
 0xb27   : > { %v5123_v44 = vpop.eup %5122  ;;  %5138 = vrcp.f32 %v2595_v29  ;;  %v2596_v49 = vadd.f32 1.0, %v5121_v46 }
 0xb28   : > { %5140 = vrcp.f32 %v2593_v24  ;;  %v2594_v18 = vadd.f32 1.0, %v5123_v44 }
 0xb29   : > { %v5125_v39 = vpop.eup %5124  ;;  %5142 = vrcp.f32 %v2596_v49 }
 0xb2a   : > { %v5127_v58 = vpop.eup %5126  ;;  %5144 = vrcp.f32 %v2594_v18  ;;  %v2615_v31 = vadd.f32 0.001, %v5125_v39 }
 0xb2b   : > { %v5129_v38 = vpop.eup %5128  ;;  %5146 = vlog2.f32 %v5841_v36  ;;  %v2613_v23 = vadd.f32 0.001, %v5127_v58 }
 0xb2c   : > { %v5131_v42 = vpop.eup %5130  ;;  %5148 = vlog2.f32 %v2615_v31  ;;  %v6079_v41 = vmul.f32 %v2615_v31, %v1689_v28  ;;  %v2616_v14 = vadd.f32 0.001, %v5129_v38 }
 0xb2d   : > { %5150 = vlog2.f32 %v2613_v23  ;;  %v6082_v0 = vmul.f32 %v2613_v23, %v1687_v6  ;;  %v2614_v57 = vadd.f32 0.001, %v5131_v42  ;;  %v5133_v53 = vpop.eup %5132 }
 0xb2e   : > { %5152 = vlog2.f32 %v2616_v14  ;;  %v6085_v36 = vmul.f32 %v2616_v14, %v1690_v13  ;;  %v5135_v56 = vpop.eup %5134  ;;  %v2694_v13 = vstv %s4239_s13  ;;  %s6443_s13 = scalar_lea.hbm %s6498_s10, %s4310_s11 }
 0xb2f   : > { %5154 = vlog2.f32 %v2614_v57  ;;  %v6087_v4 = vmul.f32 %v2614_v57, %v1688_v45  ;;  %v5137_v12 = vpop.eup %5136  ;;  %v1528_v20 = vmul.f32 0.6931472, %v5135_v56  ;;  %v2697_v14 = vmul.f32 %v2694_v13, %v5914_v15 }
 0xb30   : > { %5156 = vlog2.f32 %v5868_v51  ;;  %v1534_v54 = vmul.f32 0.6931472, %v5137_v12  ;;  %v2704_v45 = vstv %s4240_s22  ;;  %v2695_v57 = vmul.f32 %v2694_v13, %v5894_v26  ;;  %s4245_s22 = sld [smem:[#allocation7 + $0x5]] }
 0xb31   : > { %v5139_v43 = vpop.eup %5138  ;;  %5158 = vlog2.f32 %v5877_v19  ;;  %v1532_v19 = vmul.f32 0.6931472, %v5133_v53  ;;  %v2698_v53 = vmul.f32 %v2694_v13, %v5918_v21  ;;  %v2696_v56 = vmul.f32 %v2694_v13, %v5899_v30 }
 0xb32   : > { %v5141_v8 = vpop.eup %5140  ;;  %v6090_v5 = vadd.f32 0.001, %v5139_v43  ;;  %v2707_v12 = vadd.f32 %v2704_v45, %v2697_v14  ;;  %v2705_v43 = vadd.f32 %v2704_v45, %v2695_v57  ;;  %v6132_v15 = vstv %s4243_s30 }
 0xb33   : > { %v5143_v32 = vpop.eup %5142  ;;  %v2617_v16 = vadd.f32 0.001, %v5141_v8  ;;  %v2708_v8 = vadd.f32 %v2704_v45, %v2698_v53 }
 0xb34   : > { %v5145_v55 = vpop.eup %5144  ;;  %v6096_v61 = vmul.f32 %v6090_v5, %v1693_v34  ;;  %v6099_v22 = vadd.f32 0.001, %v5143_v32  ;;  %v6125_v34 = vstv %s2713_s14  ;;  %v6127_v32 = vstv %s4242_s21  ;;  %s4308_s14 = sld [smem:[#allocation7 + $0x7]] }
 0xb35   : > { %v5147_v60 = vpop.eup %5146  ;;  %5160 = vlog2.f32 %v2617_v16  ;;  %v6101_v7 = vmul.f32 %v2617_v16, %v1691_v50  ;;  %v2618_v51 = vadd.f32 0.001, %v5145_v55  ;;  %v2706_v50 = vadd.f32 %v2704_v45, %v2696_v56  ;;  %s3840_s21 = sld [smem:[#allocation2]] }
 0xb36   : > { %v5149_v52 = vpop.eup %5148  ;;  %v6105_v48 = vmul.f32 %v6099_v22, %v1694_v25  ;;  %v1530_v1 = vmul.f32 0.6931472, %v5147_v60  ;;  %v2699_v16 = vmul.f32 %v2694_v13, %v5930_v2  ;;  %v6130_v55 = vstv %s4241_s23  ;;  %s431_s23 = sand.u32 1, %s5341_s16  }
 0xb37   : > { %v5151_v62 = vpop.eup %5150  ;;  %v2626_v3 = vmul.f32 0.6931472, %v5149_v52  ;;  %5162 = vlog2.f32 %v2618_v51  ;;  %v6107_v27 = vmul.f32 %v2618_v51, %v1692_v17  ;;  %v2720_v30 = vmul.f32 %v6125_v34, %v2707_v12  ;;  %s4058_s30 = sshll.u32 %s431_s23, 3 }
 0xb38   : > { %v5153_v10 = vpop.eup %5152  ;;  %v2622_v11 = vmul.f32 0.6931472, %v5151_v62  ;;  %v2756_v25 = vmul.f32 %v6127_v32, %v2707_v12  ;;  %v2700_v60 = vmul.f32 %v2694_v13, %v5940_v59  ;;  %v2718_v17 = vmul.f32 %v6125_v34, %v2705_v43 }
 0xb39   : > { %v5155_v35 = vpop.eup %5154  ;;  %v2628_v29 = vmul.f32 0.6931472, %v5153_v10  ;;  %v6109_v63 = vadd.f32 %v2626_v3, %v1532_v19  ;;  %v2754_v51 = vmul.f32 %v6127_v32, %v2705_v43  ;;  %v2721_v2 = vmul.f32 %v6125_v34, %v2708_v8 }
 0xb3a   : > { %v2624_v46 = vmul.f32 0.6931472, %v5155_v35  ;;  %v6111_v24 = vadd.f32 %v2622_v11, %v1528_v20  ;;  %v5157_v40 = vpop.eup %5156  ;;  %v2719_v3 = vmul.f32 %v6125_v34, %v2706_v50  ;;  %v2709_v10 = vadd.f32 %v2704_v45, %v2699_v16 }
 0xb3b   : > { %v6113_v44 = vadd.f32 %v2628_v29, %v1534_v54  ;;  %v5159_v18 = vpop.eup %5158  ;;  %v1536_v58 = vmul.f32 0.6931472, %v5157_v40  ;;  %v2701_v20 = vmul.f32 %v2694_v13, %v5949_v47  ;;  %v2755_v59 = vmul.f32 %v6127_v32, %v2706_v50 }
 0xb3c   : > { %v6115_v49 = vadd.f32 %v2624_v46, %v1530_v1  ;;  %v1538_v38 = vmul.f32 0.6931472, %v5159_v18  ;;  %v6147_v35 = vstv %s4244_s8  ;;  %v2710_v40 = vadd.f32 %v2704_v45, %v2700_v60  ;;  %s433_s8 = scalar_lea.vmem [#allocation8], %s4058_s30 }
 0xb3d   : > { %v2702_v18 = vmul.f32 %v2694_v13, %v5952_v9  ;;  %v2722_v57 = vmul.f32 %v6125_v34, %v2709_v10  ;;  %v2758_v9 = vmul.f32 %v6127_v32, %v2709_v10  ;;  %v2711_v13 = vadd.f32 %v2704_v45, %v2701_v20  ;;  %s3927_s28 = sshll.u32 %s433_s8, 4  ;;  %s6438_s28 = int_to_ptr.vmem [resolvable:$true] %s3927_s28 }
 0xb3f   : > { %v5161_v39 = vpop.eup %5160  ;;  %v2760_v10 = vmul.f32 %v6127_v32, %v2711_v13 }
 0xb40   : > { %v2630_v28 = vmul.f32 0.6931472, %v5161_v39  ;;  %v2757_v39 = vmul.f32 %v6127_v32, %v2708_v8 }
 0xb41   : > { %v5163_v31 = vpop.eup %5162 }
 0xb42   : > { %v2632_v6 = vmul.f32 0.6931472, %v5163_v31  ;;  %v6117_v23 = vadd.f32 %v2630_v28, %v1536_v58 }
 0xb44   : > { %v6119_v42 = vadd.f32 %v2632_v6, %v1538_v38 }
 0xb81   : > { %v2662_v26 = vpop.permute.xlu1 %2661 }
 0xb82   : > { %v2685_v21 = vadd.f32 %v2662_v26, %v6082_v0 }
 0xb83   : > { %v2664_v52 = vpop.permute.xlu0 %2663 }
 0xb84   : > { %v2727_v62 = vmul.f32 %v6130_v55, %v2685_v21  ;;  %v2763_v19 = vmul.f32 %v6132_v15, %v2685_v21  ;;  %v2686_v0 = vadd.f32 %v2664_v52, %v6087_v4 }
 0xb85   : > { %v2666_v11 = vpop.permute.xlu1 %2665 }
 0xb86   : > { %v2735_v54 = vadd.f32 %v2727_v62, %v2718_v17  ;;  %v6149_v29 = vadd.f32 %v2763_v19, %v2754_v51  ;;  %v2728_v1 = vmul.f32 %v6130_v55, %v2686_v0  ;;  %v2764_v46 = vmul.f32 %v6132_v15, %v2686_v0 }
 0xb87   : > { %v2687_v4 = vadd.f32 %v2666_v11, %v6079_v41  ;;  %v2668_v47 = vpop.permute.xlu0 %2667  ;;  %v2723_v51 = vmul.f32 %v6125_v34, %v2710_v40 }
 0xb88   : > { %v2736_v58 = vadd.f32 %v2728_v1, %v2719_v3  ;;  %v6156_v28 = vadd.f32 %v2764_v46, %v2755_v59  ;;  %v2688_v31 = vadd.f32 %v2668_v47, %v6085_v36  ;;  %v6160_v38 = vadd.f32 %v6147_v35, %v2735_v54 }
 0xb89   : > { %v2729_v6 = vmul.f32 %v6130_v55, %v2687_v4  ;;  %v2765_v14 = vmul.f32 %v6132_v15, %v2687_v4  ;;  %v2670_v41 = vpop.permute.xlu1 %2669  ;;  %v2712_v36 = vadd.f32 %v2704_v45, %v2702_v18  ;;  %v5041_v4 = vld [vmem:[#allocation3 + $0x28] sm:$0xff]  }
 0xb8a   : > { %v2730_v53 = vmul.f32 %v6130_v55, %v2688_v31  ;;  %v2766_v56 = vmul.f32 %v6132_v15, %v2688_v31  ;;  %v2689_v12 = vadd.f32 %v2670_v41, %v6101_v7  ;;  %2792 = vperm.xlu1 %4955, %v6160_v38   ;;  %v6173_v16 = vadd.f32 %v6147_v35, %v2736_v58  ;;  %v5046_v41 = vld [vmem:[#allocation3 + $0x50] sm:$0xff]  }
 0xb8b   : > { %v2737_v43 = vadd.f32 %v2729_v6, %v2720_v30  ;;  %v6170_v8 = vadd.f32 %v2765_v14, %v2756_v25  ;;  %v2672_v50 = vpop.permute.xlu0 %2671  ;;  %v2759_v7 = vmul.f32 %v6127_v32, %v2710_v40  ;;  %v2761_v40 = vmul.f32 %v6127_v32, %v2712_v36  ;;  %4744 = vmatprep.subr.bf16.mxu0 %v5041_v4 }
 0xb8c   : > { %v2738_v26 = vadd.f32 %v2730_v53, %v2721_v2  ;;  %v6175_v21 = vadd.f32 %v2766_v56, %v2757_v39  ;;  %v2731_v60 = vmul.f32 %v6130_v55, %v2689_v12  ;;  %v2767_v17 = vmul.f32 %v6132_v15, %v2689_v12  ;;  %2797 = vperm.xlu0 %4954, %v6173_v16   ;;  %v5049_v53 = vld [vmem:[#allocation3 + $0x68] sm:$0xff]   ;;  %v4246_v56 = vld [vmem:[%s6491_s3] ss:$0 sm:$0xff] }
 0xb8d   : > { %v2690_v45 = vadd.f32 %v2672_v50, %v6107_v27  ;;  %v2674_v30 = vpop.permute.xlu1 %2673  ;;  %v6184_v25 = vadd.f32 %v6147_v35, %v2737_v43  ;;  %v2724_v27 = vmul.f32 %v6125_v34, %v2711_v13  ;;  %4745 = vmatpush3.bf16.msra.mxu0 %v5041_v4  ;;  %v5048_v13 = vld [vmem:[#allocation3 + $0x60] sm:$0xff]  }
 0xb8e   : > { %v2739_v52 = vadd.f32 %v2731_v60, %v2722_v57  ;;  %v6186_v2 = vadd.f32 %v2767_v17, %v2758_v9  ;;  %v2691_v62 = vadd.f32 %v2674_v30, %v6096_v61  ;;  %v6190_v19 = vadd.f32 %v6147_v35, %v2738_v26  ;;  %v5044_v57 = vld [vmem:[#allocation3 + $0x40] sm:$0xff]   ;;  %v5045_v9 = vld [vmem:[#allocation3 + $0x48] sm:$0xff]  }
 0xb8f   : > { %v2732_v3 = vmul.f32 %v6130_v55, %v2690_v45  ;;  %v2768_v0 = vmul.f32 %v6132_v15, %v2690_v45  ;;  %2802 = vperm.xlu1 %4955, %v6184_v25   ;;  %v2676_v20 = vpop.permute.xlu0 %2675  ;;  %v2725_v61 = vmul.f32 %v6125_v34, %v2712_v36  ;;  %4758 = vmatprep.subr.bf16.mxu1 %v5044_v57  ;;  %v4247_v36 = vld [vmem:[%s5599_s12] ss:$0 sm:$0xff] }
 0xb90   : > { %v2733_v59 = vmul.f32 %v6130_v55, %v2691_v62  ;;  %v2769_v11 = vmul.f32 %v6132_v15, %v2691_v62  ;;  %v2692_v54 = vadd.f32 %v2676_v20, %v6105_v48  ;;  %2807 = vperm.xlu0 %4954, %v6190_v19   ;;  %v6206_v18 = vadd.f32 %v6147_v35, %v2739_v52 }
 0xb91   : > { %v2740_v1 = vadd.f32 %v2732_v3, %v2723_v51  ;;  %v6201_v46 = vadd.f32 %v2768_v0, %v2759_v7  ;;  %4759 = vmatpush3.bf16.msra.mxu1 %v5044_v57 }
 0xb92   : > { %v2741_v39 = vadd.f32 %v2733_v59, %v2724_v27  ;;  %v6208_v47 = vadd.f32 %v2769_v11, %v2760_v10  ;;  %v2734_v58 = vmul.f32 %v6130_v55, %v2692_v54  ;;  %v2770_v34 = vmul.f32 %v6132_v15, %v2692_v54  ;;  %v5042_v55 = vld [vmem:[#allocation3 + $0x30] sm:$0xff]   ;;  %v5043_v15 = vld [vmem:[#allocation3 + $0x38] sm:$0xff]   ;;  %4760 = vmatprep.subr.bf16.mxu1 %v5045_v9 }
 0xb93   : > { %2812 = vperm.xlu1 %4955, %v6206_v18   ;;  %v6214_v48 = vadd.f32 %v6147_v35, %v2740_v1  ;;  %4746 = vmatprep.subr.bf16.mxu0 %v5042_v55 }
 0xb94   : > { %v2742_v32 = vadd.f32 %v2734_v58, %v2725_v61  ;;  %v6216_v31 = vadd.f32 %v2770_v34, %v2761_v40  ;;  %v6219_v6 = vadd.f32 %v6147_v35, %v2741_v39  ;;  %4747 = vmatpush3.bf16.msra.mxu0 %v5042_v55 }
 0xb95   : > { %2817 = vperm.xlu0 %4954, %v6214_v48   ;;  %4748 = vmatprep.subr.bf16.mxu0 %v5043_v15 }
 0xb96   : > { %v6223_v14 = vadd.f32 %v6147_v35, %v2742_v32  ;;  %4761 = vmatpush3.bf16.msra.mxu1 %v5045_v9  ;;  %v5047_v35 = vld [vmem:[#allocation3 + $0x58] sm:$0xff]  }
 0xb97   : > { %2822 = vperm.xlu1 %4955, %v6219_v6   ;;  %4762 = vmatprep.subr.bf16.mxu1 %v5046_v41 }
 0xb98   : > { %4749 = vmatpush3.bf16.msra.mxu0 %v5043_v15 }
 0xb99   : > { %2827 = vperm.xlu0 %4954, %v6223_v14  }
 0xb9a   : > { %4763 = vmatpush3.bf16.msra.mxu1 %v5046_v41 }
 0xb9b   : > { %4764 = vmatprep.subr.bf16.mxu1 %v5047_v35 }
 0xb9e   : > { %4765 = vmatpush3.bf16.msra.mxu1 %v5047_v35 }
 0xb9f   : > { %4766 = vmatprep.subr.bf16.mxu1 %v5048_v13 }
 0xba2   : > { %4767 = vmatpush3.bf16.msra.mxu1 %v5048_v13 }
 0xba3   : > { %4768 = vmatprep.subr.bf16.mxu1 %v5049_v53 }
 0xba6   : > { %4769 = vmatpush3.bf16.msra.mxu1 %v5049_v53 }
 0xc09   : > { %v2793_v12 = vpop.permute.xlu1 %2792 }
 0xc0a   : > { %v2836_v43 = vmul.f32 %v4246_v56, %v2793_v12  ;;  %v5050_v12 = vld [vmem:[#allocation3 + $0x70] sm:$0xff]  }
 0xc0b   : > { %v2798_v50 = vpop.permute.xlu0 %2797  ;;  %4770 = vmatprep.subr.bf16.mxu1 %v5050_v12 }
 0xc0c   : > { %v6231_v26 = vadd.f32 %v4247_v36, %v2836_v43  ;;  %v2837_v60 = vmul.f32 %v4246_v56, %v2798_v50  ;;  %v5051_v43 = vld [vmem:[#allocation3 + $0x78] sm:$0xff]   ;;  %4771 = vmatpush3.bf16.msra.mxu1 %v5050_v12  ;;  %v5052_v50 = vld [vmem:[#allocation3 + $0x80] sm:$0xff]  }
 0xc0d   : > { %4772 = vmatprep.subr.bf16.mxu1 %v5051_v43  ;;  %4782 = vmatprep.subr.bf16.mxu0 %v5052_v50 }
 0xc0e   : > { %v2803_v17 = vpop.permute.xlu1 %2802  ;;  %v6233_v51 = vadd.f32 %v4247_v36, %v2837_v60  ;;  %v2859_v30 = vmax.f32 %v6231_v26, 0.0  ;;  %v5053_v60 = vld [vmem:[#allocation3 + $0x88] sm:$0xff]  }
 0xc0f   : > { %v2838_v7 = vmul.f32 %v4246_v56, %v2803_v17  ;;  %v2808_v45 = vpop.permute.xlu0 %2807  ;;  %v5056_v17 = vld [vmem:[#allocation3 + $0xa0] sm:$0xff]  }
 0xc10   : > { %v2860_v52 = vmax.f32 %v6233_v51, 0.0  ;;  %v2839_v3 = vmul.f32 %v4246_v56, %v2808_v45  ;;  %4773 = vmatpush3.bf16.msra.mxu1 %v5051_v43 }
 0xc11   : > { %v6237_v62 = vadd.f32 %v4247_v36, %v2838_v7  ;;  %v4248_v7 = vld [vmem:[%s6493_s5] ss:$0 sm:$0xff] }
 0xc12   : > { %v2813_v0 = vpop.permute.xlu1 %2812  ;;  %v6239_v27 = vadd.f32 %v4247_v36, %v2839_v3  ;;  %v2867_v20 = vpack.c.bf16 %v2860_v52, %v2859_v30 }
 0xc13   : > { %v2840_v10 = vmul.f32 %v4246_v56, %v2813_v0  ;;  %v2861_v11 = vmax.f32 %v6237_v62, 0.0 }
 0xc14   : > { %v2818_v59 = vpop.permute.xlu0 %2817  ;;  %v2862_v61 = vmax.f32 %v6239_v27, 0.0  ;;  %4750 = vmatprep.mubr.bf16.mxu0 %v2867_v20 }
 0xc15   : > { %v6243_v54 = vadd.f32 %v4247_v36, %v2840_v10  ;;  %v2841_v1 = vmul.f32 %v4246_v56, %v2818_v59 }
 0xc16   : > { %v2823_v40 = vpop.permute.xlu1 %2822  ;;  %v2868_v4 = vpack.c.bf16 %v2862_v61, %v2861_v11 }
 0xc17   : > { %v6245_v39 = vadd.f32 %v4247_v36, %v2841_v1  ;;  %v2842_v58 = vmul.f32 %v4246_v56, %v2823_v40  ;;  %v2863_v32 = vmax.f32 %v6243_v54, 0.0 }
 0xc18   : > { %v2828_v34 = vpop.permute.xlu0 %2827  ;;  %4751 = vmatmul.mubr.bf16.vlgmr.msra.gmra.mrb[40].mxu0 %v2868_v4 }
 0xc19   : > { %v2864_v55 = vmax.f32 %v6245_v39, 0.0  ;;  %v6249_v15 = vadd.f32 %v4247_v36, %v2842_v58  ;;  %v2843_v57 = vmul.f32 %v4246_v56, %v2828_v34  ;;  %4783 = vmatpush3.bf16.msra.mxu0 %v5052_v50  ;;  %v5054_v56 = vld [vmem:[#allocation3 + $0x90] sm:$0xff]  }
 0xc1a   : > { %4784 = vmatprep.subr.bf16.mxu0 %v5053_v60 }
 0xc1b   : > { %v6251_v9 = vadd.f32 %v4247_v36, %v2843_v57  ;;  %v2869_v41 = vpack.c.bf16 %v2864_v55, %v2863_v32  ;;  %v2865_v35 = vmax.f32 %v6249_v15, 0.0  ;;  %v5055_v36 = vld [vmem:[#allocation3 + $0x98] sm:$0xff]  }
 0xc1d   : > { %v2866_v13 = vmax.f32 %v6251_v9, 0.0  ;;  %4754 = vmatprep.mubr.bf16.mxu0 %v2869_v41  ;;  %4785 = vmatpush3.bf16.msra.mxu0 %v5053_v60 }
 0xc1e   : > { %4786 = vmatprep.subr.bf16.mxu0 %v5054_v56 }
 0xc1f   : > { %v2870_v53 = vpack.c.bf16 %v2866_v13, %v2865_v35 }
 0xc21   : > { %4755 = vmatmul.mubr.bf16.gmra.mrb[44].mxu0 %v2870_v53 }
 0xc22   : > { %4787 = vmatpush3.bf16.msra.mxu0 %v5054_v56 }
 0xc23   : > { %4788 = vmatprep.subr.bf16.mxu0 %v5055_v36 }
 0xc26   : > { %4789 = vmatpush3.bf16.msra.mxu0 %v5055_v36 }
 0xc27   : > { %4790 = vmatprep.subr.bf16.mxu0 %v5056_v17 }
 0xc2a   : > { %4791 = vmatpush3.bf16.msra.mxu0 %v5056_v17  ;;  %v5057_v17 = vld [vmem:[#allocation3 + $0xa8] sm:$0xff]  }
 0xc2b   : > { %4792 = vmatprep.subr.bf16.mxu0 %v5057_v17 }
 0xc2e   : > { %4793 = vmatpush3.bf16.msra.mxu0 %v5057_v17 }
 0xceb   : > { %v4752_v45 = vpop.f32.mrb[40].mxu0 }
 0xcec   : > { %v2985_v30 = vadd.f32 %v4752_v45, %v4248_v7  ;;  %v2976_v52 = vpop.f32.mrb[41].mxu0  ;;  %v5058_v45 = vld [vmem:[#allocation3 + $0xb0] sm:$0xff]  }
 0xced   : > { %v2977_v3 = vadd.f32 %v4248_v7, %v2976_v52  ;;  %v4753_v0 = vpop.f32.mrb[42].mxu0  ;;  %4794 = vmatprep.subr.bf16.mxu0 %v5058_v45  ;;  %v5060_v52 = vld [vmem:[#allocation3 + $0xc0] sm:$0xff]  }
 0xcee   : > { %v2988_v10 = vadd.f32 %v4753_v0, %v4248_v7  ;;  %v2979_v20 = vpop.f32.mrb[43].mxu0  ;;  %v3009_v11 = vmax.f32 %v2985_v30, 0.0  ;;  %4795 = vmatpush3.bf16.msra.mxu0 %v5058_v45  ;;  %v5059_v30 = vld [vmem:[#allocation3 + $0xb8] sm:$0xff]   ;;  %4806 = vmatprep.subr.bf16.mxu1 %v5060_v52 }
 0xcef   : > { %v2980_v59 = vadd.f32 %v4248_v7, %v2979_v20  ;;  %v3007_v1 = vmax.f32 %v2977_v3, 0.0  ;;  %4796 = vmatprep.subr.bf16.mxu0 %v5059_v30  ;;  %v5061_v3 = vld [vmem:[#allocation3 + $0xc8] sm:$0xff]   ;;  %v5063_v0 = vld [vmem:[#allocation3 + $0xd8] sm:$0xff]  }
 0xcf0   : > { %v3010_v61 = vmax.f32 %v2988_v10, 0.0  ;;  %v5064_v10 = vld [vmem:[#allocation3 + $0xe0] sm:$0xff]   ;;  %v5065_v20 = vld [vmem:[#allocation3 + $0xe8] sm:$0xff]  }
 0xcf1   : > { %v3008_v40 = vmax.f32 %v2980_v59, 0.0  ;;  %v4258_v59 = vld [vmem:[%s6493_s5 + $0x1] ss:$0 sm:$0xff] }
 0xcf2   : > { %v3016_v4 = vpack.c.bf16 %v3010_v61, %v3009_v11  ;;  %4797 = vmatpush3.bf16.msra.mxu0 %v5059_v30  ;;  %v4267_v61 = vld [vmem:[%s5633_s25] ss:$0 sm:$0xff] }
 0xcf3   : > { %v3015_v58 = vpack.c.bf16 %v3008_v40, %v3007_v1 }
 0xcf4   : > { %v4756_v34 = vpop.f32.mrb[44].mxu0 }
 0xcf5   : > { %v3001_v32 = vadd.f32 %v4756_v34, %v4248_v7  ;;  %v2992_v55 = vpop.f32.mrb[45].mxu0  ;;  %4774 = vmatprep.mubr.bf16.mxu1 %v3015_v58 }
 0xcf6   : > { %v2993_v57 = vadd.f32 %v4248_v7, %v2992_v55  ;;  %v4757_v41 = vpop.f32.mrb[46].mxu0  ;;  %4775 = vmatmul.mubr.bf16.vlgmr.msra.gmra.mrb[40].mxu1 %v3016_v4 }
 0xcf7   : > { %v3004_v35 = vadd.f32 %v4757_v41, %v4248_v7  ;;  %v2995_v13 = vpop.f32.mrb[47].mxu0  ;;  %v3013_v12 = vmax.f32 %v3001_v32, 0.0  ;;  %4807 = vmatpush3.bf16.msra.mxu1 %v5060_v52 }
 0xcf8   : > { %v2996_v53 = vadd.f32 %v4248_v7, %v2995_v13  ;;  %v3011_v50 = vmax.f32 %v2993_v57, 0.0  ;;  %4808 = vmatprep.subr.bf16.mxu1 %v5061_v3  ;;  %v5062_v7 = vld [vmem:[#allocation3 + $0xd0] sm:$0xff]  }
 0xcf9   : > { %v3014_v43 = vmax.f32 %v3004_v35, 0.0 }
 0xcfa   : > { %v3012_v60 = vmax.f32 %v2996_v53, 0.0 }
 0xcfb   : > { %v3018_v56 = vpack.c.bf16 %v3014_v43, %v3013_v12  ;;  %4809 = vmatpush3.bf16.msra.mxu1 %v5061_v3 }
 0xcfc   : > { %v3017_v36 = vpack.c.bf16 %v3012_v60, %v3011_v50  ;;  %4810 = vmatprep.subr.bf16.mxu1 %v5062_v7 }
 0xcfe   : > { %4778 = vmatprep.mubr.bf16.mxu1 %v3017_v36 }
 0xcff   : > { %4779 = vmatmul.mubr.bf16.gmra.mrb[44].mxu1 %v3018_v56 }
 0xd00   : > { %4811 = vmatpush3.bf16.msra.mxu1 %v5062_v7 }
 0xd01   : > { %4812 = vmatprep.subr.bf16.mxu1 %v5063_v0 }
 0xd04   : > { %4813 = vmatpush3.bf16.msra.mxu1 %v5063_v0 }
 0xd05   : > { %4814 = vmatprep.subr.bf16.mxu1 %v5064_v10 }
 0xd08   : > { %4815 = vmatpush3.bf16.msra.mxu1 %v5064_v10 }
 0xd09   : > { %4816 = vmatprep.subr.bf16.mxu1 %v5065_v20 }
 0xd0c   : > { %4817 = vmatpush3.bf16.msra.mxu1 %v5065_v20 }
 0xdc9   : > { %v4776_v11 = vpop.f32.mrb[40].mxu1 }
 0xdca   : > { %v3135_v1 = vadd.f32 %v4776_v11, %v4258_v59  ;;  %v3126_v40 = vpop.f32.mrb[41].mxu1 }
 0xdcb   : > { %v3127_v4 = vadd.f32 %v4258_v59, %v3126_v40  ;;  %v4777_v58 = vpop.f32.mrb[42].mxu1 }
 0xdcc   : > { %v3166_v34 = vmul.f32 %v4267_v61, %v3135_v1  ;;  %v3138_v32 = vadd.f32 %v4777_v58, %v4258_v59  ;;  %v3129_v55 = vpop.f32.mrb[43].mxu1 }
 0xdcd   : > { %v3164_v57 = vmul.f32 %v4267_v61, %v3127_v4  ;;  %v3130_v41 = vadd.f32 %v4258_v59, %v3129_v55 }
 0xdce   : > { %v3167_v35 = vmul.f32 %v4267_v61, %v3138_v32  ;;  %v6266_v12 = vadd.f32 %v3166_v34, %v6237_v62 }
 0xdcf   : > { %v6263_v13 = vadd.f32 %v3164_v57, %v6231_v26  ;;  %v3165_v53 = vmul.f32 %v4267_v61, %v3130_v41  ;;  %v5067_v41 = vld [vmem:[#allocation3 + $0xf8] sm:$0xff]  }
 0xdd0   : > { %v6269_v43 = vadd.f32 %v3167_v35, %v6239_v27  ;;  %v3182_v62 = vmax.f32 %v6266_v12, 0.0  ;;  %v5070_v35 = vld [vmem:[%s6494_s6 + $0x10] sm:$0xff]  }
 0xdd1   : > { %v6272_v50 = vadd.f32 %v3165_v53, %v6233_v51  ;;  %v3180_v26 = vmax.f32 %v6263_v13, 0.0  ;;  %v5071_v53 = vld [vmem:[%s6494_s6 + $0x18] sm:$0xff]  }
 0xdd2   : > { %v4780_v60 = vpop.f32.mrb[44].mxu1  ;;  %v3183_v56 = vmax.f32 %v6269_v43, 0.0 }
 0xdd3   : > { %v3151_v36 = vadd.f32 %v4780_v60, %v4258_v59  ;;  %v3142_v17 = vpop.f32.mrb[45].mxu1  ;;  %v3181_v52 = vmax.f32 %v6272_v50, 0.0  ;;  %v5072_v60 = vld [vmem:[%s6494_s6 + $0x20] sm:$0xff]  }
 0xdd4   : > { %v3143_v45 = vadd.f32 %v4258_v59, %v3142_v17  ;;  %v4781_v30 = vpop.f32.mrb[46].mxu1  ;;  %v3189_v20 = vpack.c.bf16 %v3183_v56, %v3182_v62  ;;  %v4269_v56 = vld [vmem:[%s6493_s5 + $0x2] ss:$0 sm:$0xff] }
 0xdd5   : > { %v3170_v3 = vmul.f32 %v4267_v61, %v3151_v36  ;;  %v3154_v7 = vadd.f32 %v4781_v30, %v4258_v59  ;;  %v3145_v27 = vpop.f32.mrb[47].mxu1  ;;  %v3188_v51 = vpack.c.bf16 %v3181_v52, %v3180_v26 }
 0xdd6   : > { %v3168_v0 = vmul.f32 %v4267_v61, %v3143_v45  ;;  %v3146_v10 = vadd.f32 %v4258_v59, %v3145_v27 }
 0xdd7   : > { %v3171_v11 = vmul.f32 %v4267_v61, %v3154_v7  ;;  %4798 = vmatprep.mubr.bf16.mxu0 %v3188_v51  ;;  %v6282_v4 = vadd.f32 %v3170_v3, %v6249_v15  ;;  %v5066_v15 = vld [vmem:[#allocation3 + $0xf0] sm:$0xff]  }
 0xdd8   : > { %v6279_v1 = vadd.f32 %v3168_v0, %v6243_v54  ;;  %v3169_v40 = vmul.f32 %v4267_v61, %v3146_v10  ;;  %4799 = vmatmul.mubr.bf16.vlgmr.msra.gmra.mrb[48].mxu0 %v3189_v20  ;;  %4818 = vmatprep.subr.bf16.mxu1 %v5066_v15 }
 0xdd9   : > { %v6285_v58 = vadd.f32 %v3171_v11, %v6251_v9  ;;  %v3186_v54 = vmax.f32 %v6282_v4, 0.0  ;;  %4819 = vmatpush3.bf16.msra.mxu1 %v5066_v15  ;;  %v5069_v9 = vld [vmem:[%s6494_s6 + $0x8] sm:$0xff]  }
 0xdda   : > { %v6288_v34 = vadd.f32 %v3169_v40, %v6245_v39  ;;  %v3184_v32 = vmax.f32 %v6279_v1, 0.0  ;;  %4820 = vmatprep.subr.bf16.mxu1 %v5067_v41  ;;  %v5068_v39 = vld [vmem:[%s6494_s6] sm:$0xff]  }
 0xddb   : > { %v3187_v59 = vmax.f32 %v6285_v58, 0.0  ;;  %4830 = vmatprep.subr.bf16.mxu0 %v5068_v39 }
 0xddc   : > { %v3185_v55 = vmax.f32 %v6288_v34, 0.0  ;;  %4831 = vmatpush3.bf16.msra.mxu0 %v5068_v39 }
 0xddd   : > { %v3191_v57 = vpack.c.bf16 %v3187_v59, %v3186_v54  ;;  %4821 = vmatpush3.bf16.msra.mxu1 %v5067_v41  ;;  %4832 = vmatprep.subr.bf16.mxu0 %v5069_v9 }
 0xdde   : > { %v3190_v61 = vpack.c.bf16 %v3185_v55, %v3184_v32  ;;  %4854 = vmatprep.subr.bf16.mxu1 %v5068_v39 }
 0xde0   : > { %4802 = vmatprep.mubr.bf16.mxu0 %v3190_v61  ;;  %4833 = vmatpush3.bf16.msra.mxu0 %v5069_v9 }
 0xde1   : > { %4803 = vmatmul.mubr.bf16.gmra.mrb[52].mxu0 %v3191_v57  ;;  %4834 = vmatprep.subr.bf16.mxu0 %v5070_v35 }
 0xde4   : > { %4835 = vmatpush3.bf16.msra.mxu0 %v5070_v35 }
 0xde5   : > { %4836 = vmatprep.subr.bf16.mxu0 %v5071_v53 }
 0xde8   : > { %4837 = vmatpush3.bf16.msra.mxu0 %v5071_v53 }
 0xde9   : > { %4838 = vmatprep.subr.bf16.mxu0 %v5072_v60 }
 0xdec   : > { %4839 = vmatpush3.bf16.msra.mxu0 %v5072_v60 }
 0xeab   : > { %v4800_v36 = vpop.f32.mrb[48].mxu0 }
 0xeac   : > { %v3308_v17 = vadd.f32 %v4800_v36, %v4269_v56  ;;  %v3299_v45 = vpop.f32.mrb[49].mxu0 }
 0xead   : > { %v3300_v30 = vadd.f32 %v4269_v56, %v3299_v45  ;;  %v4801_v26 = vpop.f32.mrb[50].mxu0 }
 0xeae   : > { %v3311_v52 = vadd.f32 %v4801_v26, %v4269_v56  ;;  %v3302_v62 = vpop.f32.mrb[51].mxu0  ;;  %v3332_v7 = vmax.f32 %v3308_v17, 0.0 }
 0xeaf   : > { %v3303_v3 = vadd.f32 %v4269_v56, %v3302_v62  ;;  %v3330_v0 = vmax.f32 %v3300_v30, 0.0 }
 0xeb0   : > { %v3333_v27 = vmax.f32 %v3311_v52, 0.0 }
 0xeb1   : > { %v3331_v10 = vmax.f32 %v3303_v3, 0.0 }
 0xeb2   : > { %v3339_v51 = vpack.c.bf16 %v3333_v27, %v3332_v7 }
 0xeb3   : > { %v3338_v20 = vpack.c.bf16 %v3331_v10, %v3330_v0 }
 0xeb4   : > { %v4804_v11 = vpop.f32.mrb[52].mxu0 }
 0xeb5   : > { %v3324_v40 = vadd.f32 %v4804_v11, %v4269_v56  ;;  %v3315_v59 = vpop.f32.mrb[53].mxu0  ;;  %4822 = vmatprep.mubr.bf16.mxu1 %v3338_v20 }
 0xeb6   : > { %v3316_v32 = vadd.f32 %v4269_v56, %v3315_v59  ;;  %v4805_v55 = vpop.f32.mrb[54].mxu0  ;;  %4823 = vmatmul.mubr.bf16.vlgmr.msra.gmra.mrb[48].mxu1 %v3339_v51 }
 0xeb7   : > { %v3327_v54 = vadd.f32 %v4805_v55, %v4269_v56  ;;  %v3318_v61 = vpop.f32.mrb[55].mxu0  ;;  %4862 = vmatpush3.bf16.msra.mxu1 %v5068_v39  ;;  %v3336_v15 = vmax.f32 %v3324_v40, 0.0  ;;  %v5073_v39 = vld [vmem:[%s6494_s6 + $0x28] sm:$0xff]  }
 0xeb8   : > { %v3319_v57 = vadd.f32 %v4269_v56, %v3318_v61  ;;  %4855 = vmatprep.subr.bf16.mxu1 %v5069_v9  ;;  %v3334_v36 = vmax.f32 %v3316_v32, 0.0  ;;  %4840 = vmatprep.subr.bf16.mxu0 %v5073_v39  ;;  %v4289_v56 = vld [vmem:[%s5633_s25 + $0x1] ss:$0 sm:$0xff] }
 0xeb9   : > { %v3337_v41 = vmax.f32 %v3327_v54, 0.0  ;;  %4841 = vmatpush3.bf16.msra.mxu0 %v5073_v39 }
 0xeba   : > { %v3335_v17 = vmax.f32 %v3319_v57, 0.0 }
 0xebb   : > { %v3341_v45 = vpack.c.bf16 %v3337_v41, %v3336_v15  ;;  %4863 = vmatpush3.bf16.msra.mxu1 %v5069_v9  ;;  %v5074_v9 = vld [vmem:[%s6494_s6 + $0x30] sm:$0xff]  }
 0xebc   : > { %v3340_v30 = vpack.c.bf16 %v3335_v17, %v3334_v36  ;;  %4856 = vmatprep.subr.bf16.mxu1 %v5070_v35  ;;  %4842 = vmatprep.subr.bf16.mxu0 %v5074_v9 }
 0xebd   : > { %4843 = vmatpush3.bf16.msra.mxu0 %v5074_v9 }
 0xebe   : > { %4826 = vmatprep.mubr.bf16.mxu1 %v3340_v30 }
 0xebf   : > { %4827 = vmatmul.mubr.bf16.gmra.mrb[52].mxu1 %v3341_v45 }
 0xec0   : > { %4864 = vmatpush3.bf16.msra.mxu1 %v5070_v35  ;;  %v5075_v35 = vld [vmem:[%s6494_s6 + $0x38] sm:$0xff]  }
 0xec1   : > { %4857 = vmatprep.subr.bf16.mxu1 %v5071_v53  ;;  %4844 = vmatprep.subr.bf16.mxu0 %v5075_v35 }
 0xec2   : > { %4845 = vmatpush3.bf16.msra.mxu0 %v5075_v35 }
 0xec4   : > { %4865 = vmatpush3.bf16.msra.mxu1 %v5071_v53  ;;  %v4279_v53 = vld [vmem:[%s6493_s5 + $0x3] ss:$0 sm:$0xff] }
 0xec5   : > { %4858 = vmatprep.subr.bf16.mxu1 %v5072_v60 }
 0xec8   : > { %4866 = vmatpush3.bf16.msra.mxu1 %v5072_v60 }
 0xec9   : > { %4859 = vmatprep.subr.bf16.mxu1 %v5073_v39 }
 0xecc   : > { %4867 = vmatpush3.bf16.msra.mxu1 %v5073_v39 }
 0xecd   : > { %4860 = vmatprep.subr.bf16.mxu1 %v5074_v9 }
 0xed0   : > { %4868 = vmatpush3.bf16.msra.mxu1 %v5074_v9 }
 0xed1   : > { %4861 = vmatprep.subr.bf16.mxu1 %v5075_v35 }
 0xed4   : > { %4869 = vmatpush3.bf16.msra.mxu1 %v5075_v35 }
 0xf89   : > { %v4824_v60 = vpop.f32.mrb[48].mxu1 }
 0xf8a   : > { %v3458_v26 = vadd.f32 %v4824_v60, %v4279_v53  ;;  %v3449_v52 = vpop.f32.mrb[49].mxu1 }
 0xf8b   : > { %v3450_v62 = vadd.f32 %v4279_v53, %v3449_v52  ;;  %v4825_v3 = vpop.f32.mrb[50].mxu1 }
 0xf8c   : > { %v3490_v7 = vmul.f32 %v4289_v56, %v3458_v26  ;;  %v3461_v27 = vadd.f32 %v4825_v3, %v4279_v53  ;;  %v3452_v0 = vpop.f32.mrb[51].mxu1 }
 0xf8d   : > { %v3488_v10 = vmul.f32 %v4289_v56, %v3450_v62  ;;  %v3453_v51 = vadd.f32 %v4279_v53, %v3452_v0 }
 0xf8e   : > { %v3491_v20 = vmul.f32 %v4289_v56, %v3461_v27  ;;  %v3498_v40 = vadd.f32 %v3490_v7, %v6266_v12 }
 0xf8f   : > { %v3489_v11 = vmul.f32 %v4289_v56, %v3453_v51  ;;  %v3496_v32 = vadd.f32 %v3488_v10, %v6263_v13 }
 0xf90   : > { %v3499_v59 = vadd.f32 %v3491_v20, %v6269_v43 }
 0xf91   : > { %v3497_v55 = vadd.f32 %v3489_v11, %v6272_v50 }
 0xf92   : > { %v4828_v54 = vpop.f32.mrb[52].mxu1  ;;  %v3505_v61 = vpack.c.bf16 %v3499_v59, %v3498_v40 }
 0xf93   : > { %v3474_v57 = vadd.f32 %v4828_v54, %v4279_v53  ;;  %v3465_v15 = vpop.f32.mrb[53].mxu1  ;;  %v3504_v17 = vpack.c.bf16 %v3497_v55, %v3496_v32 }
 0xf94   : > { %v3466_v41 = vadd.f32 %v4279_v53, %v3465_v15  ;;  %v4829_v36 = vpop.f32.mrb[54].mxu1 }
 0xf95   : > { %v3494_v45 = vmul.f32 %v4289_v56, %v3474_v57  ;;  %v3477_v30 = vadd.f32 %v4829_v36, %v4279_v53  ;;  %v3468_v39 = vpop.f32.mrb[55].mxu1  ;;  %4846 = vmatprep.mubr.bf16.mxu0 %v3504_v17 }
 0xf96   : > { %v3492_v9 = vmul.f32 %v4289_v56, %v3466_v41  ;;  %v3469_v35 = vadd.f32 %v4279_v53, %v3468_v39  ;;  %4847 = vmatmul.mubr.bf16.vlgmr.msra.gmra.mrb[56].mxu0 %v3505_v61  ;;  %v4290_v53 = vld [vmem:[%s6495_s7] ss:$0 sm:$0xff] }
 0xf97   : > { %v3495_v12 = vmul.f32 %v4289_v56, %v3477_v30  ;;  %v3502_v13 = vadd.f32 %v3494_v45, %v6282_v4 }
 0xf98   : > { %v3493_v43 = vmul.f32 %v4289_v56, %v3469_v35  ;;  %v3500_v60 = vadd.f32 %v3492_v9, %v6279_v1 }
 0xf99   : > { %v3503_v50 = vadd.f32 %v3495_v12, %v6285_v58 }
 0xf9a   : > { %v3501_v26 = vadd.f32 %v3493_v43, %v6288_v34 }
 0xf9b   : > { %v3507_v52 = vpack.c.bf16 %v3503_v50, %v3502_v13 }
 0xf9c   : > { %v3506_v62 = vpack.c.bf16 %v3501_v26, %v3500_v60 }
 0xf9e   : > { %4850 = vmatprep.mubr.bf16.mxu1 %v3506_v62 }
 0xf9f   : > { %4851 = vmatmul.mubr.bf16.vlgmr.msra.gmra.mrb[56].mxu1 %v3507_v52 }
0x1069   : > { %v4848_v3 = vpop.f32.mrb[56].mxu0 }
0x106a   : > { %v3622_v7 = vadd.f32 %v4848_v3, %v4290_v53  ;;  %v3613_v27 = vpop.f32.mrb[57].mxu0 }
0x106b   : > { %v3614_v56 = vadd.f32 %v4290_v53, %v3613_v27  ;;  %v4849_v0 = vpop.f32.mrb[58].mxu0 }
0x106c   : > { %v3646_v4 = vadd.f32 2.0, %v3622_v7  ;;  %v3625_v10 = vadd.f32 %v4849_v0, %v4290_v53  ;;  %v3616_v58 = vpop.f32.mrb[59].mxu0 }
0x106d   : > { %v3644_v51 = vadd.f32 2.0, %v3614_v56  ;;  %v3617_v1 = vadd.f32 %v4290_v53, %v3616_v58  ;;  %3748 = vrot.lane.b32.xlu1 %v3614_v56, %s5364_s29 }
0x106e   : > { %v4301_v34 = vmul.f32 -1.442695, %v3646_v4  ;;  %v3647_v20 = vadd.f32 2.0, %v3625_v10 }
0x106f   : > { %v4299_v11 = vmul.f32 -1.442695, %v3644_v51  ;;  %v3645_v40 = vadd.f32 2.0, %v3617_v1  ;;  %3750 = vrot.lane.b32.xlu0 %v3617_v1, %s5364_s29 }
0x1070   : > { %5164 = vpow2.f32 %v4301_v34  ;;  %v4302_v59 = vmul.f32 -1.442695, %v3647_v20  ;;  %v2780_v34 = vstv %s4245_s22  ;;  %s3913_s22 = scalar_lea.sflag [#allocation5], %s431_s23 }
0x1071   : > { %5166 = vpow2.f32 %v4299_v11  ;;  %v4300_v32 = vmul.f32 -1.442695, %v3645_v40  ;;  %3752 = vrot.lane.b32.xlu1 %v3622_v7, %s5364_s29  ;;  %v2783_v40 = vadd.f32 %v2780_v34, %v6170_v8 }
0x1072   : > { %v4852_v55 = vpop.f32.mrb[56].mxu1  ;;  %5168 = vpow2.f32 %v4302_v59 }
0x1073   : > { %v3638_v54 = vadd.f32 %v4852_v55, %v4290_v53  ;;  %v3629_v61 = vpop.f32.mrb[57].mxu1  ;;  %5170 = vpow2.f32 %v4300_v32  ;;  %3754 = vrot.lane.b32.xlu0 %v3625_v10, %s5364_s29  ;;  %v2781_v55 = vadd.f32 %v2780_v34, %v6149_v29 }
0x1074   : > { %v3630_v57 = vadd.f32 %v4290_v53, %v3629_v61  ;;  %v4853_v15 = vpop.f32.mrb[58].mxu1 }
0x1075   : > { %v3650_v41 = vadd.f32 2.0, %v3638_v54  ;;  %v3641_v36 = vadd.f32 %v4853_v15, %v4290_v53  ;;  %v3632_v17 = vpop.f32.mrb[59].mxu1 }
0x1076   : > { %v3648_v45 = vadd.f32 2.0, %v3630_v57  ;;  %v3633_v30 = vadd.f32 %v4290_v53, %v3632_v17  ;;  %3756 = vrot.lane.b32.xlu1 %v3630_v57, %s5364_s29  ;;  %v2784_v57 = vadd.f32 %v2780_v34, %v6175_v21  ;;  %v2787_v21 = vadd.f32 %v2780_v34, %v6208_v47 }
0x1077   : > { %v4305_v39 = vmul.f32 -1.442695, %v3650_v41  ;;  %v3651_v9 = vadd.f32 2.0, %v3641_v36 }
0x1078   : > { %v4303_v35 = vmul.f32 -1.442695, %v3648_v45  ;;  %v3649_v12 = vadd.f32 2.0, %v3633_v30  ;;  %3758 = vrot.lane.b32.xlu0 %v3633_v30, %s5364_s29 }
0x1079   : > { %5172 = vpow2.f32 %v4305_v39  ;;  %v4306_v43 = vmul.f32 -1.442695, %v3651_v9 }
0x107a   : > { %5174 = vpow2.f32 %v4303_v35  ;;  %v4304_v13 = vmul.f32 -1.442695, %v3649_v12  ;;  %3760 = vrot.lane.b32.xlu1 %v3638_v54, %s5364_s29  ;;  %v5165_v50 = vpop.eup %5164 }
0x107b   : > { %5176 = vpow2.f32 %v4306_v43  ;;  %v5167_v60 = vpop.eup %5166  ;;  %v3678_v26 = vadd.f32 1.0, %v5165_v50 }
0x107c   : > { %5178 = vpow2.f32 %v4304_v13  ;;  %3762 = vrot.lane.b32.xlu0 %v3641_v36, %s5364_s29  ;;  %v5169_v52 = vpop.eup %5168  ;;  %v3676_v62 = vadd.f32 1.0, %v5167_v60  ;;  %v2782_v36 = vadd.f32 %v2780_v34, %v6156_v28  ;;  %v2785_v28 = vadd.f32 %v2780_v34, %v6186_v2  ;;  %s4307_s29 = sld [smem:[#allocation7 + $0x6]] }
0x107d   : > { %v5171_v53 = vpop.eup %5170  ;;  %5180 = vrcp.f32 %v3678_v26  ;;  %v3679_v3 = vadd.f32 1.0, %v5169_v52  ;;  %v2788_v13 = vadd.f32 %v2780_v34, %v6216_v31 }
0x107e   : > { %5182 = vrcp.f32 %v3676_v62  ;;  %v3677_v7 = vadd.f32 1.0, %v5171_v53 }
0x107f   : > { %5184 = vrcp.f32 %v3679_v3 }
0x1080   : > { %5186 = vrcp.f32 %v3677_v7 }
0x1081   : > { %5188 = vlog2.f32 %v5904_v33 }
0x1083   : > { %v5173_v27 = vpop.eup %5172 }
0x1084   : > { %v5175_v56 = vpop.eup %5174  ;;  %v3682_v0 = vadd.f32 1.0, %v5173_v27 }
0x1085   : > { %v5177_v4 = vpop.eup %5176  ;;  %v3680_v10 = vadd.f32 1.0, %v5175_v56 }
0x1086   : > { %v5179_v58 = vpop.eup %5178  ;;  %5190 = vrcp.f32 %v3682_v0  ;;  %v3683_v51 = vadd.f32 1.0, %v5177_v4 }
0x1087   : > { %5192 = vrcp.f32 %v3680_v10  ;;  %v3681_v1 = vadd.f32 1.0, %v5179_v58  ;;  %v5181_v20 = vpop.eup %5180 }
0x1088   : > { %5194 = vrcp.f32 %v3683_v51  ;;  %v5183_v11 = vpop.eup %5182  ;;  %v3702_v59 = vadd.f32 0.001, %v5181_v20 }
0x1089   : > { %5196 = vrcp.f32 %v3681_v1  ;;  %v5185_v32 = vpop.eup %5184  ;;  %v3700_v33 = vadd.f32 0.001, %v5183_v11 }
0x108a   : > { %5198 = vlog2.f32 %v6090_v5  ;;  %v5187_v54 = vpop.eup %5186  ;;  %v6348_v61 = vmul.f32 %v3702_v59, %v2783_v40  ;;  %v3703_v15 = vadd.f32 0.001, %v5185_v32 }
0x108b   : > { %5200 = vlog2.f32 %v3702_v59  ;;  %v6351_v41 = vmul.f32 %v3700_v33, %v2781_v55  ;;  %v3701_v8 = vadd.f32 0.001, %v5187_v54  ;;  %v5189_v29 = vpop.eup %5188 }
0x108c   : > { %5202 = vlog2.f32 %v3700_v33  ;;  %v6354_v17 = vmul.f32 %v3703_v15, %v2784_v57 }
0x108d   : > { %5204 = vlog2.f32 %v3703_v15  ;;  %v6356_v5 = vmul.f32 %v3701_v8, %v2782_v36 }
0x108e   : > { %5206 = vlog2.f32 %v3701_v8 }
0x108f   : > { %5208 = vlog2.f32 %v6099_v22 }
0x1090   : > { %v5191_v45 = vpop.eup %5190  ;;  %5210 = vlog2.f32 %v5906_v37  ;;  %v2786_v37 = vadd.f32 %v2780_v34, %v6201_v46  ;;  %v1540_v34 = vmul.f32 0.6931472, %v5189_v29  ;;  %v3781_v29 = vstv %s4307_s29  ;;  %s5271_s29 = scalar_lea.vmem %s6438_s28, 128 }
0x1091   : > { %v5193_v30 = vpop.eup %5192  ;;  %v3706_v39 = vadd.f32 0.001, %v5191_v45  ;;  %v3782_v45 = vmul.f32 %v3781_v29, %v6160_v38  ;;  %p5272_p13 = scmp.ne.s32.totalorder %s6438_s28, %s5271_s29 }
0x1092   : > { %v5195_v9 = vpop.eup %5194  ;;  %v3704_v35 = vadd.f32 0.001, %v5193_v30  ;;  %v3791_v30 = vstv %s4308_s14  ;;  %s5275_s14 = sshll.u32 %s5365_s18, 4  ;;  %s5276_s14 = int_to_ptr.vmem [resolvable:$false] %s5275_s14 }
0x1093   : > { %v5197_v12 = vpop.eup %5196  ;;  %5212 = vlog2.f32 %v3706_v39  ;;  %v6362_v43 = vmul.f32 %v3706_v39, %v2787_v21  ;;  %v3707_v50 = vadd.f32 0.001, %v5195_v9  ;;  %v3783_v21 = vmul.f32 %v3781_v29, %v6173_v16  ;;  %p5273_p9 = pnand %p5272_p13, %p6514_p7  ;;  %p5278_p0 = scmp.lt.s32.totalorder %s6438_s28, %s5276_s14 }
0x1094   : > { %v5199_v60 = vpop.eup %5198  ;;  %5214 = vlog2.f32 %v3704_v35  ;;  %v6365_v22 = vmul.f32 %v3704_v35, %v2785_v28  ;;  %v3705_v26 = vadd.f32 0.001, %v5197_v12  ;;  %v3784_v39 = vmul.f32 %v3781_v29, %v6184_v25 }
0x1095   : > { %v5201_v47 = vpop.eup %5200  ;;  %5216 = vlog2.f32 %v3707_v50  ;;  %v6368_v52 = vmul.f32 %v3707_v50, %v2788_v13  ;;  %v2634_v10 = vmul.f32 0.6931472, %v5199_v60  ;;  %v3785_v9 = vmul.f32 %v3781_v29, %v6190_v19  ;;  %p5274_p12 = pneg %p5273_p9 }
0x1096   : > { %v5203_v2 = vpop.eup %5202  ;;  %v3713_v62 = vmul.f32 0.6931472, %v5201_v47  ;;  %5218 = vlog2.f32 %v3705_v26  ;;  %v6370_v53 = vmul.f32 %v3705_v26, %v2786_v37  ;;  %v3793_v12 = vadd.f32 %v3791_v30, %v3783_v21 }
0x1097   : > { %v5205_v3 = vpop.eup %5204  ;;  %v3709_v7 = vmul.f32 0.6931472, %v5203_v2  ;;  %v2643_v59 = vadd.f32 %v2634_v10, %v1540_v34  ;;  %v3787_v13 = vmul.f32 %v3781_v29, %v6214_v48  ;;  %v3794_v60 = vadd.f32 %v3791_v30, %v3784_v39 }
0x1098   : > { %v5207_v31 = vpop.eup %5206  ;;  %v6373_v27 = vadd.f32 %v3713_v62, %v6109_v63  ;;  %v3715_v56 = vmul.f32 0.6931472, %v5205_v3  ;;  %v3795_v38 = vadd.f32 %v3791_v30, %v3785_v9  ;;  %v3788_v25 = vmul.f32 %v3781_v29, %v6219_v6 }
0x1099   : > { %v5209_v0 = vpop.eup %5208  ;;  %v6376_v46 = vadd.f32 %v3709_v7, %v6111_v24  ;;  %v3711_v4 = vmul.f32 0.6931472, %v5207_v31  ;;  %v3801_v2 = vmul.f32 %v3793_v12, %v3793_v12  ;;  %v3802_v3 = vmul.f32 %v3794_v60, %v3794_v60 }
0x109a   : > { %v6379_v58 = vadd.f32 %v3715_v56, %v6113_v44  ;;  %v5211_v51 = vpop.eup %5210  ;;  %v2636_v20 = vmul.f32 0.6931472, %v5209_v0  ;;  %v3803_v7 = vmul.f32 %v3795_v38, %v3795_v38  ;;  %v3797_v48 = vadd.f32 %v3791_v30, %v3787_v13 }
0x109b   : > { %v6382_v1 = vadd.f32 %v3711_v4, %v6115_v49  ;;  %v1542_v63 = vmul.f32 0.6931472, %v5211_v51  ;;  %v6406_v51 = vstv %s3840_s21  ;;  %v3798_v34 = vadd.f32 %v3791_v30, %v3788_v25  ;;  %s5277_s21 = scalar_lea.vmem %s5276_s14, 256 }
0x109c   : > { %p5279_p2 = scmp.lt.s32.totalorder %s5277_s21, %s5271_s29 }
0x109d   : > { %v5213_v11 = vpop.eup %5212  ;;  %v2644_v57 = vadd.f32 %v2636_v20, %v1542_v63  ;;  %v3851_v20 = vlaneseq }
0x109e   : > { %v5215_v40 = vpop.eup %5214  ;;  %v3721_v32 = vmul.f32 0.6931472, %v5213_v11  ;;  %p5280_p4 = por %p5279_p2, %p5278_p0 }
0x109f   : > { %v5217_v55 = vpop.eup %5216  ;;  %v3717_v33 = vmul.f32 0.6931472, %v5215_v40 }
0x10a0   : > { %v5219_v24 = vpop.eup %5218  ;;  %v6384_v54 = vadd.f32 %v3721_v32, %v2643_v59  ;;  %v3723_v15 = vmul.f32 0.6931472, %v5217_v55  ;;  %v3805_v55 = vmul.f32 %v3797_v48, %v3797_v48  ;;  %p5281_p8 = pnand %p5280_p4, %p5274_p12 }
0x10a1   : > { %v6387_v44 = vadd.f32 %v3717_v33, %v6117_v23  ;;  %v3719_v36 = vmul.f32 0.6931472, %v5219_v24  ;;  %v3792_v23 = vadd.f32 %v3791_v30, %v3782_v45 }
0x10a2   : > { %v6389_v49 = vadd.f32 %v3723_v15, %v2644_v57 }
0x10a3   : > { %v6392_v8 = vadd.f32 %v3719_v36, %v6119_v42  ;;  %v3786_v42 = vmul.f32 %v3781_v29, %v6206_v18  ;;  %v3800_v37 = vmul.f32 %v3792_v23, %v3792_v23 }
0x10a5   : > { %v3796_v31 = vadd.f32 %v3791_v30, %v3786_v42 }
0x10a7   : > { %v3804_v59 = vmul.f32 %v3796_v31, %v3796_v31 }
0x10df   : > { %v3749_v28 = vpop.permute.xlu1 %3748 }
0x10e0   : > { %v3772_v35 = vadd.f32 %v3749_v28, %v6351_v41 }
0x10e1   : > { %v3751_v50 = vpop.permute.xlu0 %3750 }
0x10e2   : > { %v3808_v26 = vmul.f32 %v3772_v35, %v3772_v35  ;;  %v3773_v16 = vadd.f32 %v3751_v50, %v6356_v5  ;;  %v3789_v5 = vmul.f32 %v3781_v29, %v6223_v14  ;;  %v3806_v29 = vmul.f32 %v3798_v34, %v3798_v34 }
0x10e3   : > { %v3753_v19 = vpop.permute.xlu1 %3752 }
0x10e4   : > { %v3816_v47 = vadd.f32 %v3808_v26, %v3800_v37  ;;  %v3809_v62 = vmul.f32 %v3773_v16, %v3773_v16  ;;  %v3774_v41 = vadd.f32 %v3753_v19, %v6348_v61  ;;  %v3799_v45 = vadd.f32 %v3791_v30, %v3789_v5 }
0x10e5   : > { %v3755_v18 = vpop.permute.xlu0 %3754 }
0x10e6   : > { %v3824_v56 = vmul.f32 0.5, %v3816_v47  ;;  %v3817_v0 = vadd.f32 %v3809_v62, %v3801_v2  ;;  %v3810_v4 = vmul.f32 %v3774_v41, %v3774_v41  ;;  %v3775_v10 = vadd.f32 %v3755_v18, %v6354_v17 }
0x10e7   : > { %v3807_v16 = vmul.f32 %v3799_v45, %v3799_v45 }
0x10e8   : > { %v3757_v6 = vpop.permute.xlu1 %3756  ;;  %v3832_v11 = vsub.f32 %v6376_v46, %v3824_v56  ;;  %v3825_v61 = vmul.f32 0.5, %v3817_v0  ;;  %v3818_v40 = vadd.f32 %v3810_v4, %v3802_v3  ;;  %v3811_v63 = vmul.f32 %v3775_v10, %v3775_v10 }
0x10e9   : > { %v3776_v32 = vadd.f32 %v3757_v6, %v6365_v22  ;;  %v3852_v22 = vshrl.u32 %v3851_v20, 7 }
0x10ea   : > { %v3759_v33 = vpop.permute.xlu0 %3758  ;;  %v3842_v17 = vadd.f32 %v6406_v51, %v3832_v11  ;;  %v3833_v14 = vsub.f32 %v6382_v1, %v3825_v61  ;;  %v3826_v24 = vmul.f32 0.5, %v3818_v40  ;;  %v3819_v57 = vadd.f32 %v3811_v63, %v3803_v7 }
0x10eb   : > { %v3812_v15 = vmul.f32 %v3776_v32, %v3776_v32  ;;  %v3777_v36 = vadd.f32 %v3759_v33, %v6370_v53  ;;  %v3859_v41 = vadd.s32 56, %v3852_v22 }
0x10ec   : > { %v3761_v46 = vpop.permute.xlu1 %3760  ;;  %v3843_v21 = vadd.f32 %v6406_v51, %v3833_v14  ;;  %v3834_v39 = vsub.f32 %v6373_v27, %v3826_v24  ;;  %v3827_v9 = vmul.f32 0.5, %v3819_v57  ;;  %v3886_v23 = vsel %vm3885_vm0, %v3842_v17, 0.0 }
0x10ed   : > { %v3820_v28 = vadd.f32 %v3812_v15, %v3804_v59  ;;  %v3813_v35 = vmul.f32 %v3777_v36, %v3777_v36  ;;  %v3778_v1 = vadd.f32 %v3761_v46, %v6362_v43  ;;  %vm3876_vm1 = vcmp.lt.s32.totalorder %v3859_v41, 60 }
0x10ee   : > { %v3763_v12 = vpop.permute.xlu0 %3762  ;;  %v3887_v42 = vsel %vm3885_vm0, %v3843_v21, 0.0  ;;  %v3844_v53 = vadd.f32 %v6406_v51, %v3834_v39  ;;  %v3835_v13 = vsub.f32 %v6379_v58, %v3827_v9 }
0x10ef   : > { %v3779_v30 = vadd.f32 %v3763_v12, %v6368_v52  ;;  %v3888_v50 = vadd.f32 %v3887_v42, %v3886_v23  ;;  %v3828_v60 = vmul.f32 0.5, %v3820_v28  ;;  %v3821_v27 = vadd.f32 %v3813_v35, %v3805_v55 }
0x10f0   : > { %v3814_v38 = vmul.f32 %v3778_v1, %v3778_v1  ;;  %v3889_v37 = vsel %vm3885_vm0, %v3844_v53, 0.0  ;;  %v3845_v26 = vadd.f32 %v6406_v51, %v3835_v13 }
0x10f1   : > { %v3815_v25 = vmul.f32 %v3779_v30, %v3779_v30  ;;  %v3890_v43 = vadd.f32 %v3889_v37, %v3888_v50  ;;  %v3836_v19 = vsub.f32 %v6387_v44, %v3828_v60  ;;  %v3829_v47 = vmul.f32 0.5, %v3821_v27 }
0x10f2   : > { %v3822_v2 = vadd.f32 %v3814_v38, %v3806_v29  ;;  %v3891_v62 = vsel %vm3885_vm0, %v3845_v26, 0.0 }
0x10f3   : > { %v3823_v58 = vadd.f32 %v3815_v25, %v3807_v16  ;;  %v3846_v52 = vadd.f32 %v6406_v51, %v3836_v19  ;;  %v3837_v3 = vsub.f32 %v6392_v8, %v3829_v47  ;;  %v3892_v18 = vadd.f32 %v3891_v62, %v3890_v43 }
0x10f4   : > { %v3830_v7 = vmul.f32 0.5, %v3822_v2 }
0x10f5   : > { %v3831_v31 = vmul.f32 0.5, %v3823_v58  ;;  %v3847_v48 = vadd.f32 %v6406_v51, %v3837_v3  ;;  %v3893_v0 = vsel %vm3885_vm0, %v3846_v52, 0.0 }
0x10f6   : > { %v3838_v56 = vsub.f32 %v6384_v54, %v3830_v7  ;;  %v3894_v4 = vadd.f32 %v3893_v0, %v3892_v18 }
0x10f7   : > { %v3839_v44 = vsub.f32 %v6389_v49, %v3831_v31  ;;  %v3895_v5 = vsel %vm3885_vm0, %v3847_v48, 0.0 }
0x10f8   : > { %v3848_v10 = vadd.f32 %v6406_v51, %v3838_v56  ;;  %v3896_v8 = vadd.f32 %v3895_v5, %v3894_v4 }
0x10f9   : > { %v3849_v6 = vadd.f32 %v6406_v51, %v3839_v44 }
0x10fa   : > { %v3897_v34 = vsel %vm3885_vm0, %v3848_v10, 0.0 }
0x10fb   : > { %v3884_v20 = vsel %vm3876_vm1, %v3849_v6, 0.0  ;;  %v3898_v11 = vadd.f32 %v3897_v34, %v3896_v8 }
0x10fc   : > { %v3899_v54 = vsel %vm3885_vm0, %v3884_v20, 0.0 }
0x10fd   : > { %v3900_v61 = vadd.f32 %v3899_v54, %v3898_v11 }
0x10ff   : > { %3901 = vadd.xlane.f32.xlu1 %v3900_v61 }
0x118c   : > { %v3902_v49 = vpop.xlane.xlu1 %3901 }
0x118d   : > { %v3903_v40 = vrot.slane %v3902_v49, 4 }
0x118f   : > { %v3904_v63 = vadd.f32 %v3903_v40, %v3902_v49 }
0x1191   : > { %v3905_v59 = vrot.slane %v3904_v63, 2 }
0x1193   : > { %v3906_v32 = vadd.f32 %v3905_v59, %v3904_v63 }
0x1195   : > { %v3907_v55 = vrot.slane %v3906_v32, 1 }
0x1197   : > { %v3908_v33 = vadd.f32 %v3907_v55, %v3906_v32 }
0x1199   : > { %4872 = vpush %v3908_v33 }
0x11ca   : > { %s4873_s12 = spop %4872 }
0x11cb   : > { %v3910_v51 = vstv %s4873_s12 }
0x11cc   : > { %3911 = vst [vmem:[%s433_s8] sm:$0xff] %v3910_v51 }
0x11cd   : > { %5284 = shalt.err (!%p5281_p8)
}
0x11ce   : > { %s5285_s23 = scalar_lea.hbm %s6443_s13, 128  ;;  %s5289_s11 = scalar_lea.hbm %s6498_s10, 512 }
0x11cf   : > { %p5286_p10 = scmp.ne.s32.totalorder %s6443_s13, %s5285_s23  ;;  %p5290_p5 = scmp.lt.u32.totalorder %s6443_s13, %s6498_s10 }
0x11d0   : > { %p5291_p6 = scmp.lt.u32.totalorder %s5289_s11, %s5285_s23  ;;  %p5293_p13 = scmp.lt.u32.totalorder %s5285_s23, %s6443_s13 }
0x11d1   : > { %p5287_p11 = pnand %p5286_p10, %p6514_p7 }
0x11d2   : > { %p5292_p1 = por %p5291_p6, %p5290_p5 }
0x11d3   : > { %p5288_p3 = pneg %p5287_p11 }
0x11d4   : > { %p5294_p9 = por %p5293_p13, %p5292_p1 }
0x11d6   : > { %p5295_p12 = pnand %p5294_p9, %p5288_p3 }
0x11d8   : > { %5298 = shalt.err (!%p5295_p12)
}
0x11d9   : > { %4882 = dma.vmem_to_hbm [thread:$0]  (%p6514_p7), %s6438_s28, 128, %s6443_s13, %s3913_s22  }
0x11da PF: > { %p4899_p0 = scmp.ge.s32.totalorder %s5357_s20, 2  ;;  %s3939_s25 = sand.u32 1, %s5337_s15  }
0x11db   : > { %p6515_p2 = scmp.ne.s32.totalorder %s6507_s26, 0  ;;  %s3940_s29 = scalar_lea.sflag [#allocation5], %s3939_s25 }
0x11dd   : > { %p4892_p4 = pnand %p4899_p0, %p6515_p2 }
0x11df   : > { %5332 = dma.done.wait (!%p4892_p4), %s3940_s29, 128  }
0x11e0   : > { %5334 = vsyncadd (!%p4892_p4), %s3940_s29, 4294967168  ;;  %s26_s20 = sadd.s32 1, %s5357_s20   ;;  %s6516_s24 = sld [smem:[#allocation12_spill]] }
0x11e1   : > { %p23_p8 = scmp.ge.s32.totalorder %s26_s20, 6   ;;  %s6517_s15 = smov %s5341_s16 }
0x11e2   : > { %s6518_s16 = smov %s5345_s17  ;;  %s6519_s17 = smov %s5477_s27 }
0x11e3   : > { %s6520_s18 = smov %s5353_s19  ;;  %25 = sbr.rel (!%p23_p8) target bundleno = 9 (0x9), region = 146 }
0x11e6   : > { %s6521_s19 = smov %s6516_s24 }
0x11ea   :  { %3945 = vsyncpa [#allocation4], 1 }
0x11eb   :  { %3947 = vsyncpa [#allocation4 + $0x1], 1 }
0x11ec   :  { %3948 = vsyncpa [#allocation5], 1 }
0x11ed   :  { %3950 = vsyncpa [#allocation5 + $0x1], 1 }
0x11ee   :  { %3951 = vsyncpa [#allocation6], 1 }
0x11ef   :  { %3953 = vsyncpa [#allocation6 + $0x1], 1 }

// kernel: tpu_custom_call.1
= control target key start
LH: loop header
LB: loop body
LE: loop exit
PB: predicated region body
PF: predicated region fallthrough
CT: control target
= control target key end

     0   :  { %s6488_s0 = inlined_call_operand.vmem [shape: f32[4,64,2], index: 0, kind: input, shape index: {}]   ;;  %s6489_s1 = inlined_call_operand.vmem [shape: f32[4,3,1,128], index: 1, kind: input, shape index: {}]   ;;  %s6490_s2 = inlined_call_operand.vmem [shape: f32[4,3,2,1,128], index: 2, kind: input, shape index: {}]   ;;  %s6491_s3 = inlined_call_operand.vmem [shape: f32[3,1,128], index: 3, kind: input, shape index: {}]   ;;  %s6492_s4 = inlined_call_operand.hbm [shape: bf16[3,2,2,128,128], index: 4, kind: input, shape index: {}]   ;;  %s6493_s5 = inlined_call_operand.vmem [shape: f32[3,2,2,1,128], index: 5, kind: input, shape index: {}]   ;;  %s6494_s6 = inlined_call_operand.vmem [shape: bf16[3,128,2], index: 6, kind: input, shape index: {}]   ;;  %s6495_s7 = inlined_call_operand.vmem [shape: f32[3,1,2], index: 7, kind: input, shape index: {}]   ;;  %s6496_s8 = inlined_call_operand.vmem [shape: f32[3,8], index: 8, kind: input, shape index: {}]   ;;  %s6497_s9 = inlined_call_operand.<no memory space> [shape: f32[1,1], index: 9, kind: input, shape index: {}]   ;;  %s6498_s10 = inlined_call_operand.hbm [shape: f32[4,1,8,128], index: 10, kind: output, shape index: {}]  }
   0x1   :  { %6504 = sst [smem:[#allocation13_spill]] %s6496_s8 }
   0x2   :  { %15 = sst [smem:[#allocation2]] %s6497_s9 }
   0x3   :  { %16 = vsyncpa [#allocation4], 0 }
   0x4   :  { %17 = vsyncpa [#allocation6], 0 }
   0x5   :  { %18 = vsyncpa [#allocation5], 0 }
   0x6   :  { %20 = vsyncpa [#allocation5 + $0x1], 0  ;;  %s5424_s15 = smov 0   ;;  %s5426_s16 = smov 0  }
   0x7   :  { %s5428_s17 = smov 0   ;;  %s5430_s18 = smov 0  }
   0x8   :  { %s5432_s19 = smov 0   ;;  %s5434_s20 = smov 0  }
   0x9 LB: > { %s4049_s9 = sadd.s32 4294967295, %s5357_s20   ;;  %s4050_s21 = sadd.s32 4294967294, %s5357_s20   ;;  %s5357_s20 = sphi %s5434_s20, %s26_s20   ;;  %s5353_s19 = sphi %s5432_s19, %s6521_s19   ;;  %s5349_s18 = sphi %s5430_s18, %s6520_s18   ;;  %s5345_s17 = sphi %s5428_s17, %s6519_s17   ;;  %s5341_s16 = sphi %s5426_s16, %s6518_s16   ;;  %s5337_s15 = sphi %s5424_s15, %s6517_s15  }
   0xa   : > { %s38_s22 = sadd.s32 1, %s5353_s19  ;;  %s274_s23 = sadd.s32 1, %s5345_s17 }
   0xb   : > { %p40_p0 = scmp.ge.s32.totalorder %s38_s22, 4  ;;  %p284_p1 = scmp.ne.s32.totalorder %s5345_s17, %s5341_s16 }
   0xc   : > { %p285_p2 = scmp.eq.s32.totalorder %s4049_s9, 3  ;;  %p290_p3 = scmp.ne.s32.totalorder %s5341_s16, %s5337_s15 }
   0xd   : > { %s6523_s22 = smov (%p40_p0, %s38_s22), 0  ;;  %p291_p5 = scmp.eq.s32.totalorder %s4050_s21, 3 }
   0xe   : > { %6505 = sst [smem:[#allocation12_spill]] %s6523_s22  ;;  %p5464_p4 = por %p285_p2, %p284_p1 }
   0xf   : > { %s269_s25 = ssub.s32 %s5353_s19, %s6523_s22  ;;  %p4051_p6 = scmp.ge.s32.totalorder %s5357_s20, 1 }
  0x10   : > { %s6506_s24 = scalar_select %p5464_p4, 1, 0 }
  0x11   : > { %p272_p7 = scmp.eq.s32.totalorder %s269_s25, 0  ;;  %p5471_p8 = por %p291_p5, %p290_p3 }
  0x12   : > { %p298_p9 = scmp.lt.s32.totalorder %s5357_s20, 5  ;;  %p5483_p11 = scmp.eq.s32.totalorder %s4049_s9, 0 }
  0x13   : > { %s6507_s26 = scalar_select %p5471_p8, 1, 0 }
  0x14   : > { %s5477_s27 = scalar_select %p272_p7, %s5345_s17, %s274_s23  }
  0x15   : > { %p5479_p10 = pnand %p4051_p6, %p298_p9  ;;  %s5359_s30 = smov [#allocation3]  }
  0x16   : > { %s6509_s29 = scalar_select %p5483_p11, 1, 0 }
  0x17   : > { %s6508_s28 = scalar_select %p5479_p10, 1, 0 }
  0x18   : > { %p4884_p12 = pneg %p5479_p10  ;;  %s313_s11 = sshll.u32 %s5359_s30, 4  ;;  %s314_s11 = int_to_ptr.vmem [resolvable:$true] %s313_s11 }
  0x19   : > { %s6511_s8 = sld [smem:[#allocation13_spill]]  ;;  %s5228_s25 = scalar_lea.hbm %s6492_s4, 12288 }
  0x1a   : > { %p5491_p13 = pnand %p5483_p11, %p4884_p12  ;;  %p5229_p0 = scmp.ne.s32.totalorder %s6492_s4, %s5228_s25 }
  0x1b   : > { %p5235_p5 = scmp.lt.u32.totalorder %s5228_s25, %s6492_s4 }
  0x1c   : > { %p5230_p1 = pneg %p5491_p13 }
  0x1e   : > { %p5231_p2 = pnand %p5230_p1, %p5229_p0 }
  0x1f   : > { %s336_s9 = sshll.u32 %s6511_s8, 4  ;;  %s5498_s9 = int_to_ptr.vmem [resolvable:$true] %s336_s9 }
  0x20   : > { %p5232_p3 = pneg %p5231_p2 }
  0x22   : > { %p5237_p6 = pnand %p5235_p5, %p5232_p3 }
  0x24   : > { %5240 = shalt.err (!%p5237_p6)
}
  0x25   : > { %s5241_s8 = scalar_lea.vmem %s314_s11, 12288  ;;  %p5249_p8 = scmp.lt.s32.totalorder %s314_s11, %s314_s11 }
  0x26   : > { %p5242_p7 = scmp.ne.s32.totalorder %s314_s11, %s5241_s8  ;;  %p5250_p4 = scmp.lt.s32.totalorder %s5241_s8, %s5241_s8 }
  0x28   : > { %p5244_p9 = pnand %p5242_p7, %p5230_p1  ;;  %p5251_p11 = por %p5250_p4, %p5249_p8 }
  0x2a   : > { %p5245_p12 = pneg %p5244_p9 }
  0x2c   : > { %p5252_p10 = pnand %p5251_p11, %p5245_p12 }
  0x2e   : > { %5255 = shalt.err (!%p5252_p10)
}
  0x2f   : > { %s5360_s22 = smov 64   ;;  %s5361_s21 = smov 4  }
  0x30   : > { %4887 = dma.hbm_to_vmem [thread:$0]  (!%p5491_p13), %s6492_s4, 12288, %s314_s11, [#allocation4], %s5360_s22, %s5360_s22, %s5361_s21  }
  0x31   : > { %s5256_s30 = scalar_lea.vmem %s5498_s9, 64  ;;  %p5264_p8 = scmp.lt.s32.totalorder %s5498_s9, %s5498_s9 }
  0x32   : > { %p5257_p0 = scmp.ne.s32.totalorder %s5498_s9, %s5256_s30  ;;  %p5265_p10 = scmp.lt.s32.totalorder %s5256_s30, %s5256_s30 }
  0x34   : > { %p5259_p2 = pnand %p5257_p0, %p5230_p1  ;;  %p5266_p11 = por %p5265_p10, %p5264_p8 }
  0x36   : > { %p5260_p4 = pneg %p5259_p2 }
  0x38   : > { %p5267_p3 = pnand %p5266_p11, %p5260_p4 }
  0x3a   : > { %5270 = shalt.err (!%p5267_p3)
}
  0x3b   : > { %s5362_s8 = smov [#allocation7]   ;;  %p6512_p5 = scmp.ne.s32.totalorder %s6508_s28, 0 }
  0x3c   : > { %4890 = dma.vmem_to_smem (!%p5491_p13), %s5498_s9, 64, %s5362_s8, [#allocation6]  }
  0x3d   : > { %379 = sbr.rel (%p6512_p5) target bundleno = 4570 (0x11da), region = 60  ;;  %p6513_p6 = scmp.ne.s32.totalorder (!%p6512_p5), %s6509_s29, 0 }
  0x44   : > { %5324 = dma.done.wait (%p6513_p6), [#allocation4], 12288  }
  0x45   : > { %5326 = vsyncadd (%p6513_p6), [#allocation4], 4294955008 }
  0x46   : > { %5328 = dma.done.wait (%p6513_p6), [#allocation6], 64  }
  0x47   : > { %5330 = vsyncadd (%p6513_p6), [#allocation6], 4294967232 }
  0x48   : > { %389 = sfence }
  0x49   : > { %p435_p1 = scmp.lt.s32.totalorder %s5349_s18, 3  ;;  %s4062_s11 = sld [smem:[#allocation7 + $0x101]]  ;;  %v5363_v0 = vmov 0   ;;  %v4956_v16 = vld [vmem:[#allocation3 + $0x200] sm:$0xff]   ;;  %v4957_v17 = vld [vmem:[#allocation3 + $0x208] sm:$0xff]   ;;  %v4958_v20 = vld [vmem:[#allocation3 + $0x210] sm:$0xff]  }
  0x4a   : > { %4954 = vset.pattern.permute.xlu0 %v5363_v0  ;;  %4955 = vset.pattern.permute.xlu1 %v5363_v0  ;;  %s5364_s29 = smov 127   ;;  %v4959_v21 = vld [vmem:[#allocation3 + $0x218] sm:$0xff]   ;;  %s4061_s22 = sld [smem:[#allocation7 + $0x100]]  ;;  %v4960_v32 = vld [vmem:[#allocation3 + $0x220] sm:$0xff]   ;;  %v4961_v42 = vld [vmem:[#allocation3 + $0x228] sm:$0xff]   ;;  %vm3885_vm0 = vcmask 7168  }
  0x4b   : > { %s5544_s28 = scalar_select %p435_p1, %s5349_s18, 3  ;;  %4494 = vmatprep.subr.bf16.mxu0 %v4956_v16  ;;  %v4962_v51 = vld [vmem:[#allocation3 + $0x230] sm:$0xff]   ;;  %v4963_v58 = vld [vmem:[#allocation3 + $0x238] sm:$0xff]   ;;  %v4964_v60 = vld [vmem:[#allocation3 + $0x240] sm:$0xff]  }
  0x4c   : > { %4495 = vmatpush3.bf16.msra.mxu0 %v4956_v16  ;;  %s4065_s21 = sld [smem:[#allocation7 + $0x104]]  ;;  %v4965_v61 = vld [vmem:[#allocation3 + $0x248] sm:$0xff]   ;;  %4518 = vmatprep.subr.bf16.mxu1 %v4964_v60  ;;  %v4966_v62 = vld [vmem:[#allocation3 + $0x250] sm:$0xff]   ;;  %v4967_v63 = vld [vmem:[#allocation3 + $0x258] sm:$0xff]   ;;  %s4151_s30 = sld [smem:[#allocation7 + $0x80]] }
  0x4d   : > { %s4313_s12 = sshll.u32 %s5544_s28, 6  ;;  %4496 = vmatprep.subr.bf16.mxu0 %v4957_v17  ;;  %4519 = vmatpush3.bf16.msra.mxu1 %v4964_v60  ;;  %v4968_v0 = vld [vmem:[#allocation3 + $0x260] sm:$0xff]   ;;  %s4870_s23 = smul.u32 3, %s5544_s28 }
  0x4e   : > { %s5550_s14 = scalar_lea.vmem %s6488_s0, %s4313_s12  ;;  %4520 = vmatprep.subr.bf16.mxu1 %v4965_v61  ;;  %s4066_s8 = sld [smem:[#allocation7 + $0x105]] }
  0x4f   : > { %v455_v1 = vld [vmem:[%s5550_s14 + $0x10] sm:$0xff]  ;;  %v474_v2 = vstv %s4062_s11  ;;  %v453_v3 = vld [vmem:[%s5550_s14] sm:$0xff]  ;;  %v456_v4 = vld [vmem:[%s5550_s14 + $0x18] sm:$0xff]  ;;  %s5599_s12 = scalar_lea.vmem %s6489_s1, %s4870_s23  ;;  %s4150_s23 = sld [smem:[#allocation7 + $0x107]] }
  0x50   : > { %v477_v5 = vmul.f32 %v474_v2, %v455_v1  ;;  %v475_v6 = vmul.f32 %v474_v2, %v453_v3  ;;  %v454_v7 = vld [vmem:[%s5550_s14 + $0x8] sm:$0xff]  ;;  %v457_v9 = vld [vmem:[%s5550_s14 + $0x20] sm:$0xff]  ;;  %v478_v10 = vmul.f32 %v474_v2, %v456_v4  ;;  %v460_v12 = vld [vmem:[%s5550_s14 + $0x38] sm:$0xff]  ;;  %4497 = vmatpush3.bf16.msra.mxu0 %v4957_v17  ;;  %v465_v22 = vstv %s4061_s22  ;;  %s4871_s22 = smul.u32 6, %s5544_s28  ;;  %s4064_s28 = sld [smem:[#allocation7 + $0x103]] }
  0x51   : > { %v458_v8 = vld [vmem:[%s5550_s14 + $0x28] sm:$0xff]  ;;  %v476_v11 = vmul.f32 %v474_v2, %v454_v7  ;;  %v459_v13 = vld [vmem:[%s5550_s14 + $0x30] sm:$0xff]  ;;  %v479_v15 = vmul.f32 %v474_v2, %v457_v9  ;;  %v482_v18 = vmul.f32 %v474_v2, %v460_v12  ;;  %4498 = vmatprep.subr.bf16.mxu0 %v4958_v20  ;;  %v466_v23 = vmul.f32 %v465_v22, %v453_v3  ;;  %s5793_s11 = sld [smem:[#allocation7 + $0x81]]  ;;  %s5801_s9 = sld [smem:[#allocation7 + $0x83]] }
  0x52   : > { %495 = vrot.lane.b32.xlu1 %v477_v5, %s5364_s29  ;;  %491 = vrot.lane.b32.xlu0 %v475_v6, %s5364_s29  ;;  %v480_v14 = vmul.f32 %v474_v2, %v458_v8  ;;  %v481_v19 = vmul.f32 %v474_v2, %v459_v13  ;;  %v524_v24 = vstv %s4065_s21  ;;  %v469_v28 = vmul.f32 %v465_v22, %v456_v4  ;;  %v4068_v2 = vld [vmem:[%s6491_s3 + $0x2] ss:$0 sm:$0xff]  ;;  %s5633_s25 = scalar_lea.vmem %s6490_s2, %s4871_s22  ;;  %s4063_s21 = sld [smem:[#allocation7 + $0x102]] }
  0x53   : > { %v467_v29 = vmul.f32 %v465_v22, %v454_v7  ;;  %v468_v30 = vmul.f32 %v465_v22, %v455_v1  ;;  %v471_v37 = vmul.f32 %v465_v22, %v458_v8  ;;  %v470_v38 = vmul.f32 %v465_v22, %v457_v9  ;;  %4521 = vmatpush3.bf16.msra.mxu1 %v4965_v61  ;;  %v4969_v1 = vld [vmem:[#allocation3 + $0x268] sm:$0xff]   ;;  %v4070_v5 = vld [vmem:[%s5599_s12 + $0x2] ss:$0 sm:$0xff]  ;;  %s5848_s13 = sld [smem:[#allocation7 + $0x84]]  ;;  %s4240_s22 = sld [smem:[#allocation7 + $0x87]] }
  0x54   : > { %4499 = vmatpush3.bf16.msra.mxu0 %v4958_v20  ;;  %v473_v46 = vmul.f32 %v465_v22, %v460_v12  ;;  %v472_v47 = vmul.f32 %v465_v22, %v459_v13  ;;  %4522 = vmatprep.subr.bf16.mxu1 %v4966_v62  ;;  %p6514_p7 = scmp.ne.s32.totalorder %s6506_s24, 0 }
  0x55   : > { %4500 = vmatprep.subr.bf16.mxu0 %v4959_v21 }
  0x56   : > { %497 = vrot.lane.b32.xlu1 %v478_v10, %s5364_s29  ;;  %493 = vrot.lane.b32.xlu0 %v476_v11, %s5364_s29 }
  0x57   : > { %4523 = vmatpush3.bf16.msra.mxu1 %v4966_v62 }
  0x58   : > { %4501 = vmatpush3.bf16.msra.mxu0 %v4959_v21  ;;  %4524 = vmatprep.subr.bf16.mxu1 %v4967_v63 }
  0x59   : > { %4502 = vmatprep.subr.bf16.mxu0 %v4960_v32 }
  0x5a   : > { %501 = vrot.lane.b32.xlu1 %v480_v14, %s5364_s29  ;;  %499 = vrot.lane.b32.xlu0 %v479_v15, %s5364_s29 }
  0x5b   : > { %4525 = vmatpush3.bf16.msra.mxu1 %v4967_v63 }
  0x5c   : > { %4503 = vmatpush3.bf16.msra.mxu0 %v4960_v32  ;;  %4526 = vmatprep.subr.bf16.mxu1 %v4968_v0 }
  0x5d   : > { %4504 = vmatprep.subr.bf16.mxu0 %v4961_v42 }
  0x5e   : > { %505 = vrot.lane.b32.xlu1 %v482_v18, %s5364_s29  ;;  %503 = vrot.lane.b32.xlu0 %v481_v19, %s5364_s29 }
  0x5f   : > { %4527 = vmatpush3.bf16.msra.mxu1 %v4968_v0 }
  0x60   : > { %4505 = vmatpush3.bf16.msra.mxu0 %v4961_v42  ;;  %4528 = vmatprep.subr.bf16.mxu1 %v4969_v1 }
  0x61   : > { %4506 = vmatprep.subr.bf16.mxu0 %v4962_v51 }
  0x63   : > { %4529 = vmatpush3.bf16.msra.mxu1 %v4969_v1 }
  0x64   : > { %4507 = vmatpush3.bf16.msra.mxu0 %v4962_v51  ;;  %v4976_v51 = vld [vmem:[#allocation3 + $0x2a0] sm:$0xff]  }
  0x65   : > { %4508 = vmatprep.subr.bf16.mxu0 %v4963_v58 }
  0x68   : > { %4509 = vmatpush3.bf16.msra.mxu0 %v4963_v58 }
  0xc4   : > { %v496_v25 = vpop.permute.xlu1 %495  ;;  %v492_v26 = vpop.permute.xlu0 %491 }
  0xc5   : > { %v515_v27 = vadd.f32 %v492_v26, %v466_v23  ;;  %v517_v39 = vadd.f32 %v496_v25, %v468_v30 }
  0xc7   : > { %v5568_v31 = vadd.f32 %v524_v24, %v515_v27  ;;  %v5577_v49 = vadd.f32 %v524_v24, %v517_v39 }
  0xc8   : > { %v498_v33 = vpop.permute.xlu1 %497  ;;  %v494_v34 = vpop.permute.xlu0 %493 }
  0xc9   : > { %v518_v35 = vadd.f32 %v498_v33, %v469_v28  ;;  %v516_v36 = vadd.f32 %v494_v34, %v467_v29  ;;  %605 = vperm.xlu0 %4954, %v5568_v31  }
  0xcb   : > { %v5571_v40 = vadd.f32 %v524_v24, %v518_v35  ;;  %v5573_v41 = vadd.f32 %v524_v24, %v516_v36 }
  0xcc   : > { %v502_v43 = vpop.permute.xlu1 %501  ;;  %v500_v44 = vpop.permute.xlu0 %499 }
  0xcd   : > { %v520_v45 = vadd.f32 %v502_v43, %v471_v37  ;;  %610 = vperm.xlu1 %4955, %v5573_v41   ;;  %620 = vperm.xlu0 %4954, %v5571_v40   ;;  %v519_v48 = vadd.f32 %v500_v44, %v470_v38  ;;  %v4970_v43 = vld [vmem:[#allocation3 + $0x270] sm:$0xff]   ;;  %v4971_v44 = vld [vmem:[#allocation3 + $0x278] sm:$0xff]  }
  0xce   : > { %4530 = vmatprep.subr.bf16.mxu1 %v4970_v43 }
  0xcf   : > { %v5579_v50 = vadd.f32 %v524_v24, %v520_v45  ;;  %v5581_v55 = vadd.f32 %v524_v24, %v519_v48  ;;  %4531 = vmatpush3.bf16.msra.mxu1 %v4970_v43  ;;  %v4972_v45 = vld [vmem:[#allocation3 + $0x280] sm:$0xff]   ;;  %v4975_v48 = vld [vmem:[#allocation3 + $0x298] sm:$0xff]  }
  0xd0   : > { %v506_v52 = vpop.permute.xlu1 %505  ;;  %v504_v53 = vpop.permute.xlu0 %503  ;;  %4532 = vmatprep.subr.bf16.mxu1 %v4971_v44  ;;  %4542 = vmatprep.subr.bf16.mxu0 %v4972_v45 }
  0xd1   : > { %v522_v54 = vadd.f32 %v506_v52, %v473_v46  ;;  %615 = vperm.xlu1 %4955, %v5577_v49   ;;  %630 = vperm.xlu0 %4954, %v5579_v50   ;;  %v521_v56 = vadd.f32 %v504_v53, %v472_v47  ;;  %v4973_v46 = vld [vmem:[#allocation3 + $0x288] sm:$0xff]   ;;  %v4974_v47 = vld [vmem:[#allocation3 + $0x290] sm:$0xff]  }
  0xd2   : > { %v4072_v52 = vld [vmem:[%s6493_s5 + $0x8] ss:$0 sm:$0xff] }
  0xd3   : > { %v5585_v57 = vadd.f32 %v524_v24, %v522_v54  ;;  %v5587_v59 = vadd.f32 %v524_v24, %v521_v56  ;;  %4533 = vmatpush3.bf16.msra.mxu1 %v4971_v44 }
  0xd5   : > { %625 = vperm.xlu1 %4955, %v5581_v55   ;;  %640 = vperm.xlu0 %4954, %v5585_v57  }
  0xd9   : > { %635 = vperm.xlu1 %4955, %v5587_v59  }
 0x148   : > { %v606_v3 = vpop.permute.xlu0 %605 }
 0x149   : > { %v649_v4 = vmul.f32 %v4068_v2, %v606_v3 }
 0x14b   : > { %v5602_v8 = vadd.f32 %v4070_v5, %v649_v4 }
 0x14c   : > { %v611_v6 = vpop.permute.xlu1 %610  ;;  %v621_v7 = vpop.permute.xlu0 %620 }
 0x14d   : > { %v650_v9 = vmul.f32 %v4068_v2, %v611_v6  ;;  %v652_v10 = vmul.f32 %v4068_v2, %v621_v7  ;;  %v673_v17 = vmax.f32 %v5602_v8, 0.0 }
 0x14f   : > { %v5604_v11 = vadd.f32 %v4070_v5, %v650_v9  ;;  %v5606_v12 = vadd.f32 %v4070_v5, %v652_v10 }
 0x150   : > { %v616_v13 = vpop.permute.xlu1 %615  ;;  %v631_v14 = vpop.permute.xlu0 %630 }
 0x151   : > { %v651_v15 = vmul.f32 %v4068_v2, %v616_v13  ;;  %v654_v16 = vmul.f32 %v4068_v2, %v631_v14  ;;  %v674_v18 = vmax.f32 %v5604_v11, 0.0  ;;  %v676_v21 = vmax.f32 %v5606_v12, 0.0 }
 0x153   : > { %v5610_v19 = vadd.f32 %v4070_v5, %v651_v15  ;;  %v681_v20 = vpack.c.bf16 %v674_v18, %v673_v17  ;;  %v5614_v25 = vadd.f32 %v4070_v5, %v654_v16 }
 0x154   : > { %v626_v22 = vpop.permute.xlu1 %625  ;;  %v641_v23 = vpop.permute.xlu0 %640 }
 0x155   : > { %v675_v24 = vmax.f32 %v5610_v19, 0.0  ;;  %v653_v26 = vmul.f32 %v4068_v2, %v626_v22  ;;  %v656_v27 = vmul.f32 %v4068_v2, %v641_v23  ;;  %4510 = vmatprep.mubr.bf16.mxu0 %v681_v20  ;;  %v678_v32 = vmax.f32 %v5614_v25, 0.0 }
 0x157   : > { %v5616_v28 = vadd.f32 %v4070_v5, %v653_v26  ;;  %v682_v29 = vpack.c.bf16 %v676_v21, %v675_v24  ;;  %v5620_v34 = vadd.f32 %v4070_v5, %v656_v27  ;;  %v4977_v24 = vld [vmem:[#allocation3 + $0x2a8] sm:$0xff]   ;;  %v4978_v26 = vld [vmem:[#allocation3 + $0x2b0] sm:$0xff]   ;;  %v4979_v27 = vld [vmem:[#allocation3 + $0x2b8] sm:$0xff]  }
 0x158   : > { %v636_v30 = vpop.permute.xlu1 %635 }
 0x159   : > { %v677_v33 = vmax.f32 %v5616_v28, 0.0  ;;  %v655_v35 = vmul.f32 %v4068_v2, %v636_v30  ;;  %4511 = vmatmul.mubr.bf16.vlgmr.msra.gmra.mrb[0].mxu0 %v682_v29  ;;  %v680_v38 = vmax.f32 %v5620_v34, 0.0  ;;  %v4980_v29 = vld [vmem:[#allocation3 + $0x2c0] sm:$0xff]   ;;  %v4981_v30 = vld [vmem:[#allocation3 + $0x2c8] sm:$0xff]  }
 0x15a   : > { %4543 = vmatpush3.bf16.msra.mxu0 %v4972_v45  ;;  %4566 = vmatprep.subr.bf16.mxu1 %v4980_v29 }
 0x15b   : > { %v5622_v36 = vadd.f32 %v4070_v5, %v655_v35  ;;  %v683_v37 = vpack.c.bf16 %v678_v32, %v677_v33  ;;  %4544 = vmatprep.subr.bf16.mxu0 %v4973_v46  ;;  %v4982_v32 = vld [vmem:[#allocation3 + $0x2d0] sm:$0xff]   ;;  %v4983_v33 = vld [vmem:[#allocation3 + $0x2d8] sm:$0xff]   ;;  %v4984_v35 = vld [vmem:[#allocation3 + $0x2e0] sm:$0xff]  }
 0x15d   : > { %v679_v39 = vmax.f32 %v5622_v36, 0.0  ;;  %4514 = vmatprep.mubr.bf16.mxu0 %v683_v37  ;;  %v4985_v37 = vld [vmem:[#allocation3 + $0x2e8] sm:$0xff]  }
 0x15e   : > { %4545 = vmatpush3.bf16.msra.mxu0 %v4973_v46 }
 0x15f   : > { %v684_v42 = vpack.c.bf16 %v680_v38, %v679_v39  ;;  %4546 = vmatprep.subr.bf16.mxu0 %v4974_v47  ;;  %v4082_v38 = vld [vmem:[%s6493_s5 + $0x9] ss:$0 sm:$0xff] }
 0x161   : > { %4515 = vmatmul.mubr.bf16.gmra.mrb[4].mxu0 %v684_v42  ;;  %v4092_v42 = vld [vmem:[%s5633_s25 + $0x4] ss:$0 sm:$0xff] }
 0x162   : > { %4547 = vmatpush3.bf16.msra.mxu0 %v4974_v47 }
 0x163   : > { %4548 = vmatprep.subr.bf16.mxu0 %v4975_v48 }
 0x166   : > { %4549 = vmatpush3.bf16.msra.mxu0 %v4975_v48 }
 0x167   : > { %4550 = vmatprep.subr.bf16.mxu0 %v4976_v51 }
 0x16a   : > { %4551 = vmatpush3.bf16.msra.mxu0 %v4976_v51 }
 0x16b   : > { %4552 = vmatprep.subr.bf16.mxu0 %v4977_v24 }
 0x16e   : > { %4553 = vmatpush3.bf16.msra.mxu0 %v4977_v24 }
 0x16f   : > { %4554 = vmatprep.subr.bf16.mxu0 %v4978_v26 }
 0x172   : > { %4555 = vmatpush3.bf16.msra.mxu0 %v4978_v26 }
 0x173   : > { %4556 = vmatprep.subr.bf16.mxu0 %v4979_v27 }
 0x176   : > { %4557 = vmatpush3.bf16.msra.mxu0 %v4979_v27  ;;  %v4989_v27 = vld [vmem:[%s6494_s6 + $0x88] sm:$0xff]  }
 0x22c   : > { %v4512_v53 = vpop.f32.mrb[0].mxu0 }
 0x22d   : > { %v801_v54 = vadd.f32 %v4512_v53, %v4072_v52  ;;  %v792_v56 = vpop.f32.mrb[1].mxu0 }
 0x22e   : > { %v793_v58 = vadd.f32 %v4072_v52, %v792_v56  ;;  %v4513_v60 = vpop.f32.mrb[2].mxu0 }
 0x22f   : > { %v804_v61 = vadd.f32 %v4513_v60, %v4072_v52  ;;  %v795_v62 = vpop.f32.mrb[3].mxu0  ;;  %v825_v0 = vmax.f32 %v801_v54, 0.0 }
 0x230   : > { %v796_v63 = vadd.f32 %v4072_v52, %v795_v62  ;;  %v823_v2 = vmax.f32 %v793_v58, 0.0 }
 0x231   : > { %v826_v1 = vmax.f32 %v804_v61, 0.0 }
 0x232   : > { %v824_v3 = vmax.f32 %v796_v63, 0.0 }
 0x233   : > { %v832_v4 = vpack.c.bf16 %v826_v1, %v825_v0 }
 0x234   : > { %v4516_v5 = vpop.f32.mrb[4].mxu0  ;;  %v831_v6 = vpack.c.bf16 %v824_v3, %v823_v2 }
 0x235   : > { %v817_v7 = vadd.f32 %v4516_v5, %v4072_v52  ;;  %v808_v9 = vpop.f32.mrb[5].mxu0 }
 0x236   : > { %v809_v10 = vadd.f32 %v4072_v52, %v808_v9  ;;  %v4517_v13 = vpop.f32.mrb[6].mxu0  ;;  %4534 = vmatprep.mubr.bf16.mxu1 %v831_v6 }
 0x237   : > { %v820_v14 = vadd.f32 %v4517_v13, %v4072_v52  ;;  %v811_v15 = vpop.f32.mrb[7].mxu0  ;;  %4535 = vmatmul.mubr.bf16.vlgmr.msra.gmra.mrb[0].mxu1 %v832_v4  ;;  %v829_v17 = vmax.f32 %v817_v7, 0.0 }
 0x238   : > { %v812_v16 = vadd.f32 %v4072_v52, %v811_v15  ;;  %v827_v20 = vmax.f32 %v809_v10, 0.0  ;;  %4567 = vmatpush3.bf16.msra.mxu1 %v4980_v29  ;;  %v4990_v29 = vld [vmem:[%s6494_s6 + $0x90] sm:$0xff]  }
 0x239   : > { %v830_v18 = vmax.f32 %v820_v14, 0.0  ;;  %4568 = vmatprep.subr.bf16.mxu1 %v4981_v30 }
 0x23a   : > { %v828_v21 = vmax.f32 %v812_v16, 0.0 }
 0x23b   : > { %v834_v22 = vpack.c.bf16 %v830_v18, %v829_v17 }
 0x23c   : > { %v833_v23 = vpack.c.bf16 %v828_v21, %v827_v20  ;;  %4569 = vmatpush3.bf16.msra.mxu1 %v4981_v30  ;;  %v4991_v30 = vld [vmem:[%s6494_s6 + $0x98] sm:$0xff]  }
 0x23d   : > { %4570 = vmatprep.subr.bf16.mxu1 %v4982_v32 }
 0x23e   : > { %4538 = vmatprep.mubr.bf16.mxu1 %v833_v23 }
 0x23f   : > { %4539 = vmatmul.mubr.bf16.gmra.mrb[4].mxu1 %v834_v22 }
 0x240   : > { %4571 = vmatpush3.bf16.msra.mxu1 %v4982_v32  ;;  %v4992_v32 = vld [vmem:[%s6494_s6 + $0xa0] sm:$0xff]  }
 0x241   : > { %4572 = vmatprep.subr.bf16.mxu1 %v4983_v33 }
 0x244   : > { %4573 = vmatpush3.bf16.msra.mxu1 %v4983_v33  ;;  %v4094_v33 = vld [vmem:[%s6493_s5 + $0xa] ss:$0 sm:$0xff] }
 0x245   : > { %4574 = vmatprep.subr.bf16.mxu1 %v4984_v35 }
 0x248   : > { %4575 = vmatpush3.bf16.msra.mxu1 %v4984_v35 }
 0x249   : > { %4576 = vmatprep.subr.bf16.mxu1 %v4985_v37 }
 0x24c   : > { %4577 = vmatpush3.bf16.msra.mxu1 %v4985_v37 }
 0x30a   : > { %v4536_v39 = vpop.f32.mrb[0].mxu1 }
 0x30b   : > { %v951_v43 = vadd.f32 %v4536_v39, %v4082_v38  ;;  %v942_v44 = vpop.f32.mrb[1].mxu1 }
 0x30c   : > { %v943_v45 = vadd.f32 %v4082_v38, %v942_v44  ;;  %v4537_v46 = vpop.f32.mrb[2].mxu1 }
 0x30d   : > { %v983_v47 = vmul.f32 %v4092_v42, %v951_v43  ;;  %v954_v48 = vadd.f32 %v4537_v46, %v4082_v38  ;;  %v945_v51 = vpop.f32.mrb[3].mxu1 }
 0x30e   : > { %v981_v52 = vmul.f32 %v4092_v42, %v943_v45  ;;  %v946_v53 = vadd.f32 %v4082_v38, %v945_v51 }
 0x30f   : > { %v984_v54 = vmul.f32 %v4092_v42, %v954_v48  ;;  %v5643_v60 = vadd.f32 %v983_v47, %v5610_v19 }
 0x310   : > { %v5640_v56 = vadd.f32 %v981_v52, %v5602_v8  ;;  %v982_v58 = vmul.f32 %v4092_v42, %v946_v53 }
 0x311   : > { %v5646_v61 = vadd.f32 %v984_v54, %v5606_v12  ;;  %v999_v19 = vmax.f32 %v5643_v60, 0.0 }
 0x312   : > { %v5649_v62 = vadd.f32 %v982_v58, %v5604_v11  ;;  %v4540_v63 = vpop.f32.mrb[4].mxu1  ;;  %v997_v8 = vmax.f32 %v5640_v56, 0.0 }
 0x313   : > { %v1000_v0 = vmax.f32 %v5646_v61, 0.0  ;;  %v967_v1 = vadd.f32 %v4540_v63, %v4082_v38  ;;  %v958_v2 = vpop.f32.mrb[5].mxu1 }
 0x314   : > { %v959_v3 = vadd.f32 %v4082_v38, %v958_v2  ;;  %v4541_v4 = vpop.f32.mrb[6].mxu1  ;;  %v998_v5 = vmax.f32 %v5649_v62, 0.0 }
 0x315   : > { %v987_v6 = vmul.f32 %v4092_v42, %v967_v1  ;;  %v970_v7 = vadd.f32 %v4541_v4, %v4082_v38  ;;  %v961_v12 = vpop.f32.mrb[7].mxu1  ;;  %v1006_v13 = vpack.c.bf16 %v1000_v0, %v999_v19 }
 0x316   : > { %v985_v9 = vmul.f32 %v4092_v42, %v959_v3  ;;  %v962_v10 = vadd.f32 %v4082_v38, %v961_v12  ;;  %v1005_v11 = vpack.c.bf16 %v998_v5, %v997_v8 }
 0x317   : > { %v988_v14 = vmul.f32 %v4092_v42, %v970_v7  ;;  %v5659_v17 = vadd.f32 %v987_v6, %v5622_v36  ;;  %v4986_v36 = vld [vmem:[#allocation3 + $0x2f0] sm:$0xff]  }
 0x318   : > { %v5656_v15 = vadd.f32 %v985_v9, %v5616_v28  ;;  %v986_v16 = vmul.f32 %v4092_v42, %v962_v10  ;;  %4558 = vmatprep.mubr.bf16.mxu0 %v1005_v11  ;;  %4578 = vmatprep.subr.bf16.mxu1 %v4986_v36  ;;  %v4993_v9 = vld [vmem:[%s6494_s6 + $0xa8] sm:$0xff]   ;;  %v4994_v10 = vld [vmem:[%s6494_s6 + $0xb0] sm:$0xff]   ;;  %v4995_v11 = vld [vmem:[%s6494_s6 + $0xb8] sm:$0xff]  }
 0x319   : > { %v5662_v18 = vadd.f32 %v988_v14, %v5620_v34  ;;  %4559 = vmatmul.mubr.bf16.vlgmr.msra.gmra.mrb[8].mxu0 %v1006_v13  ;;  %v1003_v28 = vmax.f32 %v5659_v17, 0.0  ;;  %4579 = vmatpush3.bf16.msra.mxu1 %v4986_v36  ;;  %v4987_v34 = vld [vmem:[#allocation3 + $0x2f8] sm:$0xff]   ;;  %v5698_v13 = vstv %s4064_s28  ;;  %v5701_v14 = vld [vmem:[%s5550_s14] sm:$0xff]  ;;  %s4153_s28 = sld [smem:[#allocation7 + $0x82]] }
 0x31a   : > { %v5665_v20 = vadd.f32 %v986_v16, %v5614_v25  ;;  %v1001_v22 = vmax.f32 %v5656_v15, 0.0  ;;  %4580 = vmatprep.subr.bf16.mxu1 %v4987_v34  ;;  %v4988_v25 = vld [vmem:[%s6494_s6 + $0x80] sm:$0xff]   ;;  %v543_v16 = vmul.f32 %v5701_v14, %v5698_v13 }
 0x31b   : > { %v1004_v21 = vmax.f32 %v5662_v18, 0.0  ;;  %4590 = vmatprep.subr.bf16.mxu0 %v4988_v25  ;;  %v5725_v36 = vld [vmem:[%s5550_s14 + $0x20] sm:$0xff] }
 0x31c   : > { %v1002_v23 = vmax.f32 %v5665_v20, 0.0  ;;  %4591 = vmatpush3.bf16.msra.mxu0 %v4988_v25  ;;  %559 = vrot.lane.b32.xlu1 %v543_v16, %s5364_s29  ;;  %v5730_v25 = vld [vmem:[%s5550_s14 + $0x28] sm:$0xff] }
 0x31d   : > { %v1008_v26 = vpack.c.bf16 %v1004_v21, %v1003_v28  ;;  %4581 = vmatpush3.bf16.msra.mxu1 %v4987_v34  ;;  %4592 = vmatprep.subr.bf16.mxu0 %v4989_v27  ;;  %v5706_v21 = vld [vmem:[%s5550_s14 + $0x8] sm:$0xff]  ;;  %v547_v34 = vmul.f32 %v5725_v36, %v5698_v13 }
 0x31e   : > { %v1007_v24 = vpack.c.bf16 %v1002_v23, %v1001_v22  ;;  %v544_v22 = vmul.f32 %v5706_v21, %v5698_v13  ;;  %v5713_v23 = vld [vmem:[%s5550_s14 + $0x10] sm:$0xff] }
 0x31f   : > { %v545_v28 = vmul.f32 %v5713_v23, %v5698_v13 }
 0x320   : > { %4562 = vmatprep.mubr.bf16.mxu0 %v1007_v24  ;;  %4593 = vmatpush3.bf16.msra.mxu0 %v4989_v27  ;;  %v5718_v24 = vld [vmem:[%s5550_s14 + $0x18] sm:$0xff]  ;;  %v548_v27 = vmul.f32 %v5730_v25, %v5698_v13 }
 0x321   : > { %4563 = vmatmul.mubr.bf16.gmra.mrb[12].mxu0 %v1008_v26  ;;  %4594 = vmatprep.subr.bf16.mxu0 %v4990_v29  ;;  %v546_v26 = vmul.f32 %v5718_v24, %v5698_v13 }
 0x322   : > { %561 = vrot.lane.b32.xlu0 %v544_v22, %s5364_s29  ;;  %563 = vrot.lane.b32.xlu1 %v545_v28, %s5364_s29 }
 0x324   : > { %4595 = vmatpush3.bf16.msra.mxu0 %v4990_v29  ;;  %v4104_v29 = vld [vmem:[%s6493_s5 + $0xb] ss:$0 sm:$0xff] }
 0x325   : > { %4596 = vmatprep.subr.bf16.mxu0 %v4991_v30 }
 0x326   : > { %565 = vrot.lane.b32.xlu0 %v546_v26, %s5364_s29  ;;  %567 = vrot.lane.b32.xlu1 %v547_v34, %s5364_s29  ;;  %v5755_v34 = vld [vmem:[%s5550_s14 + $0x30] sm:$0xff] }
 0x328   : > { %4597 = vmatpush3.bf16.msra.mxu0 %v4991_v30 }
 0x329   : > { %4598 = vmatprep.subr.bf16.mxu0 %v4992_v32 }
 0x32a   : > { %569 = vrot.lane.b32.xlu0 %v548_v27, %s5364_s29  ;;  %v549_v27 = vmul.f32 %v5755_v34, %v5698_v13 }
 0x32c   : > { %4599 = vmatpush3.bf16.msra.mxu0 %v4992_v32  ;;  %v4114_v32 = vld [vmem:[%s5633_s25 + $0x5] ss:$0 sm:$0xff] }
 0x32d   : > { %4600 = vmatprep.subr.bf16.mxu0 %v4993_v9 }
 0x330   : > { %4601 = vmatpush3.bf16.msra.mxu0 %v4993_v9 }
 0x331   : > { %4602 = vmatprep.subr.bf16.mxu0 %v4994_v10 }
 0x334   : > { %4603 = vmatpush3.bf16.msra.mxu0 %v4994_v10 }
 0x335   : > { %4604 = vmatprep.subr.bf16.mxu0 %v4995_v11 }
 0x338   : > { %4605 = vmatpush3.bf16.msra.mxu0 %v4995_v11  ;;  %v4132_v11 = vld [vmem:[%s6495_s7 + $0x2] ss:$0 sm:$0xff] }
 0x3ec   : > { %v4560_v35 = vpop.f32.mrb[8].mxu0 }
 0x3ed   : > { %v1125_v37 = vadd.f32 %v4560_v35, %v4094_v33  ;;  %v1116_v38 = vpop.f32.mrb[9].mxu0 }
 0x3ee   : > { %v1117_v39 = vadd.f32 %v4094_v33, %v1116_v38  ;;  %v4561_v42 = vpop.f32.mrb[10].mxu0 }
 0x3ef   : > { %v1128_v43 = vadd.f32 %v4561_v42, %v4094_v33  ;;  %v1119_v44 = vpop.f32.mrb[11].mxu0  ;;  %v1149_v46 = vmax.f32 %v1125_v37, 0.0 }
 0x3f0   : > { %v1120_v45 = vadd.f32 %v4094_v33, %v1119_v44  ;;  %v1147_v48 = vmax.f32 %v1117_v39, 0.0 }
 0x3f1   : > { %v1150_v47 = vmax.f32 %v1128_v43, 0.0 }
 0x3f2   : > { %v1148_v51 = vmax.f32 %v1120_v45, 0.0 }
 0x3f3   : > { %v1156_v52 = vpack.c.bf16 %v1150_v47, %v1149_v46 }
 0x3f4   : > { %v1155_v53 = vpack.c.bf16 %v1148_v51, %v1147_v48  ;;  %v4564_v54 = vpop.f32.mrb[12].mxu0 }
 0x3f5   : > { %v1141_v58 = vadd.f32 %v4564_v54, %v4094_v33  ;;  %v1132_v63 = vpop.f32.mrb[13].mxu0 }
 0x3f6   : > { %v1133_v0 = vadd.f32 %v4094_v33, %v1132_v63  ;;  %v4565_v1 = vpop.f32.mrb[14].mxu0  ;;  %4582 = vmatprep.mubr.bf16.mxu1 %v1155_v53 }
 0x3f7   : > { %v1144_v2 = vadd.f32 %v4565_v1, %v4094_v33  ;;  %v1135_v3 = vpop.f32.mrb[15].mxu0  ;;  %4583 = vmatmul.mubr.bf16.vlgmr.msra.gmra.mrb[8].mxu1 %v1156_v52  ;;  %v1153_v8 = vmax.f32 %v1141_v58, 0.0 }
 0x3f8   : > { %v1136_v4 = vadd.f32 %v4094_v33, %v1135_v3  ;;  %v1151_v19 = vmax.f32 %v1133_v0, 0.0 }
 0x3f9   : > { %v1154_v5 = vmax.f32 %v1144_v2, 0.0 }
 0x3fa   : > { %v1152_v6 = vmax.f32 %v1136_v4, 0.0 }
 0x3fb   : > { %v1158_v7 = vpack.c.bf16 %v1154_v5, %v1153_v8 }
 0x3fc   : > { %v1157_v12 = vpack.c.bf16 %v1152_v6, %v1151_v19 }
 0x3fe   : > { %4586 = vmatprep.mubr.bf16.mxu1 %v1157_v12 }
 0x3ff   : > { %4587 = vmatmul.mubr.bf16.gmra.mrb[12].mxu1 %v1158_v7 }
 0x4ca   : > { %v4584_v30 = vpop.f32.mrb[8].mxu1 }
 0x4cb   : > { %v1275_v33 = vadd.f32 %v4584_v30, %v4104_v29  ;;  %v1266_v35 = vpop.f32.mrb[9].mxu1 }
 0x4cc   : > { %v1267_v37 = vadd.f32 %v4104_v29, %v1266_v35  ;;  %v4585_v38 = vpop.f32.mrb[10].mxu1 }
 0x4cd   : > { %v1307_v39 = vmul.f32 %v4114_v32, %v1275_v33  ;;  %v1278_v42 = vadd.f32 %v4585_v38, %v4104_v29  ;;  %v1269_v43 = vpop.f32.mrb[11].mxu1 }
 0x4ce   : > { %v1305_v44 = vmul.f32 %v4114_v32, %v1267_v37  ;;  %v1270_v45 = vadd.f32 %v4104_v29, %v1269_v43  ;;  %v4996_v43 = vld [vmem:[#allocation3 + $0x100] sm:$0xff]  }
 0x4cf   : > { %v1308_v46 = vmul.f32 %v4114_v32, %v1278_v42  ;;  %v1315_v48 = vadd.f32 %v1307_v39, %v5643_v60  ;;  %4614 = vmatprep.subr.bf16.mxu1 %v4996_v43 }
 0x4d0   : > { %v1306_v47 = vmul.f32 %v4114_v32, %v1270_v45  ;;  %v1313_v52 = vadd.f32 %v1305_v44, %v5640_v56  ;;  %v4997_v44 = vld [vmem:[#allocation3 + $0x108] sm:$0xff]   ;;  %4615 = vmatpush3.bf16.msra.mxu1 %v4996_v43  ;;  %v5795_v43 = vstv %s4151_s30  ;;  %s4243_s30 = sld [smem:[#allocation7 + $0x3]] }
 0x4d1   : > { %v1316_v51 = vadd.f32 %v1308_v46, %v5646_v61  ;;  %4616 = vmatprep.subr.bf16.mxu1 %v4997_v44  ;;  %v4999_v46 = vld [vmem:[#allocation3 + $0x118] sm:$0xff]  }
 0x4d2   : > { %v1314_v53 = vadd.f32 %v1306_v47, %v5649_v62  ;;  %v4588_v54 = vpop.f32.mrb[12].mxu1  ;;  %v5000_v47 = vld [vmem:[#allocation3 + $0x120] sm:$0xff]  }
 0x4d3   : > { %v1322_v58 = vpack.c.bf16 %v1316_v51, %v1315_v48  ;;  %v1291_v63 = vadd.f32 %v4588_v54, %v4104_v29  ;;  %v1282_v0 = vpop.f32.mrb[13].mxu1 }
 0x4d4   : > { %v1283_v1 = vadd.f32 %v4104_v29, %v1282_v0  ;;  %v4589_v2 = vpop.f32.mrb[14].mxu1  ;;  %v1321_v3 = vpack.c.bf16 %v1314_v53, %v1313_v52  ;;  %4617 = vmatpush3.bf16.msra.mxu1 %v4997_v44 }
 0x4d5   : > { %v1311_v4 = vmul.f32 %v4114_v32, %v1291_v63  ;;  %v1294_v8 = vadd.f32 %v4589_v2, %v4104_v29  ;;  %v1285_v5 = vpop.f32.mrb[15].mxu1 }
 0x4d6   : > { %v1309_v19 = vmul.f32 %v4114_v32, %v1283_v1  ;;  %v1286_v6 = vadd.f32 %v4104_v29, %v1285_v5  ;;  %4606 = vmatprep.mubr.bf16.mxu0 %v1321_v3 }
 0x4d7   : > { %v1312_v60 = vmul.f32 %v4114_v32, %v1294_v8  ;;  %4607 = vmatmul.mubr.bf16.vlgmr.msra.gmra.mrb[16].mxu0 %v1322_v58  ;;  %v1319_v56 = vadd.f32 %v1311_v4, %v5659_v17 }
 0x4d8   : > { %v1310_v61 = vmul.f32 %v4114_v32, %v1286_v6  ;;  %v1317_v7 = vadd.f32 %v1309_v19, %v5656_v15  ;;  %v5761_v32 = vld [vmem:[%s5550_s14 + $0x38] sm:$0xff]  ;;  %s4149_s14 = sld [smem:[#allocation7 + $0x106]] }
 0x4d9   : > { %v1320_v62 = vadd.f32 %v1312_v60, %v5662_v18  ;;  %v550_v33 = vmul.f32 %v5761_v32, %v5698_v13  ;;  %v4998_v13 = vld [vmem:[#allocation3 + $0x110] sm:$0xff]  }
 0x4da   : > { %v1318_v12 = vadd.f32 %v1310_v61, %v5665_v20  ;;  %4618 = vmatprep.subr.bf16.mxu1 %v4998_v13 }
 0x4db   : > { %v1324_v9 = vpack.c.bf16 %v1320_v62, %v1319_v56  ;;  %4619 = vmatpush3.bf16.msra.mxu1 %v4998_v13 }
 0x4dc   : > { %v1323_v10 = vpack.c.bf16 %v1318_v12, %v1317_v7  ;;  %4620 = vmatprep.subr.bf16.mxu1 %v4999_v46 }
 0x4de   : > { %4610 = vmatprep.mubr.bf16.mxu0 %v1323_v10  ;;  %v560_v10 = vpop.permute.xlu1 %559 }
 0x4df   : > { %4611 = vmatmul.mubr.bf16.gmra.mrb[20].mxu0 %v1324_v9  ;;  %4621 = vmatpush3.bf16.msra.mxu1 %v4999_v46 }
 0x4e0   : > { %4622 = vmatprep.subr.bf16.mxu1 %v5000_v47 }
 0x4e3   : > { %4623 = vmatpush3.bf16.msra.mxu1 %v5000_v47  ;;  %v5804_v47 = vstv %s4153_s28 }
 0x5aa   : > { %v4608_v16 = vpop.f32.mrb[16].mxu0 }
 0x5ab   : > { %v1441_v22 = vadd.f32 %v4608_v16, %v4132_v11  ;;  %v1432_v28 = vpop.f32.mrb[17].mxu0 }
 0x5ac   : > { %v4609_v17 = vpop.f32.mrb[18].mxu0  ;;  %v1433_v18 = vadd.f32 %v4132_v11, %v1432_v28  ;;  %v562_v28 = vpop.permute.xlu0 %561 }
 0x5ad   : > { %v1444_v26 = vadd.f32 %v4609_v17, %v4132_v11  ;;  %1571 = vrot.lane.b32.xlu1 %v1441_v22, %s5364_s29  ;;  %v1435_v15 = vpop.f32.mrb[19].mxu0  ;;  %v1465_v48 = vadd.f32 2.0, %v1441_v22  ;;  %v5773_v22 = vstv %s4063_s21  ;;  %s4242_s21 = sld [smem:[#allocation7 + $0x2]] }
 0x5ae   : > { %v1436_v20 = vadd.f32 %v4132_v11, %v1435_v15  ;;  %v1463_v53 = vadd.f32 2.0, %v1433_v18 }
 0x5af   : > { %1573 = vrot.lane.b32.xlu0 %v1444_v26, %s5364_s29  ;;  %v1466_v51 = vadd.f32 2.0, %v1444_v26  ;;  %v4143_v52 = vmul.f32 -1.442695, %v1465_v48 }
 0x5b0   : > { %v1464_v54 = vadd.f32 2.0, %v1436_v20  ;;  %v4141_v63 = vmul.f32 -1.442695, %v1463_v53 }
 0x5b1   : > { %1567 = vrot.lane.b32.xlu1 %v1433_v18, %s5364_s29  ;;  %v4144_v58 = vmul.f32 -1.442695, %v1466_v51  ;;  %5076 = vpow2.f32 %v4143_v52  ;;  %v5779_v18 = vstv %s4150_s23  ;;  %s4241_s23 = sld [smem:[#allocation7 + $0x1]] }
 0x5b2   : > { %v4612_v29 = vpop.f32.mrb[20].mxu0  ;;  %v4142_v0 = vmul.f32 -1.442695, %v1464_v54 }
 0x5b3   : > { %1569 = vrot.lane.b32.xlu0 %v1436_v20, %s5364_s29  ;;  %v1448_v30 = vpop.f32.mrb[21].mxu0  ;;  %v1457_v42 = vadd.f32 %v4612_v29, %v4132_v11  ;;  %5078 = vpow2.f32 %v4144_v58  ;;  %v536_v20 = vmul.f32 %v5713_v23, %v5773_v22  ;;  %v535_v23 = vmul.f32 %v5706_v21, %v5773_v22 }
 0x5b4   : > { %v4613_v35 = vpop.f32.mrb[22].mxu0  ;;  %v1449_v38 = vadd.f32 %v4132_v11, %v1448_v30  ;;  %5080 = vpow2.f32 %v4141_v63 }
 0x5b5   : > { %571 = vrot.lane.b32.xlu1 %v549_v27, %s5364_s29  ;;  %v1451_v37 = vpop.f32.mrb[23].mxu0  ;;  %v1460_v45 = vadd.f32 %v4613_v35, %v4132_v11  ;;  %5082 = vpow2.f32 %v4142_v0  ;;  %v1469_v3 = vadd.f32 2.0, %v1457_v42  ;;  %v564_v27 = vpop.permute.xlu1 %563  ;;  %v584_v53 = vadd.f32 %v562_v28, %v535_v23 }
 0x5b6   : > { %v1452_v39 = vadd.f32 %v4132_v11, %v1451_v37  ;;  %v1467_v1 = vadd.f32 2.0, %v1449_v38  ;;  %v5771_v11 = vstv %s4149_s14  ;;  %v566_v37 = vpop.permute.xlu0 %565  ;;  %s2713_s14 = sld [smem:[#allocation7]] }
 0x5b7   : > { %573 = vrot.lane.b32.xlu0 %v550_v33, %s5364_s29  ;;  %v1470_v5 = vadd.f32 2.0, %v1460_v45  ;;  %v4147_v60 = vmul.f32 -1.442695, %v1469_v3  ;;  %v1603_v17 = vmul.f32 %v5771_v11, %v5577_v49  ;;  %v1601_v26 = vmul.f32 %v5771_v11, %v5568_v31 }
 0x5b8   : > { %v1468_v2 = vadd.f32 2.0, %v1452_v39  ;;  %v4145_v4 = vmul.f32 -1.442695, %v1467_v1  ;;  %v537_v33 = vmul.f32 %v5718_v24, %v5773_v22  ;;  %v1604_v31 = vmul.f32 %v5771_v11, %v5571_v40 }
 0x5b9   : > { %1575 = vrot.lane.b32.xlu1 %v1449_v38, %s5364_s29  ;;  %v4148_v62 = vmul.f32 -1.442695, %v1470_v5  ;;  %v1613_v30 = vadd.f32 %v5779_v18, %v1603_v17  ;;  %v1611_v49 = vadd.f32 %v5779_v18, %v1601_v26  ;;  %v1602_v44 = vmul.f32 %v5771_v11, %v5573_v41 }
 0x5ba   : > { %v4146_v19 = vmul.f32 -1.442695, %v1468_v2  ;;  %5084 = vpow2.f32 %v4145_v4  ;;  %v5799_v40 = vstv %s4066_s8  ;;  %v586_v46 = vadd.f32 %v566_v37, %v537_v33  ;;  %v568_v2 = vpop.permute.xlu1 %567  ;;  %s4244_s8 = sld [smem:[#allocation7 + $0x4]] }
 0x5bb   : > { %1577 = vrot.lane.b32.xlu0 %v1452_v39, %s5364_s29  ;;  %v5077_v8 = vpop.eup %5076  ;;  %v534_v39 = vmul.f32 %v5701_v14, %v5773_v22  ;;  %v1626_v14 = vmul.f32 %v5795_v43, %v1613_v30  ;;  %v1614_v48 = vadd.f32 %v5779_v18, %v1604_v31  ;;  %v1662_v51 = vmul.f32 %v5804_v47, %v1613_v30 }
 0x5bc   : > { %v1497_v61 = vadd.f32 1.0, %v5077_v8  ;;  %5086 = vpow2.f32 %v4146_v19  ;;  %v5809_v52 = vmul.f32 %v5795_v43, %v1611_v49  ;;  %v1612_v0 = vadd.f32 %v5779_v18, %v1602_v44 }
 0x5bd   : > { %1579 = vrot.lane.b32.xlu1 %v1457_v42, %s5364_s29  ;;  %v5079_v6 = vpop.eup %5078  ;;  %5088 = vpow2.f32 %v4147_v60  ;;  %v585_v42 = vadd.f32 %v564_v27, %v536_v20  ;;  %v583_v41 = vadd.f32 %v560_v10, %v534_v39  ;;  %v5816_v3 = vmul.f32 %v5804_v47, %v1611_v49 }
 0x5be   : > { %v5081_v56 = vpop.eup %5080  ;;  %v1498_v12 = vadd.f32 1.0, %v5079_v6  ;;  %5090 = vrcp.f32 %v1497_v61  ;;  %v1606_v8 = vmul.f32 %v5771_v11, %v5579_v50  ;;  %v596_v19 = vadd.f32 %v5799_v40, %v586_v46 }
 0x5bf   : > { %1581 = vrot.lane.b32.xlu0 %v1460_v45, %s5364_s29  ;;  %v5083_v7 = vpop.eup %5082  ;;  %v1495_v9 = vadd.f32 1.0, %v5081_v56  ;;  %5092 = vpow2.f32 %v4148_v62  ;;  %v595_v54 = vadd.f32 %v5799_v40, %v585_v42  ;;  %v1605_v60 = vmul.f32 %v5771_v11, %v5581_v55  ;;  %v570_v62 = vpop.permute.xlu0 %569 }
 0x5c0   : > { %v1496_v16 = vadd.f32 1.0, %v5083_v7  ;;  %5094 = vrcp.f32 %v1498_v12  ;;  %v538_v61 = vmul.f32 %v5725_v36, %v5773_v22  ;;  %v539_v56 = vmul.f32 %v5730_v25, %v5773_v22 }
 0x5c1   : > { %5096 = vrcp.f32 %v1495_v9  ;;  %v1627_v7 = vmul.f32 %v5795_v43, %v1614_v48  ;;  %v593_v12 = vadd.f32 %v5799_v40, %v583_v41  ;;  %v594_v50 = vadd.f32 %v5799_v40, %v584_v53 }
 0x5c2   : > { %5098 = vrcp.f32 %v1496_v16  ;;  %v5833_v9 = vstv %s5793_s11  ;;  %v5837_v16 = vstv %s5801_s9  ;;  %v1663_v26 = vmul.f32 %v5804_v47, %v1614_v48  ;;  %s4156_s9 = sld [smem:[#allocation7 + $0x85]]  ;;  %s4310_s11 = sshll.u32 %s5349_s18, 7 }
 0x5c3   : > { %v587_v20 = vadd.f32 %v568_v2, %v538_v61  ;;  %v1661_v30 = vmul.f32 %v5804_v47, %v1612_v0  ;;  %v1615_v33 = vadd.f32 %v5779_v18, %v1605_v60  ;;  %v1608_v48 = vmul.f32 %v5771_v11, %v5585_v57  ;;  %s5365_s18 = smov [#allocation8]  }
 0x5c4   : > { %v5085_v15 = vpop.eup %5084 }
 0x5c5   : > { %v1499_v35 = vadd.f32 1.0, %v5085_v15  ;;  %v1616_v15 = vadd.f32 %v5779_v18, %v1606_v8  ;;  %v597_v41 = vadd.f32 %v5799_v40, %v587_v20 }
 0x5c6   : > { %v5087_v29 = vpop.eup %5086 }
 0x5c7   : > { %v5089_v38 = vpop.eup %5088  ;;  %v1500_v45 = vadd.f32 1.0, %v5087_v29  ;;  %5100 = vrcp.f32 %v1499_v35  ;;  %v1625_v29 = vmul.f32 %v5795_v43, %v1612_v0 }
 0x5c8   : > { %v5091_v24 = vpop.eup %5090  ;;  %v1501_v1 = vadd.f32 1.0, %v5089_v38  ;;  %v588_v38 = vadd.f32 %v570_v62, %v539_v56  ;;  %v1629_v62 = vmul.f32 %v5795_v43, %v1616_v15 }
 0x5c9   : > { %v5093_v13 = vpop.eup %5092  ;;  %v5812_v58 = vadd.f32 0.001, %v5091_v24  ;;  %5102 = vrcp.f32 %v1500_v45  ;;  %v540_v24 = vmul.f32 %v5755_v34, %v5773_v22 }
 0x5ca   : > { %v5095_v21 = vpop.eup %5094  ;;  %v1502_v5 = vadd.f32 1.0, %v5093_v13  ;;  %5104 = vrcp.f32 %v1501_v1  ;;  %v1607_v1 = vmul.f32 %v5771_v11, %v5587_v59  ;;  %v598_v2 = vadd.f32 %v5799_v40, %v588_v38 }
 0x5cb   : > { %v5097_v63 = vpop.eup %5096  ;;  %v5821_v6 = vadd.f32 0.001, %v5095_v21  ;;  %v1553_v10 = vmul.f32 %v5812_v58, %v595_v54  ;;  %v5884_v11 = vstv %s5848_s13  ;;  %v1618_v38 = vadd.f32 %v5779_v18, %v1608_v48  ;;  %s4239_s13 = sld [smem:[#allocation7 + $0x86]] }
 0x5cc   : > { %v5099_v4 = vpop.eup %5098  ;;  %v5839_v28 = vadd.f32 0.001, %v5097_v63  ;;  %5106 = vrcp.f32 %v1502_v5  ;;  %v541_v63 = vmul.f32 %v5761_v32, %v5773_v22 }
 0x5cd   : > { %v5841_v36 = vadd.f32 0.001, %v5099_v4  ;;  %v1554_v17 = vmul.f32 %v5821_v6, %v596_v19 }
 0x5ce   : > { %v1551_v23 = vmul.f32 %v5839_v28, %v593_v12 }
 0x5cf   : > { %v1552_v42 = vmul.f32 %v5841_v36, %v594_v50 }
 0x5d1   : > { %v5101_v37 = vpop.eup %5100 }
 0x5d3   : > { %v5103_v21 = vpop.eup %5102 }
 0x5d4   : > { %v5877_v19 = vadd.f32 0.001, %v5103_v21  ;;  %v5105_v60 = vpop.eup %5104 }
 0x61f   : > { %v1572_v55 = vpop.permute.xlu1 %1571 }
 0x620   : > { %v1593_v25 = vadd.f32 %v1572_v55, %v1553_v10 }
 0x621   : > { %v1574_v27 = vpop.permute.xlu0 %1573 }
 0x622   : > { %v1635_v49 = vmul.f32 %v5833_v9, %v1593_v25  ;;  %v1671_v31 = vmul.f32 %v5837_v16, %v1593_v25  ;;  %v1594_v35 = vadd.f32 %v1574_v27, %v1554_v17  ;;  %v1628_v17 = vmul.f32 %v5795_v43, %v1615_v33 }
 0x623   : > { %v1568_v39 = vpop.permute.xlu1 %1567 }
 0x624   : > { %v1643_v44 = vadd.f32 %v1635_v49, %v1626_v14  ;;  %v5857_v45 = vadd.f32 %v1671_v31, %v1662_v51  ;;  %v1636_v13 = vmul.f32 %v5833_v9, %v1594_v35  ;;  %v1672_v46 = vmul.f32 %v5837_v16, %v1594_v35 }
 0x625   : > { %v1591_v53 = vadd.f32 %v1568_v39, %v1551_v23  ;;  %v1570_v54 = vpop.permute.xlu0 %1569  ;;  %v5868_v51 = vadd.f32 0.001, %v5101_v37  ;;  %v1617_v49 = vadd.f32 %v5779_v18, %v1607_v1  ;;  %v1665_v31 = vmul.f32 %v5804_v47, %v1616_v15 }
 0x626   : > { %v1644_v0 = vadd.f32 %v1636_v13, %v1627_v7  ;;  %v5866_v34 = vadd.f32 %v1672_v46, %v1663_v26  ;;  %v1592_v14 = vadd.f32 %v1570_v54, %v1552_v42  ;;  %v5107_v7 = vpop.eup %5106  ;;  %v5001_v42 = vld [vmem:[#allocation3 + $0x128] sm:$0xff]   ;;  %v5914_v15 = vadd.f32 %v5884_v11, %v1643_v44 }
 0x627   : > { %v1633_v57 = vmul.f32 %v5833_v9, %v1591_v53  ;;  %v1669_v4 = vmul.f32 %v5837_v16, %v1591_v53  ;;  %v572_v8 = vpop.permute.xlu1 %571  ;;  %v1555_v55 = vmul.f32 %v5868_v51, %v597_v41  ;;  %v5906_v37 = vadd.f32 0.001, %v5107_v7  ;;  %4624 = vmatprep.subr.bf16.mxu1 %v5001_v42 }
 0x628   : > { %v1634_v5 = vmul.f32 %v5833_v9, %v1592_v14  ;;  %v1670_v32 = vmul.f32 %v5837_v16, %v1592_v14  ;;  %v589_v22 = vadd.f32 %v572_v8, %v540_v24  ;;  %v5918_v21 = vadd.f32 %v5884_v11, %v1644_v0  ;;  %4625 = vmatpush3.bf16.msra.mxu1 %v5001_v42 }
 0x629   : > { %v1641_v61 = vadd.f32 %v1633_v57, %v5809_v52  ;;  %v5881_v56 = vadd.f32 %v1669_v4, %v5816_v3  ;;  %v574_v59 = vpop.permute.xlu0 %573  ;;  %v1664_v52 = vmul.f32 %v5804_v47, %v1615_v33  ;;  %v5904_v33 = vadd.f32 0.001, %v5105_v60  ;;  %v5002_v57 = vld [vmem:[#allocation3 + $0x130] sm:$0xff]  }
 0x62a   : > { %v1642_v12 = vadd.f32 %v1634_v5, %v1625_v29  ;;  %v5887_v50 = vadd.f32 %v1670_v32, %v1661_v30  ;;  %v590_v10 = vadd.f32 %v574_v59, %v541_v63  ;;  %v599_v25 = vadd.f32 %v5799_v40, %v589_v22  ;;  %4626 = vmatprep.subr.bf16.mxu1 %v5002_v57 }
 0x62b   : > { %v1576_v3 = vpop.permute.xlu1 %1575  ;;  %v5894_v26 = vadd.f32 %v5884_v11, %v1641_v61  ;;  %v1556_v29 = vmul.f32 %v5877_v19, %v598_v2  ;;  %v1630_v54 = vmul.f32 %v5795_v43, %v1617_v49  ;;  %v1666_v4 = vmul.f32 %v5804_v47, %v1617_v49 }
 0x62c   : > { %v600_v20 = vadd.f32 %v5799_v40, %v590_v10  ;;  %v1595_v27 = vadd.f32 %v1576_v3, %v1555_v55  ;;  %v5899_v30 = vadd.f32 %v5884_v11, %v1642_v12  ;;  %v1557_v24 = vmul.f32 %v5904_v33, %v599_v25  ;;  %4627 = vmatpush3.bf16.msra.mxu1 %v5002_v57  ;;  %v5005_v55 = vld [vmem:[#allocation3 + $0x148] sm:$0xff]   ;;  %v5006_v25 = vld [vmem:[#allocation3 + $0x150] sm:$0xff]   ;;  %v4158_v3 = vld [vmem:[%s6491_s3 + $0x1] ss:$0 sm:$0xff] }
 0x62d   : > { %1699 = vperm.xlu1 %4955, %v5894_v26   ;;  %v1578_v35 = vpop.permute.xlu0 %1577  ;;  %v1631_v32 = vmul.f32 %v5795_v43, %v1618_v38  ;;  %v1667_v22 = vmul.f32 %v5804_v47, %v1618_v38  ;;  %v5003_v43 = vld [vmem:[#allocation3 + $0x138] sm:$0xff]  }
 0x62e   : > { %v1637_v40 = vmul.f32 %v5833_v9, %v1595_v27  ;;  %v1673_v39 = vmul.f32 %v5837_v16, %v1595_v27  ;;  %v1596_v23 = vadd.f32 %v1578_v35, %v1556_v29  ;;  %1704 = vperm.xlu0 %4954, %v5899_v30   ;;  %v1558_v46 = vmul.f32 %v5906_v37, %v600_v20  ;;  %v4160_v20 = vld [vmem:[%s5599_s12 + $0x1] ss:$0 sm:$0xff] }
 0x62f   : > { %v1580_v13 = vpop.permute.xlu1 %1579  ;;  %4628 = vmatprep.subr.bf16.mxu1 %v5003_v43 }
 0x630   : > { %v1645_v18 = vadd.f32 %v1637_v40, %v1628_v17  ;;  %v5920_v48 = vadd.f32 %v1673_v39, %v1664_v52  ;;  %v1638_v41 = vmul.f32 %v5833_v9, %v1596_v23  ;;  %v1674_v53 = vmul.f32 %v5837_v16, %v1596_v23  ;;  %4629 = vmatpush3.bf16.msra.mxu1 %v5003_v43  ;;  %v5007_v17 = vld [vmem:[#allocation3 + $0x158] sm:$0xff]   ;;  %v5009_v52 = vld [vmem:[#allocation3 + $0x168] sm:$0xff]  }
 0x631   : > { %v1597_v63 = vadd.f32 %v1580_v13, %v1557_v24  ;;  %1709 = vperm.xlu1 %4955, %v5914_v15   ;;  %v1582_v44 = vpop.permute.xlu0 %1581 }
 0x632   : > { %v1646_v14 = vadd.f32 %v1638_v41, %v1629_v62  ;;  %v5926_v1 = vadd.f32 %v1674_v53, %v1665_v31  ;;  %v1598_v0 = vadd.f32 %v1582_v44, %v1558_v46  ;;  %1714 = vperm.xlu0 %4954, %v5918_v21   ;;  %v5930_v2 = vadd.f32 %v5884_v11, %v1645_v18 }
 0x633   : > { %v1639_v8 = vmul.f32 %v5833_v9, %v1597_v63  ;;  %v1675_v5 = vmul.f32 %v5837_v16, %v1597_v63 }
 0x634   : > { %v1640_v60 = vmul.f32 %v5833_v9, %v1598_v0  ;;  %v1676_v61 = vmul.f32 %v5837_v16, %v1598_v0  ;;  %v5940_v59 = vadd.f32 %v5884_v11, %v1646_v14  ;;  %v5004_v16 = vld [vmem:[#allocation3 + $0x140] sm:$0xff]  }
 0x635   : > { %v1647_v62 = vadd.f32 %v1639_v8, %v1630_v54  ;;  %v5942_v7 = vadd.f32 %v1675_v5, %v1666_v4  ;;  %1719 = vperm.xlu1 %4955, %v5930_v2   ;;  %4638 = vmatprep.subr.bf16.mxu0 %v5004_v16 }
 0x636   : > { %v1648_v12 = vadd.f32 %v1640_v60, %v1631_v32  ;;  %v5945_v10 = vadd.f32 %v1676_v61, %v1667_v22  ;;  %1724 = vperm.xlu0 %4954, %v5940_v59   ;;  %4639 = vmatpush3.bf16.msra.mxu0 %v5004_v16 }
 0x637   : > { %v5949_v47 = vadd.f32 %v5884_v11, %v1647_v62  ;;  %4640 = vmatprep.subr.bf16.mxu0 %v5005_v55 }
 0x638   : > { %v5952_v9 = vadd.f32 %v5884_v11, %v1648_v12  ;;  %v5008_v11 = vld [vmem:[#allocation3 + $0x160] sm:$0xff]  }
 0x639   : > { %1729 = vperm.xlu1 %4955, %v5949_v47  }
 0x63a   : > { %1734 = vperm.xlu0 %4954, %v5952_v9   ;;  %4641 = vmatpush3.bf16.msra.mxu0 %v5005_v55 }
 0x63b   : > { %4642 = vmatprep.subr.bf16.mxu0 %v5006_v25 }
 0x63e   : > { %4643 = vmatpush3.bf16.msra.mxu0 %v5006_v25 }
 0x63f   : > { %4644 = vmatprep.subr.bf16.mxu0 %v5007_v17 }
 0x642   : > { %4645 = vmatpush3.bf16.msra.mxu0 %v5007_v17 }
 0x643   : > { %4646 = vmatprep.subr.bf16.mxu0 %v5008_v11 }
 0x646   : > { %4647 = vmatpush3.bf16.msra.mxu0 %v5008_v11  ;;  %v5010_v11 = vld [vmem:[#allocation3 + $0x170] sm:$0xff]  }
 0x647   : > { %4648 = vmatprep.subr.bf16.mxu0 %v5009_v52 }
 0x64a   : > { %4649 = vmatpush3.bf16.msra.mxu0 %v5009_v52  ;;  %v5011_v52 = vld [vmem:[#allocation3 + $0x178] sm:$0xff]  }
 0x64b   : > { %4650 = vmatprep.subr.bf16.mxu0 %v5010_v11 }
 0x64e   : > { %4651 = vmatpush3.bf16.msra.mxu0 %v5010_v11 }
 0x64f   : > { %4652 = vmatprep.subr.bf16.mxu0 %v5011_v52 }
 0x652   : > { %4653 = vmatpush3.bf16.msra.mxu0 %v5011_v52 }
 0x6ac   : > { %v1700_v27 = vpop.permute.xlu1 %1699 }
 0x6ad   : > { %v1743_v29 = vmul.f32 %v4158_v3, %v1700_v27  ;;  %v1705_v49 = vpop.permute.xlu0 %1704  ;;  %v5013_v27 = vld [vmem:[#allocation3 + $0x188] sm:$0xff]  }
 0x6ae   : > { %v1744_v31 = vmul.f32 %v4158_v3, %v1705_v49  ;;  %v5016_v49 = vld [vmem:[#allocation3 + $0x1a0] sm:$0xff]  }
 0x6af   : > { %v5960_v35 = vadd.f32 %v4160_v20, %v1743_v29  ;;  %v5015_v29 = vld [vmem:[#allocation3 + $0x198] sm:$0xff]  }
 0x6b0   : > { %v5962_v38 = vadd.f32 %v4160_v20, %v1744_v31  ;;  %v1710_v40 = vpop.permute.xlu1 %1709  ;;  %v4162_v31 = vld [vmem:[%s6493_s5 + $0x4] ss:$0 sm:$0xff] }
 0x6b1   : > { %v1745_v39 = vmul.f32 %v4158_v3, %v1710_v40  ;;  %v1715_v23 = vpop.permute.xlu0 %1714  ;;  %v1767_v42 = vmax.f32 %v5960_v35, 0.0 }
 0x6b2   : > { %v1768_v24 = vmax.f32 %v5962_v38, 0.0  ;;  %v1746_v13 = vmul.f32 %v4158_v3, %v1715_v23 }
 0x6b3   : > { %v5966_v46 = vadd.f32 %v4160_v20, %v1745_v39 }
 0x6b4   : > { %v5968_v18 = vadd.f32 %v4160_v20, %v1746_v13  ;;  %v1720_v41 = vpop.permute.xlu1 %1719  ;;  %v1775_v53 = vpack.c.bf16 %v1768_v24, %v1767_v42 }
 0x6b5   : > { %v1747_v54 = vmul.f32 %v4158_v3, %v1720_v41  ;;  %v1725_v63 = vpop.permute.xlu0 %1724  ;;  %v1769_v44 = vmax.f32 %v5966_v46, 0.0 }
 0x6b6   : > { %v1770_v14 = vmax.f32 %v5968_v18, 0.0  ;;  %v1748_v0 = vmul.f32 %v4158_v3, %v1725_v63  ;;  %4630 = vmatprep.mubr.bf16.mxu1 %v1775_v53 }
 0x6b7   : > { %v5972_v57 = vadd.f32 %v4160_v20, %v1747_v54 }
 0x6b8   : > { %v1776_v4 = vpack.c.bf16 %v1770_v14, %v1769_v44  ;;  %v5974_v8 = vadd.f32 %v4160_v20, %v1748_v0  ;;  %v1730_v5 = vpop.permute.xlu1 %1729 }
 0x6b9   : > { %v1749_v32 = vmul.f32 %v4158_v3, %v1730_v5  ;;  %v1735_v22 = vpop.permute.xlu0 %1734  ;;  %v1771_v60 = vmax.f32 %v5972_v57, 0.0 }
 0x6ba   : > { %v1772_v61 = vmax.f32 %v5974_v8, 0.0  ;;  %v1750_v62 = vmul.f32 %v4158_v3, %v1735_v22  ;;  %4631 = vmatmul.mubr.bf16.vlgmr.msra.gmra.mrb[16].mxu1 %v1776_v4  ;;  %v5012_v3 = vld [vmem:[#allocation3 + $0x180] sm:$0xff]  }
 0x6bb   : > { %v5978_v12 = vadd.f32 %v4160_v20, %v1749_v32  ;;  %4662 = vmatprep.subr.bf16.mxu1 %v5012_v3 }
 0x6bc   : > { %v5980_v43 = vadd.f32 %v4160_v20, %v1750_v62  ;;  %v1777_v16 = vpack.c.bf16 %v1772_v61, %v1771_v60  ;;  %4663 = vmatpush3.bf16.msra.mxu1 %v5012_v3  ;;  %v5014_v20 = vld [vmem:[#allocation3 + $0x190] sm:$0xff]  }
 0x6bd   : > { %v1773_v55 = vmax.f32 %v5978_v12, 0.0  ;;  %4664 = vmatprep.subr.bf16.mxu1 %v5013_v27 }
 0x6be   : > { %v1774_v25 = vmax.f32 %v5980_v43, 0.0  ;;  %4634 = vmatprep.mubr.bf16.mxu1 %v1777_v16 }
 0x6c0   : > { %v1778_v17 = vpack.c.bf16 %v1774_v25, %v1773_v55  ;;  %4665 = vmatpush3.bf16.msra.mxu1 %v5013_v27 }
 0x6c1   : > { %4666 = vmatprep.subr.bf16.mxu1 %v5014_v20 }
 0x6c2   : > { %4635 = vmatmul.mubr.bf16.gmra.mrb[20].mxu1 %v1778_v17 }
 0x6c4   : > { %4667 = vmatpush3.bf16.msra.mxu1 %v5014_v20  ;;  %v5017_v20 = vld [vmem:[#allocation3 + $0x1a8] sm:$0xff]  }
 0x6c5   : > { %4668 = vmatprep.subr.bf16.mxu1 %v5015_v29 }
 0x6c8   : > { %4669 = vmatpush3.bf16.msra.mxu1 %v5015_v29  ;;  %v5018_v29 = vld [vmem:[#allocation3 + $0x1b0] sm:$0xff]  }
 0x6c9   : > { %4670 = vmatprep.subr.bf16.mxu1 %v5016_v49 }
 0x6cc   : > { %4671 = vmatpush3.bf16.msra.mxu1 %v5016_v49  ;;  %v5019_v49 = vld [vmem:[#allocation3 + $0x1b8] sm:$0xff]  }
 0x6cd   : > { %4672 = vmatprep.subr.bf16.mxu1 %v5017_v20 }
 0x6d0   : > { %4673 = vmatpush3.bf16.msra.mxu1 %v5017_v20 }
 0x6d1   : > { %4674 = vmatprep.subr.bf16.mxu1 %v5018_v29 }
 0x6d4   : > { %4675 = vmatpush3.bf16.msra.mxu1 %v5018_v29 }
 0x6d5   : > { %4676 = vmatprep.subr.bf16.mxu1 %v5019_v49 }
 0x6d8   : > { %4677 = vmatpush3.bf16.msra.mxu1 %v5019_v49 }
 0x78d   : > { %v4632_v40 = vpop.f32.mrb[16].mxu1 }
 0x78e   : > { %v1895_v39 = vadd.f32 %v4632_v40, %v4162_v31  ;;  %v1886_v23 = vpop.f32.mrb[17].mxu1  ;;  %v5020_v40 = vld [vmem:[#allocation3 + $0x1c0] sm:$0xff]  }
 0x78f   : > { %v1887_v42 = vadd.f32 %v4162_v31, %v1886_v23  ;;  %v4633_v24 = vpop.f32.mrb[18].mxu1  ;;  %4686 = vmatprep.subr.bf16.mxu0 %v5020_v40  ;;  %v5023_v23 = vld [vmem:[#allocation3 + $0x1d8] sm:$0xff]  }
 0x790   : > { %v1898_v13 = vadd.f32 %v4633_v24, %v4162_v31  ;;  %v1889_v41 = vpop.f32.mrb[19].mxu1  ;;  %v1919_v54 = vmax.f32 %v1895_v39, 0.0  ;;  %v5021_v39 = vld [vmem:[#allocation3 + $0x1c8] sm:$0xff]  }
 0x791   : > { %v1890_v53 = vadd.f32 %v4162_v31, %v1889_v41  ;;  %v1917_v44 = vmax.f32 %v1887_v42, 0.0  ;;  %v5024_v42 = vld [vmem:[#allocation3 + $0x1e0] sm:$0xff]   ;;  %v5025_v24 = vld [vmem:[#allocation3 + $0x1e8] sm:$0xff]  }
 0x792   : > { %v1920_v63 = vmax.f32 %v1898_v13, 0.0  ;;  %v4172_v13 = vld [vmem:[%s6493_s5 + $0x5] ss:$0 sm:$0xff] }
 0x793   : > { %v1918_v14 = vmax.f32 %v1890_v53, 0.0  ;;  %v4182_v53 = vld [vmem:[%s5633_s25 + $0x2] ss:$0 sm:$0xff] }
 0x794   : > { %v1926_v0 = vpack.c.bf16 %v1920_v63, %v1919_v54 }
 0x795   : > { %v1925_v4 = vpack.c.bf16 %v1918_v14, %v1917_v44  ;;  %v4636_v5 = vpop.f32.mrb[20].mxu1 }
 0x796   : > { %v1911_v32 = vadd.f32 %v4636_v5, %v4162_v31  ;;  %v1902_v22 = vpop.f32.mrb[21].mxu1 }
 0x797   : > { %v1903_v60 = vadd.f32 %v4162_v31, %v1902_v22  ;;  %v4637_v61 = vpop.f32.mrb[22].mxu1  ;;  %4654 = vmatprep.mubr.bf16.mxu0 %v1925_v4 }
 0x798   : > { %v1914_v62 = vadd.f32 %v4637_v61, %v4162_v31  ;;  %v1905_v16 = vpop.f32.mrb[23].mxu1  ;;  %4655 = vmatmul.mubr.bf16.vlgmr.msra.gmra.mrb[24].mxu0 %v1926_v0  ;;  %v1923_v25 = vmax.f32 %v1911_v32, 0.0 }
 0x799   : > { %v1906_v55 = vadd.f32 %v4162_v31, %v1905_v16  ;;  %v1921_v11 = vmax.f32 %v1903_v60, 0.0  ;;  %4687 = vmatpush3.bf16.msra.mxu0 %v5020_v40  ;;  %v5022_v31 = vld [vmem:[#allocation3 + $0x1d0] sm:$0xff]  }
 0x79a   : > { %v1924_v17 = vmax.f32 %v1914_v62, 0.0  ;;  %4688 = vmatprep.subr.bf16.mxu0 %v5021_v39 }
 0x79b   : > { %v1922_v52 = vmax.f32 %v1906_v55, 0.0 }
 0x79c   : > { %v1928_v3 = vpack.c.bf16 %v1924_v17, %v1923_v25 }
 0x79d   : > { %v1927_v27 = vpack.c.bf16 %v1922_v52, %v1921_v11  ;;  %4689 = vmatpush3.bf16.msra.mxu0 %v5021_v39 }
 0x79e   : > { %4690 = vmatprep.subr.bf16.mxu0 %v5022_v31 }
 0x79f   : > { %4658 = vmatprep.mubr.bf16.mxu0 %v1927_v27 }
 0x7a0   : > { %4659 = vmatmul.mubr.bf16.gmra.mrb[28].mxu0 %v1928_v3 }
 0x7a1   : > { %4691 = vmatpush3.bf16.msra.mxu0 %v5022_v31 }
 0x7a2   : > { %4692 = vmatprep.subr.bf16.mxu0 %v5023_v23 }
 0x7a5   : > { %4693 = vmatpush3.bf16.msra.mxu0 %v5023_v23 }
 0x7a6   : > { %4694 = vmatprep.subr.bf16.mxu0 %v5024_v42 }
 0x7a9   : > { %4695 = vmatpush3.bf16.msra.mxu0 %v5024_v42 }
 0x7aa   : > { %4696 = vmatprep.subr.bf16.mxu0 %v5025_v24 }
 0x7ad   : > { %4697 = vmatpush3.bf16.msra.mxu0 %v5025_v24 }
 0x86b   : > { %v4656_v41 = vpop.f32.mrb[24].mxu0 }
 0x86c   : > { %v2045_v54 = vadd.f32 %v4656_v41, %v4172_v13  ;;  %v2036_v63 = vpop.f32.mrb[25].mxu0 }
 0x86d   : > { %v2037_v44 = vadd.f32 %v4172_v13, %v2036_v63  ;;  %v4657_v14 = vpop.f32.mrb[26].mxu0 }
 0x86e   : > { %v2077_v0 = vmul.f32 %v4182_v53, %v2045_v54  ;;  %v2048_v4 = vadd.f32 %v4657_v14, %v4172_v13  ;;  %v2039_v5 = vpop.f32.mrb[27].mxu0 }
 0x86f   : > { %v2075_v32 = vmul.f32 %v4182_v53, %v2037_v44  ;;  %v2040_v22 = vadd.f32 %v4172_v13, %v2039_v5  ;;  %v5029_v5 = vld [vmem:[%s6494_s6 + $0x48] sm:$0xff]  }
 0x870   : > { %v2078_v60 = vmul.f32 %v4182_v53, %v2048_v4  ;;  %v5995_v16 = vadd.f32 %v2077_v0, %v5966_v46 }
 0x871   : > { %v5992_v61 = vadd.f32 %v2075_v32, %v5960_v35  ;;  %v2076_v62 = vmul.f32 %v4182_v53, %v2040_v22  ;;  %v5030_v32 = vld [vmem:[%s6494_s6 + $0x50] sm:$0xff]   ;;  %v5031_v22 = vld [vmem:[%s6494_s6 + $0x58] sm:$0xff]  }
 0x872   : > { %v5998_v55 = vadd.f32 %v2078_v60, %v5968_v18  ;;  %v2093_v46 = vmax.f32 %v5995_v16, 0.0  ;;  %v5032_v60 = vld [vmem:[%s6494_s6 + $0x60] sm:$0xff]  }
 0x873   : > { %v6001_v25 = vadd.f32 %v2076_v62, %v5962_v38  ;;  %v4660_v17 = vpop.f32.mrb[28].mxu0  ;;  %v2091_v35 = vmax.f32 %v5992_v61, 0.0  ;;  %v4184_v62 = vld [vmem:[%s6493_s5 + $0x6] ss:$0 sm:$0xff] }
 0x874   : > { %v2094_v11 = vmax.f32 %v5998_v55, 0.0  ;;  %v2061_v52 = vadd.f32 %v4660_v17, %v4172_v13  ;;  %v2052_v3 = vpop.f32.mrb[29].mxu0 }
 0x875   : > { %v2053_v27 = vadd.f32 %v4172_v13, %v2052_v3  ;;  %v4661_v20 = vpop.f32.mrb[30].mxu0  ;;  %v2092_v29 = vmax.f32 %v6001_v25, 0.0 }
 0x876   : > { %v2081_v49 = vmul.f32 %v4182_v53, %v2061_v52  ;;  %v2064_v40 = vadd.f32 %v4661_v20, %v4172_v13  ;;  %v2055_v18 = vpop.f32.mrb[31].mxu0  ;;  %v2100_v23 = vpack.c.bf16 %v2094_v11, %v2093_v46 }
 0x877   : > { %v2079_v39 = vmul.f32 %v4182_v53, %v2053_v27  ;;  %v2056_v31 = vadd.f32 %v4172_v13, %v2055_v18  ;;  %v2099_v38 = vpack.c.bf16 %v2092_v29, %v2091_v35 }
 0x878   : > { %v2082_v42 = vmul.f32 %v4182_v53, %v2064_v40  ;;  %v6011_v54 = vadd.f32 %v2081_v49, %v5978_v12  ;;  %v5026_v12 = vld [vmem:[#allocation3 + $0x1f0] sm:$0xff]  }
 0x879   : > { %v6008_v24 = vadd.f32 %v2079_v39, %v5972_v57  ;;  %v2080_v41 = vmul.f32 %v4182_v53, %v2056_v31  ;;  %4678 = vmatprep.mubr.bf16.mxu1 %v2099_v38  ;;  %4698 = vmatprep.subr.bf16.mxu0 %v5026_v12 }
 0x87a   : > { %v6014_v63 = vadd.f32 %v2082_v42, %v5980_v43  ;;  %4679 = vmatmul.mubr.bf16.vlgmr.msra.gmra.mrb[24].mxu1 %v2100_v23  ;;  %v2097_v57 = vmax.f32 %v6011_v54, 0.0  ;;  %4699 = vmatpush3.bf16.msra.mxu0 %v5026_v12  ;;  %v5027_v43 = vld [vmem:[#allocation3 + $0x1f8] sm:$0xff]  }
 0x87b   : > { %v6017_v44 = vadd.f32 %v2080_v41, %v5974_v8  ;;  %v2095_v14 = vmax.f32 %v6008_v24, 0.0  ;;  %4700 = vmatprep.subr.bf16.mxu0 %v5027_v43  ;;  %v5028_v8 = vld [vmem:[%s6494_s6 + $0x40] sm:$0xff]  }
 0x87c   : > { %v2098_v13 = vmax.f32 %v6014_v63, 0.0  ;;  %4710 = vmatprep.subr.bf16.mxu1 %v5028_v8 }
 0x87d   : > { %v2096_v0 = vmax.f32 %v6017_v44, 0.0  ;;  %4711 = vmatpush3.bf16.msra.mxu1 %v5028_v8 }
 0x87e   : > { %v2102_v4 = vpack.c.bf16 %v2098_v13, %v2097_v57  ;;  %4701 = vmatpush3.bf16.msra.mxu0 %v5027_v43  ;;  %4712 = vmatprep.subr.bf16.mxu1 %v5029_v5 }
 0x87f   : > { %v2101_v53 = vpack.c.bf16 %v2096_v0, %v2095_v14 }
 0x881   : > { %4682 = vmatprep.mubr.bf16.mxu1 %v2101_v53  ;;  %4713 = vmatpush3.bf16.msra.mxu1 %v5029_v5 }
 0x882   : > { %4683 = vmatmul.mubr.bf16.gmra.mrb[28].mxu1 %v2102_v4  ;;  %4714 = vmatprep.subr.bf16.mxu1 %v5030_v32 }
 0x885   : > { %4715 = vmatpush3.bf16.msra.mxu1 %v5030_v32  ;;  %v5033_v32 = vld [vmem:[%s6494_s6 + $0x68] sm:$0xff]  }
 0x886   : > { %4716 = vmatprep.subr.bf16.mxu1 %v5031_v22 }
 0x889   : > { %4717 = vmatpush3.bf16.msra.mxu1 %v5031_v22  ;;  %v5034_v22 = vld [vmem:[%s6494_s6 + $0x70] sm:$0xff]  }
 0x88a   : > { %4718 = vmatprep.subr.bf16.mxu1 %v5032_v60 }
 0x88d   : > { %4719 = vmatpush3.bf16.msra.mxu1 %v5032_v60  ;;  %v5035_v60 = vld [vmem:[%s6494_s6 + $0x78] sm:$0xff]  }
 0x88e   : > { %4720 = vmatprep.subr.bf16.mxu1 %v5033_v32 }
 0x891   : > { %4721 = vmatpush3.bf16.msra.mxu1 %v5033_v32 }
 0x892   : > { %4722 = vmatprep.subr.bf16.mxu1 %v5034_v22 }
 0x895   : > { %4723 = vmatpush3.bf16.msra.mxu1 %v5034_v22 }
 0x896   : > { %4724 = vmatprep.subr.bf16.mxu1 %v5035_v60 }
 0x899   : > { %4725 = vmatpush3.bf16.msra.mxu1 %v5035_v60 }
 0x94d   : > { %v4680_v17 = vpop.f32.mrb[24].mxu1 }
 0x94e   : > { %v2219_v11 = vadd.f32 %v4680_v17, %v4184_v62  ;;  %v2210_v52 = vpop.f32.mrb[25].mxu1 }
 0x94f   : > { %v2211_v3 = vadd.f32 %v4184_v62, %v2210_v52  ;;  %v4681_v27 = vpop.f32.mrb[26].mxu1 }
 0x950   : > { %v2222_v20 = vadd.f32 %v4681_v27, %v4184_v62  ;;  %v2213_v35 = vpop.f32.mrb[27].mxu1  ;;  %v2243_v46 = vmax.f32 %v2219_v11, 0.0  ;;  %v4204_v11 = vld [vmem:[%s5633_s25 + $0x3] ss:$0 sm:$0xff] }
 0x951   : > { %v2214_v29 = vadd.f32 %v4184_v62, %v2213_v35  ;;  %v2241_v40 = vmax.f32 %v2211_v3, 0.0 }
 0x952   : > { %v2244_v49 = vmax.f32 %v2222_v20, 0.0 }
 0x953   : > { %v2242_v18 = vmax.f32 %v2214_v29, 0.0 }
 0x954   : > { %v2250_v39 = vpack.c.bf16 %v2244_v49, %v2243_v46 }
 0x955   : > { %v2249_v31 = vpack.c.bf16 %v2242_v18, %v2241_v40  ;;  %v4684_v38 = vpop.f32.mrb[28].mxu1 }
 0x956   : > { %v2235_v23 = vadd.f32 %v4684_v38, %v4184_v62  ;;  %v2226_v42 = vpop.f32.mrb[29].mxu1 }
 0x957   : > { %v2227_v41 = vadd.f32 %v4184_v62, %v2226_v42  ;;  %v4685_v13 = vpop.f32.mrb[30].mxu1  ;;  %4702 = vmatprep.mubr.bf16.mxu0 %v2249_v31 }
 0x958   : > { %v2238_v14 = vadd.f32 %v4685_v13, %v4184_v62  ;;  %v2229_v0 = vpop.f32.mrb[31].mxu1  ;;  %4703 = vmatmul.mubr.bf16.vlgmr.msra.gmra.mrb[32].mxu0 %v2250_v39  ;;  %v2247_v53 = vmax.f32 %v2235_v23, 0.0 }
 0x959   : > { %v2230_v57 = vadd.f32 %v4184_v62, %v2229_v0  ;;  %v2245_v12 = vmax.f32 %v2227_v41, 0.0  ;;  %v4194_v62 = vld [vmem:[%s6493_s5 + $0x7] ss:$0 sm:$0xff] }
 0x95a   : > { %v2248_v4 = vmax.f32 %v2238_v14, 0.0 }
 0x95b   : > { %v2246_v43 = vmax.f32 %v2230_v57, 0.0 }
 0x95c   : > { %v2252_v8 = vpack.c.bf16 %v2248_v4, %v2247_v53 }
 0x95d   : > { %v2251_v5 = vpack.c.bf16 %v2246_v43, %v2245_v12 }
 0x95f   : > { %4706 = vmatprep.mubr.bf16.mxu0 %v2251_v5 }
 0x960   : > { %4707 = vmatmul.mubr.bf16.gmra.mrb[36].mxu0 %v2252_v8 }
 0xa2b   : > { %v4704_v17 = vpop.f32.mrb[32].mxu0 }
 0xa2c   : > { %v2369_v52 = vadd.f32 %v4704_v17, %v4194_v62  ;;  %v2360_v3 = vpop.f32.mrb[33].mxu0 }
 0xa2d   : > { %v2361_v27 = vadd.f32 %v4194_v62, %v2360_v3  ;;  %v4705_v20 = vpop.f32.mrb[34].mxu0 }
 0xa2e   : > { %v2401_v35 = vmul.f32 %v4204_v11, %v2369_v52  ;;  %v2372_v29 = vadd.f32 %v4705_v20, %v4194_v62  ;;  %v2363_v46 = vpop.f32.mrb[35].mxu0 }
 0xa2f   : > { %v2399_v49 = vmul.f32 %v4204_v11, %v2361_v27  ;;  %v2364_v40 = vadd.f32 %v4194_v62, %v2363_v46 }
 0xa30   : > { %v2402_v18 = vmul.f32 %v4204_v11, %v2372_v29  ;;  %v2409_v31 = vadd.f32 %v2401_v35, %v5995_v16 }
 0xa31   : > { %v2400_v39 = vmul.f32 %v4204_v11, %v2364_v40  ;;  %v2407_v23 = vadd.f32 %v2399_v49, %v5992_v61 }
 0xa32   : > { %v2410_v38 = vadd.f32 %v2402_v18, %v5998_v55 }
 0xa33   : > { %v2408_v42 = vadd.f32 %v2400_v39, %v6001_v25  ;;  %v4708_v41 = vpop.f32.mrb[36].mxu0 }
 0xa34   : > { %v2416_v13 = vpack.c.bf16 %v2410_v38, %v2409_v31  ;;  %v2385_v14 = vadd.f32 %v4708_v41, %v4194_v62  ;;  %v2376_v0 = vpop.f32.mrb[37].mxu0 }
 0xa35   : > { %v2377_v57 = vadd.f32 %v4194_v62, %v2376_v0  ;;  %v4709_v53 = vpop.f32.mrb[38].mxu0  ;;  %v2415_v4 = vpack.c.bf16 %v2408_v42, %v2407_v23 }
 0xa36   : > { %v2405_v12 = vmul.f32 %v4204_v11, %v2385_v14  ;;  %v2388_v43 = vadd.f32 %v4709_v53, %v4194_v62  ;;  %v2379_v8 = vpop.f32.mrb[39].mxu0 }
 0xa37   : > { %v2403_v5 = vmul.f32 %v4204_v11, %v2377_v57  ;;  %v2380_v32 = vadd.f32 %v4194_v62, %v2379_v8  ;;  %4726 = vmatprep.mubr.bf16.mxu1 %v2415_v4  ;;  %v4222_v62 = vld [vmem:[%s6495_s7 + $0x1] ss:$0 sm:$0xff] }
 0xa38   : > { %v2406_v16 = vmul.f32 %v4204_v11, %v2388_v43  ;;  %4727 = vmatmul.mubr.bf16.vlgmr.msra.gmra.mrb[32].mxu1 %v2416_v13  ;;  %v2413_v61 = vadd.f32 %v2405_v12, %v6011_v54 }
 0xa39   : > { %v2404_v55 = vmul.f32 %v4204_v11, %v2380_v32  ;;  %v2411_v22 = vadd.f32 %v2403_v5, %v6008_v24  ;;  %v5036_v32 = vld [vmem:[#allocation3] sm:$0xff]  }
 0xa3a   : > { %v2414_v25 = vadd.f32 %v2406_v16, %v6014_v63  ;;  %v5037_v16 = vld [vmem:[#allocation3 + $0x8] sm:$0xff]   ;;  %4734 = vmatprep.subr.bf16.mxu0 %v5036_v32 }
 0xa3b   : > { %v2412_v60 = vadd.f32 %v2404_v55, %v6017_v44  ;;  %4735 = vmatpush3.bf16.msra.mxu0 %v5036_v32 }
 0xa3c   : > { %v2418_v17 = vpack.c.bf16 %v2414_v25, %v2413_v61  ;;  %4736 = vmatprep.subr.bf16.mxu0 %v5037_v16 }
 0xa3d   : > { %v2417_v52 = vpack.c.bf16 %v2412_v60, %v2411_v22 }
 0xa3f   : > { %4730 = vmatprep.mubr.bf16.mxu1 %v2417_v52  ;;  %4737 = vmatpush3.bf16.msra.mxu0 %v5037_v16 }
 0xa40   : > { %4731 = vmatmul.mubr.bf16.gmra.mrb[36].mxu1 %v2418_v17  ;;  %v5038_v17 = vld [vmem:[#allocation3 + $0x10] sm:$0xff]  }
 0xa41   : > { %4738 = vmatprep.subr.bf16.mxu0 %v5038_v17 }
 0xa43   : > { %4739 = vmatpush3.bf16.msra.mxu0 %v5038_v17 }
 0xb0b   : > { %v4728_v3 = vpop.f32.mrb[32].mxu1 }
 0xb0c   : > { %v2535_v27 = vadd.f32 %v4728_v3, %v4222_v62  ;;  %v2526_v20 = vpop.f32.mrb[33].mxu1 }
 0xb0d   : > { %v2527_v11 = vadd.f32 %v4222_v62, %v2526_v20  ;;  %v4729_v35 = vpop.f32.mrb[34].mxu1 }
 0xb0e   : > { %v2559_v54 = vadd.f32 2.0, %v2535_v27  ;;  %v2538_v29 = vadd.f32 %v4729_v35, %v4222_v62  ;;  %v2529_v63 = vpop.f32.mrb[35].mxu1 }
 0xb0f   : > { %v2557_v46 = vadd.f32 2.0, %v2527_v11  ;;  %v2530_v24 = vadd.f32 %v4222_v62, %v2529_v63  ;;  %2661 = vrot.lane.b32.xlu1 %v2527_v11, %s5364_s29  ;;  %v5039_v11 = vld [vmem:[#allocation3 + $0x18] sm:$0xff]   ;;  %v5040_v63 = vld [vmem:[#allocation3 + $0x20] sm:$0xff]  }
 0xb10   : > { %v4233_v44 = vmul.f32 -1.442695, %v2559_v54  ;;  %v2560_v49 = vadd.f32 2.0, %v2538_v29  ;;  %4740 = vmatprep.subr.bf16.mxu0 %v5039_v11 }
 0xb11   : > { %v4231_v40 = vmul.f32 -1.442695, %v2557_v46  ;;  %v2558_v18 = vadd.f32 2.0, %v2530_v24  ;;  %2663 = vrot.lane.b32.xlu0 %v2530_v24, %s5364_s29  ;;  %4741 = vmatpush3.bf16.msra.mxu0 %v5039_v11 }
 0xb12   : > { %5108 = vpow2.f32 %v4233_v44  ;;  %v4234_v39 = vmul.f32 -1.442695, %v2560_v49  ;;  %4742 = vmatprep.subr.bf16.mxu0 %v5040_v63 }
 0xb13   : > { %5110 = vpow2.f32 %v4231_v40  ;;  %v4232_v31 = vmul.f32 -1.442695, %v2558_v18  ;;  %2665 = vrot.lane.b32.xlu1 %v2535_v27, %s5364_s29  ;;  %v4732_v38 = vpop.f32.mrb[36].mxu1  ;;  %v1686_v40 = vstv %s4156_s9 }
 0xb14   : > { %5112 = vpow2.f32 %v4234_v39  ;;  %v2551_v23 = vadd.f32 %v4732_v38, %v4222_v62  ;;  %v2542_v42 = vpop.f32.mrb[37].mxu1  ;;  %v1692_v17 = vadd.f32 %v1686_v40, %v5926_v1 }
 0xb15   : > { %5114 = vpow2.f32 %v4232_v31  ;;  %v2543_v41 = vadd.f32 %v4222_v62, %v2542_v42  ;;  %2667 = vrot.lane.b32.xlu0 %v2538_v29, %s5364_s29  ;;  %v4733_v13 = vpop.f32.mrb[38].mxu1  ;;  %4743 = vmatpush3.bf16.msra.mxu0 %v5040_v63 }
 0xb16   : > { %v2563_v14 = vadd.f32 2.0, %v2551_v23  ;;  %v2554_v0 = vadd.f32 %v4733_v13, %v4222_v62  ;;  %v2545_v57 = vpop.f32.mrb[39].mxu1  ;;  %v1690_v13 = vadd.f32 %v1686_v40, %v5866_v34  ;;  %v1693_v34 = vadd.f32 %v1686_v40, %v5942_v7 }
 0xb17   : > { %v2561_v53 = vadd.f32 2.0, %v2543_v41  ;;  %v2546_v4 = vadd.f32 %v4222_v62, %v2545_v57  ;;  %2669 = vrot.lane.b32.xlu1 %v2543_v41, %s5364_s29 }
 0xb18   : > { %v4237_v12 = vmul.f32 -1.442695, %v2563_v14  ;;  %v2564_v43 = vadd.f32 2.0, %v2554_v0 }
 0xb19   : > { %v4235_v8 = vmul.f32 -1.442695, %v2561_v53  ;;  %v2562_v5 = vadd.f32 2.0, %v2546_v4  ;;  %2671 = vrot.lane.b32.xlu0 %v2546_v4, %s5364_s29 }
 0xb1a   : > { %5116 = vpow2.f32 %v4237_v12  ;;  %v4238_v55 = vmul.f32 -1.442695, %v2564_v43 }
 0xb1b   : > { %5118 = vpow2.f32 %v4235_v8  ;;  %v4236_v61 = vmul.f32 -1.442695, %v2562_v5  ;;  %2673 = vrot.lane.b32.xlu1 %v2551_v23, %s5364_s29 }
 0xb1c   : > { %v5109_v25 = vpop.eup %5108  ;;  %5120 = vpow2.f32 %v4238_v55 }
 0xb1d   : > { %v5111_v22 = vpop.eup %5110  ;;  %v2591_v60 = vadd.f32 1.0, %v5109_v25  ;;  %5122 = vpow2.f32 %v4236_v61  ;;  %2675 = vrot.lane.b32.xlu0 %v2554_v0, %s5364_s29  ;;  %v1694_v25 = vadd.f32 %v1686_v40, %v5945_v10 }
 0xb1e   : > { %v5113_v52 = vpop.eup %5112  ;;  %v2589_v62 = vadd.f32 1.0, %v5111_v22 }
 0xb1f   : > { %v5115_v3 = vpop.eup %5114  ;;  %5124 = vrcp.f32 %v2591_v60  ;;  %v2592_v27 = vadd.f32 1.0, %v5113_v52 }
 0xb20   : > { %5126 = vrcp.f32 %v2589_v62  ;;  %v2590_v20 = vadd.f32 1.0, %v5115_v3 }
 0xb21   : > { %5128 = vrcp.f32 %v2592_v27 }
 0xb22   : > { %5130 = vrcp.f32 %v2590_v20 }
 0xb23   : > { %5132 = vlog2.f32 %v5812_v58 }
 0xb24   : > { %v5117_v35 = vpop.eup %5116  ;;  %5134 = vlog2.f32 %v5839_v28  ;;  %v1689_v28 = vadd.f32 %v1686_v40, %v5857_v45  ;;  %v1688_v45 = vadd.f32 %v1686_v40, %v5887_v50  ;;  %v1691_v50 = vadd.f32 %v1686_v40, %v5920_v48 }
 0xb25   : > { %v5119_v54 = vpop.eup %5118  ;;  %v2595_v29 = vadd.f32 1.0, %v5117_v35  ;;  %5136 = vlog2.f32 %v5821_v6  ;;  %v1687_v6 = vadd.f32 %v1686_v40, %v5881_v56 }
 0xb26   : > { %v5121_v46 = vpop.eup %5120  ;;  %v2593_v24 = vadd.f32 1.0, %v5119_v54 }
 0xb27   : > { %v5123_v44 = vpop.eup %5122  ;;  %5138 = vrcp.f32 %v2595_v29  ;;  %v2596_v49 = vadd.f32 1.0, %v5121_v46 }
 0xb28   : > { %5140 = vrcp.f32 %v2593_v24  ;;  %v2594_v18 = vadd.f32 1.0, %v5123_v44 }
 0xb29   : > { %v5125_v39 = vpop.eup %5124  ;;  %5142 = vrcp.f32 %v2596_v49 }
 0xb2a   : > { %v5127_v58 = vpop.eup %5126  ;;  %5144 = vrcp.f32 %v2594_v18  ;;  %v2615_v31 = vadd.f32 0.001, %v5125_v39 }
 0xb2b   : > { %v5129_v38 = vpop.eup %5128  ;;  %5146 = vlog2.f32 %v5841_v36  ;;  %v2613_v23 = vadd.f32 0.001, %v5127_v58 }
 0xb2c   : > { %v5131_v42 = vpop.eup %5130  ;;  %5148 = vlog2.f32 %v2615_v31  ;;  %v6079_v41 = vmul.f32 %v2615_v31, %v1689_v28  ;;  %v2616_v14 = vadd.f32 0.001, %v5129_v38 }
 0xb2d   : > { %5150 = vlog2.f32 %v2613_v23  ;;  %v6082_v0 = vmul.f32 %v2613_v23, %v1687_v6  ;;  %v2614_v57 = vadd.f32 0.001, %v5131_v42  ;;  %v5133_v53 = vpop.eup %5132 }
 0xb2e   : > { %5152 = vlog2.f32 %v2616_v14  ;;  %v6085_v36 = vmul.f32 %v2616_v14, %v1690_v13  ;;  %v5135_v56 = vpop.eup %5134  ;;  %v2694_v13 = vstv %s4239_s13  ;;  %s6443_s13 = scalar_lea.hbm %s6498_s10, %s4310_s11 }
 0xb2f   : > { %5154 = vlog2.f32 %v2614_v57  ;;  %v6087_v4 = vmul.f32 %v2614_v57, %v1688_v45  ;;  %v5137_v12 = vpop.eup %5136  ;;  %v1528_v20 = vmul.f32 0.6931472, %v5135_v56  ;;  %v2697_v14 = vmul.f32 %v2694_v13, %v5914_v15 }
 0xb30   : > { %5156 = vlog2.f32 %v5868_v51  ;;  %v1534_v54 = vmul.f32 0.6931472, %v5137_v12  ;;  %v2704_v45 = vstv %s4240_s22  ;;  %v2695_v57 = vmul.f32 %v2694_v13, %v5894_v26  ;;  %s4245_s22 = sld [smem:[#allocation7 + $0x5]] }
 0xb31   : > { %v5139_v43 = vpop.eup %5138  ;;  %5158 = vlog2.f32 %v5877_v19  ;;  %v1532_v19 = vmul.f32 0.6931472, %v5133_v53  ;;  %v2698_v53 = vmul.f32 %v2694_v13, %v5918_v21  ;;  %v2696_v56 = vmul.f32 %v2694_v13, %v5899_v30 }
 0xb32   : > { %v5141_v8 = vpop.eup %5140  ;;  %v6090_v5 = vadd.f32 0.001, %v5139_v43  ;;  %v2707_v12 = vadd.f32 %v2704_v45, %v2697_v14  ;;  %v2705_v43 = vadd.f32 %v2704_v45, %v2695_v57  ;;  %v6132_v15 = vstv %s4243_s30 }
 0xb33   : > { %v5143_v32 = vpop.eup %5142  ;;  %v2617_v16 = vadd.f32 0.001, %v5141_v8  ;;  %v2708_v8 = vadd.f32 %v2704_v45, %v2698_v53 }
 0xb34   : > { %v5145_v55 = vpop.eup %5144  ;;  %v6096_v61 = vmul.f32 %v6090_v5, %v1693_v34  ;;  %v6099_v22 = vadd.f32 0.001, %v5143_v32  ;;  %v6125_v34 = vstv %s2713_s14  ;;  %v6127_v32 = vstv %s4242_s21  ;;  %s4308_s14 = sld [smem:[#allocation7 + $0x7]] }
 0xb35   : > { %v5147_v60 = vpop.eup %5146  ;;  %5160 = vlog2.f32 %v2617_v16  ;;  %v6101_v7 = vmul.f32 %v2617_v16, %v1691_v50  ;;  %v2618_v51 = vadd.f32 0.001, %v5145_v55  ;;  %v2706_v50 = vadd.f32 %v2704_v45, %v2696_v56  ;;  %s3840_s21 = sld [smem:[#allocation2]] }
 0xb36   : > { %v5149_v52 = vpop.eup %5148  ;;  %v6105_v48 = vmul.f32 %v6099_v22, %v1694_v25  ;;  %v1530_v1 = vmul.f32 0.6931472, %v5147_v60  ;;  %v2699_v16 = vmul.f32 %v2694_v13, %v5930_v2  ;;  %v6130_v55 = vstv %s4241_s23  ;;  %s431_s23 = sand.u32 1, %s5341_s16  }
 0xb37   : > { %v5151_v62 = vpop.eup %5150  ;;  %v2626_v3 = vmul.f32 0.6931472, %v5149_v52  ;;  %5162 = vlog2.f32 %v2618_v51  ;;  %v6107_v27 = vmul.f32 %v2618_v51, %v1692_v17  ;;  %v2720_v30 = vmul.f32 %v6125_v34, %v2707_v12  ;;  %s4058_s30 = sshll.u32 %s431_s23, 3 }
 0xb38   : > { %v5153_v10 = vpop.eup %5152  ;;  %v2622_v11 = vmul.f32 0.6931472, %v5151_v62  ;;  %v2756_v25 = vmul.f32 %v6127_v32, %v2707_v12  ;;  %v2700_v60 = vmul.f32 %v2694_v13, %v5940_v59  ;;  %v2718_v17 = vmul.f32 %v6125_v34, %v2705_v43 }
 0xb39   : > { %v5155_v35 = vpop.eup %5154  ;;  %v2628_v29 = vmul.f32 0.6931472, %v5153_v10  ;;  %v6109_v63 = vadd.f32 %v2626_v3, %v1532_v19  ;;  %v2754_v51 = vmul.f32 %v6127_v32, %v2705_v43  ;;  %v2721_v2 = vmul.f32 %v6125_v34, %v2708_v8 }
 0xb3a   : > { %v2624_v46 = vmul.f32 0.6931472, %v5155_v35  ;;  %v6111_v24 = vadd.f32 %v2622_v11, %v1528_v20  ;;  %v5157_v40 = vpop.eup %5156  ;;  %v2719_v3 = vmul.f32 %v6125_v34, %v2706_v50  ;;  %v2709_v10 = vadd.f32 %v2704_v45, %v2699_v16 }
 0xb3b   : > { %v6113_v44 = vadd.f32 %v2628_v29, %v1534_v54  ;;  %v5159_v18 = vpop.eup %5158  ;;  %v1536_v58 = vmul.f32 0.6931472, %v5157_v40  ;;  %v2701_v20 = vmul.f32 %v2694_v13, %v5949_v47  ;;  %v2755_v59 = vmul.f32 %v6127_v32, %v2706_v50 }
 0xb3c   : > { %v6115_v49 = vadd.f32 %v2624_v46, %v1530_v1  ;;  %v1538_v38 = vmul.f32 0.6931472, %v5159_v18  ;;  %v6147_v35 = vstv %s4244_s8  ;;  %v2710_v40 = vadd.f32 %v2704_v45, %v2700_v60  ;;  %s433_s8 = scalar_lea.vmem [#allocation8], %s4058_s30 }
 0xb3d   : > { %v2702_v18 = vmul.f32 %v2694_v13, %v5952_v9  ;;  %v2722_v57 = vmul.f32 %v6125_v34, %v2709_v10  ;;  %v2758_v9 = vmul.f32 %v6127_v32, %v2709_v10  ;;  %v2711_v13 = vadd.f32 %v2704_v45, %v2701_v20  ;;  %s3927_s28 = sshll.u32 %s433_s8, 4  ;;  %s6438_s28 = int_to_ptr.vmem [resolvable:$true] %s3927_s28 }
 0xb3f   : > { %v5161_v39 = vpop.eup %5160  ;;  %v2760_v10 = vmul.f32 %v6127_v32, %v2711_v13 }
 0xb40   : > { %v2630_v28 = vmul.f32 0.6931472, %v5161_v39  ;;  %v2757_v39 = vmul.f32 %v6127_v32, %v2708_v8 }
 0xb41   : > { %v5163_v31 = vpop.eup %5162 }
 0xb42   : > { %v2632_v6 = vmul.f32 0.6931472, %v5163_v31  ;;  %v6117_v23 = vadd.f32 %v2630_v28, %v1536_v58 }
 0xb44   : > { %v6119_v42 = vadd.f32 %v2632_v6, %v1538_v38 }
 0xb81   : > { %v2662_v26 = vpop.permute.xlu1 %2661 }
 0xb82   : > { %v2685_v21 = vadd.f32 %v2662_v26, %v6082_v0 }
 0xb83   : > { %v2664_v52 = vpop.permute.xlu0 %2663 }
 0xb84   : > { %v2727_v62 = vmul.f32 %v6130_v55, %v2685_v21  ;;  %v2763_v19 = vmul.f32 %v6132_v15, %v2685_v21  ;;  %v2686_v0 = vadd.f32 %v2664_v52, %v6087_v4 }
 0xb85   : > { %v2666_v11 = vpop.permute.xlu1 %2665 }
 0xb86   : > { %v2735_v54 = vadd.f32 %v2727_v62, %v2718_v17  ;;  %v6149_v29 = vadd.f32 %v2763_v19, %v2754_v51  ;;  %v2728_v1 = vmul.f32 %v6130_v55, %v2686_v0  ;;  %v2764_v46 = vmul.f32 %v6132_v15, %v2686_v0 }
 0xb87   : > { %v2687_v4 = vadd.f32 %v2666_v11, %v6079_v41  ;;  %v2668_v47 = vpop.permute.xlu0 %2667  ;;  %v2723_v51 = vmul.f32 %v6125_v34, %v2710_v40 }
 0xb88   : > { %v2736_v58 = vadd.f32 %v2728_v1, %v2719_v3  ;;  %v6156_v28 = vadd.f32 %v2764_v46, %v2755_v59  ;;  %v2688_v31 = vadd.f32 %v2668_v47, %v6085_v36  ;;  %v6160_v38 = vadd.f32 %v6147_v35, %v2735_v54 }
 0xb89   : > { %v2729_v6 = vmul.f32 %v6130_v55, %v2687_v4  ;;  %v2765_v14 = vmul.f32 %v6132_v15, %v2687_v4  ;;  %v2670_v41 = vpop.permute.xlu1 %2669  ;;  %v2712_v36 = vadd.f32 %v2704_v45, %v2702_v18  ;;  %v5041_v4 = vld [vmem:[#allocation3 + $0x28] sm:$0xff]  }
 0xb8a   : > { %v2730_v53 = vmul.f32 %v6130_v55, %v2688_v31  ;;  %v2766_v56 = vmul.f32 %v6132_v15, %v2688_v31  ;;  %v2689_v12 = vadd.f32 %v2670_v41, %v6101_v7  ;;  %2792 = vperm.xlu1 %4955, %v6160_v38   ;;  %v6173_v16 = vadd.f32 %v6147_v35, %v2736_v58  ;;  %v5046_v41 = vld [vmem:[#allocation3 + $0x50] sm:$0xff]  }
 0xb8b   : > { %v2737_v43 = vadd.f32 %v2729_v6, %v2720_v30  ;;  %v6170_v8 = vadd.f32 %v2765_v14, %v2756_v25  ;;  %v2672_v50 = vpop.permute.xlu0 %2671  ;;  %v2759_v7 = vmul.f32 %v6127_v32, %v2710_v40  ;;  %v2761_v40 = vmul.f32 %v6127_v32, %v2712_v36  ;;  %4744 = vmatprep.subr.bf16.mxu0 %v5041_v4 }
 0xb8c   : > { %v2738_v26 = vadd.f32 %v2730_v53, %v2721_v2  ;;  %v6175_v21 = vadd.f32 %v2766_v56, %v2757_v39  ;;  %v2731_v60 = vmul.f32 %v6130_v55, %v2689_v12  ;;  %v2767_v17 = vmul.f32 %v6132_v15, %v2689_v12  ;;  %2797 = vperm.xlu0 %4954, %v6173_v16   ;;  %v5049_v53 = vld [vmem:[#allocation3 + $0x68] sm:$0xff]   ;;  %v4246_v56 = vld [vmem:[%s6491_s3] ss:$0 sm:$0xff] }
 0xb8d   : > { %v2690_v45 = vadd.f32 %v2672_v50, %v6107_v27  ;;  %v2674_v30 = vpop.permute.xlu1 %2673  ;;  %v6184_v25 = vadd.f32 %v6147_v35, %v2737_v43  ;;  %v2724_v27 = vmul.f32 %v6125_v34, %v2711_v13  ;;  %4745 = vmatpush3.bf16.msra.mxu0 %v5041_v4  ;;  %v5048_v13 = vld [vmem:[#allocation3 + $0x60] sm:$0xff]  }
 0xb8e   : > { %v2739_v52 = vadd.f32 %v2731_v60, %v2722_v57  ;;  %v6186_v2 = vadd.f32 %v2767_v17, %v2758_v9  ;;  %v2691_v62 = vadd.f32 %v2674_v30, %v6096_v61  ;;  %v6190_v19 = vadd.f32 %v6147_v35, %v2738_v26  ;;  %v5044_v57 = vld [vmem:[#allocation3 + $0x40] sm:$0xff]   ;;  %v5045_v9 = vld [vmem:[#allocation3 + $0x48] sm:$0xff]  }
 0xb8f   : > { %v2732_v3 = vmul.f32 %v6130_v55, %v2690_v45  ;;  %v2768_v0 = vmul.f32 %v6132_v15, %v2690_v45  ;;  %2802 = vperm.xlu1 %4955, %v6184_v25   ;;  %v2676_v20 = vpop.permute.xlu0 %2675  ;;  %v2725_v61 = vmul.f32 %v6125_v34, %v2712_v36  ;;  %4758 = vmatprep.subr.bf16.mxu1 %v5044_v57  ;;  %v4247_v36 = vld [vmem:[%s5599_s12] ss:$0 sm:$0xff] }
 0xb90   : > { %v2733_v59 = vmul.f32 %v6130_v55, %v2691_v62  ;;  %v2769_v11 = vmul.f32 %v6132_v15, %v2691_v62  ;;  %v2692_v54 = vadd.f32 %v2676_v20, %v6105_v48  ;;  %2807 = vperm.xlu0 %4954, %v6190_v19   ;;  %v6206_v18 = vadd.f32 %v6147_v35, %v2739_v52 }
 0xb91   : > { %v2740_v1 = vadd.f32 %v2732_v3, %v2723_v51  ;;  %v6201_v46 = vadd.f32 %v2768_v0, %v2759_v7  ;;  %4759 = vmatpush3.bf16.msra.mxu1 %v5044_v57 }
 0xb92   : > { %v2741_v39 = vadd.f32 %v2733_v59, %v2724_v27  ;;  %v6208_v47 = vadd.f32 %v2769_v11, %v2760_v10  ;;  %v2734_v58 = vmul.f32 %v6130_v55, %v2692_v54  ;;  %v2770_v34 = vmul.f32 %v6132_v15, %v2692_v54  ;;  %v5042_v55 = vld [vmem:[#allocation3 + $0x30] sm:$0xff]   ;;  %v5043_v15 = vld [vmem:[#allocation3 + $0x38] sm:$0xff]   ;;  %4760 = vmatprep.subr.bf16.mxu1 %v5045_v9 }
 0xb93   : > { %2812 = vperm.xlu1 %4955, %v6206_v18   ;;  %v6214_v48 = vadd.f32 %v6147_v35, %v2740_v1  ;;  %4746 = vmatprep.subr.bf16.mxu0 %v5042_v55 }
 0xb94   : > { %v2742_v32 = vadd.f32 %v2734_v58, %v2725_v61  ;;  %v6216_v31 = vadd.f32 %v2770_v34, %v2761_v40  ;;  %v6219_v6 = vadd.f32 %v6147_v35, %v2741_v39  ;;  %4747 = vmatpush3.bf16.msra.mxu0 %v5042_v55 }
 0xb95   : > { %2817 = vperm.xlu0 %4954, %v6214_v48   ;;  %4748 = vmatprep.subr.bf16.mxu0 %v5043_v15 }
 0xb96   : > { %v6223_v14 = vadd.f32 %v6147_v35, %v2742_v32  ;;  %4761 = vmatpush3.bf16.msra.mxu1 %v5045_v9  ;;  %v5047_v35 = vld [vmem:[#allocation3 + $0x58] sm:$0xff]  }
 0xb97   : > { %2822 = vperm.xlu1 %4955, %v6219_v6   ;;  %4762 = vmatprep.subr.bf16.mxu1 %v5046_v41 }
 0xb98   : > { %4749 = vmatpush3.bf16.msra.mxu0 %v5043_v15 }
 0xb99   : > { %2827 = vperm.xlu0 %4954, %v6223_v14  }
 0xb9a   : > { %4763 = vmatpush3.bf16.msra.mxu1 %v5046_v41 }
 0xb9b   : > { %4764 = vmatprep.subr.bf16.mxu1 %v5047_v35 }
 0xb9e   : > { %4765 = vmatpush3.bf16.msra.mxu1 %v5047_v35 }
 0xb9f   : > { %4766 = vmatprep.subr.bf16.mxu1 %v5048_v13 }
 0xba2   : > { %4767 = vmatpush3.bf16.msra.mxu1 %v5048_v13 }
 0xba3   : > { %4768 = vmatprep.subr.bf16.mxu1 %v5049_v53 }
 0xba6   : > { %4769 = vmatpush3.bf16.msra.mxu1 %v5049_v53 }
 0xc09   : > { %v2793_v12 = vpop.permute.xlu1 %2792 }
 0xc0a   : > { %v2836_v43 = vmul.f32 %v4246_v56, %v2793_v12  ;;  %v5050_v12 = vld [vmem:[#allocation3 + $0x70] sm:$0xff]  }
 0xc0b   : > { %v2798_v50 = vpop.permute.xlu0 %2797  ;;  %4770 = vmatprep.subr.bf16.mxu1 %v5050_v12 }
 0xc0c   : > { %v6231_v26 = vadd.f32 %v4247_v36, %v2836_v43  ;;  %v2837_v60 = vmul.f32 %v4246_v56, %v2798_v50  ;;  %v5051_v43 = vld [vmem:[#allocation3 + $0x78] sm:$0xff]   ;;  %4771 = vmatpush3.bf16.msra.mxu1 %v5050_v12  ;;  %v5052_v50 = vld [vmem:[#allocation3 + $0x80] sm:$0xff]  }
 0xc0d   : > { %4772 = vmatprep.subr.bf16.mxu1 %v5051_v43  ;;  %4782 = vmatprep.subr.bf16.mxu0 %v5052_v50 }
 0xc0e   : > { %v2803_v17 = vpop.permute.xlu1 %2802  ;;  %v6233_v51 = vadd.f32 %v4247_v36, %v2837_v60  ;;  %v2859_v30 = vmax.f32 %v6231_v26, 0.0  ;;  %v5053_v60 = vld [vmem:[#allocation3 + $0x88] sm:$0xff]  }
 0xc0f   : > { %v2838_v7 = vmul.f32 %v4246_v56, %v2803_v17  ;;  %v2808_v45 = vpop.permute.xlu0 %2807  ;;  %v5056_v17 = vld [vmem:[#allocation3 + $0xa0] sm:$0xff]  }
 0xc10   : > { %v2860_v52 = vmax.f32 %v6233_v51, 0.0  ;;  %v2839_v3 = vmul.f32 %v4246_v56, %v2808_v45  ;;  %4773 = vmatpush3.bf16.msra.mxu1 %v5051_v43 }
 0xc11   : > { %v6237_v62 = vadd.f32 %v4247_v36, %v2838_v7  ;;  %v4248_v7 = vld [vmem:[%s6493_s5] ss:$0 sm:$0xff] }
 0xc12   : > { %v2813_v0 = vpop.permute.xlu1 %2812  ;;  %v6239_v27 = vadd.f32 %v4247_v36, %v2839_v3  ;;  %v2867_v20 = vpack.c.bf16 %v2860_v52, %v2859_v30 }
 0xc13   : > { %v2840_v10 = vmul.f32 %v4246_v56, %v2813_v0  ;;  %v2861_v11 = vmax.f32 %v6237_v62, 0.0 }
 0xc14   : > { %v2818_v59 = vpop.permute.xlu0 %2817  ;;  %v2862_v61 = vmax.f32 %v6239_v27, 0.0  ;;  %4750 = vmatprep.mubr.bf16.mxu0 %v2867_v20 }
 0xc15   : > { %v6243_v54 = vadd.f32 %v4247_v36, %v2840_v10  ;;  %v2841_v1 = vmul.f32 %v4246_v56, %v2818_v59 }
 0xc16   : > { %v2823_v40 = vpop.permute.xlu1 %2822  ;;  %v2868_v4 = vpack.c.bf16 %v2862_v61, %v2861_v11 }
 0xc17   : > { %v6245_v39 = vadd.f32 %v4247_v36, %v2841_v1  ;;  %v2842_v58 = vmul.f32 %v4246_v56, %v2823_v40  ;;  %v2863_v32 = vmax.f32 %v6243_v54, 0.0 }
 0xc18   : > { %v2828_v34 = vpop.permute.xlu0 %2827  ;;  %4751 = vmatmul.mubr.bf16.vlgmr.msra.gmra.mrb[40].mxu0 %v2868_v4 }
 0xc19   : > { %v2864_v55 = vmax.f32 %v6245_v39, 0.0  ;;  %v6249_v15 = vadd.f32 %v4247_v36, %v2842_v58  ;;  %v2843_v57 = vmul.f32 %v4246_v56, %v2828_v34  ;;  %4783 = vmatpush3.bf16.msra.mxu0 %v5052_v50  ;;  %v5054_v56 = vld [vmem:[#allocation3 + $0x90] sm:$0xff]  }
 0xc1a   : > { %4784 = vmatprep.subr.bf16.mxu0 %v5053_v60 }
 0xc1b   : > { %v6251_v9 = vadd.f32 %v4247_v36, %v2843_v57  ;;  %v2869_v41 = vpack.c.bf16 %v2864_v55, %v2863_v32  ;;  %v2865_v35 = vmax.f32 %v6249_v15, 0.0  ;;  %v5055_v36 = vld [vmem:[#allocation3 + $0x98] sm:$0xff]  }
 0xc1d   : > { %v2866_v13 = vmax.f32 %v6251_v9, 0.0  ;;  %4754 = vmatprep.mubr.bf16.mxu0 %v2869_v41  ;;  %4785 = vmatpush3.bf16.msra.mxu0 %v5053_v60 }
 0xc1e   : > { %4786 = vmatprep.subr.bf16.mxu0 %v5054_v56 }
 0xc1f   : > { %v2870_v53 = vpack.c.bf16 %v2866_v13, %v2865_v35 }
 0xc21   : > { %4755 = vmatmul.mubr.bf16.gmra.mrb[44].mxu0 %v2870_v53 }
 0xc22   : > { %4787 = vmatpush3.bf16.msra.mxu0 %v5054_v56 }
 0xc23   : > { %4788 = vmatprep.subr.bf16.mxu0 %v5055_v36 }
 0xc26   : > { %4789 = vmatpush3.bf16.msra.mxu0 %v5055_v36 }
 0xc27   : > { %4790 = vmatprep.subr.bf16.mxu0 %v5056_v17 }
 0xc2a   : > { %4791 = vmatpush3.bf16.msra.mxu0 %v5056_v17  ;;  %v5057_v17 = vld [vmem:[#allocation3 + $0xa8] sm:$0xff]  }
 0xc2b   : > { %4792 = vmatprep.subr.bf16.mxu0 %v5057_v17 }
 0xc2e   : > { %4793 = vmatpush3.bf16.msra.mxu0 %v5057_v17 }
 0xceb   : > { %v4752_v45 = vpop.f32.mrb[40].mxu0 }
 0xcec   : > { %v2985_v30 = vadd.f32 %v4752_v45, %v4248_v7  ;;  %v2976_v52 = vpop.f32.mrb[41].mxu0  ;;  %v5058_v45 = vld [vmem:[#allocation3 + $0xb0] sm:$0xff]  }
 0xced   : > { %v2977_v3 = vadd.f32 %v4248_v7, %v2976_v52  ;;  %v4753_v0 = vpop.f32.mrb[42].mxu0  ;;  %4794 = vmatprep.subr.bf16.mxu0 %v5058_v45  ;;  %v5060_v52 = vld [vmem:[#allocation3 + $0xc0] sm:$0xff]  }
 0xcee   : > { %v2988_v10 = vadd.f32 %v4753_v0, %v4248_v7  ;;  %v2979_v20 = vpop.f32.mrb[43].mxu0  ;;  %v3009_v11 = vmax.f32 %v2985_v30, 0.0  ;;  %4795 = vmatpush3.bf16.msra.mxu0 %v5058_v45  ;;  %v5059_v30 = vld [vmem:[#allocation3 + $0xb8] sm:$0xff]   ;;  %4806 = vmatprep.subr.bf16.mxu1 %v5060_v52 }
 0xcef   : > { %v2980_v59 = vadd.f32 %v4248_v7, %v2979_v20  ;;  %v3007_v1 = vmax.f32 %v2977_v3, 0.0  ;;  %4796 = vmatprep.subr.bf16.mxu0 %v5059_v30  ;;  %v5061_v3 = vld [vmem:[#allocation3 + $0xc8] sm:$0xff]   ;;  %v5063_v0 = vld [vmem:[#allocation3 + $0xd8] sm:$0xff]  }
 0xcf0   : > { %v3010_v61 = vmax.f32 %v2988_v10, 0.0  ;;  %v5064_v10 = vld [vmem:[#allocation3 + $0xe0] sm:$0xff]   ;;  %v5065_v20 = vld [vmem:[#allocation3 + $0xe8] sm:$0xff]  }
 0xcf1   : > { %v3008_v40 = vmax.f32 %v2980_v59, 0.0  ;;  %v4258_v59 = vld [vmem:[%s6493_s5 + $0x1] ss:$0 sm:$0xff] }
 0xcf2   : > { %v3016_v4 = vpack.c.bf16 %v3010_v61, %v3009_v11  ;;  %4797 = vmatpush3.bf16.msra.mxu0 %v5059_v30  ;;  %v4267_v61 = vld [vmem:[%s5633_s25] ss:$0 sm:$0xff] }
 0xcf3   : > { %v3015_v58 = vpack.c.bf16 %v3008_v40, %v3007_v1 }
 0xcf4   : > { %v4756_v34 = vpop.f32.mrb[44].mxu0 }
 0xcf5   : > { %v3001_v32 = vadd.f32 %v4756_v34, %v4248_v7  ;;  %v2992_v55 = vpop.f32.mrb[45].mxu0  ;;  %4774 = vmatprep.mubr.bf16.mxu1 %v3015_v58 }
 0xcf6   : > { %v2993_v57 = vadd.f32 %v4248_v7, %v2992_v55  ;;  %v4757_v41 = vpop.f32.mrb[46].mxu0  ;;  %4775 = vmatmul.mubr.bf16.vlgmr.msra.gmra.mrb[40].mxu1 %v3016_v4 }
 0xcf7   : > { %v3004_v35 = vadd.f32 %v4757_v41, %v4248_v7  ;;  %v2995_v13 = vpop.f32.mrb[47].mxu0  ;;  %v3013_v12 = vmax.f32 %v3001_v32, 0.0  ;;  %4807 = vmatpush3.bf16.msra.mxu1 %v5060_v52 }
 0xcf8   : > { %v2996_v53 = vadd.f32 %v4248_v7, %v2995_v13  ;;  %v3011_v50 = vmax.f32 %v2993_v57, 0.0  ;;  %4808 = vmatprep.subr.bf16.mxu1 %v5061_v3  ;;  %v5062_v7 = vld [vmem:[#allocation3 + $0xd0] sm:$0xff]  }
 0xcf9   : > { %v3014_v43 = vmax.f32 %v3004_v35, 0.0 }
 0xcfa   : > { %v3012_v60 = vmax.f32 %v2996_v53, 0.0 }
 0xcfb   : > { %v3018_v56 = vpack.c.bf16 %v3014_v43, %v3013_v12  ;;  %4809 = vmatpush3.bf16.msra.mxu1 %v5061_v3 }
 0xcfc   : > { %v3017_v36 = vpack.c.bf16 %v3012_v60, %v3011_v50  ;;  %4810 = vmatprep.subr.bf16.mxu1 %v5062_v7 }
 0xcfe   : > { %4778 = vmatprep.mubr.bf16.mxu1 %v3017_v36 }
 0xcff   : > { %4779 = vmatmul.mubr.bf16.gmra.mrb[44].mxu1 %v3018_v56 }
 0xd00   : > { %4811 = vmatpush3.bf16.msra.mxu1 %v5062_v7 }
 0xd01   : > { %4812 = vmatprep.subr.bf16.mxu1 %v5063_v0 }
 0xd04   : > { %4813 = vmatpush3.bf16.msra.mxu1 %v5063_v0 }
 0xd05   : > { %4814 = vmatprep.subr.bf16.mxu1 %v5064_v10 }
 0xd08   : > { %4815 = vmatpush3.bf16.msra.mxu1 %v5064_v10 }
 0xd09   : > { %4816 = vmatprep.subr.bf16.mxu1 %v5065_v20 }
 0xd0c   : > { %4817 = vmatpush3.bf16.msra.mxu1 %v5065_v20 }
 0xdc9   : > { %v4776_v11 = vpop.f32.mrb[40].mxu1 }
 0xdca   : > { %v3135_v1 = vadd.f32 %v4776_v11, %v4258_v59  ;;  %v3126_v40 = vpop.f32.mrb[41].mxu1 }
 0xdcb   : > { %v3127_v4 = vadd.f32 %v4258_v59, %v3126_v40  ;;  %v4777_v58 = vpop.f32.mrb[42].mxu1 }
 0xdcc   : > { %v3166_v34 = vmul.f32 %v4267_v61, %v3135_v1  ;;  %v3138_v32 = vadd.f32 %v4777_v58, %v4258_v59  ;;  %v3129_v55 = vpop.f32.mrb[43].mxu1 }
 0xdcd   : > { %v3164_v57 = vmul.f32 %v4267_v61, %v3127_v4  ;;  %v3130_v41 = vadd.f32 %v4258_v59, %v3129_v55 }
 0xdce   : > { %v3167_v35 = vmul.f32 %v4267_v61, %v3138_v32  ;;  %v6266_v12 = vadd.f32 %v3166_v34, %v6237_v62 }
 0xdcf   : > { %v6263_v13 = vadd.f32 %v3164_v57, %v6231_v26  ;;  %v3165_v53 = vmul.f32 %v4267_v61, %v3130_v41  ;;  %v5067_v41 = vld [vmem:[#allocation3 + $0xf8] sm:$0xff]  }
 0xdd0   : > { %v6269_v43 = vadd.f32 %v3167_v35, %v6239_v27  ;;  %v3182_v62 = vmax.f32 %v6266_v12, 0.0  ;;  %v5070_v35 = vld [vmem:[%s6494_s6 + $0x10] sm:$0xff]  }
 0xdd1   : > { %v6272_v50 = vadd.f32 %v3165_v53, %v6233_v51  ;;  %v3180_v26 = vmax.f32 %v6263_v13, 0.0  ;;  %v5071_v53 = vld [vmem:[%s6494_s6 + $0x18] sm:$0xff]  }
 0xdd2   : > { %v4780_v60 = vpop.f32.mrb[44].mxu1  ;;  %v3183_v56 = vmax.f32 %v6269_v43, 0.0 }
 0xdd3   : > { %v3151_v36 = vadd.f32 %v4780_v60, %v4258_v59  ;;  %v3142_v17 = vpop.f32.mrb[45].mxu1  ;;  %v3181_v52 = vmax.f32 %v6272_v50, 0.0  ;;  %v5072_v60 = vld [vmem:[%s6494_s6 + $0x20] sm:$0xff]  }
 0xdd4   : > { %v3143_v45 = vadd.f32 %v4258_v59, %v3142_v17  ;;  %v4781_v30 = vpop.f32.mrb[46].mxu1  ;;  %v3189_v20 = vpack.c.bf16 %v3183_v56, %v3182_v62  ;;  %v4269_v56 = vld [vmem:[%s6493_s5 + $0x2] ss:$0 sm:$0xff] }
 0xdd5   : > { %v3170_v3 = vmul.f32 %v4267_v61, %v3151_v36  ;;  %v3154_v7 = vadd.f32 %v4781_v30, %v4258_v59  ;;  %v3145_v27 = vpop.f32.mrb[47].mxu1  ;;  %v3188_v51 = vpack.c.bf16 %v3181_v52, %v3180_v26 }
 0xdd6   : > { %v3168_v0 = vmul.f32 %v4267_v61, %v3143_v45  ;;  %v3146_v10 = vadd.f32 %v4258_v59, %v3145_v27 }
 0xdd7   : > { %v3171_v11 = vmul.f32 %v4267_v61, %v3154_v7  ;;  %4798 = vmatprep.mubr.bf16.mxu0 %v3188_v51  ;;  %v6282_v4 = vadd.f32 %v3170_v3, %v6249_v15  ;;  %v5066_v15 = vld [vmem:[#allocation3 + $0xf0] sm:$0xff]  }
 0xdd8   : > { %v6279_v1 = vadd.f32 %v3168_v0, %v6243_v54  ;;  %v3169_v40 = vmul.f32 %v4267_v61, %v3146_v10  ;;  %4799 = vmatmul.mubr.bf16.vlgmr.msra.gmra.mrb[48].mxu0 %v3189_v20  ;;  %4818 = vmatprep.subr.bf16.mxu1 %v5066_v15 }
 0xdd9   : > { %v6285_v58 = vadd.f32 %v3171_v11, %v6251_v9  ;;  %v3186_v54 = vmax.f32 %v6282_v4, 0.0  ;;  %4819 = vmatpush3.bf16.msra.mxu1 %v5066_v15  ;;  %v5069_v9 = vld [vmem:[%s6494_s6 + $0x8] sm:$0xff]  }
 0xdda   : > { %v6288_v34 = vadd.f32 %v3169_v40, %v6245_v39  ;;  %v3184_v32 = vmax.f32 %v6279_v1, 0.0  ;;  %4820 = vmatprep.subr.bf16.mxu1 %v5067_v41  ;;  %v5068_v39 = vld [vmem:[%s6494_s6] sm:$0xff]  }
 0xddb   : > { %v3187_v59 = vmax.f32 %v6285_v58, 0.0  ;;  %4830 = vmatprep.subr.bf16.mxu0 %v5068_v39 }
 0xddc   : > { %v3185_v55 = vmax.f32 %v6288_v34, 0.0  ;;  %4831 = vmatpush3.bf16.msra.mxu0 %v5068_v39 }
 0xddd   : > { %v3191_v57 = vpack.c.bf16 %v3187_v59, %v3186_v54  ;;  %4821 = vmatpush3.bf16.msra.mxu1 %v5067_v41  ;;  %4832 = vmatprep.subr.bf16.mxu0 %v5069_v9 }
 0xdde   : > { %v3190_v61 = vpack.c.bf16 %v3185_v55, %v3184_v32  ;;  %4854 = vmatprep.subr.bf16.mxu1 %v5068_v39 }
 0xde0   : > { %4802 = vmatprep.mubr.bf16.mxu0 %v3190_v61  ;;  %4833 = vmatpush3.bf16.msra.mxu0 %v5069_v9 }
 0xde1   : > { %4803 = vmatmul.mubr.bf16.gmra.mrb[52].mxu0 %v3191_v57  ;;  %4834 = vmatprep.subr.bf16.mxu0 %v5070_v35 }
 0xde4   : > { %4835 = vmatpush3.bf16.msra.mxu0 %v5070_v35 }
 0xde5   : > { %4836 = vmatprep.subr.bf16.mxu0 %v5071_v53 }
 0xde8   : > { %4837 = vmatpush3.bf16.msra.mxu0 %v5071_v53 }
 0xde9   : > { %4838 = vmatprep.subr.bf16.mxu0 %v5072_v60 }
 0xdec   : > { %4839 = vmatpush3.bf16.msra.mxu0 %v5072_v60 }
 0xeab   : > { %v4800_v36 = vpop.f32.mrb[48].mxu0 }
 0xeac   : > { %v3308_v17 = vadd.f32 %v4800_v36, %v4269_v56  ;;  %v3299_v45 = vpop.f32.mrb[49].mxu0 }
 0xead   : > { %v3300_v30 = vadd.f32 %v4269_v56, %v3299_v45  ;;  %v4801_v26 = vpop.f32.mrb[50].mxu0 }
 0xeae   : > { %v3311_v52 = vadd.f32 %v4801_v26, %v4269_v56  ;;  %v3302_v62 = vpop.f32.mrb[51].mxu0  ;;  %v3332_v7 = vmax.f32 %v3308_v17, 0.0 }
 0xeaf   : > { %v3303_v3 = vadd.f32 %v4269_v56, %v3302_v62  ;;  %v3330_v0 = vmax.f32 %v3300_v30, 0.0 }
 0xeb0   : > { %v3333_v27 = vmax.f32 %v3311_v52, 0.0 }
 0xeb1   : > { %v3331_v10 = vmax.f32 %v3303_v3, 0.0 }
 0xeb2   : > { %v3339_v51 = vpack.c.bf16 %v3333_v27, %v3332_v7 }
 0xeb3   : > { %v3338_v20 = vpack.c.bf16 %v3331_v10, %v3330_v0 }
 0xeb4   : > { %v4804_v11 = vpop.f32.mrb[52].mxu0 }
 0xeb5   : > { %v3324_v40 = vadd.f32 %v4804_v11, %v4269_v56  ;;  %v3315_v59 = vpop.f32.mrb[53].mxu0  ;;  %4822 = vmatprep.mubr.bf16.mxu1 %v3338_v20 }
 0xeb6   : > { %v3316_v32 = vadd.f32 %v4269_v56, %v3315_v59  ;;  %v4805_v55 = vpop.f32.mrb[54].mxu0  ;;  %4823 = vmatmul.mubr.bf16.vlgmr.msra.gmra.mrb[48].mxu1 %v3339_v51 }
 0xeb7   : > { %v3327_v54 = vadd.f32 %v4805_v55, %v4269_v56  ;;  %v3318_v61 = vpop.f32.mrb[55].mxu0  ;;  %4862 = vmatpush3.bf16.msra.mxu1 %v5068_v39  ;;  %v3336_v15 = vmax.f32 %v3324_v40, 0.0  ;;  %v5073_v39 = vld [vmem:[%s6494_s6 + $0x28] sm:$0xff]  }
 0xeb8   : > { %v3319_v57 = vadd.f32 %v4269_v56, %v3318_v61  ;;  %4855 = vmatprep.subr.bf16.mxu1 %v5069_v9  ;;  %v3334_v36 = vmax.f32 %v3316_v32, 0.0  ;;  %4840 = vmatprep.subr.bf16.mxu0 %v5073_v39  ;;  %v4289_v56 = vld [vmem:[%s5633_s25 + $0x1] ss:$0 sm:$0xff] }
 0xeb9   : > { %v3337_v41 = vmax.f32 %v3327_v54, 0.0  ;;  %4841 = vmatpush3.bf16.msra.mxu0 %v5073_v39 }
 0xeba   : > { %v3335_v17 = vmax.f32 %v3319_v57, 0.0 }
 0xebb   : > { %v3341_v45 = vpack.c.bf16 %v3337_v41, %v3336_v15  ;;  %4863 = vmatpush3.bf16.msra.mxu1 %v5069_v9  ;;  %v5074_v9 = vld [vmem:[%s6494_s6 + $0x30] sm:$0xff]  }
 0xebc   : > { %v3340_v30 = vpack.c.bf16 %v3335_v17, %v3334_v36  ;;  %4856 = vmatprep.subr.bf16.mxu1 %v5070_v35  ;;  %4842 = vmatprep.subr.bf16.mxu0 %v5074_v9 }
 0xebd   : > { %4843 = vmatpush3.bf16.msra.mxu0 %v5074_v9 }
 0xebe   : > { %4826 = vmatprep.mubr.bf16.mxu1 %v3340_v30 }
 0xebf   : > { %4827 = vmatmul.mubr.bf16.gmra.mrb[52].mxu1 %v3341_v45 }
 0xec0   : > { %4864 = vmatpush3.bf16.msra.mxu1 %v5070_v35  ;;  %v5075_v35 = vld [vmem:[%s6494_s6 + $0x38] sm:$0xff]  }
 0xec1   : > { %4857 = vmatprep.subr.bf16.mxu1 %v5071_v53  ;;  %4844 = vmatprep.subr.bf16.mxu0 %v5075_v35 }
 0xec2   : > { %4845 = vmatpush3.bf16.msra.mxu0 %v5075_v35 }
 0xec4   : > { %4865 = vmatpush3.bf16.msra.mxu1 %v5071_v53  ;;  %v4279_v53 = vld [vmem:[%s6493_s5 + $0x3] ss:$0 sm:$0xff] }
 0xec5   : > { %4858 = vmatprep.subr.bf16.mxu1 %v5072_v60 }
 0xec8   : > { %4866 = vmatpush3.bf16.msra.mxu1 %v5072_v60 }
 0xec9   : > { %4859 = vmatprep.subr.bf16.mxu1 %v5073_v39 }
 0xecc   : > { %4867 = vmatpush3.bf16.msra.mxu1 %v5073_v39 }
 0xecd   : > { %4860 = vmatprep.subr.bf16.mxu1 %v5074_v9 }
 0xed0   : > { %4868 = vmatpush3.bf16.msra.mxu1 %v5074_v9 }
 0xed1   : > { %4861 = vmatprep.subr.bf16.mxu1 %v5075_v35 }
 0xed4   : > { %4869 = vmatpush3.bf16.msra.mxu1 %v5075_v35 }
 0xf89   : > { %v4824_v60 = vpop.f32.mrb[48].mxu1 }
 0xf8a   : > { %v3458_v26 = vadd.f32 %v4824_v60, %v4279_v53  ;;  %v3449_v52 = vpop.f32.mrb[49].mxu1 }
 0xf8b   : > { %v3450_v62 = vadd.f32 %v4279_v53, %v3449_v52  ;;  %v4825_v3 = vpop.f32.mrb[50].mxu1 }
 0xf8c   : > { %v3490_v7 = vmul.f32 %v4289_v56, %v3458_v26  ;;  %v3461_v27 = vadd.f32 %v4825_v3, %v4279_v53  ;;  %v3452_v0 = vpop.f32.mrb[51].mxu1 }
 0xf8d   : > { %v3488_v10 = vmul.f32 %v4289_v56, %v3450_v62  ;;  %v3453_v51 = vadd.f32 %v4279_v53, %v3452_v0 }
 0xf8e   : > { %v3491_v20 = vmul.f32 %v4289_v56, %v3461_v27  ;;  %v3498_v40 = vadd.f32 %v3490_v7, %v6266_v12 }
 0xf8f   : > { %v3489_v11 = vmul.f32 %v4289_v56, %v3453_v51  ;;  %v3496_v32 = vadd.f32 %v3488_v10, %v6263_v13 }
 0xf90   : > { %v3499_v59 = vadd.f32 %v3491_v20, %v6269_v43 }
 0xf91   : > { %v3497_v55 = vadd.f32 %v3489_v11, %v6272_v50 }
 0xf92   : > { %v4828_v54 = vpop.f32.mrb[52].mxu1  ;;  %v3505_v61 = vpack.c.bf16 %v3499_v59, %v3498_v40 }
 0xf93   : > { %v3474_v57 = vadd.f32 %v4828_v54, %v4279_v53  ;;  %v3465_v15 = vpop.f32.mrb[53].mxu1  ;;  %v3504_v17 = vpack.c.bf16 %v3497_v55, %v3496_v32 }
 0xf94   : > { %v3466_v41 = vadd.f32 %v4279_v53, %v3465_v15  ;;  %v4829_v36 = vpop.f32.mrb[54].mxu1 }
 0xf95   : > { %v3494_v45 = vmul.f32 %v4289_v56, %v3474_v57  ;;  %v3477_v30 = vadd.f32 %v4829_v36, %v4279_v53  ;;  %v3468_v39 = vpop.f32.mrb[55].mxu1  ;;  %4846 = vmatprep.mubr.bf16.mxu0 %v3504_v17 }
 0xf96   : > { %v3492_v9 = vmul.f32 %v4289_v56, %v3466_v41  ;;  %v3469_v35 = vadd.f32 %v4279_v53, %v3468_v39  ;;  %4847 = vmatmul.mubr.bf16.vlgmr.msra.gmra.mrb[56].mxu0 %v3505_v61  ;;  %v4290_v53 = vld [vmem:[%s6495_s7] ss:$0 sm:$0xff] }
 0xf97   : > { %v3495_v12 = vmul.f32 %v4289_v56, %v3477_v30  ;;  %v3502_v13 = vadd.f32 %v3494_v45, %v6282_v4 }
 0xf98   : > { %v3493_v43 = vmul.f32 %v4289_v56, %v3469_v35  ;;  %v3500_v60 = vadd.f32 %v3492_v9, %v6279_v1 }
 0xf99   : > { %v3503_v50 = vadd.f32 %v3495_v12, %v6285_v58 }
 0xf9a   : > { %v3501_v26 = vadd.f32 %v3493_v43, %v6288_v34 }
 0xf9b   : > { %v3507_v52 = vpack.c.bf16 %v3503_v50, %v3502_v13 }
 0xf9c   : > { %v3506_v62 = vpack.c.bf16 %v3501_v26, %v3500_v60 }
 0xf9e   : > { %4850 = vmatprep.mubr.bf16.mxu1 %v3506_v62 }
 0xf9f   : > { %4851 = vmatmul.mubr.bf16.vlgmr.msra.gmra.mrb[56].mxu1 %v3507_v52 }
0x1069   : > { %v4848_v3 = vpop.f32.mrb[56].mxu0 }
0x106a   : > { %v3622_v7 = vadd.f32 %v4848_v3, %v4290_v53  ;;  %v3613_v27 = vpop.f32.mrb[57].mxu0 }
0x106b   : > { %v3614_v56 = vadd.f32 %v4290_v53, %v3613_v27  ;;  %v4849_v0 = vpop.f32.mrb[58].mxu0 }
0x106c   : > { %v3646_v4 = vadd.f32 2.0, %v3622_v7  ;;  %v3625_v10 = vadd.f32 %v4849_v0, %v4290_v53  ;;  %v3616_v58 = vpop.f32.mrb[59].mxu0 }
0x106d   : > { %v3644_v51 = vadd.f32 2.0, %v3614_v56  ;;  %v3617_v1 = vadd.f32 %v4290_v53, %v3616_v58  ;;  %3748 = vrot.lane.b32.xlu1 %v3614_v56, %s5364_s29 }
0x106e   : > { %v4301_v34 = vmul.f32 -1.442695, %v3646_v4  ;;  %v3647_v20 = vadd.f32 2.0, %v3625_v10 }
0x106f   : > { %v4299_v11 = vmul.f32 -1.442695, %v3644_v51  ;;  %v3645_v40 = vadd.f32 2.0, %v3617_v1  ;;  %3750 = vrot.lane.b32.xlu0 %v3617_v1, %s5364_s29 }
0x1070   : > { %5164 = vpow2.f32 %v4301_v34  ;;  %v4302_v59 = vmul.f32 -1.442695, %v3647_v20  ;;  %v2780_v34 = vstv %s4245_s22  ;;  %s3913_s22 = scalar_lea.sflag [#allocation5], %s431_s23 }
0x1071   : > { %5166 = vpow2.f32 %v4299_v11  ;;  %v4300_v32 = vmul.f32 -1.442695, %v3645_v40  ;;  %3752 = vrot.lane.b32.xlu1 %v3622_v7, %s5364_s29  ;;  %v2783_v40 = vadd.f32 %v2780_v34, %v6170_v8 }
0x1072   : > { %v4852_v55 = vpop.f32.mrb[56].mxu1  ;;  %5168 = vpow2.f32 %v4302_v59 }
0x1073   : > { %v3638_v54 = vadd.f32 %v4852_v55, %v4290_v53  ;;  %v3629_v61 = vpop.f32.mrb[57].mxu1  ;;  %5170 = vpow2.f32 %v4300_v32  ;;  %3754 = vrot.lane.b32.xlu0 %v3625_v10, %s5364_s29  ;;  %v2781_v55 = vadd.f32 %v2780_v34, %v6149_v29 }
0x1074   : > { %v3630_v57 = vadd.f32 %v4290_v53, %v3629_v61  ;;  %v4853_v15 = vpop.f32.mrb[58].mxu1 }
0x1075   : > { %v3650_v41 = vadd.f32 2.0, %v3638_v54  ;;  %v3641_v36 = vadd.f32 %v4853_v15, %v4290_v53  ;;  %v3632_v17 = vpop.f32.mrb[59].mxu1 }
0x1076   : > { %v3648_v45 = vadd.f32 2.0, %v3630_v57  ;;  %v3633_v30 = vadd.f32 %v4290_v53, %v3632_v17  ;;  %3756 = vrot.lane.b32.xlu1 %v3630_v57, %s5364_s29  ;;  %v2784_v57 = vadd.f32 %v2780_v34, %v6175_v21  ;;  %v2787_v21 = vadd.f32 %v2780_v34, %v6208_v47 }
0x1077   : > { %v4305_v39 = vmul.f32 -1.442695, %v3650_v41  ;;  %v3651_v9 = vadd.f32 2.0, %v3641_v36 }
0x1078   : > { %v4303_v35 = vmul.f32 -1.442695, %v3648_v45  ;;  %v3649_v12 = vadd.f32 2.0, %v3633_v30  ;;  %3758 = vrot.lane.b32.xlu0 %v3633_v30, %s5364_s29 }
0x1079   : > { %5172 = vpow2.f32 %v4305_v39  ;;  %v4306_v43 = vmul.f32 -1.442695, %v3651_v9 }
0x107a   : > { %5174 = vpow2.f32 %v4303_v35  ;;  %v4304_v13 = vmul.f32 -1.442695, %v3649_v12  ;;  %3760 = vrot.lane.b32.xlu1 %v3638_v54, %s5364_s29  ;;  %v5165_v50 = vpop.eup %5164 }
0x107b   : > { %5176 = vpow2.f32 %v4306_v43  ;;  %v5167_v60 = vpop.eup %5166  ;;  %v3678_v26 = vadd.f32 1.0, %v5165_v50 }
0x107c   : > { %5178 = vpow2.f32 %v4304_v13  ;;  %3762 = vrot.lane.b32.xlu0 %v3641_v36, %s5364_s29  ;;  %v5169_v52 = vpop.eup %5168  ;;  %v3676_v62 = vadd.f32 1.0, %v5167_v60  ;;  %v2782_v36 = vadd.f32 %v2780_v34, %v6156_v28  ;;  %v2785_v28 = vadd.f32 %v2780_v34, %v6186_v2  ;;  %s4307_s29 = sld [smem:[#allocation7 + $0x6]] }
0x107d   : > { %v5171_v53 = vpop.eup %5170  ;;  %5180 = vrcp.f32 %v3678_v26  ;;  %v3679_v3 = vadd.f32 1.0, %v5169_v52  ;;  %v2788_v13 = vadd.f32 %v2780_v34, %v6216_v31 }
0x107e   : > { %5182 = vrcp.f32 %v3676_v62  ;;  %v3677_v7 = vadd.f32 1.0, %v5171_v53 }
0x107f   : > { %5184 = vrcp.f32 %v3679_v3 }
0x1080   : > { %5186 = vrcp.f32 %v3677_v7 }
0x1081   : > { %5188 = vlog2.f32 %v5904_v33 }
0x1083   : > { %v5173_v27 = vpop.eup %5172 }
0x1084   : > { %v5175_v56 = vpop.eup %5174  ;;  %v3682_v0 = vadd.f32 1.0, %v5173_v27 }
0x1085   : > { %v5177_v4 = vpop.eup %5176  ;;  %v3680_v10 = vadd.f32 1.0, %v5175_v56 }
0x1086   : > { %v5179_v58 = vpop.eup %5178  ;;  %5190 = vrcp.f32 %v3682_v0  ;;  %v3683_v51 = vadd.f32 1.0, %v5177_v4 }
0x1087   : > { %5192 = vrcp.f32 %v3680_v10  ;;  %v3681_v1 = vadd.f32 1.0, %v5179_v58  ;;  %v5181_v20 = vpop.eup %5180 }
0x1088   : > { %5194 = vrcp.f32 %v3683_v51  ;;  %v5183_v11 = vpop.eup %5182  ;;  %v3702_v59 = vadd.f32 0.001, %v5181_v20 }
0x1089   : > { %5196 = vrcp.f32 %v3681_v1  ;;  %v5185_v32 = vpop.eup %5184  ;;  %v3700_v33 = vadd.f32 0.001, %v5183_v11 }
0x108a   : > { %5198 = vlog2.f32 %v6090_v5  ;;  %v5187_v54 = vpop.eup %5186  ;;  %v6348_v61 = vmul.f32 %v3702_v59, %v2783_v40  ;;  %v3703_v15 = vadd.f32 0.001, %v5185_v32 }
0x108b   : > { %5200 = vlog2.f32 %v3702_v59  ;;  %v6351_v41 = vmul.f32 %v3700_v33, %v2781_v55  ;;  %v3701_v8 = vadd.f32 0.001, %v5187_v54  ;;  %v5189_v29 = vpop.eup %5188 }
0x108c   : > { %5202 = vlog2.f32 %v3700_v33  ;;  %v6354_v17 = vmul.f32 %v3703_v15, %v2784_v57 }
0x108d   : > { %5204 = vlog2.f32 %v3703_v15  ;;  %v6356_v5 = vmul.f32 %v3701_v8, %v2782_v36 }
0x108e   : > { %5206 = vlog2.f32 %v3701_v8 }
0x108f   : > { %5208 = vlog2.f32 %v6099_v22 }
0x1090   : > { %v5191_v45 = vpop.eup %5190  ;;  %5210 = vlog2.f32 %v5906_v37  ;;  %v2786_v37 = vadd.f32 %v2780_v34, %v6201_v46  ;;  %v1540_v34 = vmul.f32 0.6931472, %v5189_v29  ;;  %v3781_v29 = vstv %s4307_s29  ;;  %s5271_s29 = scalar_lea.vmem %s6438_s28, 128 }
0x1091   : > { %v5193_v30 = vpop.eup %5192  ;;  %v3706_v39 = vadd.f32 0.001, %v5191_v45  ;;  %v3782_v45 = vmul.f32 %v3781_v29, %v6160_v38  ;;  %p5272_p13 = scmp.ne.s32.totalorder %s6438_s28, %s5271_s29 }
0x1092   : > { %v5195_v9 = vpop.eup %5194  ;;  %v3704_v35 = vadd.f32 0.001, %v5193_v30  ;;  %v3791_v30 = vstv %s4308_s14  ;;  %s5275_s14 = sshll.u32 %s5365_s18, 4  ;;  %s5276_s14 = int_to_ptr.vmem [resolvable:$false] %s5275_s14 }
0x1093   : > { %v5197_v12 = vpop.eup %5196  ;;  %5212 = vlog2.f32 %v3706_v39  ;;  %v6362_v43 = vmul.f32 %v3706_v39, %v2787_v21  ;;  %v3707_v50 = vadd.f32 0.001, %v5195_v9  ;;  %v3783_v21 = vmul.f32 %v3781_v29, %v6173_v16  ;;  %p5273_p9 = pnand %p5272_p13, %p6514_p7  ;;  %p5278_p0 = scmp.lt.s32.totalorder %s6438_s28, %s5276_s14 }
0x1094   : > { %v5199_v60 = vpop.eup %5198  ;;  %5214 = vlog2.f32 %v3704_v35  ;;  %v6365_v22 = vmul.f32 %v3704_v35, %v2785_v28  ;;  %v3705_v26 = vadd.f32 0.001, %v5197_v12  ;;  %v3784_v39 = vmul.f32 %v3781_v29, %v6184_v25 }
0x1095   : > { %v5201_v47 = vpop.eup %5200  ;;  %5216 = vlog2.f32 %v3707_v50  ;;  %v6368_v52 = vmul.f32 %v3707_v50, %v2788_v13  ;;  %v2634_v10 = vmul.f32 0.6931472, %v5199_v60  ;;  %v3785_v9 = vmul.f32 %v3781_v29, %v6190_v19  ;;  %p5274_p12 = pneg %p5273_p9 }
0x1096   : > { %v5203_v2 = vpop.eup %5202  ;;  %v3713_v62 = vmul.f32 0.6931472, %v5201_v47  ;;  %5218 = vlog2.f32 %v3705_v26  ;;  %v6370_v53 = vmul.f32 %v3705_v26, %v2786_v37  ;;  %v3793_v12 = vadd.f32 %v3791_v30, %v3783_v21 }
0x1097   : > { %v5205_v3 = vpop.eup %5204  ;;  %v3709_v7 = vmul.f32 0.6931472, %v5203_v2  ;;  %v2643_v59 = vadd.f32 %v2634_v10, %v1540_v34  ;;  %v3787_v13 = vmul.f32 %v3781_v29, %v6214_v48  ;;  %v3794_v60 = vadd.f32 %v3791_v30, %v3784_v39 }
0x1098   : > { %v5207_v31 = vpop.eup %5206  ;;  %v6373_v27 = vadd.f32 %v3713_v62, %v6109_v63  ;;  %v3715_v56 = vmul.f32 0.6931472, %v5205_v3  ;;  %v3795_v38 = vadd.f32 %v3791_v30, %v3785_v9  ;;  %v3788_v25 = vmul.f32 %v3781_v29, %v6219_v6 }
0x1099   : > { %v5209_v0 = vpop.eup %5208  ;;  %v6376_v46 = vadd.f32 %v3709_v7, %v6111_v24  ;;  %v3711_v4 = vmul.f32 0.6931472, %v5207_v31  ;;  %v3801_v2 = vmul.f32 %v3793_v12, %v3793_v12  ;;  %v3802_v3 = vmul.f32 %v3794_v60, %v3794_v60 }
0x109a   : > { %v6379_v58 = vadd.f32 %v3715_v56, %v6113_v44  ;;  %v5211_v51 = vpop.eup %5210  ;;  %v2636_v20 = vmul.f32 0.6931472, %v5209_v0  ;;  %v3803_v7 = vmul.f32 %v3795_v38, %v3795_v38  ;;  %v3797_v48 = vadd.f32 %v3791_v30, %v3787_v13 }
0x109b   : > { %v6382_v1 = vadd.f32 %v3711_v4, %v6115_v49  ;;  %v1542_v63 = vmul.f32 0.6931472, %v5211_v51  ;;  %v6406_v51 = vstv %s3840_s21  ;;  %v3798_v34 = vadd.f32 %v3791_v30, %v3788_v25  ;;  %s5277_s21 = scalar_lea.vmem %s5276_s14, 256 }
0x109c   : > { %p5279_p2 = scmp.lt.s32.totalorder %s5277_s21, %s5271_s29 }
0x109d   : > { %v5213_v11 = vpop.eup %5212  ;;  %v2644_v57 = vadd.f32 %v2636_v20, %v1542_v63  ;;  %v3851_v20 = vlaneseq }
0x109e   : > { %v5215_v40 = vpop.eup %5214  ;;  %v3721_v32 = vmul.f32 0.6931472, %v5213_v11  ;;  %p5280_p4 = por %p5279_p2, %p5278_p0 }
0x109f   : > { %v5217_v55 = vpop.eup %5216  ;;  %v3717_v33 = vmul.f32 0.6931472, %v5215_v40 }
0x10a0   : > { %v5219_v24 = vpop.eup %5218  ;;  %v6384_v54 = vadd.f32 %v3721_v32, %v2643_v59  ;;  %v3723_v15 = vmul.f32 0.6931472, %v5217_v55  ;;  %v3805_v55 = vmul.f32 %v3797_v48, %v3797_v48  ;;  %p5281_p8 = pnand %p5280_p4, %p5274_p12 }
0x10a1   : > { %v6387_v44 = vadd.f32 %v3717_v33, %v6117_v23  ;;  %v3719_v36 = vmul.f32 0.6931472, %v5219_v24  ;;  %v3792_v23 = vadd.f32 %v3791_v30, %v3782_v45 }
0x10a2   : > { %v6389_v49 = vadd.f32 %v3723_v15, %v2644_v57 }
0x10a3   : > { %v6392_v8 = vadd.f32 %v3719_v36, %v6119_v42  ;;  %v3786_v42 = vmul.f32 %v3781_v29, %v6206_v18  ;;  %v3800_v37 = vmul.f32 %v3792_v23, %v3792_v23 }
0x10a5   : > { %v3796_v31 = vadd.f32 %v3791_v30, %v3786_v42 }
0x10a7   : > { %v3804_v59 = vmul.f32 %v3796_v31, %v3796_v31 }
0x10df   : > { %v3749_v28 = vpop.permute.xlu1 %3748 }
0x10e0   : > { %v3772_v35 = vadd.f32 %v3749_v28, %v6351_v41 }
0x10e1   : > { %v3751_v50 = vpop.permute.xlu0 %3750 }
0x10e2   : > { %v3808_v26 = vmul.f32 %v3772_v35, %v3772_v35  ;;  %v3773_v16 = vadd.f32 %v3751_v50, %v6356_v5  ;;  %v3789_v5 = vmul.f32 %v3781_v29, %v6223_v14  ;;  %v3806_v29 = vmul.f32 %v3798_v34, %v3798_v34 }
0x10e3   : > { %v3753_v19 = vpop.permute.xlu1 %3752 }
0x10e4   : > { %v3816_v47 = vadd.f32 %v3808_v26, %v3800_v37  ;;  %v3809_v62 = vmul.f32 %v3773_v16, %v3773_v16  ;;  %v3774_v41 = vadd.f32 %v3753_v19, %v6348_v61  ;;  %v3799_v45 = vadd.f32 %v3791_v30, %v3789_v5 }
0x10e5   : > { %v3755_v18 = vpop.permute.xlu0 %3754 }
0x10e6   : > { %v3824_v56 = vmul.f32 0.5, %v3816_v47  ;;  %v3817_v0 = vadd.f32 %v3809_v62, %v3801_v2  ;;  %v3810_v4 = vmul.f32 %v3774_v41, %v3774_v41  ;;  %v3775_v10 = vadd.f32 %v3755_v18, %v6354_v17 }
0x10e7   : > { %v3807_v16 = vmul.f32 %v3799_v45, %v3799_v45 }
0x10e8   : > { %v3757_v6 = vpop.permute.xlu1 %3756  ;;  %v3832_v11 = vsub.f32 %v6376_v46, %v3824_v56  ;;  %v3825_v61 = vmul.f32 0.5, %v3817_v0  ;;  %v3818_v40 = vadd.f32 %v3810_v4, %v3802_v3  ;;  %v3811_v63 = vmul.f32 %v3775_v10, %v3775_v10 }
0x10e9   : > { %v3776_v32 = vadd.f32 %v3757_v6, %v6365_v22  ;;  %v3852_v22 = vshrl.u32 %v3851_v20, 7 }
0x10ea   : > { %v3759_v33 = vpop.permute.xlu0 %3758  ;;  %v3842_v17 = vadd.f32 %v6406_v51, %v3832_v11  ;;  %v3833_v14 = vsub.f32 %v6382_v1, %v3825_v61  ;;  %v3826_v24 = vmul.f32 0.5, %v3818_v40  ;;  %v3819_v57 = vadd.f32 %v3811_v63, %v3803_v7 }
0x10eb   : > { %v3812_v15 = vmul.f32 %v3776_v32, %v3776_v32  ;;  %v3777_v36 = vadd.f32 %v3759_v33, %v6370_v53  ;;  %v3859_v41 = vadd.s32 56, %v3852_v22 }
0x10ec   : > { %v3761_v46 = vpop.permute.xlu1 %3760  ;;  %v3843_v21 = vadd.f32 %v6406_v51, %v3833_v14  ;;  %v3834_v39 = vsub.f32 %v6373_v27, %v3826_v24  ;;  %v3827_v9 = vmul.f32 0.5, %v3819_v57  ;;  %v3886_v23 = vsel %vm3885_vm0, %v3842_v17, 0.0 }
0x10ed   : > { %v3820_v28 = vadd.f32 %v3812_v15, %v3804_v59  ;;  %v3813_v35 = vmul.f32 %v3777_v36, %v3777_v36  ;;  %v3778_v1 = vadd.f32 %v3761_v46, %v6362_v43  ;;  %vm3876_vm1 = vcmp.lt.s32.totalorder %v3859_v41, 60 }
0x10ee   : > { %v3763_v12 = vpop.permute.xlu0 %3762  ;;  %v3887_v42 = vsel %vm3885_vm0, %v3843_v21, 0.0  ;;  %v3844_v53 = vadd.f32 %v6406_v51, %v3834_v39  ;;  %v3835_v13 = vsub.f32 %v6379_v58, %v3827_v9 }
0x10ef   : > { %v3779_v30 = vadd.f32 %v3763_v12, %v6368_v52  ;;  %v3888_v50 = vadd.f32 %v3887_v42, %v3886_v23  ;;  %v3828_v60 = vmul.f32 0.5, %v3820_v28  ;;  %v3821_v27 = vadd.f32 %v3813_v35, %v3805_v55 }
0x10f0   : > { %v3814_v38 = vmul.f32 %v3778_v1, %v3778_v1  ;;  %v3889_v37 = vsel %vm3885_vm0, %v3844_v53, 0.0  ;;  %v3845_v26 = vadd.f32 %v6406_v51, %v3835_v13 }
0x10f1   : > { %v3815_v25 = vmul.f32 %v3779_v30, %v3779_v30  ;;  %v3890_v43 = vadd.f32 %v3889_v37, %v3888_v50  ;;  %v3836_v19 = vsub.f32 %v6387_v44, %v3828_v60  ;;  %v3829_v47 = vmul.f32 0.5, %v3821_v27 }
0x10f2   : > { %v3822_v2 = vadd.f32 %v3814_v38, %v3806_v29  ;;  %v3891_v62 = vsel %vm3885_vm0, %v3845_v26, 0.0 }
0x10f3   : > { %v3823_v58 = vadd.f32 %v3815_v25, %v3807_v16  ;;  %v3846_v52 = vadd.f32 %v6406_v51, %v3836_v19  ;;  %v3837_v3 = vsub.f32 %v6392_v8, %v3829_v47  ;;  %v3892_v18 = vadd.f32 %v3891_v62, %v3890_v43 }
0x10f4   : > { %v3830_v7 = vmul.f32 0.5, %v3822_v2 }
0x10f5   : > { %v3831_v31 = vmul.f32 0.5, %v3823_v58  ;;  %v3847_v48 = vadd.f32 %v6406_v51, %v3837_v3  ;;  %v3893_v0 = vsel %vm3885_vm0, %v3846_v52, 0.0 }
0x10f6   : > { %v3838_v56 = vsub.f32 %v6384_v54, %v3830_v7  ;;  %v3894_v4 = vadd.f32 %v3893_v0, %v3892_v18 }
0x10f7   : > { %v3839_v44 = vsub.f32 %v6389_v49, %v3831_v31  ;;  %v3895_v5 = vsel %vm3885_vm0, %v3847_v48, 0.0 }
0x10f8   : > { %v3848_v10 = vadd.f32 %v6406_v51, %v3838_v56  ;;  %v3896_v8 = vadd.f32 %v3895_v5, %v3894_v4 }
0x10f9   : > { %v3849_v6 = vadd.f32 %v6406_v51, %v3839_v44 }
0x10fa   : > { %v3897_v34 = vsel %vm3885_vm0, %v3848_v10, 0.0 }
0x10fb   : > { %v3884_v20 = vsel %vm3876_vm1, %v3849_v6, 0.0  ;;  %v3898_v11 = vadd.f32 %v3897_v34, %v3896_v8 }
0x10fc   : > { %v3899_v54 = vsel %vm3885_vm0, %v3884_v20, 0.0 }
0x10fd   : > { %v3900_v61 = vadd.f32 %v3899_v54, %v3898_v11 }
0x10ff   : > { %3901 = vadd.xlane.f32.xlu1 %v3900_v61 }
0x118c   : > { %v3902_v49 = vpop.xlane.xlu1 %3901 }
0x118d   : > { %v3903_v40 = vrot.slane %v3902_v49, 4 }
0x118f   : > { %v3904_v63 = vadd.f32 %v3903_v40, %v3902_v49 }
0x1191   : > { %v3905_v59 = vrot.slane %v3904_v63, 2 }
0x1193   : > { %v3906_v32 = vadd.f32 %v3905_v59, %v3904_v63 }
0x1195   : > { %v3907_v55 = vrot.slane %v3906_v32, 1 }
0x1197   : > { %v3908_v33 = vadd.f32 %v3907_v55, %v3906_v32 }
0x1199   : > { %4872 = vpush %v3908_v33 }
0x11ca   : > { %s4873_s12 = spop %4872 }
0x11cb   : > { %v3910_v51 = vstv %s4873_s12 }
0x11cc   : > { %3911 = vst [vmem:[%s433_s8] sm:$0xff] %v3910_v51 }
0x11cd   : > { %5284 = shalt.err (!%p5281_p8)
}
0x11ce   : > { %s5285_s23 = scalar_lea.hbm %s6443_s13, 128  ;;  %s5289_s11 = scalar_lea.hbm %s6498_s10, 512 }
0x11cf   : > { %p5286_p10 = scmp.ne.s32.totalorder %s6443_s13, %s5285_s23  ;;  %p5290_p5 = scmp.lt.u32.totalorder %s6443_s13, %s6498_s10 }
0x11d0   : > { %p5291_p6 = scmp.lt.u32.totalorder %s5289_s11, %s5285_s23  ;;  %p5293_p13 = scmp.lt.u32.totalorder %s5285_s23, %s6443_s13 }
0x11d1   : > { %p5287_p11 = pnand %p5286_p10, %p6514_p7 }
0x11d2   : > { %p5292_p1 = por %p5291_p6, %p5290_p5 }
0x11d3   : > { %p5288_p3 = pneg %p5287_p11 }
0x11d4   : > { %p5294_p9 = por %p5293_p13, %p5292_p1 }
0x11d6   : > { %p5295_p12 = pnand %p5294_p9, %p5288_p3 }
0x11d8   : > { %5298 = shalt.err (!%p5295_p12)
}
0x11d9   : > { %4882 = dma.vmem_to_hbm [thread:$0]  (%p6514_p7), %s6438_s28, 128, %s6443_s13, %s3913_s22  }
0x11da PF: > { %p4899_p0 = scmp.ge.s32.totalorder %s5357_s20, 2  ;;  %s3939_s25 = sand.u32 1, %s5337_s15  }
0x11db   : > { %p6515_p2 = scmp.ne.s32.totalorder %s6507_s26, 0  ;;  %s3940_s29 = scalar_lea.sflag [#allocation5], %s3939_s25 }
0x11dd   : > { %p4892_p4 = pnand %p4899_p0, %p6515_p2 }
0x11df   : > { %5332 = dma.done.wait (!%p4892_p4), %s3940_s29, 128  }
0x11e0   : > { %5334 = vsyncadd (!%p4892_p4), %s3940_s29, 4294967168  ;;  %s26_s20 = sadd.s32 1, %s5357_s20   ;;  %s6516_s24 = sld [smem:[#allocation12_spill]] }
0x11e1   : > { %p23_p8 = scmp.ge.s32.totalorder %s26_s20, 6   ;;  %s6517_s15 = smov %s5341_s16 }
0x11e2   : > { %s6518_s16 = smov %s5345_s17  ;;  %s6519_s17 = smov %s5477_s27 }
0x11e3   : > { %s6520_s18 = smov %s5353_s19  ;;  %25 = sbr.rel (!%p23_p8) target bundleno = 9 (0x9), region = 146 }
0x11e6   : > { %s6521_s19 = smov %s6516_s24 }
0x11ea   :  { %3945 = vsyncpa [#allocation4], 1 }
0x11eb   :  { %3947 = vsyncpa [#allocation4 + $0x1], 1 }
0x11ec   :  { %3948 = vsyncpa [#allocation5], 1 }
0x11ed   :  { %3950 = vsyncpa [#allocation5 + $0x1], 1 }
0x11ee   :  { %3951 = vsyncpa [#allocation6], 1 }
0x11ef   :  { %3953 = vsyncpa [#allocation6 + $0x1], 1 }

</bundles_post_ra>
